<compile_context>
chip_gen: v7x
topology: tpu7x:2x2x1
jax: 0.10.0
libtpu: 0.0.40
codegen_flags: <defaults>
</compile_context>

<pallas_src>
import functools

import jax
import jax.numpy as jnp
from jax.experimental import pallas as pl
from jax.experimental.pallas import tpu as pltpu

LEAKY_SLOPE = 1.0  # nn.LeakyReLU(True): first positional arg is negative_slope


# ---------------------------------------------------------------------------
# Kernel 1: fused refine = conv3x3 -> (identity) -> conv3x3 -> channel L2-norm
# ---------------------------------------------------------------------------
def _refine_kernel(x_ref, w1_ref, b1_ref, w2_ref, b2_ref, o_ref,
                   pad_ref, acc_ref, *, n_tile, H, W, C):
    """x_ref   : (n_tile, H, W, C)      f32  input image tile
       w*_ref  : (9, C, C)              bf16 tap-major weights, w[ky*3+kx]
       b*_ref  : (1, C)                 f32  biases
       o_ref   : (n_tile, H, W, C)      f32  L2-normalized refined output
       pad_ref : (n_tile, H+2, W+2, C)  f32  VMEM scratch (padded activation)
       acc_ref : (n_tile*H*W, C)        f32  VMEM matmul accumulator
    """
    M = n_tile * H * W

    # Zero the padded scratch every step (cheap, and correct under "parallel"
    # grid semantics where a core may never execute grid step 0).
    pad_ref[...] = jnp.zeros_like(pad_ref)

    def conv3x3(w_ref, b_ref):
        first = True
        for kx in range(3):
            # one sublane-offset slice per kx shift (3 per conv, not 9)
            slab = pad_ref[:, :, kx:kx + W, :]            # (n_tile, H+2, W, C)
            for ky in range(3):
                # ky slices a major axis -> free; bf16 operands, f32 accumulate
                patch = (slab[:, ky:ky + H, :, :]
                         .reshape(M, C).astype(jnp.bfloat16))
                contrib = jnp.dot(patch, w_ref[ky * 3 + kx],
                                  preferred_element_type=jnp.float32)
                if first:
                    acc_ref[...] = contrib
                    first = False
                else:
                    acc_ref[...] += contrib
        return acc_ref[...] + b_ref[...]                   # (M, C) f32

    # conv1  (LeakyReLU(negative_slope=1.0) == identity -> omitted)
    pad_ref[:, 1:H + 1, 1:W + 1, :] = x_ref[...]
    h = conv3x3(w1_ref, b1_ref)

    # conv2: intermediate stays in VMEM (interior overwritten, border still 0)
    pad_ref[:, 1:H + 1, 1:W + 1, :] = h.reshape(n_tile, H, W, C)
    y = conv3x3(w2_ref, b2_ref)

    # channel-wise L2 normalization (rsqrt -> EUP)
    ssq = jnp.sum(y * y, axis=-1, keepdims=True)
    y = y * jax.lax.rsqrt(jnp.maximum(ssq, 1e-12))
    o_ref[...] = y.reshape(n_tile, H, W, C)


def _pick_img_tile(n_imgs, hw, target_rows=256):
    """Largest divisor of n_imgs keeping M = tile * H * W near 256 MXU rows."""
    want = min(n_imgs, max(1, target_rows // max(hw, 1)))
    for t in range(want, 0, -1):
        if n_imgs % t == 0:
            return t
    return 1


def _refine_batched(feats, w1t, b1, w2t, b2):
    """feats: (N, H, W, C) f32 -> (N, H, W, C) f32 refined + L2-normalized."""
    N, H, W, C = feats.shape
    n_tile = _pick_img_tile(N, H * W)
    kernel = functools.partial(_refine_kernel, n_tile=n_tile, H=H, W=W, C=C)
    return pl.pallas_call(
        kernel,
        out_shape=jax.ShapeDtypeStruct((N, H, W, C), jnp.float32),
        grid=(N // n_tile,),
        in_specs=[
            pl.BlockSpec((n_tile, H, W, C), lambda i: (i, 0, 0, 0)),
            pl.BlockSpec((9, C, C), lambda i: (0, 0, 0)),
            pl.BlockSpec((1, C), lambda i: (0, 0)),
            pl.BlockSpec((9, C, C), lambda i: (0, 0, 0)),
            pl.BlockSpec((1, C), lambda i: (0, 0)),
        ],
        out_specs=pl.BlockSpec((n_tile, H, W, C), lambda i: (i, 0, 0, 0)),
        scratch_shapes=[
            pltpu.VMEM((n_tile, H + 2, W + 2, C), jnp.float32),
            pltpu.VMEM((n_tile * H * W, C), jnp.float32),
        ],
        compiler_params=pltpu.CompilerParams(
            dimension_semantics=("parallel",)),
    )(feats, w1t, b1, w2t, b2)


# ---------------------------------------------------------------------------
# Kernel 2: cosine-softmax aggregation
#   w_s = mean_c(x1_norm * supp_norm_s); w = softmax_S(w); agg = x + x*sum_s w_s
# ---------------------------------------------------------------------------
def _aggregate_kernel(x_ref, x1_ref, supp_ref, o_ref, *, use_mean):
    """x_ref/x1_ref: (1, hT, W, C) f32; supp_ref: (S, hT, W, C) f32."""
    S, hT, W, C = supp_ref.shape
    M = hT * W
    x1 = x1_ref[...].reshape(M, C)
    supp = supp_ref[...].reshape(S, M, C)

    # cosine weights in a lane-dense (S, M) layout (pixels on lanes)
    w = jnp.sum(supp * x1[None, :, :], axis=-1)        # (S, M)
    if use_mean:
        w = w * (1.0 / C)
    # softmax over the S support features (axis 0)
    w = w - jnp.max(w, axis=0, keepdims=True)
    w = jnp.exp(w)
    w = w / jnp.sum(w, axis=0, keepdims=True)
    wsum = jnp.sum(w, axis=0, keepdims=True)           # (1, M), ~= 1

    # agg = x + sum_s(x * w_s) == x * (1 + sum_s w_s); broadcast back to rows
    scale = 1.0 + jnp.transpose(wsum, (1, 0))          # (M, 1)
    x = x_ref[...].reshape(M, C)
    o_ref[...] = (x * scale).reshape(1, hT, W, C)


def _pick_h_tile(H, W, C, S, budget_bytes=8 << 20):
    """Largest divisor of H keeping the per-step blocks within a VMEM budget."""
    per_row = (S + 3) * W * C * 4 * 2   # x, x1, out + S supp rows, double-buffered
    for hT in range(H, 0, -1):
        if H % hT == 0 and hT * per_row <= budget_bytes:
            return hT
    return 1


def _aggregate(x, x1, supp_n, use_mean):
    B, H, W, C = x.shape
    S = supp_n.shape[0]
    hT = _pick_h_tile(H, W, C, S)
    kernel = functools.partial(_aggregate_kernel, use_mean=use_mean)
    return pl.pallas_call(
        kernel,
        out_shape=jax.ShapeDtypeStruct((B, H, W, C), jnp.float32),
        # batch innermost so the shared support block is only re-fetched when
        # the spatial tile changes
        grid=(H // hT, B),
        in_specs=[
            pl.BlockSpec((1, hT, W, C), lambda h, b: (b, h, 0, 0)),
            pl.BlockSpec((1, hT, W, C), lambda h, b: (b, h, 0, 0)),
            pl.BlockSpec((S, hT, W, C), lambda h, b: (0, h, 0, 0)),
        ],
        out_specs=pl.BlockSpec((1, hT, W, C), lambda h, b: (b, h, 0, 0)),
        compiler_params=pltpu.CompilerParams(
            dimension_semantics=("parallel", "parallel")),
    )(x, x1, supp_n)


# ---------------------------------------------------------------------------
# Forward glue (NCHW interface like the PyTorch module)
# ---------------------------------------------------------------------------
def _prep_params(params_oihw):
    w1, b1, w2, b2 = params_oihw
    C = w1.shape[0]
    # tap-major (9, Cin, Cout) bf16 weights for the MXU; f32 biases
    w1t = jnp.transpose(w1, (2, 3, 1, 0)).reshape(9, C, C).astype(jnp.bfloat16)
    w2t = jnp.transpose(w2, (2, 3, 1, 0)).reshape(9, C, C).astype(jnp.bfloat16)
    b1r = b1.reshape(1, C).astype(jnp.float32)
    b2r = b2.reshape(1, C).astype(jnp.float32)
    return w1t, b1r, w2t, b2r


def refine_features_nchw(feats_nchw, params_oihw):
    """conv -> (LeakyReLU slope=1 == identity) -> conv -> channel L2-norm."""
    w1t, b1r, w2t, b2r = _prep_params(params_oihw)
    f = jnp.transpose(feats_nchw, (0, 2, 3, 1)).astype(jnp.float32)
    y = _refine_batched(f, w1t, b1r, w2t, b2r)
    return jnp.transpose(y, (0, 3, 1, 2))


def refinenet1_forward(x_nchw, supp_nchw, params_oihw, mean=True):
    """x: (B, 256, H, W), supp: (B*S, 256, H, W) -> (B, 256, H, W)."""
    w1t, b1r, w2t, b2r = _prep_params(params_oihw)
    B = x_nchw.shape[0]

    x_nhwc = jnp.transpose(x_nchw, (0, 2, 3, 1)).astype(jnp.float32)
    # torch code uses supp[ll * batch] for every kk (independent of kk)
    supp_nhwc = jnp.transpose(supp_nchw[::B], (0, 2, 3, 1)).astype(jnp.float32)

    # one refine launch for query + support: weights DMA'd once, M ~= 256 rows
    feats = jnp.concatenate([x_nhwc, supp_nhwc], axis=0)
    refined = _refine_batched(feats, w1t, b1r, w2t, b2r)     # (B+S, H, W, C)
    x1, supp_n = refined[:B], refined[B:]

    out_nhwc = _aggregate(x_nhwc, x1, supp_n, use_mean=mean)
    return jnp.transpose(out_nhwc, (0, 3, 1, 2))


# ---------------------------------------------------------------------------
# Pure-JAX reference (mirrors the PyTorch forward, NCHW) for verification.
# ---------------------------------------------------------------------------
def _conv_ref(x, w, b):
    y = jax.lax.conv_general_dilated(
        x, w, window_strides=(1, 1), padding="SAME",
        dimension_numbers=("NCHW", "OIHW", "NCHW"),
        precision=jax.lax.Precision.HIGHEST)
    return y + b[None, :, None, None]


def _refine_reference(t, w1, b1, w2, b2):
    h = _conv_ref(t, w1, b1)
    h = jnp.where(h >= 0, h, LEAKY_SLOPE * h)   # identity for slope 1.0
    y = _conv_ref(h, w2, b2)
    return y / jnp.sqrt(jnp.sum(y * y, axis=1, keepdims=True))


def refinenet1_reference(x, supp, params_oihw, mean=True):
    w1, b1, w2, b2 = params_oihw
    batch = x.shape[0]
    S = supp.shape[0] // batch
    outs = []
    for kk in range(batch):
        x1 = _refine_reference(x[kk:kk + 1], w1, b1, w2, b2)
        _supp = jnp.concatenate(
            [supp[ll * batch:ll * batch + 1] for ll in range(S)], 0)
        _supp = _refine_reference(_supp, w1, b1, w2, b2)
        if mean:
            ada = jnp.mean(x1 * _supp, axis=1, keepdims=True)
        else:
            ada = jnp.sum(x1 * _supp, axis=1, keepdims=True)
        ada = jax.nn.softmax(ada, axis=0)
        agg = x[kk:kk + 1] + jnp.sum(x[kk:kk + 1] * ada, axis=0, keepdims=True)
        outs.append(agg)
    return jnp.concatenate(outs, 0)


# ---------------------------------------------------------------------------
if __name__ == "__main__":
    C = 256                       # fixed by the module's Conv2d(256, 256, 3)
    B, H, W = 2, 8, 8             # small batch / spatial
    S = 2                         # supp_fea_num

    key = jax.random.PRNGKey(0)
    k1, k2, k3, k4, kx, ks = jax.random.split(key, 6)

    bound = 1.0 / (C * 9) ** 0.5  # PyTorch conv default init bound
    w1 = jax.random.uniform(k1, (C, C, 3, 3), jnp.float32, -bound, bound)
    b1 = jax.random.uniform(k2, (C,), jnp.float32, -bound, bound)
    w2 = jax.random.uniform(k3, (C, C, 3, 3), jnp.float32, -bound, bound)
    b2 = jax.random.uniform(k4, (C,), jnp.float32, -bound, bound)
    params = (w1, b1, w2, b2)

    x = jax.random.normal(kx, (B, C, H, W), jnp.float32)
    supp = jax.random.normal(ks, (B * S, C, H, W), jnp.float32)

    # full forward (2 Pallas launches)
    out = refinenet1_forward(x, supp, params, mean=True)
    out = jax.block_until_ready(out)
    assert out.shape == (B, C, H, W)
    assert bool(jnp.all(jnp.isfinite(out)))

    # check the fused refine kernel against a pure-JAX reference
    feats_pallas = jax.block_until_ready(refine_features_nchw(x, params))
    feats_ref = jax.block_until_ready(_refine_reference(x, w1, b1, w2, b2))
    feat_err = float(jnp.max(jnp.abs(feats_pallas - feats_ref)))
    assert feat_err < 3e-2, f"refine mismatch: max abs err = {feat_err}"

    # check the full forward against the reference
    ref = jax.block_until_ready(refinenet1_reference(x, supp, params, mean=True))
    max_err = float(jnp.max(jnp.abs(out - ref)))
    assert max_err < 2e-2, f"forward mismatch: max abs err = {max_err}"

    print("KERNEL_OK")
</pallas_src>

<mosaic_0001>
module attributes {stable_mosaic.version = 11 : i64} {
  func.func @_refine_kernel(%arg0: i32, %arg1: memref<4x8x8x256xf32, #tpu.memory_space<vmem>>, %arg2: memref<9x256x256xbf16, #tpu.memory_space<vmem>>, %arg3: memref<1x256xf32, #tpu.memory_space<vmem>>, %arg4: memref<9x256x256xbf16, #tpu.memory_space<vmem>>, %arg5: memref<1x256xf32, #tpu.memory_space<vmem>>, %arg6: memref<4x8x8x256xf32, #tpu.memory_space<vmem>>, %arg7: memref<4x10x10x256xf32, #tpu.memory_space<vmem>>, %arg8: memref<256x256xf32, #tpu.memory_space<vmem>>) attributes {dimension_semantics = [#tpu.dimension_semantics<parallel>], iteration_bounds = array<i64: 1>, scalar_prefetch = 0 : i64, scratch_operands = 2 : i64, tpu.core_type = #tpu.core_type<tc>, window_params = [{transform_indices = @transform_0, window_bounds = array<i64: 4, 8, 8, 256>}, {pipeline_mode = #tpu.pipeline_mode<synchronous>, transform_indices = @transform_1, window_bounds = array<i64: 9, 256, 256>}, {pipeline_mode = #tpu.pipeline_mode<synchronous>, transform_indices = @transform_2, window_bounds = array<i64: 1, 256>}, {pipeline_mode = #tpu.pipeline_mode<synchronous>, transform_indices = @transform_3, window_bounds = array<i64: 9, 256, 256>}, {pipeline_mode = #tpu.pipeline_mode<synchronous>, transform_indices = @transform_4, window_bounds = array<i64: 1, 256>}, {transform_indices = @transform_5, window_bounds = array<i64: 4, 8, 8, 256>}]} {
    %cst = arith.constant 0.000000e+00 : f32
    %0 = vector.broadcast %cst : f32 to vector<4x10x10x256xf32>
    %c0 = arith.constant 0 : index
    %c0_0 = arith.constant 0 : index
    %c0_1 = arith.constant 0 : index
    %c0_2 = arith.constant 0 : index
    %1 = vector.load %arg7[%c0, %c0_0, %c0_1, %c0_2] : memref<4x10x10x256xf32, #tpu.memory_space<vmem>>, vector<4x10x10x256xf32>
    tpu.vector_store %arg7[%c0, %c0_0, %c0_1, %c0_2], %0 {strides = array<i32>} : memref<4x10x10x256xf32, #tpu.memory_space<vmem>>, vector<4x10x10x256xf32>,
    %c0_3 = arith.constant 0 : index
    %c0_4 = arith.constant 0 : index
    %c0_5 = arith.constant 0 : index
    %c0_6 = arith.constant 0 : index
    %2 = vector.load %arg1[%c0_3, %c0_4, %c0_5, %c0_6] : memref<4x8x8x256xf32, #tpu.memory_space<vmem>>, vector<4x8x8x256xf32>
    %c0_7 = arith.constant 0 : index
    %c1 = arith.constant 1 : index
    %c1_8 = arith.constant 1 : index
    %c0_9 = arith.constant 0 : index
    %3 = vector.load %arg7[%c0_7, %c1, %c1_8, %c0_9] : memref<4x10x10x256xf32, #tpu.memory_space<vmem>>, vector<4x8x8x256xf32>
    tpu.vector_store %arg7[%c0_7, %c1, %c1_8, %c0_9], %2 {strides = array<i32>} : memref<4x10x10x256xf32, #tpu.memory_space<vmem>>, vector<4x8x8x256xf32>,
    %c0_10 = arith.constant 0 : index
    %c0_11 = arith.constant 0 : index
    %c0_12 = arith.constant 0 : index
    %c0_13 = arith.constant 0 : index
    %4 = vector.load %arg7[%c0_10, %c0_11, %c0_12, %c0_13] : memref<4x10x10x256xf32, #tpu.memory_space<vmem>>, vector<4x10x8x256xf32>
    %5 = vector.extract_strided_slice %4 {offsets = [0, 0, 0, 0], sizes = [4, 8, 8, 256], strides = [1, 1, 1, 1]} : vector<4x10x8x256xf32> to vector<4x8x8x256xf32>
    %6 = vector.shape_cast %5 : vector<4x8x8x256xf32> to vector<256x256xf32>
    %7 = arith.truncf %6 : vector<256x256xf32> to vector<256x256xbf16>
    %c0_14 = arith.constant 0 : index
    %c0_15 = arith.constant 0 : index
    %c0_16 = arith.constant 0 : index
    %8 = vector.load %arg2[%c0_14, %c0_15, %c0_16] : memref<9x256x256xbf16, #tpu.memory_space<vmem>>, vector<1x256x256xbf16>
    %9 = vector.shape_cast %8 : vector<1x256x256xbf16> to vector<256x256xbf16>
    %cst_17 = arith.constant dense<0.000000e+00> : vector<256x256xf32>
    %10 = tpu.matmul %7, %9, %cst_17 {dimension_numbers = #tpu.dot_dimension_numbers<[1], [0], [0], [1], [0, 0, 1, 1], [], []>} : vector<256x256xbf16>, vector<256x256xbf16>, vector<256x256xf32> -> vector<256x256xf32>
    %c0_18 = arith.constant 0 : index
    %c0_19 = arith.constant 0 : index
    %11 = vector.load %arg8[%c0_18, %c0_19] : memref<256x256xf32, #tpu.memory_space<vmem>>, vector<256x256xf32>
    tpu.vector_store %arg8[%c0_18, %c0_19], %10 {strides = array<i32>} : memref<256x256xf32, #tpu.memory_space<vmem>>, vector<256x256xf32>,
    %12 = vector.extract_strided_slice %4 {offsets = [0, 1, 0, 0], sizes = [4, 8, 8, 256], strides = [1, 1, 1, 1]} : vector<4x10x8x256xf32> to vector<4x8x8x256xf32>
    %13 = vector.shape_cast %12 : vector<4x8x8x256xf32> to vector<256x256xf32>
    %14 = arith.truncf %13 : vector<256x256xf32> to vector<256x256xbf16>
    %c3 = arith.constant 3 : index
    %c0_20 = arith.constant 0 : index
    %c0_21 = arith.constant 0 : index
    %15 = vector.load %arg2[%c3, %c0_20, %c0_21] : memref<9x256x256xbf16, #tpu.memory_space<vmem>>, vector<1x256x256xbf16>
    %16 = vector.shape_cast %15 : vector<1x256x256xbf16> to vector<256x256xbf16>
    %cst_22 = arith.constant dense<0.000000e+00> : vector<256x256xf32>
    %17 = tpu.matmul %14, %16, %cst_22 {dimension_numbers = #tpu.dot_dimension_numbers<[1], [0], [0], [1], [0, 0, 1, 1], [], []>} : vector<256x256xbf16>, vector<256x256xbf16>, vector<256x256xf32> -> vector<256x256xf32>
    %c0_23 = arith.constant 0 : index
    %c0_24 = arith.constant 0 : index
    %18 = vector.load %arg8[%c0_23, %c0_24] : memref<256x256xf32, #tpu.memory_space<vmem>>, vector<256x256xf32>
    %19 = arith.addf %18, %17 : vector<256x256xf32>
    %c0_25 = arith.constant 0 : index
    %c0_26 = arith.constant 0 : index
    %20 = vector.load %arg8[%c0_25, %c0_26] : memref<256x256xf32, #tpu.memory_space<vmem>>, vector<256x256xf32>
    tpu.vector_store %arg8[%c0_25, %c0_26], %19 {strides = array<i32>} : memref<256x256xf32, #tpu.memory_space<vmem>>, vector<256x256xf32>,
    %21 = vector.extract_strided_slice %4 {offsets = [0, 2, 0, 0], sizes = [4, 8, 8, 256], strides = [1, 1, 1, 1]} : vector<4x10x8x256xf32> to vector<4x8x8x256xf32>
    %22 = vector.shape_cast %21 : vector<4x8x8x256xf32> to vector<256x256xf32>
    %23 = arith.truncf %22 : vector<256x256xf32> to vector<256x256xbf16>
    %c6 = arith.constant 6 : index
    %c0_27 = arith.constant 0 : index
    %c0_28 = arith.constant 0 : index
    %24 = vector.load %arg2[%c6, %c0_27, %c0_28] : memref<9x256x256xbf16, #tpu.memory_space<vmem>>, vector<1x256x256xbf16>
    %25 = vector.shape_cast %24 : vector<1x256x256xbf16> to vector<256x256xbf16>
    %cst_29 = arith.constant dense<0.000000e+00> : vector<256x256xf32>
    %26 = tpu.matmul %23, %25, %cst_29 {dimension_numbers = #tpu.dot_dimension_numbers<[1], [0], [0], [1], [0, 0, 1, 1], [], []>} : vector<256x256xbf16>, vector<256x256xbf16>, vector<256x256xf32> -> vector<256x256xf32>
    %c0_30 = arith.constant 0 : index
    %c0_31 = arith.constant 0 : index
    %27 = vector.load %arg8[%c0_30, %c0_31] : memref<256x256xf32, #tpu.memory_space<vmem>>, vector<256x256xf32>
    %28 = arith.addf %27, %26 : vector<256x256xf32>
    %c0_32 = arith.constant 0 : index
    %c0_33 = arith.constant 0 : index
    %29 = vector.load %arg8[%c0_32, %c0_33] : memref<256x256xf32, #tpu.memory_space<vmem>>, vector<256x256xf32>
    tpu.vector_store %arg8[%c0_32, %c0_33], %28 {strides = array<i32>} : memref<256x256xf32, #tpu.memory_space<vmem>>, vector<256x256xf32>,
    %c0_34 = arith.constant 0 : index
    %c0_35 = arith.constant 0 : index
    %c1_36 = arith.constant 1 : index
    %c0_37 = arith.constant 0 : index
    %30 = vector.load %arg7[%c0_34, %c0_35, %c1_36, %c0_37] : memref<4x10x10x256xf32, #tpu.memory_space<vmem>>, vector<4x10x8x256xf32>
    %31 = vector.extract_strided_slice %30 {offsets = [0, 0, 0, 0], sizes = [4, 8, 8, 256], strides = [1, 1, 1, 1]} : vector<4x10x8x256xf32> to vector<4x8x8x256xf32>
    %32 = vector.shape_cast %31 : vector<4x8x8x256xf32> to vector<256x256xf32>
    %33 = arith.truncf %32 : vector<256x256xf32> to vector<256x256xbf16>
    %c1_38 = arith.constant 1 : index
    %c0_39 = arith.constant 0 : index
    %c0_40 = arith.constant 0 : index
    %34 = vector.load %arg2[%c1_38, %c0_39, %c0_40] : memref<9x256x256xbf16, #tpu.memory_space<vmem>>, vector<1x256x256xbf16>
    %35 = vector.shape_cast %34 : vector<1x256x256xbf16> to vector<256x256xbf16>
    %cst_41 = arith.constant dense<0.000000e+00> : vector<256x256xf32>
    %36 = tpu.matmul %33, %35, %cst_41 {dimension_numbers = #tpu.dot_dimension_numbers<[1], [0], [0], [1], [0, 0, 1, 1], [], []>} : vector<256x256xbf16>, vector<256x256xbf16>, vector<256x256xf32> -> vector<256x256xf32>
    %c0_42 = arith.constant 0 : index
    %c0_43 = arith.constant 0 : index
    %37 = vector.load %arg8[%c0_42, %c0_43] : memref<256x256xf32, #tpu.memory_space<vmem>>, vector<256x256xf32>
    %38 = arith.addf %37, %36 : vector<256x256xf32>
    %c0_44 = arith.constant 0 : index
    %c0_45 = arith.constant 0 : index
    %39 = vector.load %arg8[%c0_44, %c0_45] : memref<256x256xf32, #tpu.memory_space<vmem>>, vector<256x256xf32>
    tpu.vector_store %arg8[%c0_44, %c0_45], %38 {strides = array<i32>} : memref<256x256xf32, #tpu.memory_space<vmem>>, vector<256x256xf32>,
    %40 = vector.extract_strided_slice %30 {offsets = [0, 1, 0, 0], sizes = [4, 8, 8, 256], strides = [1, 1, 1, 1]} : vector<4x10x8x256xf32> to vector<4x8x8x256xf32>
    %41 = vector.shape_cast %40 : vector<4x8x8x256xf32> to vector<256x256xf32>
    %42 = arith.truncf %41 : vector<256x256xf32> to vector<256x256xbf16>
    %c4 = arith.constant 4 : index
    %c0_46 = arith.constant 0 : index
    %c0_47 = arith.constant 0 : index
    %43 = vector.load %arg2[%c4, %c0_46, %c0_47] : memref<9x256x256xbf16, #tpu.memory_space<vmem>>, vector<1x256x256xbf16>
    %44 = vector.shape_cast %43 : vector<1x256x256xbf16> to vector<256x256xbf16>
    %cst_48 = arith.constant dense<0.000000e+00> : vector<256x256xf32>
    %45 = tpu.matmul %42, %44, %cst_48 {dimension_numbers = #tpu.dot_dimension_numbers<[1], [0], [0], [1], [0, 0, 1, 1], [], []>} : vector<256x256xbf16>, vector<256x256xbf16>, vector<256x256xf32> -> vector<256x256xf32>
    %c0_49 = arith.constant 0 : index
    %c0_50 = arith.constant 0 : index
    %46 = vector.load %arg8[%c0_49, %c0_50] : memref<256x256xf32, #tpu.memory_space<vmem>>, vector<256x256xf32>
    %47 = arith.addf %46, %45 : vector<256x256xf32>
    %c0_51 = arith.constant 0 : index
    %c0_52 = arith.constant 0 : index
    %48 = vector.load %arg8[%c0_51, %c0_52] : memref<256x256xf32, #tpu.memory_space<vmem>>, vector<256x256xf32>
    tpu.vector_store %arg8[%c0_51, %c0_52], %47 {strides = array<i32>} : memref<256x256xf32, #tpu.memory_space<vmem>>, vector<256x256xf32>,
    %49 = vector.extract_strided_slice %30 {offsets = [0, 2, 0, 0], sizes = [4, 8, 8, 256], strides = [1, 1, 1, 1]} : vector<4x10x8x256xf32> to vector<4x8x8x256xf32>
    %50 = vector.shape_cast %49 : vector<4x8x8x256xf32> to vector<256x256xf32>
    %51 = arith.truncf %50 : vector<256x256xf32> to vector<256x256xbf16>
    %c7 = arith.constant 7 : index
    %c0_53 = arith.constant 0 : index
    %c0_54 = arith.constant 0 : index
    %52 = vector.load %arg2[%c7, %c0_53, %c0_54] : memref<9x256x256xbf16, #tpu.memory_space<vmem>>, vector<1x256x256xbf16>
    %53 = vector.shape_cast %52 : vector<1x256x256xbf16> to vector<256x256xbf16>
    %cst_55 = arith.constant dense<0.000000e+00> : vector<256x256xf32>
    %54 = tpu.matmul %51, %53, %cst_55 {dimension_numbers = #tpu.dot_dimension_numbers<[1], [0], [0], [1], [0, 0, 1, 1], [], []>} : vector<256x256xbf16>, vector<256x256xbf16>, vector<256x256xf32> -> vector<256x256xf32>
    %c0_56 = arith.constant 0 : index
    %c0_57 = arith.constant 0 : index
    %55 = vector.load %arg8[%c0_56, %c0_57] : memref<256x256xf32, #tpu.memory_space<vmem>>, vector<256x256xf32>
    %56 = arith.addf %55, %54 : vector<256x256xf32>
    %c0_58 = arith.constant 0 : index
    %c0_59 = arith.constant 0 : index
    %57 = vector.load %arg8[%c0_58, %c0_59] : memref<256x256xf32, #tpu.memory_space<vmem>>, vector<256x256xf32>
    tpu.vector_store %arg8[%c0_58, %c0_59], %56 {strides = array<i32>} : memref<256x256xf32, #tpu.memory_space<vmem>>, vector<256x256xf32>,
    %c0_60 = arith.constant 0 : index
    %c0_61 = arith.constant 0 : index
    %c2 = arith.constant 2 : index
    %c0_62 = arith.constant 0 : index
    %58 = vector.load %arg7[%c0_60, %c0_61, %c2, %c0_62] : memref<4x10x10x256xf32, #tpu.memory_space<vmem>>, vector<4x10x8x256xf32>
    %59 = vector.extract_strided_slice %58 {offsets = [0, 0, 0, 0], sizes = [4, 8, 8, 256], strides = [1, 1, 1, 1]} : vector<4x10x8x256xf32> to vector<4x8x8x256xf32>
    %60 = vector.shape_cast %59 : vector<4x8x8x256xf32> to vector<256x256xf32>
    %61 = arith.truncf %60 : vector<256x256xf32> to vector<256x256xbf16>
    %c2_63 = arith.constant 2 : index
    %c0_64 = arith.constant 0 : index
    %c0_65 = arith.constant 0 : index
    %62 = vector.load %arg2[%c2_63, %c0_64, %c0_65] : memref<9x256x256xbf16, #tpu.memory_space<vmem>>, vector<1x256x256xbf16>
    %63 = vector.shape_cast %62 : vector<1x256x256xbf16> to vector<256x256xbf16>
    %cst_66 = arith.constant dense<0.000000e+00> : vector<256x256xf32>
    %64 = tpu.matmul %61, %63, %cst_66 {dimension_numbers = #tpu.dot_dimension_numbers<[1], [0], [0], [1], [0, 0, 1, 1], [], []>} : vector<256x256xbf16>, vector<256x256xbf16>, vector<256x256xf32> -> vector<256x256xf32>
    %c0_67 = arith.constant 0 : index
    %c0_68 = arith.constant 0 : index
    %65 = vector.load %arg8[%c0_67, %c0_68] : memref<256x256xf32, #tpu.memory_space<vmem>>, vector<256x256xf32>
    %66 = arith.addf %65, %64 : vector<256x256xf32>
    %c0_69 = arith.constant 0 : index
    %c0_70 = arith.constant 0 : index
    %67 = vector.load %arg8[%c0_69, %c0_70] : memref<256x256xf32, #tpu.memory_space<vmem>>, vector<256x256xf32>
    tpu.vector_store %arg8[%c0_69, %c0_70], %66 {strides = array<i32>} : memref<256x256xf32, #tpu.memory_space<vmem>>, vector<256x256xf32>,
    %68 = vector.extract_strided_slice %58 {offsets = [0, 1, 0, 0], sizes = [4, 8, 8, 256], strides = [1, 1, 1, 1]} : vector<4x10x8x256xf32> to vector<4x8x8x256xf32>
    %69 = vector.shape_cast %68 : vector<4x8x8x256xf32> to vector<256x256xf32>
    %70 = arith.truncf %69 : vector<256x256xf32> to vector<256x256xbf16>
    %c5 = arith.constant 5 : index
    %c0_71 = arith.constant 0 : index
    %c0_72 = arith.constant 0 : index
    %71 = vector.load %arg2[%c5, %c0_71, %c0_72] : memref<9x256x256xbf16, #tpu.memory_space<vmem>>, vector<1x256x256xbf16>
    %72 = vector.shape_cast %71 : vector<1x256x256xbf16> to vector<256x256xbf16>
    %cst_73 = arith.constant dense<0.000000e+00> : vector<256x256xf32>
    %73 = tpu.matmul %70, %72, %cst_73 {dimension_numbers = #tpu.dot_dimension_numbers<[1], [0], [0], [1], [0, 0, 1, 1], [], []>} : vector<256x256xbf16>, vector<256x256xbf16>, vector<256x256xf32> -> vector<256x256xf32>
    %c0_74 = arith.constant 0 : index
    %c0_75 = arith.constant 0 : index
    %74 = vector.load %arg8[%c0_74, %c0_75] : memref<256x256xf32, #tpu.memory_space<vmem>>, vector<256x256xf32>
    %75 = arith.addf %74, %73 : vector<256x256xf32>
    %c0_76 = arith.constant 0 : index
    %c0_77 = arith.constant 0 : index
    %76 = vector.load %arg8[%c0_76, %c0_77] : memref<256x256xf32, #tpu.memory_space<vmem>>, vector<256x256xf32>
    tpu.vector_store %arg8[%c0_76, %c0_77], %75 {strides = array<i32>} : memref<256x256xf32, #tpu.memory_space<vmem>>, vector<256x256xf32>,
    %77 = vector.extract_strided_slice %58 {offsets = [0, 2, 0, 0], sizes = [4, 8, 8, 256], strides = [1, 1, 1, 1]} : vector<4x10x8x256xf32> to vector<4x8x8x256xf32>
    %78 = vector.shape_cast %77 : vector<4x8x8x256xf32> to vector<256x256xf32>
    %79 = arith.truncf %78 : vector<256x256xf32> to vector<256x256xbf16>
    %c8 = arith.constant 8 : index
    %c0_78 = arith.constant 0 : index
    %c0_79 = arith.constant 0 : index
    %80 = vector.load %arg2[%c8, %c0_78, %c0_79] : memref<9x256x256xbf16, #tpu.memory_space<vmem>>, vector<1x256x256xbf16>
    %81 = vector.shape_cast %80 : vector<1x256x256xbf16> to vector<256x256xbf16>
    %cst_80 = arith.constant dense<0.000000e+00> : vector<256x256xf32>
    %82 = tpu.matmul %79, %81, %cst_80 {dimension_numbers = #tpu.dot_dimension_numbers<[1], [0], [0], [1], [0, 0, 1, 1], [], []>} : vector<256x256xbf16>, vector<256x256xbf16>, vector<256x256xf32> -> vector<256x256xf32>
    %c0_81 = arith.constant 0 : index
    %c0_82 = arith.constant 0 : index
    %83 = vector.load %arg8[%c0_81, %c0_82] : memref<256x256xf32, #tpu.memory_space<vmem>>, vector<256x256xf32>
    %84 = arith.addf %83, %82 : vector<256x256xf32>
    %c0_83 = arith.constant 0 : index
    %c0_84 = arith.constant 0 : index
    %85 = vector.load %arg8[%c0_83, %c0_84] : memref<256x256xf32, #tpu.memory_space<vmem>>, vector<256x256xf32>
    tpu.vector_store %arg8[%c0_83, %c0_84], %84 {strides = array<i32>} : memref<256x256xf32, #tpu.memory_space<vmem>>, vector<256x256xf32>,
    %c0_85 = arith.constant 0 : index
    %c0_86 = arith.constant 0 : index
    %86 = vector.load %arg8[%c0_85, %c0_86] : memref<256x256xf32, #tpu.memory_space<vmem>>, vector<256x256xf32>
    %c0_87 = arith.constant 0 : index
    %c0_88 = arith.constant 0 : index
    %87 = vector.load %arg3[%c0_87, %c0_88] : memref<1x256xf32, #tpu.memory_space<vmem>>, vector<1x256xf32>
    %88 = vector.broadcast %87 : vector<1x256xf32> to vector<256x256xf32>
    %89 = arith.addf %86, %88 : vector<256x256xf32>
    %90 = vector.shape_cast %89 : vector<256x256xf32> to vector<4x8x8x256xf32>
    %c0_89 = arith.constant 0 : index
    %c1_90 = arith.constant 1 : index
    %c1_91 = arith.constant 1 : index
    %c0_92 = arith.constant 0 : index
    %91 = vector.load %arg7[%c0_89, %c1_90, %c1_91, %c0_92] : memref<4x10x10x256xf32, #tpu.memory_space<vmem>>, vector<4x8x8x256xf32>
    tpu.vector_store %arg7[%c0_89, %c1_90, %c1_91, %c0_92], %90 {strides = array<i32>} : memref<4x10x10x256xf32, #tpu.memory_space<vmem>>, vector<4x8x8x256xf32>,
    %c0_93 = arith.constant 0 : index
    %c0_94 = arith.constant 0 : index
    %c0_95 = arith.constant 0 : index
    %c0_96 = arith.constant 0 : index
    %92 = vector.load %arg7[%c0_93, %c0_94, %c0_95, %c0_96] : memref<4x10x10x256xf32, #tpu.memory_space<vmem>>, vector<4x10x8x256xf32>
    %93 = vector.extract_strided_slice %92 {offsets = [0, 0, 0, 0], sizes = [4, 8, 8, 256], strides = [1, 1, 1, 1]} : vector<4x10x8x256xf32> to vector<4x8x8x256xf32>
    %94 = vector.shape_cast %93 : vector<4x8x8x256xf32> to vector<256x256xf32>
    %95 = arith.truncf %94 : vector<256x256xf32> to vector<256x256xbf16>
    %c0_97 = arith.constant 0 : index
    %c0_98 = arith.constant 0 : index
    %c0_99 = arith.constant 0 : index
    %96 = vector.load %arg4[%c0_97, %c0_98, %c0_99] : memref<9x256x256xbf16, #tpu.memory_space<vmem>>, vector<1x256x256xbf16>
    %97 = vector.shape_cast %96 : vector<1x256x256xbf16> to vector<256x256xbf16>
    %cst_100 = arith.constant dense<0.000000e+00> : vector<256x256xf32>
    %98 = tpu.matmul %95, %97, %cst_100 {dimension_numbers = #tpu.dot_dimension_numbers<[1], [0], [0], [1], [0, 0, 1, 1], [], []>} : vector<256x256xbf16>, vector<256x256xbf16>, vector<256x256xf32> -> vector<256x256xf32>
    %c0_101 = arith.constant 0 : index
    %c0_102 = arith.constant 0 : index
    %99 = vector.load %arg8[%c0_101, %c0_102] : memref<256x256xf32, #tpu.memory_space<vmem>>, vector<256x256xf32>
    tpu.vector_store %arg8[%c0_101, %c0_102], %98 {strides = array<i32>} : memref<256x256xf32, #tpu.memory_space<vmem>>, vector<256x256xf32>,
    %100 = vector.extract_strided_slice %92 {offsets = [0, 1, 0, 0], sizes = [4, 8, 8, 256], strides = [1, 1, 1, 1]} : vector<4x10x8x256xf32> to vector<4x8x8x256xf32>
    %101 = vector.shape_cast %100 : vector<4x8x8x256xf32> to vector<256x256xf32>
    %102 = arith.truncf %101 : vector<256x256xf32> to vector<256x256xbf16>
    %c3_103 = arith.constant 3 : index
    %c0_104 = arith.constant 0 : index
    %c0_105 = arith.constant 0 : index
    %103 = vector.load %arg4[%c3_103, %c0_104, %c0_105] : memref<9x256x256xbf16, #tpu.memory_space<vmem>>, vector<1x256x256xbf16>
    %104 = vector.shape_cast %103 : vector<1x256x256xbf16> to vector<256x256xbf16>
    %cst_106 = arith.constant dense<0.000000e+00> : vector<256x256xf32>
    %105 = tpu.matmul %102, %104, %cst_106 {dimension_numbers = #tpu.dot_dimension_numbers<[1], [0], [0], [1], [0, 0, 1, 1], [], []>} : vector<256x256xbf16>, vector<256x256xbf16>, vector<256x256xf32> -> vector<256x256xf32>
    %c0_107 = arith.constant 0 : index
    %c0_108 = arith.constant 0 : index
    %106 = vector.load %arg8[%c0_107, %c0_108] : memref<256x256xf32, #tpu.memory_space<vmem>>, vector<256x256xf32>
    %107 = arith.addf %106, %105 : vector<256x256xf32>
    %c0_109 = arith.constant 0 : index
    %c0_110 = arith.constant 0 : index
    %108 = vector.load %arg8[%c0_109, %c0_110] : memref<256x256xf32, #tpu.memory_space<vmem>>, vector<256x256xf32>
    tpu.vector_store %arg8[%c0_109, %c0_110], %107 {strides = array<i32>} : memref<256x256xf32, #tpu.memory_space<vmem>>, vector<256x256xf32>,
    %109 = vector.extract_strided_slice %92 {offsets = [0, 2, 0, 0], sizes = [4, 8, 8, 256], strides = [1, 1, 1, 1]} : vector<4x10x8x256xf32> to vector<4x8x8x256xf32>
    %110 = vector.shape_cast %109 : vector<4x8x8x256xf32> to vector<256x256xf32>
    %111 = arith.truncf %110 : vector<256x256xf32> to vector<256x256xbf16>
    %c6_111 = arith.constant 6 : index
    %c0_112 = arith.constant 0 : index
    %c0_113 = arith.constant 0 : index
    %112 = vector.load %arg4[%c6_111, %c0_112, %c0_113] : memref<9x256x256xbf16, #tpu.memory_space<vmem>>, vector<1x256x256xbf16>
    %113 = vector.shape_cast %112 : vector<1x256x256xbf16> to vector<256x256xbf16>
    %cst_114 = arith.constant dense<0.000000e+00> : vector<256x256xf32>
    %114 = tpu.matmul %111, %113, %cst_114 {dimension_numbers = #tpu.dot_dimension_numbers<[1], [0], [0], [1], [0, 0, 1, 1], [], []>} : vector<256x256xbf16>, vector<256x256xbf16>, vector<256x256xf32> -> vector<256x256xf32>
    %c0_115 = arith.constant 0 : index
    %c0_116 = arith.constant 0 : index
    %115 = vector.load %arg8[%c0_115, %c0_116] : memref<256x256xf32, #tpu.memory_space<vmem>>, vector<256x256xf32>
    %116 = arith.addf %115, %114 : vector<256x256xf32>
    %c0_117 = arith.constant 0 : index
    %c0_118 = arith.constant 0 : index
    %117 = vector.load %arg8[%c0_117, %c0_118] : memref<256x256xf32, #tpu.memory_space<vmem>>, vector<256x256xf32>
    tpu.vector_store %arg8[%c0_117, %c0_118], %116 {strides = array<i32>} : memref<256x256xf32, #tpu.memory_space<vmem>>, vector<256x256xf32>,
    %c0_119 = arith.constant 0 : index
    %c0_120 = arith.constant 0 : index
    %c1_121 = arith.constant 1 : index
    %c0_122 = arith.constant 0 : index
    %118 = vector.load %arg7[%c0_119, %c0_120, %c1_121, %c0_122] : memref<4x10x10x256xf32, #tpu.memory_space<vmem>>, vector<4x10x8x256xf32>
    %119 = vector.extract_strided_slice %118 {offsets = [0, 0, 0, 0], sizes = [4, 8, 8, 256], strides = [1, 1, 1, 1]} : vector<4x10x8x256xf32> to vector<4x8x8x256xf32>
    %120 = vector.shape_cast %119 : vector<4x8x8x256xf32> to vector<256x256xf32>
    %121 = arith.truncf %120 : vector<256x256xf32> to vector<256x256xbf16>
    %c1_123 = arith.constant 1 : index
    %c0_124 = arith.constant 0 : index
    %c0_125 = arith.constant 0 : index
    %122 = vector.load %arg4[%c1_123, %c0_124, %c0_125] : memref<9x256x256xbf16, #tpu.memory_space<vmem>>, vector<1x256x256xbf16>
    %123 = vector.shape_cast %122 : vector<1x256x256xbf16> to vector<256x256xbf16>
    %cst_126 = arith.constant dense<0.000000e+00> : vector<256x256xf32>
    %124 = tpu.matmul %121, %123, %cst_126 {dimension_numbers = #tpu.dot_dimension_numbers<[1], [0], [0], [1], [0, 0, 1, 1], [], []>} : vector<256x256xbf16>, vector<256x256xbf16>, vector<256x256xf32> -> vector<256x256xf32>
    %c0_127 = arith.constant 0 : index
    %c0_128 = arith.constant 0 : index
    %125 = vector.load %arg8[%c0_127, %c0_128] : memref<256x256xf32, #tpu.memory_space<vmem>>, vector<256x256xf32>
    %126 = arith.addf %125, %124 : vector<256x256xf32>
    %c0_129 = arith.constant 0 : index
    %c0_130 = arith.constant 0 : index
    %127 = vector.load %arg8[%c0_129, %c0_130] : memref<256x256xf32, #tpu.memory_space<vmem>>, vector<256x256xf32>
    tpu.vector_store %arg8[%c0_129, %c0_130], %126 {strides = array<i32>} : memref<256x256xf32, #tpu.memory_space<vmem>>, vector<256x256xf32>,
    %128 = vector.extract_strided_slice %118 {offsets = [0, 1, 0, 0], sizes = [4, 8, 8, 256], strides = [1, 1, 1, 1]} : vector<4x10x8x256xf32> to vector<4x8x8x256xf32>
    %129 = vector.shape_cast %128 : vector<4x8x8x256xf32> to vector<256x256xf32>
    %130 = arith.truncf %129 : vector<256x256xf32> to vector<256x256xbf16>
    %c4_131 = arith.constant 4 : index
    %c0_132 = arith.constant 0 : index
    %c0_133 = arith.constant 0 : index
    %131 = vector.load %arg4[%c4_131, %c0_132, %c0_133] : memref<9x256x256xbf16, #tpu.memory_space<vmem>>, vector<1x256x256xbf16>
    %132 = vector.shape_cast %131 : vector<1x256x256xbf16> to vector<256x256xbf16>
    %cst_134 = arith.constant dense<0.000000e+00> : vector<256x256xf32>
    %133 = tpu.matmul %130, %132, %cst_134 {dimension_numbers = #tpu.dot_dimension_numbers<[1], [0], [0], [1], [0, 0, 1, 1], [], []>} : vector<256x256xbf16>, vector<256x256xbf16>, vector<256x256xf32> -> vector<256x256xf32>
    %c0_135 = arith.constant 0 : index
    %c0_136 = arith.constant 0 : index
    %134 = vector.load %arg8[%c0_135, %c0_136] : memref<256x256xf32, #tpu.memory_space<vmem>>, vector<256x256xf32>
    %135 = arith.addf %134, %133 : vector<256x256xf32>
    %c0_137 = arith.constant 0 : index
    %c0_138 = arith.constant 0 : index
    %136 = vector.load %arg8[%c0_137, %c0_138] : memref<256x256xf32, #tpu.memory_space<vmem>>, vector<256x256xf32>
    tpu.vector_store %arg8[%c0_137, %c0_138], %135 {strides = array<i32>} : memref<256x256xf32, #tpu.memory_space<vmem>>, vector<256x256xf32>,
    %137 = vector.extract_strided_slice %118 {offsets = [0, 2, 0, 0], sizes = [4, 8, 8, 256], strides = [1, 1, 1, 1]} : vector<4x10x8x256xf32> to vector<4x8x8x256xf32>
    %138 = vector.shape_cast %137 : vector<4x8x8x256xf32> to vector<256x256xf32>
    %139 = arith.truncf %138 : vector<256x256xf32> to vector<256x256xbf16>
    %c7_139 = arith.constant 7 : index
    %c0_140 = arith.constant 0 : index
    %c0_141 = arith.constant 0 : index
    %140 = vector.load %arg4[%c7_139, %c0_140, %c0_141] : memref<9x256x256xbf16, #tpu.memory_space<vmem>>, vector<1x256x256xbf16>
    %141 = vector.shape_cast %140 : vector<1x256x256xbf16> to vector<256x256xbf16>
    %cst_142 = arith.constant dense<0.000000e+00> : vector<256x256xf32>
    %142 = tpu.matmul %139, %141, %cst_142 {dimension_numbers = #tpu.dot_dimension_numbers<[1], [0], [0], [1], [0, 0, 1, 1], [], []>} : vector<256x256xbf16>, vector<256x256xbf16>, vector<256x256xf32> -> vector<256x256xf32>
    %c0_143 = arith.constant 0 : index
    %c0_144 = arith.constant 0 : index
    %143 = vector.load %arg8[%c0_143, %c0_144] : memref<256x256xf32, #tpu.memory_space<vmem>>, vector<256x256xf32>
    %144 = arith.addf %143, %142 : vector<256x256xf32>
    %c0_145 = arith.constant 0 : index
    %c0_146 = arith.constant 0 : index
    %145 = vector.load %arg8[%c0_145, %c0_146] : memref<256x256xf32, #tpu.memory_space<vmem>>, vector<256x256xf32>
    tpu.vector_store %arg8[%c0_145, %c0_146], %144 {strides = array<i32>} : memref<256x256xf32, #tpu.memory_space<vmem>>, vector<256x256xf32>,
    %c0_147 = arith.constant 0 : index
    %c0_148 = arith.constant 0 : index
    %c2_149 = arith.constant 2 : index
    %c0_150 = arith.constant 0 : index
    %146 = vector.load %arg7[%c0_147, %c0_148, %c2_149, %c0_150] : memref<4x10x10x256xf32, #tpu.memory_space<vmem>>, vector<4x10x8x256xf32>
    %147 = vector.extract_strided_slice %146 {offsets = [0, 0, 0, 0], sizes = [4, 8, 8, 256], strides = [1, 1, 1, 1]} : vector<4x10x8x256xf32> to vector<4x8x8x256xf32>
    %148 = vector.shape_cast %147 : vector<4x8x8x256xf32> to vector<256x256xf32>
    %149 = arith.truncf %148 : vector<256x256xf32> to vector<256x256xbf16>
    %c2_151 = arith.constant 2 : index
    %c0_152 = arith.constant 0 : index
    %c0_153 = arith.constant 0 : index
    %150 = vector.load %arg4[%c2_151, %c0_152, %c0_153] : memref<9x256x256xbf16, #tpu.memory_space<vmem>>, vector<1x256x256xbf16>
    %151 = vector.shape_cast %150 : vector<1x256x256xbf16> to vector<256x256xbf16>
    %cst_154 = arith.constant dense<0.000000e+00> : vector<256x256xf32>
    %152 = tpu.matmul %149, %151, %cst_154 {dimension_numbers = #tpu.dot_dimension_numbers<[1], [0], [0], [1], [0, 0, 1, 1], [], []>} : vector<256x256xbf16>, vector<256x256xbf16>, vector<256x256xf32> -> vector<256x256xf32>
    %c0_155 = arith.constant 0 : index
    %c0_156 = arith.constant 0 : index
    %153 = vector.load %arg8[%c0_155, %c0_156] : memref<256x256xf32, #tpu.memory_space<vmem>>, vector<256x256xf32>
    %154 = arith.addf %153, %152 : vector<256x256xf32>
    %c0_157 = arith.constant 0 : index
    %c0_158 = arith.constant 0 : index
    %155 = vector.load %arg8[%c0_157, %c0_158] : memref<256x256xf32, #tpu.memory_space<vmem>>, vector<256x256xf32>
    tpu.vector_store %arg8[%c0_157, %c0_158], %154 {strides = array<i32>} : memref<256x256xf32, #tpu.memory_space<vmem>>, vector<256x256xf32>,
    %156 = vector.extract_strided_slice %146 {offsets = [0, 1, 0, 0], sizes = [4, 8, 8, 256], strides = [1, 1, 1, 1]} : vector<4x10x8x256xf32> to vector<4x8x8x256xf32>
    %157 = vector.shape_cast %156 : vector<4x8x8x256xf32> to vector<256x256xf32>
    %158 = arith.truncf %157 : vector<256x256xf32> to vector<256x256xbf16>
    %c5_159 = arith.constant 5 : index
    %c0_160 = arith.constant 0 : index
    %c0_161 = arith.constant 0 : index
    %159 = vector.load %arg4[%c5_159, %c0_160, %c0_161] : memref<9x256x256xbf16, #tpu.memory_space<vmem>>, vector<1x256x256xbf16>
    %160 = vector.shape_cast %159 : vector<1x256x256xbf16> to vector<256x256xbf16>
    %cst_162 = arith.constant dense<0.000000e+00> : vector<256x256xf32>
    %161 = tpu.matmul %158, %160, %cst_162 {dimension_numbers = #tpu.dot_dimension_numbers<[1], [0], [0], [1], [0, 0, 1, 1], [], []>} : vector<256x256xbf16>, vector<256x256xbf16>, vector<256x256xf32> -> vector<256x256xf32>
    %c0_163 = arith.constant 0 : index
    %c0_164 = arith.constant 0 : index
    %162 = vector.load %arg8[%c0_163, %c0_164] : memref<256x256xf32, #tpu.memory_space<vmem>>, vector<256x256xf32>
    %163 = arith.addf %162, %161 : vector<256x256xf32>
    %c0_165 = arith.constant 0 : index
    %c0_166 = arith.constant 0 : index
    %164 = vector.load %arg8[%c0_165, %c0_166] : memref<256x256xf32, #tpu.memory_space<vmem>>, vector<256x256xf32>
    tpu.vector_store %arg8[%c0_165, %c0_166], %163 {strides = array<i32>} : memref<256x256xf32, #tpu.memory_space<vmem>>, vector<256x256xf32>,
    %165 = vector.extract_strided_slice %146 {offsets = [0, 2, 0, 0], sizes = [4, 8, 8, 256], strides = [1, 1, 1, 1]} : vector<4x10x8x256xf32> to vector<4x8x8x256xf32>
    %166 = vector.shape_cast %165 : vector<4x8x8x256xf32> to vector<256x256xf32>
    %167 = arith.truncf %166 : vector<256x256xf32> to vector<256x256xbf16>
    %c8_167 = arith.constant 8 : index
    %c0_168 = arith.constant 0 : index
    %c0_169 = arith.constant 0 : index
    %168 = vector.load %arg4[%c8_167, %c0_168, %c0_169] : memref<9x256x256xbf16, #tpu.memory_space<vmem>>, vector<1x256x256xbf16>
    %169 = vector.shape_cast %168 : vector<1x256x256xbf16> to vector<256x256xbf16>
    %cst_170 = arith.constant dense<0.000000e+00> : vector<256x256xf32>
    %170 = tpu.matmul %167, %169, %cst_170 {dimension_numbers = #tpu.dot_dimension_numbers<[1], [0], [0], [1], [0, 0, 1, 1], [], []>} : vector<256x256xbf16>, vector<256x256xbf16>, vector<256x256xf32> -> vector<256x256xf32>
    %c0_171 = arith.constant 0 : index
    %c0_172 = arith.constant 0 : index
    %171 = vector.load %arg8[%c0_171, %c0_172] : memref<256x256xf32, #tpu.memory_space<vmem>>, vector<256x256xf32>
    %172 = arith.addf %171, %170 : vector<256x256xf32>
    %c0_173 = arith.constant 0 : index
    %c0_174 = arith.constant 0 : index
    %173 = vector.load %arg8[%c0_173, %c0_174] : memref<256x256xf32, #tpu.memory_space<vmem>>, vector<256x256xf32>
    tpu.vector_store %arg8[%c0_173, %c0_174], %172 {strides = array<i32>} : memref<256x256xf32, #tpu.memory_space<vmem>>, vector<256x256xf32>,
    %c0_175 = arith.constant 0 : index
    %c0_176 = arith.constant 0 : index
    %174 = vector.load %arg8[%c0_175, %c0_176] : memref<256x256xf32, #tpu.memory_space<vmem>>, vector<256x256xf32>
    %c0_177 = arith.constant 0 : index
    %c0_178 = arith.constant 0 : index
    %175 = vector.load %arg5[%c0_177, %c0_178] : memref<1x256xf32, #tpu.memory_space<vmem>>, vector<1x256xf32>
    %176 = vector.broadcast %175 : vector<1x256xf32> to vector<256x256xf32>
    %177 = arith.addf %174, %176 : vector<256x256xf32>
    %178 = arith.mulf %177, %177 : vector<256x256xf32>
    %cst_179 = arith.constant dense<0.000000e+00> : vector<256xf32>
    %179 = vector.multi_reduction <add>, %178, %cst_179 [1] : vector<256x256xf32> to vector<256xf32>
    %180 = vector.shape_cast %179 : vector<256xf32> to vector<256x1xf32>
    %cst_180 = arith.constant 9.99999996E-13 : f32
    %181 = vector.broadcast %cst_180 : f32 to vector<256x1xf32>
    %182 = arith.maximumf %180, %181 : vector<256x1xf32>
    %183 = math.rsqrt %182 : vector<256x1xf32>
    %184 = vector.broadcast %183 : vector<256x1xf32> to vector<256x256xf32>
    %185 = arith.mulf %177, %184 : vector<256x256xf32>
    %186 = vector.shape_cast %185 : vector<256x256xf32> to vector<4x8x8x256xf32>
    %c0_181 = arith.constant 0 : index
    %c0_182 = arith.constant 0 : index
    %c0_183 = arith.constant 0 : index
    %c0_184 = arith.constant 0 : index
    %187 = vector.load %arg6[%c0_181, %c0_182, %c0_183, %c0_184] : memref<4x8x8x256xf32, #tpu.memory_space<vmem>>, vector<4x8x8x256xf32>
    tpu.vector_store %arg6[%c0_181, %c0_182, %c0_183, %c0_184], %186 {strides = array<i32>} : memref<4x8x8x256xf32, #tpu.memory_space<vmem>>, vector<4x8x8x256xf32>,
    return
  }
  func.func @transform_0(%arg0: i32) -> (i32, i32, i32, i32) {
    %c0_i32 = arith.constant 0 : i32
    %c0_i32_0 = arith.constant 0 : i32
    %c0_i32_1 = arith.constant 0 : i32
    %c0_i32_2 = arith.constant 0 : i32
    return %arg0, %c0_i32, %c0_i32_0, %c0_i32_1 : i32, i32, i32, i32
  }
  func.func @transform_1(%arg0: i32) -> (i32, i32, i32) {
    %c0_i32 = arith.constant 0 : i32
    %c0_i32_0 = arith.constant 0 : i32
    %c0_i32_1 = arith.constant 0 : i32
    %c0_i32_2 = arith.constant 0 : i32
    return %c0_i32, %c0_i32_0, %c0_i32_1 : i32, i32, i32
  }
  func.func @transform_2(%arg0: i32) -> (i32, i32) {
    %c0_i32 = arith.constant 0 : i32
    %c0_i32_0 = arith.constant 0 : i32
    %c0_i32_1 = arith.constant 0 : i32
    return %c0_i32, %c0_i32_0 : i32, i32
  }
  func.func @transform_3(%arg0: i32) -> (i32, i32, i32) {
    %c0_i32 = arith.constant 0 : i32
    %c0_i32_0 = arith.constant 0 : i32
    %c0_i32_1 = arith.constant 0 : i32
    %c0_i32_2 = arith.constant 0 : i32
    return %c0_i32, %c0_i32_0, %c0_i32_1 : i32, i32, i32
  }
  func.func @transform_4(%arg0: i32) -> (i32, i32) {
    %c0_i32 = arith.constant 0 : i32
    %c0_i32_0 = arith.constant 0 : i32
    %c0_i32_1 = arith.constant 0 : i32
    return %c0_i32, %c0_i32_0 : i32, i32
  }
  func.func @transform_5(%arg0: i32) -> (i32, i32, i32, i32) {
    %c0_i32 = arith.constant 0 : i32
    %c0_i32_0 = arith.constant 0 : i32
    %c0_i32_1 = arith.constant 0 : i32
    %c0_i32_2 = arith.constant 0 : i32
    return %arg0, %c0_i32, %c0_i32_0, %c0_i32_1 : i32, i32, i32, i32
  }
}

</mosaic_0001>

<bundles_post_ra>
// kernel: tpu_custom_call.1
= control target key start
LH: loop header
LB: loop body
LE: loop exit
PB: predicated region body
PF: predicated region fallthrough
CT: control target
= control target key end

     0   :  { %10 = vsyncpa [#allocation5], 0  ;;  %s20950_s0 = inlined_call_operand.hbm [shape: f32[4,8,8,256], index: 0, kind: input, shape index: {}]   ;;  %s20951_s1 = inlined_call_operand.hbm [shape: bf16[9,256,256], index: 1, kind: input, shape index: {}]   ;;  %s20952_s2 = inlined_call_operand.hbm [shape: f32[1,256], index: 2, kind: input, shape index: {}]   ;;  %s20953_s3 = inlined_call_operand.hbm [shape: bf16[9,256,256], index: 3, kind: input, shape index: {}]   ;;  %s20954_s4 = inlined_call_operand.hbm [shape: f32[1,256], index: 4, kind: input, shape index: {}]   ;;  %s20955_s5 = inlined_call_operand.hbm [shape: f32[4,8,8,256], index: 5, kind: output, shape index: {}]  }
   0x1   :  { %11 = vsyncpa [#allocation8], 0 }
   0x2   :  { %12 = vsyncpa [#allocation11], 0 }
   0x3   :  { %13 = vsyncpa [#allocation6], 0  ;;  %s17624_s18 = smov [#allocation7]   ;;  %s17484_s22 = scalar_lea.hbm %s20951_s1, 36864 }
   0x4   :  { %s31_s19 = sshll.u32 %s17624_s18, 4  ;;  %p17485_p0 = scmp.ne.s32.totalorder %s20951_s1, %s17484_s22  ;;  %s32_s19 = int_to_ptr.vmem [resolvable:$true] %s31_s19 }
   0x5   :  { %p17488_p1 = scmp.lt.u32.totalorder %s17484_s22, %s20951_s1 }
   0x7   :  { %p17490_p2 = pnand %p17488_p1, %p17485_p0 }
   0x9   :  { %17493 = shalt.err (!%p17490_p2)
}
   0xa   :  { %s17494_s27 = scalar_lea.vmem %s32_s19, 36864  ;;  %p17499_p4 = scmp.lt.s32.totalorder %s32_s19, %s32_s19 }
   0xb   :  { %p17495_p3 = scmp.ne.s32.totalorder %s32_s19, %s17494_s27  ;;  %p17500_p5 = scmp.lt.s32.totalorder %s17494_s27, %s17494_s27 }
   0xd   :  { %p17501_p6 = por %p17500_p5, %p17499_p4 }
   0xf   :  { %p17502_p7 = pnand %p17501_p6, %p17495_p3 }
  0x11   :  { %17505 = shalt.err (!%p17502_p7)
}
  0x12   :  { %s17625_s28 = smov 128   ;;  %s17626_s29 = smov 8  }
  0x13   :  { %37 = dma.hbm_to_vmem [thread:$0]  %s20951_s1, 36864, %s32_s19, [#allocation8], %s17625_s28, %s17625_s28, %s17626_s29  }
  0x14   :  { %s17627_s7 = smov [#allocation10]   ;;  %s17628_s9 = smov [#allocation4]  }
  0x15   :  { %s53_s8 = sshll.u32 %s17627_s7, 4  ;;  %s19_s10 = sshll.u32 %s17628_s9, 4  ;;  %s54_s8 = int_to_ptr.vmem [resolvable:$true] %s53_s8  ;;  %s20_s10 = int_to_ptr.vmem [resolvable:$true] %s19_s10 }
  0x16   :  { %s17506_s13 = scalar_lea.hbm %s20953_s3, 36864 }
  0x17   :  { %p17507_p8 = scmp.ne.s32.totalorder %s20953_s3, %s17506_s13  ;;  %p17510_p9 = scmp.lt.u32.totalorder %s17506_s13, %s20953_s3 }
  0x19   :  { %p17512_p10 = pnand %p17510_p9, %p17507_p8 }
  0x1b   :  { %17515 = shalt.err (!%p17512_p10)
}
  0x1c   :  { %s17516_s1 = scalar_lea.vmem %s54_s8, 36864  ;;  %p17521_p12 = scmp.lt.s32.totalorder %s54_s8, %s54_s8 }
  0x1d   :  { %p17517_p11 = scmp.ne.s32.totalorder %s54_s8, %s17516_s1  ;;  %p17522_p13 = scmp.lt.s32.totalorder %s17516_s1, %s17516_s1 }
  0x1f   :  { %p17523_p0 = por %p17522_p13, %p17521_p12 }
  0x21   :  { %p17524_p1 = pnand %p17523_p0, %p17517_p11 }
  0x23   :  { %17527 = shalt.err (!%p17524_p1)
}
  0x24   :  { %59 = dma.hbm_to_vmem [thread:$0]  %s20953_s3, 36864, %s54_s8, [#allocation11], %s17625_s28, %s17625_s28, %s17626_s29  }
  0x25   :  { %s17528_s22 = scalar_lea.hbm %s20950_s0, 8192 }
  0x26   :  { %p17529_p2 = scmp.ne.s32.totalorder %s20950_s0, %s17528_s22  ;;  %p17532_p3 = scmp.lt.u32.totalorder %s17528_s22, %s20950_s0 }
  0x28   :  { %p17534_p4 = pnand %p17532_p3, %p17529_p2 }
  0x2a   :  { %17537 = shalt.err (!%p17534_p4)
}
  0x2b   :  { %s17538_s27 = scalar_lea.vmem %s20_s10, 8192  ;;  %p17543_p6 = scmp.lt.s32.totalorder %s20_s10, %s20_s10 }
  0x2c   :  { %p17539_p5 = scmp.ne.s32.totalorder %s20_s10, %s17538_s27  ;;  %p17544_p7 = scmp.lt.s32.totalorder %s17538_s27, %s17538_s27 }
  0x2e   :  { %p17545_p8 = por %p17544_p7, %p17543_p6 }
  0x30   :  { %p17546_p9 = pnand %p17545_p8, %p17539_p5 }
  0x32   :  { %17549 = shalt.err (!%p17546_p9)
}
  0x33   :  { %s17629_s3 = smov 256   ;;  %s17630_s28 = smov 16  }
  0x34   :  { %25 = dma.hbm_to_vmem [thread:$0]  %s20950_s0, 8192, %s20_s10, [#allocation5], %s17629_s3, %s17629_s3, %s17630_s28  }
  0x35   :  { %s17631_s6 = smov [#allocation9]   ;;  %s17632_s8 = smov [#allocation12]  }
  0x36   :  { %s44_s7 = sshll.u32 %s17631_s6, 4  ;;  %s66_s9 = sshll.u32 %s17632_s8, 4  ;;  %s45_s7 = int_to_ptr.vmem [resolvable:$true] %s44_s7  ;;  %s67_s9 = int_to_ptr.vmem [resolvable:$true] %s66_s9 }
  0x37   :  { %s17550_s13 = scalar_lea.hbm %s20952_s2, 32 }
  0x38   :  { %p17551_p10 = scmp.ne.s32.totalorder %s20952_s2, %s17550_s13  ;;  %p17554_p11 = scmp.lt.u32.totalorder %s17550_s13, %s20952_s2 }
  0x3a   :  { %p17556_p12 = pnand %p17554_p11, %p17551_p10 }
  0x3c   :  { %17559 = shalt.err (!%p17556_p12)
}
  0x3d   :  { %s17560_s0 = scalar_lea.vmem %s45_s7, 32  ;;  %p17565_p0 = scmp.lt.s32.totalorder %s45_s7, %s45_s7 }
  0x3e   :  { %p17561_p13 = scmp.ne.s32.totalorder %s45_s7, %s17560_s0  ;;  %p17566_p1 = scmp.lt.s32.totalorder %s17560_s0, %s17560_s0 }
  0x40   :  { %p17567_p2 = por %p17566_p1, %p17565_p0 }
  0x42   :  { %p17568_p3 = pnand %p17567_p2, %p17561_p13 }
  0x44   :  { %17571 = shalt.err (!%p17568_p3)
}
  0x45   :  { %47 = dma.hbm_to_vmem [thread:$0]  %s20952_s2, 32, %s45_s7, [#allocation8]  }
  0x46   :  { %s17572_s20 = scalar_lea.hbm %s20954_s4, 32 }
  0x47   :  { %p17573_p4 = scmp.ne.s32.totalorder %s20954_s4, %s17572_s20  ;;  %p17576_p5 = scmp.lt.u32.totalorder %s17572_s20, %s20954_s4 }
  0x49   :  { %p17578_p6 = pnand %p17576_p5, %p17573_p4 }
  0x4b   :  { %17581 = shalt.err (!%p17578_p6)
}
  0x4c   :  { %s17582_s25 = scalar_lea.vmem %s67_s9, 32  ;;  %p17587_p8 = scmp.lt.s32.totalorder %s67_s9, %s67_s9 }
  0x4d   :  { %p17583_p7 = scmp.ne.s32.totalorder %s67_s9, %s17582_s25  ;;  %p17588_p9 = scmp.lt.s32.totalorder %s17582_s25, %s17582_s25 }
  0x4f   :  { %p17589_p10 = por %p17588_p9, %p17587_p8 }
  0x51   :  { %p17590_p11 = pnand %p17589_p10, %p17583_p7 }
  0x53   :  { %17593 = shalt.err (!%p17590_p11)
}
  0x54   :  { %69 = dma.hbm_to_vmem [thread:$0]  %s20954_s4, 32, %s67_s9, [#allocation11]  }
  0x55   :  { %17616 = dma.done.wait [#allocation5], 8192  }
  0x56   :  { %17617 = vsyncadd [#allocation5], 4294959104 }
  0x57   :  { %17618 = dma.done.wait [#allocation8], 36896  }
  0x58   :  { %17619 = vsyncadd [#allocation8], 4294930400 }
  0x59   :  { %17620 = dma.done.wait [#allocation11], 36896  }
  0x5a   :  { %17621 = vsyncadd [#allocation11], 4294930400  ;;  %v17633_v0 = vmov 0.0   ;;  %v16512_v1 = vld [vmem:[#allocation7 + $0x4] ss:$8 sps:$4 sm:$0xff]   ;;  %v248_v20 = vld [vmem:[#allocation4 + $0x18] sm:$0xff] }
  0x5b   :  { %86 = vst [vmem:[#allocation2 + $0x8] sm:$0xff] %v17633_v0  ;;  %90 = vst [vmem:[#allocation2 + $0x28] sm:$0xff] %v17633_v0  ;;  %v16514_v2 = vld [vmem:[#allocation7] ss:$8 sps:$4 sm:$0xff]   ;;  %934 = vmatprep.subr.bf16.mxu0 %v16512_v1  ;;  %v16515_v3 = vld [vmem:[#allocation7 + $0x14] ss:$8 sps:$4 sm:$0xff]  }
  0x5c   :  { %85 = vst [vmem:[#allocation2] sm:$0xff] %v17633_v0  ;;  %87 = vst [vmem:[#allocation2 + $0x10] sm:$0x3] %v17633_v0  ;;  %935 = vmatpush1.bf16.msra.mxu0 %v16514_v2  ;;  %v16517_v4 = vld [vmem:[#allocation7 + $0x10] ss:$8 sps:$4 sm:$0xff]   ;;  %v246_v14 = vld [vmem:[#allocation4 + $0x8] sm:$0xff] }
  0x5d   :  { %88 = vst [vmem:[#allocation2 + $0x18] sm:$0x3] %v17633_v0  ;;  %89 = vst [vmem:[#allocation2 + $0x20] sm:$0xff] %v17633_v0  ;;  %936 = vmatprep.subr.bf16.mxu0 %v16515_v3  ;;  %v16518_v5 = vld [vmem:[#allocation7 + $0x24] ss:$8 sps:$4 sm:$0xff]   ;;  %v374_v17 = vrot.slane %v246_v14, 7 }
  0x5e   :  { %91 = vst [vmem:[#allocation2 + $0x30] sm:$0x3] %v17633_v0  ;;  %92 = vst [vmem:[#allocation2 + $0x38] sm:$0x3] %v17633_v0  ;;  %v16520_v6 = vld [vmem:[#allocation7 + $0x20] ss:$8 sps:$4 sm:$0xff]  }
  0x5f   :  { %93 = vst [vmem:[#allocation2 + $0x40] sm:$0xff] %v17633_v0  ;;  %94 = vst [vmem:[#allocation2 + $0x48] sm:$0xff] %v17633_v0  ;;  %v16521_v7 = vld [vmem:[#allocation7 + $0x34] ss:$8 sps:$4 sm:$0xff]   ;;  %v16523_v8 = vld [vmem:[#allocation7 + $0x30] ss:$8 sps:$4 sm:$0xff]  }
  0x60   :  { %95 = vst [vmem:[#allocation2 + $0x50] sm:$0x3] %v17633_v0  ;;  %96 = vst [vmem:[#allocation2 + $0x58] sm:$0x3] %v17633_v0  ;;  %937 = vmatpush1.bf16.msra.mxu0 %v16517_v4  ;;  %v16524_v9 = vld [vmem:[#allocation7 + $0x44] ss:$8 sps:$4 sm:$0xff]  }
  0x61   :  { %97 = vst [vmem:[#allocation2 + $0x60] sm:$0xff] %v17633_v0  ;;  %98 = vst [vmem:[#allocation2 + $0x68] sm:$0xff] %v17633_v0  ;;  %938 = vmatprep.subr.bf16.mxu0 %v16518_v5  ;;  %v16526_v10 = vld [vmem:[#allocation7 + $0x40] ss:$8 sps:$4 sm:$0xff]   ;;  %v16527_v11 = vld [vmem:[#allocation7 + $0x54] ss:$8 sps:$4 sm:$0xff]  }
  0x62   :  { %99 = vst [vmem:[#allocation2 + $0x70] sm:$0x3] %v17633_v0  ;;  %100 = vst [vmem:[#allocation2 + $0x78] sm:$0x3] %v17633_v0  ;;  %v16529_v12 = vld [vmem:[#allocation7 + $0x50] ss:$8 sps:$4 sm:$0xff]  }
  0x63   :  { %101 = vst [vmem:[#allocation2 + $0x80] sm:$0xff] %v17633_v0  ;;  %102 = vst [vmem:[#allocation2 + $0x88] sm:$0xff] %v17633_v0  ;;  %v16530_v13 = vld [vmem:[#allocation7 + $0x64] ss:$8 sps:$4 sm:$0xff]   ;;  %v16532_v16 = vld [vmem:[#allocation7 + $0x60] ss:$8 sps:$4 sm:$0xff]  }
  0x64   :  { %103 = vst [vmem:[#allocation2 + $0x90] sm:$0x3] %v17633_v0  ;;  %104 = vst [vmem:[#allocation2 + $0x98] sm:$0x3] %v17633_v0  ;;  %939 = vmatpush1.bf16.msra.mxu0 %v16520_v6  ;;  %v245_v15 = vld [vmem:[#allocation4] sm:$0xff]  ;;  %v250_v21 = vld [vmem:[#allocation4 + $0x28] sm:$0xff] }
  0x65   :  { %105 = vst [vmem:[#allocation2 + $0xa0] sm:$0xff] %v17633_v0  ;;  %106 = vst [vmem:[#allocation2 + $0xa8] sm:$0xff] %v17633_v0  ;;  %940 = vmatprep.subr.bf16.mxu0 %v16521_v7  ;;  %v373_v18 = vrot.slane %v245_v15, 7  ;;  %v16533_v19 = vld [vmem:[#allocation7 + $0x74] ss:$8 sps:$4 sm:$0xff]   ;;  %v376_v22 = vrot.slane %v248_v20, 7 }
  0x66   :  { %107 = vst [vmem:[#allocation2 + $0xb0] sm:$0x3] %v17633_v0  ;;  %108 = vst [vmem:[#allocation2 + $0xb8] sm:$0x3] %v17633_v0  ;;  %v378_v23 = vrot.slane %v250_v21, 7  ;;  %v247_v24 = vld [vmem:[#allocation4 + $0x10] sm:$0xff] }
  0x67   :  { %109 = vst [vmem:[#allocation2 + $0xc0] sm:$0xff] %v17633_v0  ;;  %110 = vst [vmem:[#allocation2 + $0xc8] sm:$0xff] %v17633_v0  ;;  %v249_v25 = vld [vmem:[#allocation4 + $0x20] sm:$0xff]  ;;  %v375_v26 = vrot.slane %v247_v24, 7  ;;  %v252_v28 = vld [vmem:[#allocation4 + $0x38] sm:$0xff]  ;;  %vm2675_vm0 = vcmask 1046528  }
  0x68   :  { %111 = vst [vmem:[#allocation2 + $0xd0] sm:$0x3] %v17633_v0  ;;  %112 = vst [vmem:[#allocation2 + $0xd8] sm:$0x3] %v17633_v0  ;;  %941 = vmatpush1.bf16.msra.mxu0 %v16523_v8  ;;  %v377_v27 = vrot.slane %v249_v25, 7  ;;  %v254_v30 = vld [vmem:[#allocation4 + $0x48] sm:$0xff] }
  0x69   :  { %113 = vst [vmem:[#allocation2 + $0xe0] sm:$0xff] %v17633_v0  ;;  %114 = vst [vmem:[#allocation2 + $0xe8] sm:$0xff] %v17633_v0  ;;  %942 = vmatprep.subr.bf16.mxu0 %v16524_v9  ;;  %v16535_v29 = vld [vmem:[#allocation7 + $0x70] ss:$8 sps:$4 sm:$0xff]   ;;  %v380_v31 = vrot.slane %v252_v28, 7  ;;  %v382_v33 = vrot.slane %v254_v30, 7 }
  0x6a   :  { %115 = vst [vmem:[#allocation2 + $0xf0] sm:$0x3] %v17633_v0  ;;  %116 = vst [vmem:[#allocation2 + $0xf8] sm:$0x3] %v17633_v0  ;;  %v251_v32 = vld [vmem:[#allocation4 + $0x30] sm:$0xff]  ;;  %v253_v34 = vld [vmem:[#allocation4 + $0x40] sm:$0xff] }
  0x6b   :  { %117 = vst [vmem:[#allocation2 + $0x100] sm:$0xff] %v17633_v0  ;;  %118 = vst [vmem:[#allocation2 + $0x108] sm:$0xff] %v17633_v0  ;;  %v379_v35 = vrot.slane %v251_v32, 7  ;;  %v16536_v36 = vld [vmem:[#allocation7 + $0x84] ss:$8 sps:$4 sm:$0xff]   ;;  %v381_v37 = vrot.slane %v253_v34, 7 }
  0x6c   :  { %119 = vst [vmem:[#allocation2 + $0x110] sm:$0x3] %v17633_v0  ;;  %120 = vst [vmem:[#allocation2 + $0x118] sm:$0x3] %v17633_v0  ;;  %943 = vmatpush1.bf16.msra.mxu0 %v16526_v10  ;;  %v256_v38 = vld [vmem:[#allocation4 + $0x58] sm:$0xff]  ;;  %v258_v39 = vld [vmem:[#allocation4 + $0x68] sm:$0xff] }
  0x6d   :  { %121 = vst [vmem:[#allocation2 + $0x120] sm:$0xff] %v17633_v0  ;;  %122 = vst [vmem:[#allocation2 + $0x128] sm:$0xff] %v17633_v0  ;;  %944 = vmatprep.subr.bf16.mxu0 %v16527_v11  ;;  %v384_v40 = vrot.slane %v256_v38, 7  ;;  %v255_v41 = vld [vmem:[#allocation4 + $0x50] sm:$0xff]  ;;  %v257_v42 = vld [vmem:[#allocation4 + $0x60] sm:$0xff]  ;;  %v386_v43 = vrot.slane %v258_v39, 7 }
  0x6e   :  { %123 = vst [vmem:[#allocation2 + $0x130] sm:$0x3] %v17633_v0  ;;  %124 = vst [vmem:[#allocation2 + $0x138] sm:$0x3] %v17633_v0  ;;  %v383_v44 = vrot.slane %v255_v41, 7  ;;  %v385_v45 = vrot.slane %v257_v42, 7 }
  0x6f   :  { %125 = vst [vmem:[#allocation2 + $0x140] sm:$0xff] %v17633_v0  ;;  %126 = vst [vmem:[#allocation2 + $0x148] sm:$0xff] %v17633_v0  ;;  %v262_v46 = vld [vmem:[#allocation4 + $0x88] sm:$0xff]  ;;  %v16539_v50 = vld [vmem:[#allocation7 + $0x94] ss:$8 sps:$4 sm:$0xff]   ;;  %vm5122_vm1 = vcmask 1045504  }
  0x70   :  { %127 = vst [vmem:[#allocation2 + $0x150] sm:$0x3] %v17633_v0  ;;  %128 = vst [vmem:[#allocation2 + $0x158] sm:$0x3] %v17633_v0  ;;  %945 = vmatpush1.bf16.msra.mxu0 %v16529_v12  ;;  %v16538_v47 = vld [vmem:[#allocation7 + $0x80] ss:$8 sps:$4 sm:$0xff]  }
  0x71   :  { %129 = vst [vmem:[#allocation2 + $0x160] sm:$0xff] %v17633_v0  ;;  %130 = vst [vmem:[#allocation2 + $0x168] sm:$0xff] %v17633_v0  ;;  %946 = vmatprep.subr.bf16.mxu0 %v16530_v13  ;;  %v390_v49 = vrot.slane %v262_v46, 7  ;;  %v261_v52 = vld [vmem:[#allocation4 + $0x80] sm:$0xff]  ;;  %v16541_v54 = vld [vmem:[#allocation7 + $0x90] ss:$8 sps:$4 sm:$0xff]  }
  0x72   :  { %131 = vst [vmem:[#allocation2 + $0x170] sm:$0x3] %v17633_v0  ;;  %132 = vst [vmem:[#allocation2 + $0x178] sm:$0x3] %v17633_v0  ;;  %v389_v53 = vrot.slane %v261_v52, 7  ;;  %v264_v55 = vld [vmem:[#allocation4 + $0x98] sm:$0xff] }
  0x73   :  { %133 = vst [vmem:[#allocation2 + $0x180] sm:$0xff] %v17633_v0  ;;  %134 = vst [vmem:[#allocation2 + $0x188] sm:$0xff] %v17633_v0  ;;  %v16542_v56 = vld [vmem:[#allocation7 + $0xa4] ss:$8 sps:$4 sm:$0xff]   ;;  %v392_v58 = vrot.slane %v264_v55, 7  ;;  %v263_v60 = vld [vmem:[#allocation4 + $0x90] sm:$0xff] }
  0x74   :  { %135 = vst [vmem:[#allocation2 + $0x190] sm:$0x3] %v17633_v0  ;;  %136 = vst [vmem:[#allocation2 + $0x198] sm:$0x3] %v17633_v0  ;;  %947 = vmatpush1.bf16.msra.mxu0 %v16532_v16  ;;  %v266_v57 = vld [vmem:[#allocation4 + $0xa8] sm:$0xff]  ;;  %v265_v61 = vld [vmem:[#allocation4 + $0xa0] sm:$0xff] }
  0x75   :  { %137 = vst [vmem:[#allocation2 + $0x1a0] sm:$0xff] %v17633_v0  ;;  %138 = vst [vmem:[#allocation2 + $0x1a8] sm:$0xff] %v17633_v0  ;;  %948 = vmatprep.subr.bf16.mxu0 %v16533_v19  ;;  %v394_v59 = vrot.slane %v266_v57, 7  ;;  %v391_v62 = vrot.slane %v263_v60, 7  ;;  %v393_v63 = vrot.slane %v265_v61, 7  ;;  %v268_v3 = vld [vmem:[#allocation4 + $0xb8] sm:$0xff] }
  0x76   :  { %139 = vst [vmem:[#allocation2 + $0x1b0] sm:$0x3] %v17633_v0  ;;  %140 = vst [vmem:[#allocation2 + $0x1b8] sm:$0x3] %v17633_v0  ;;  %v16544_v1 = vld [vmem:[#allocation7 + $0xa0] ss:$8 sps:$4 sm:$0xff]  }
  0x77   :  { %141 = vst [vmem:[#allocation2 + $0x1c0] sm:$0xff] %v17633_v0  ;;  %142 = vst [vmem:[#allocation2 + $0x1c8] sm:$0xff] %v17633_v0  ;;  %v16545_v2 = vld [vmem:[#allocation7 + $0xb4] ss:$8 sps:$4 sm:$0xff]   ;;  %v270_v4 = vld [vmem:[#allocation4 + $0xc8] sm:$0xff]  ;;  %v396_v6 = vrot.slane %v268_v3, 7 }
  0x78   :  { %143 = vst [vmem:[#allocation2 + $0x1d0] sm:$0x3] %v17633_v0  ;;  %144 = vst [vmem:[#allocation2 + $0x1d8] sm:$0x3] %v17633_v0  ;;  %949 = vmatpush1.bf16.msra.mxu0 %v16535_v29  ;;  %v267_v5 = vld [vmem:[#allocation4 + $0xb0] sm:$0xff]  ;;  %v398_v7 = vrot.slane %v270_v4, 7 }
  0x79   :  { %145 = vst [vmem:[#allocation2 + $0x1e0] sm:$0xff] %v17633_v0  ;;  %146 = vst [vmem:[#allocation2 + $0x1e8] sm:$0xff] %v17633_v0  ;;  %950 = vmatprep.subr.bf16.mxu0 %v16536_v36  ;;  %v269_v8 = vld [vmem:[#allocation4 + $0xc0] sm:$0xff]  ;;  %v395_v9 = vrot.slane %v267_v5, 7  ;;  %v16547_v10 = vld [vmem:[#allocation7 + $0xb0] ss:$8 sps:$4 sm:$0xff]  }
  0x7a   :  { %147 = vst [vmem:[#allocation2 + $0x1f0] sm:$0x3] %v17633_v0  ;;  %148 = vst [vmem:[#allocation2 + $0x1f8] sm:$0x3] %v17633_v0  ;;  %v16548_v11 = vld [vmem:[#allocation7 + $0xc4] ss:$8 sps:$4 sm:$0xff]  }
  0x7b   :  { %149 = vst [vmem:[#allocation2 + $0x200] sm:$0xff] %v17633_v0  ;;  %150 = vst [vmem:[#allocation2 + $0x208] sm:$0xff] %v17633_v0  ;;  %v397_v12 = vrot.slane %v269_v8, 7  ;;  %v272_v13 = vld [vmem:[#allocation4 + $0xd8] sm:$0xff]  ;;  %v274_v14 = vld [vmem:[#allocation4 + $0xe8] sm:$0xff]  ;;  %s17634_s4 = smov [#allocation13]  }
  0x7c   :  { %151 = vst [vmem:[#allocation2 + $0x210] sm:$0x3] %v17633_v0  ;;  %152 = vst [vmem:[#allocation2 + $0x218] sm:$0x3] %v17633_v0  ;;  %951 = vmatpush1.bf16.msra.mxu0 %v16538_v47  ;;  %v271_v15 = vld [vmem:[#allocation4 + $0xd0] sm:$0xff]  ;;  %v400_v16 = vrot.slane %v272_v13, 7 }
  0x7d   :  { %153 = vst [vmem:[#allocation2 + $0x220] sm:$0xff] %v17633_v0  ;;  %154 = vst [vmem:[#allocation2 + $0x228] sm:$0xff] %v17633_v0  ;;  %952 = vmatprep.subr.bf16.mxu0 %v16539_v50  ;;  %v399_v19 = vrot.slane %v271_v15, 7  ;;  %v16550_v21 = vld [vmem:[#allocation7 + $0xc0] ss:$8 sps:$4 sm:$0xff]   ;;  %v279_v30 = vld [vmem:[#allocation4 + $0x110] sm:$0xff] }
  0x7e   :  { %155 = vst [vmem:[#allocation2 + $0x230] sm:$0x3] %v17633_v0  ;;  %156 = vst [vmem:[#allocation2 + $0x238] sm:$0x3] %v17633_v0  ;;  %v277_v24 = vld [vmem:[#allocation4 + $0x100] sm:$0xff]  ;;  %v282_v28 = vld [vmem:[#allocation4 + $0x128] sm:$0xff] }
  0x7f   :  { %157 = vst [vmem:[#allocation2 + $0x240] sm:$0xff] %v17633_v0  ;;  %158 = vst [vmem:[#allocation2 + $0x248] sm:$0xff] %v17633_v0  ;;  %v410_v32 = vrot.slane %v282_v28, 7  ;;  %v16554_v34 = vld [vmem:[#allocation7 + $0xe4] ss:$8 sps:$4 sm:$0xff]   ;;  %v284_v39 = vld [vmem:[#allocation4 + $0x138] sm:$0xff] }
  0x80   :  { %159 = vst [vmem:[#allocation2 + $0x250] sm:$0x3] %v17633_v0  ;;  %160 = vst [vmem:[#allocation2 + $0x258] sm:$0x3] %v17633_v0  ;;  %953 = vmatpush1.bf16.msra.mxu0 %v16541_v54  ;;  %v16557_v38 = vld [vmem:[#allocation7 + $0xf4] ss:$8 sps:$4 sm:$0xff]  }
  0x81   :  { %161 = vst [vmem:[#allocation2 + $0x260] sm:$0xff] %v17633_v0  ;;  %162 = vst [vmem:[#allocation2 + $0x268] sm:$0xff] %v17633_v0  ;;  %954 = vmatprep.subr.bf16.mxu0 %v16542_v56  ;;  %v412_v41 = vrot.slane %v284_v39, 7  ;;  %v288_v47 = vld [vmem:[#allocation4 + $0x158] sm:$0xff]  ;;  %v290_v52 = vld [vmem:[#allocation4 + $0x168] sm:$0xff]  ;;  %s14887_s27 = sshll.u32 %s17634_s4, 4  ;;  %s14888_s27 = int_to_ptr.vmem [resolvable:$true] %s14887_s27 }
  0x82   :  { %163 = vst [vmem:[#allocation2 + $0x270] sm:$0x3] %v17633_v0  ;;  %164 = vst [vmem:[#allocation2 + $0x278] sm:$0x3] %v17633_v0  ;;  %v416_v50 = vrot.slane %v288_v47, 7  ;;  %v418_v56 = vrot.slane %v290_v52, 7  ;;  %p17599_p13 = scmp.lt.s32.totalorder %s14888_s27, %s14888_s27 }
  0x83   :  { %165 = vst [vmem:[#allocation2 + $0x280] sm:$0xff] %v17633_v0  ;;  %166 = vst [vmem:[#allocation2 + $0x288] sm:$0xff] %v17633_v0  ;;  %v289_v57 = vld [vmem:[#allocation4 + $0x160] sm:$0xff]  ;;  %v16565_v3 = vld [vmem:[#allocation7 + $0x314] ss:$8 sps:$4 sm:$0xff]   ;;  %s17594_s29 = scalar_lea.vmem %s14888_s27, 8192 }
  0x84   :  { %167 = vst [vmem:[#allocation2 + $0x290] sm:$0x3] %v17633_v0  ;;  %168 = vst [vmem:[#allocation2 + $0x298] sm:$0x3] %v17633_v0  ;;  %955 = vmatpush1.bf16.msra.mxu0 %v16544_v1  ;;  %v16560_v61 = vld [vmem:[#allocation7 + $0x300] ss:$8 sps:$4 sm:$0xff]   ;;  %p17595_p12 = scmp.ne.s32.totalorder %s14888_s27, %s17594_s29  ;;  %p17600_p0 = scmp.lt.s32.totalorder %s17594_s29, %s17594_s29 }
  0x85   :  { %169 = vst [vmem:[#allocation2 + $0x2a0] sm:$0xff] %v17633_v0  ;;  %170 = vst [vmem:[#allocation2 + $0x2a8] sm:$0xff] %v17633_v0  ;;  %956 = vmatprep.subr.bf16.mxu0 %v16545_v2  ;;  %v293_v2 = vld [vmem:[#allocation4 + $0x180] sm:$0xff]  ;;  %v296_v5 = vld [vmem:[#allocation4 + $0x198] sm:$0xff] }
  0x86   :  { %171 = vst [vmem:[#allocation2 + $0x2b0] sm:$0x3] %v17633_v0  ;;  %172 = vst [vmem:[#allocation2 + $0x2b8] sm:$0x3] %v17633_v0  ;;  %v421_v4 = vrot.slane %v293_v2, 7  ;;  %v297_v13 = vld [vmem:[#allocation4 + $0x1a0] sm:$0xff]  ;;  %p17601_p1 = por %p17600_p0, %p17599_p13 }
  0x87   :  { %173 = vst [vmem:[#allocation2 + $0x2c0] sm:$0xff] %v17633_v0  ;;  %174 = vst [vmem:[#allocation2 + $0x2c8] sm:$0xff] %v17633_v0  ;;  %v16571_v28 = vld [vmem:[#allocation7 + $0x334] ss:$8 sps:$4 sm:$0xff]  }
  0x88   :  { %175 = vst [vmem:[#allocation2 + $0x2d0] sm:$0x3] %v17633_v0  ;;  %176 = vst [vmem:[#allocation2 + $0x2d8] sm:$0x3] %v17633_v0  ;;  %957 = vmatpush1.bf16.msra.mxu0 %v16547_v10  ;;  %v16577_v47 = vld [vmem:[#allocation7 + $0x354] ss:$8 sps:$4 sm:$0xff]   ;;  %p17602_p2 = pnand %p17601_p1, %p17595_p12 }
  0x89   :  { %177 = vst [vmem:[#allocation2 + $0x2e0] sm:$0xff] %v17633_v0  ;;  %178 = vst [vmem:[#allocation2 + $0x2e8] sm:$0xff] %v17633_v0  ;;  %958 = vmatprep.subr.bf16.mxu0 %v16548_v11  ;;  %v295_v11 = vld [vmem:[#allocation4 + $0x190] sm:$0xff] }
  0x8a   :  { %179 = vst [vmem:[#allocation2 + $0x2f0] sm:$0x3] %v17633_v0  ;;  %180 = vst [vmem:[#allocation2 + $0x2f8] sm:$0x3] %v17633_v0 }
  0x8b   :  { %181 = vst [vmem:[#allocation2 + $0x300] sm:$0xff] %v17633_v0  ;;  %182 = vst [vmem:[#allocation2 + $0x308] sm:$0xff] %v17633_v0 }
  0x8c   :  { %183 = vst [vmem:[#allocation2 + $0x310] sm:$0x3] %v17633_v0  ;;  %184 = vst [vmem:[#allocation2 + $0x318] sm:$0x3] %v17633_v0  ;;  %959 = vmatpush1.bf16.msra.mxu0 %v16550_v21  ;;  %v302_v21 = vld [vmem:[#allocation4 + $0x1c8] sm:$0xff] }
  0x8d   :  { %185 = vst [vmem:[#allocation2 + $0x320] sm:$0xff] %v17633_v0  ;;  %186 = vst [vmem:[#allocation2 + $0x328] sm:$0xff] %v17633_v0 }
  0x8e   :  { %187 = vst [vmem:[#allocation2 + $0x330] sm:$0x3] %v17633_v0  ;;  %188 = vst [vmem:[#allocation2 + $0x338] sm:$0x3] %v17633_v0 }
  0x8f   :  { %189 = vst [vmem:[#allocation2 + $0x340] sm:$0xff] %v17633_v0  ;;  %190 = vst [vmem:[#allocation2 + $0x348] sm:$0xff] %v17633_v0 }
  0x90   :  { %191 = vst [vmem:[#allocation2 + $0x350] sm:$0x3] %v17633_v0  ;;  %192 = vst [vmem:[#allocation2 + $0x358] sm:$0x3] %v17633_v0 }
  0x91   :  { %193 = vst [vmem:[#allocation2 + $0x360] sm:$0xff] %v17633_v0  ;;  %194 = vst [vmem:[#allocation2 + $0x368] sm:$0xff] %v17633_v0 }
  0x92   :  { %195 = vst [vmem:[#allocation2 + $0x370] sm:$0x3] %v17633_v0  ;;  %196 = vst [vmem:[#allocation2 + $0x378] sm:$0x3] %v17633_v0 }
  0x93   :  { %197 = vst [vmem:[#allocation2 + $0x380] sm:$0xff] %v17633_v0  ;;  %198 = vst [vmem:[#allocation2 + $0x388] sm:$0xff] %v17633_v0 }
  0x94   :  { %199 = vst [vmem:[#allocation2 + $0x390] sm:$0x3] %v17633_v0  ;;  %200 = vst [vmem:[#allocation2 + $0x398] sm:$0x3] %v17633_v0 }
  0x95   :  { %201 = vst [vmem:[#allocation2 + $0x3a0] sm:$0xff] %v17633_v0  ;;  %202 = vst [vmem:[#allocation2 + $0x3a8] sm:$0xff] %v17633_v0 }
  0x96   :  { %203 = vst [vmem:[#allocation2 + $0x3b0] sm:$0x3] %v17633_v0  ;;  %204 = vst [vmem:[#allocation2 + $0x3b8] sm:$0x3] %v17633_v0 }
  0x97   :  { %205 = vst [vmem:[#allocation2 + $0x3c0] sm:$0xff] %v17633_v0  ;;  %206 = vst [vmem:[#allocation2 + $0x3c8] sm:$0xff] %v17633_v0 }
  0x98   :  { %207 = vst [vmem:[#allocation2 + $0x3d0] sm:$0x3] %v17633_v0  ;;  %208 = vst [vmem:[#allocation2 + $0x3d8] sm:$0x3] %v17633_v0 }
  0x99   :  { %209 = vst [vmem:[#allocation2 + $0x3e0] sm:$0xff] %v17633_v0  ;;  %210 = vst [vmem:[#allocation2 + $0x3e8] sm:$0xff] %v17633_v0 }
  0x9a   :  { %211 = vst [vmem:[#allocation2 + $0x3f0] sm:$0x3] %v17633_v0  ;;  %212 = vst [vmem:[#allocation2 + $0x3f8] sm:$0x3] %v17633_v0 }
  0x9b   :  { %213 = vst [vmem:[#allocation2 + $0x400] sm:$0xff] %v17633_v0  ;;  %214 = vst [vmem:[#allocation2 + $0x408] sm:$0xff] %v17633_v0 }
  0x9c   :  { %215 = vst [vmem:[#allocation2 + $0x410] sm:$0x3] %v17633_v0  ;;  %216 = vst [vmem:[#allocation2 + $0x418] sm:$0x3] %v17633_v0 }
  0x9d   :  { %217 = vst [vmem:[#allocation2 + $0x420] sm:$0xff] %v17633_v0  ;;  %218 = vst [vmem:[#allocation2 + $0x428] sm:$0xff] %v17633_v0 }
  0x9e   :  { %219 = vst [vmem:[#allocation2 + $0x430] sm:$0x3] %v17633_v0  ;;  %220 = vst [vmem:[#allocation2 + $0x438] sm:$0x3] %v17633_v0 }
  0x9f   :  { %221 = vst [vmem:[#allocation2 + $0x440] sm:$0xff] %v17633_v0  ;;  %222 = vst [vmem:[#allocation2 + $0x448] sm:$0xff] %v17633_v0 }
  0xa0   :  { %223 = vst [vmem:[#allocation2 + $0x450] sm:$0x3] %v17633_v0  ;;  %224 = vst [vmem:[#allocation2 + $0x458] sm:$0x3] %v17633_v0 }
  0xa1   :  { %225 = vst [vmem:[#allocation2 + $0x460] sm:$0xff] %v17633_v0  ;;  %226 = vst [vmem:[#allocation2 + $0x468] sm:$0xff] %v17633_v0 }
  0xa2   :  { %227 = vst [vmem:[#allocation2 + $0x470] sm:$0x3] %v17633_v0  ;;  %228 = vst [vmem:[#allocation2 + $0x478] sm:$0x3] %v17633_v0 }
  0xa3   :  { %229 = vst [vmem:[#allocation2 + $0x480] sm:$0xff] %v17633_v0  ;;  %230 = vst [vmem:[#allocation2 + $0x488] sm:$0xff] %v17633_v0 }
  0xa4   :  { %231 = vst [vmem:[#allocation2 + $0x490] sm:$0x3] %v17633_v0  ;;  %232 = vst [vmem:[#allocation2 + $0x498] sm:$0x3] %v17633_v0 }
  0xa5   :  { %233 = vst [vmem:[#allocation2 + $0x4a0] sm:$0xff] %v17633_v0  ;;  %234 = vst [vmem:[#allocation2 + $0x4a8] sm:$0xff] %v17633_v0 }
  0xa6   :  { %235 = vst [vmem:[#allocation2 + $0x4b0] sm:$0x3] %v17633_v0  ;;  %236 = vst [vmem:[#allocation2 + $0x4b8] sm:$0x3] %v17633_v0 }
  0xa7   :  { %237 = vst [vmem:[#allocation2 + $0x4c0] sm:$0xff] %v17633_v0  ;;  %238 = vst [vmem:[#allocation2 + $0x4c8] sm:$0xff] %v17633_v0 }
  0xa8   :  { %239 = vst [vmem:[#allocation2 + $0x4d0] sm:$0x3] %v17633_v0  ;;  %240 = vst [vmem:[#allocation2 + $0x4d8] sm:$0x3] %v17633_v0 }
  0xa9   :  { %241 = vst [vmem:[#allocation2 + $0x4e0] sm:$0xff] %v17633_v0  ;;  %242 = vst [vmem:[#allocation2 + $0x4e8] sm:$0xff] %v17633_v0 }
  0xaa   :  { %243 = vst [vmem:[#allocation2 + $0x4f0] sm:$0x3] %v17633_v0  ;;  %244 = vst [vmem:[#allocation2 + $0x4f8] sm:$0x3] %v17633_v0 }
  0xab   :  { %503 = vst [vmem:[#allocation2 + $0x28] sm:$0xfe] %v374_v17  ;;  %502 = vst [vmem:[#allocation2 + $0x20] sm:$0xfe] %v373_v18 }
  0xac   :  { %504 = vst [vmem:[#allocation2 + $0x30] sm:$0x1] %v373_v18  ;;  %505 = vst [vmem:[#allocation2 + $0x38] sm:$0x1] %v374_v17  ;;  %v402_v17 = vrot.slane %v274_v14, 7  ;;  %v273_v18 = vld [vmem:[#allocation4 + $0xe0] sm:$0xff] }
  0xad   :  { %507 = vst [vmem:[#allocation2 + $0x48] sm:$0xfe] %v376_v22  ;;  %511 = vst [vmem:[#allocation2 + $0x68] sm:$0xfe] %v378_v23  ;;  %v401_v20 = vrot.slane %v273_v18, 7  ;;  %v423_v14 = vrot.slane %v295_v11, 7 }
  0xae   :  { %509 = vst [vmem:[#allocation2 + $0x58] sm:$0x1] %v376_v22  ;;  %513 = vst [vmem:[#allocation2 + $0x78] sm:$0x1] %v378_v23  ;;  %v16551_v22 = vld [vmem:[#allocation7 + $0xd4] ss:$8 sps:$4 sm:$0xff]  }
  0xaf   :  { %506 = vst [vmem:[#allocation2 + $0x40] sm:$0xfe] %v375_v26  ;;  %510 = vst [vmem:[#allocation2 + $0x60] sm:$0xfe] %v377_v27  ;;  %v278_v23 = vld [vmem:[#allocation4 + $0x108] sm:$0xff]  ;;  %960 = vmatprep.subr.bf16.mxu0 %v16551_v22  ;;  %v300_v18 = vld [vmem:[#allocation4 + $0x1b8] sm:$0xff] }
  0xb0   :  { %508 = vst [vmem:[#allocation2 + $0x50] sm:$0x1] %v375_v26  ;;  %512 = vst [vmem:[#allocation2 + $0x70] sm:$0x1] %v377_v27  ;;  %v406_v25 = vrot.slane %v278_v23, 7  ;;  %v405_v26 = vrot.slane %v277_v24, 7 }
  0xb1   :  { %515 = vst [vmem:[#allocation2 + $0x88] sm:$0xfe] %v380_v31  ;;  %517 = vst [vmem:[#allocation2 + $0x98] sm:$0x1] %v380_v31  ;;  %v280_v27 = vld [vmem:[#allocation4 + $0x118] sm:$0xff]  ;;  %v428_v22 = vrot.slane %v300_v18, 7 }
  0xb2   :  { %519 = vst [vmem:[#allocation2 + $0xa8] sm:$0xfe] %v382_v33  ;;  %521 = vst [vmem:[#allocation2 + $0xb8] sm:$0x1] %v382_v33  ;;  %v633_v48 = vld [vmem:[#allocation2 + $0x28] sm:$0xff]  ;;  %v408_v29 = vrot.slane %v280_v27, 7 }
  0xb3   :  { %514 = vst [vmem:[#allocation2 + $0x80] sm:$0xfe] %v379_v35  ;;  %516 = vst [vmem:[#allocation2 + $0x90] sm:$0x1] %v379_v35  ;;  %v711_v51 = vpack.c.bf16 %v633_v48, %v17633_v0  ;;  %v16553_v31 = vld [vmem:[#allocation7 + $0xd0] ss:$8 sps:$4 sm:$0xff]  }
  0xb4   :  { %518 = vst [vmem:[#allocation2 + $0xa0] sm:$0xfe] %v381_v37  ;;  %520 = vst [vmem:[#allocation2 + $0xb0] sm:$0x1] %v381_v37  ;;  %v407_v33 = vrot.slane %v279_v30, 7  ;;  %v281_v35 = vld [vmem:[#allocation4 + $0x120] sm:$0xff]  ;;  %961 = vmatpush1.bf16.msra.mxu0 %v16553_v31 }
  0xb5   :  { %523 = vst [vmem:[#allocation2 + $0xc8] sm:$0xfe] %v384_v40  ;;  %525 = vst [vmem:[#allocation2 + $0xd8] sm:$0x1] %v384_v40  ;;  %966 = vmatprep.mubr.bf16.mxu0 %v711_v51  ;;  %v409_v36 = vrot.slane %v281_v35, 7  ;;  %v286_v40 = vld [vmem:[#allocation4 + $0x148] sm:$0xff]  ;;  %962 = vmatprep.subr.bf16.mxu0 %v16554_v34 }
  0xb6   :  { %527 = vst [vmem:[#allocation2 + $0xe8] sm:$0xfe] %v386_v43  ;;  %529 = vst [vmem:[#allocation2 + $0xf8] sm:$0x1] %v386_v43  ;;  %v16556_v37 = vld [vmem:[#allocation7 + $0xe0] ss:$8 sps:$4 sm:$0xff]  }
  0xb7   :  { %522 = vst [vmem:[#allocation2 + $0xc0] sm:$0xfe] %v383_v44  ;;  %526 = vst [vmem:[#allocation2 + $0xe0] sm:$0xfe] %v385_v45  ;;  %v414_v42 = vrot.slane %v286_v40, 7  ;;  %v283_v43 = vld [vmem:[#allocation4 + $0x130] sm:$0xff] }
  0xb8   :  { %524 = vst [vmem:[#allocation2 + $0xd0] sm:$0x1] %v383_v44  ;;  %528 = vst [vmem:[#allocation2 + $0xf0] sm:$0x1] %v385_v45  ;;  %v285_v44 = vld [vmem:[#allocation4 + $0x140] sm:$0xff]  ;;  %v411_v45 = vrot.slane %v283_v43, 7  ;;  %963 = vmatpush1.bf16.msra.mxu0 %v16556_v37 }
  0xb9   :  { %535 = vst [vmem:[#allocation2 + $0x168] sm:$0xfe] %v390_v49  ;;  %537 = vst [vmem:[#allocation2 + $0x178] sm:$0x1] %v390_v49  ;;  %v413_v46 = vrot.slane %v285_v44, 7  ;;  %v632_v51 = vld [vmem:[#allocation2 + $0x20] sm:$0xff]  ;;  %964 = vmatprep.subr.bf16.mxu0 %v16557_v38 }
  0xba   :  { %534 = vst [vmem:[#allocation2 + $0x160] sm:$0xfe] %v389_v53  ;;  %536 = vst [vmem:[#allocation2 + $0x170] sm:$0x1] %v389_v53  ;;  %v16559_v48 = vld [vmem:[#allocation7 + $0xf0] ss:$8 sps:$4 sm:$0xff]   ;;  %v710_v60 = vpack.c.bf16 %v632_v51, %v17633_v0 }
  0xbb   :  { %539 = vst [vmem:[#allocation2 + $0x188] sm:$0xfe] %v392_v58  ;;  %541 = vst [vmem:[#allocation2 + $0x198] sm:$0x1] %v392_v58  ;;  %v16562_v49 = vld [vmem:[#allocation7 + $0x304] ss:$8 sps:$4 sm:$0xff]  }
  0xbc   :  { %543 = vst [vmem:[#allocation2 + $0x1a8] sm:$0xfe] %v394_v59  ;;  %545 = vst [vmem:[#allocation2 + $0x1b8] sm:$0x1] %v394_v59  ;;  %v287_v53 = vld [vmem:[#allocation4 + $0x150] sm:$0xff]  ;;  %v635_v54 = vld [vmem:[#allocation2 + $0x48] sm:$0xff]  ;;  %965 = vmatpush1.bf16.msra.mxu0 %v16559_v48 }
  0xbd   :  { %538 = vst [vmem:[#allocation2 + $0x180] sm:$0xfe] %v391_v62  ;;  %542 = vst [vmem:[#allocation2 + $0x1a0] sm:$0xfe] %v393_v63  ;;  %v637_v55 = vld [vmem:[#allocation2 + $0x68] sm:$0xff]  ;;  %v415_v58 = vrot.slane %v287_v53, 7  ;;  %1416 = vmatprep.subr.bf16.mxu0 %v16562_v49 }
  0xbe   :  { %540 = vst [vmem:[#allocation2 + $0x190] sm:$0x1] %v391_v62  ;;  %544 = vst [vmem:[#allocation2 + $0x1b0] sm:$0x1] %v393_v63  ;;  %v417_v59 = vrot.slane %v289_v57, 7  ;;  %v294_v62 = vld [vmem:[#allocation4 + $0x188] sm:$0xff]  ;;  %v17890_v63 = vpack.c.bf16 %v637_v55, %v635_v54 }
  0xbf   :  { %547 = vst [vmem:[#allocation2 + $0x1c8] sm:$0xfe] %v396_v6  ;;  %551 = vst [vmem:[#allocation2 + $0x1e8] sm:$0xfe] %v398_v7  ;;  %v422_v1 = vrot.slane %v294_v62, 7  ;;  %v298_v0 = vld [vmem:[#allocation4 + $0x1a8] sm:$0xff]  ;;  %967 = vmatmul.mubr.bf16.vlgmr.msra.gmra.mrb[0].mxu0 %v710_v60 }
  0xc0   :  { %549 = vst [vmem:[#allocation2 + $0x1d8] sm:$0x1] %v396_v6  ;;  %553 = vst [vmem:[#allocation2 + $0x1f8] sm:$0x1] %v398_v7  ;;  %v16563_v6 = vld [vmem:[#allocation7 + $0x310] ss:$8 sps:$4 sm:$0xff]   ;;  %1417 = vmatpush1.bf16.msra.mxu0 %v16560_v61  ;;  %976 = vmatprep.mubr.bf16.mxu0 %v17890_v63 }
  0xc1   :  { %546 = vst [vmem:[#allocation2 + $0x1c0] sm:$0xfe] %v395_v9  ;;  %548 = vst [vmem:[#allocation2 + $0x1d0] sm:$0x1] %v395_v9  ;;  %v424_v7 = vrot.slane %v296_v5, 7  ;;  %v634_v8 = vld [vmem:[#allocation2 + $0x40] sm:$0xff]  ;;  %1418 = vmatprep.subr.bf16.mxu0 %v16565_v3 }
  0xc2   :  { %550 = vst [vmem:[#allocation2 + $0x1e0] sm:$0xfe] %v397_v12  ;;  %552 = vst [vmem:[#allocation2 + $0x1f0] sm:$0x1] %v397_v12  ;;  %v16568_v9 = vld [vmem:[#allocation7 + $0x324] ss:$8 sps:$4 sm:$0xff]  }
  0xc3   :  { %555 = vst [vmem:[#allocation2 + $0x208] sm:$0xfe] %v400_v16  ;;  %559 = vst [vmem:[#allocation2 + $0x228] sm:$0xfe] %v402_v17  ;;  %v426_v10 = vrot.slane %v298_v0, 7  ;;  %v636_v12 = vld [vmem:[#allocation2 + $0x60] sm:$0xff] }
  0xc4   :  { %557 = vst [vmem:[#allocation2 + $0x218] sm:$0x1] %v400_v16  ;;  %561 = vst [vmem:[#allocation2 + $0x238] sm:$0x1] %v402_v17  ;;  %v639_v15 = vld [vmem:[#allocation2 + $0x88] sm:$0xff]  ;;  %v425_v17 = vrot.slane %v297_v13, 7  ;;  %1419 = vmatpush1.bf16.msra.mxu0 %v16563_v6 }
  0xc5   :  { %554 = vst [vmem:[#allocation2 + $0x200] sm:$0xfe] %v399_v19  ;;  %556 = vst [vmem:[#allocation2 + $0x210] sm:$0x1] %v399_v19  ;;  %v641_v16 = vld [vmem:[#allocation2 + $0xa8] sm:$0xff]  ;;  %v17893_v19 = vpack.c.bf16 %v636_v12, %v634_v8  ;;  %v299_v23 = vld [vmem:[#allocation4 + $0x1b0] sm:$0xff]  ;;  %1420 = vmatprep.subr.bf16.mxu0 %v16568_v9 }
  0xc6   :  { %558 = vst [vmem:[#allocation2 + $0x220] sm:$0xfe] %v401_v20  ;;  %560 = vst [vmem:[#allocation2 + $0x230] sm:$0x1] %v401_v20  ;;  %v16566_v20 = vld [vmem:[#allocation7 + $0x320] ss:$8 sps:$4 sm:$0xff]   ;;  %v17895_v24 = vpack.c.bf16 %v641_v16, %v639_v15 }
  0xc7   :  { %567 = vst [vmem:[#allocation2 + $0x2a8] sm:$0xfe] %v406_v25  ;;  %569 = vst [vmem:[#allocation2 + $0x2b8] sm:$0x1] %v406_v25  ;;  %v430_v25 = vrot.slane %v302_v21, 7  ;;  %v427_v27 = vrot.slane %v299_v23, 7  ;;  %977 = vmatmul.mubr.bf16.gmra.mrb[4].mxu0 %v17893_v19 }
  0xc8   :  { %566 = vst [vmem:[#allocation2 + $0x2a0] sm:$0xfe] %v405_v26  ;;  %568 = vst [vmem:[#allocation2 + $0x2b0] sm:$0x1] %v405_v26  ;;  %v301_v26 = vld [vmem:[#allocation4 + $0x1c0] sm:$0xff]  ;;  %v304_v31 = vld [vmem:[#allocation4 + $0x1d8] sm:$0xff]  ;;  %986 = vmatprep.mubr.bf16.mxu0 %v17895_v24  ;;  %1421 = vmatpush1.bf16.msra.mxu0 %v16566_v20 }
  0xc9   :  { %571 = vst [vmem:[#allocation2 + $0x2c8] sm:$0xfe] %v408_v29  ;;  %573 = vst [vmem:[#allocation2 + $0x2d8] sm:$0x1] %v408_v29  ;;  %v429_v29 = vrot.slane %v301_v26, 7  ;;  %v432_v34 = vrot.slane %v304_v31, 7  ;;  %1422 = vmatprep.subr.bf16.mxu0 %v16571_v28 }
  0xca   :  { %575 = vst [vmem:[#allocation2 + $0x2e8] sm:$0xfe] %v410_v32  ;;  %577 = vst [vmem:[#allocation2 + $0x2f8] sm:$0x1] %v410_v32  ;;  %v16569_v30 = vld [vmem:[#allocation7 + $0x330] ss:$8 sps:$4 sm:$0xff]  }
  0xcb   :  { %570 = vst [vmem:[#allocation2 + $0x2c0] sm:$0xfe] %v407_v33  ;;  %572 = vst [vmem:[#allocation2 + $0x2d0] sm:$0x1] %v407_v33  ;;  %v306_v32 = vld [vmem:[#allocation4 + $0x1e8] sm:$0xff]  ;;  %v638_v33 = vld [vmem:[#allocation2 + $0x80] sm:$0xff] }
  0xcc   :  { %574 = vst [vmem:[#allocation2 + $0x2e0] sm:$0xfe] %v409_v36  ;;  %576 = vst [vmem:[#allocation2 + $0x2f0] sm:$0x1] %v409_v36  ;;  %v434_v35 = vrot.slane %v306_v32, 7  ;;  %v303_v36 = vld [vmem:[#allocation4 + $0x1d0] sm:$0xff]  ;;  %1423 = vmatpush1.bf16.msra.mxu0 %v16569_v30 }
  0xcd   :  { %579 = vst [vmem:[#allocation2 + $0x308] sm:$0xfe] %v412_v41  ;;  %583 = vst [vmem:[#allocation2 + $0x328] sm:$0xfe] %v414_v42  ;;  %v305_v37 = vld [vmem:[#allocation4 + $0x1e0] sm:$0xff]  ;;  %v431_v39 = vrot.slane %v303_v36, 7 }
  0xce   :  { %581 = vst [vmem:[#allocation2 + $0x318] sm:$0x1] %v412_v41  ;;  %585 = vst [vmem:[#allocation2 + $0x338] sm:$0x1] %v414_v42  ;;  %v640_v38 = vld [vmem:[#allocation2 + $0xa0] sm:$0xff]  ;;  %v433_v40 = vrot.slane %v305_v37, 7 }
  0xcf   :  { %578 = vst [vmem:[#allocation2 + $0x300] sm:$0xfe] %v411_v45  ;;  %582 = vst [vmem:[#allocation2 + $0x320] sm:$0xfe] %v413_v46  ;;  %v643_v41 = vld [vmem:[#allocation2 + $0xc8] sm:$0xff]  ;;  %v17899_v44 = vpack.c.bf16 %v640_v38, %v638_v33  ;;  %v642_v48 = vld [vmem:[#allocation2 + $0xc0] sm:$0xff] }
  0xd0   :  { %580 = vst [vmem:[#allocation2 + $0x310] sm:$0x1] %v411_v45  ;;  %584 = vst [vmem:[#allocation2 + $0x330] sm:$0x1] %v413_v46  ;;  %v645_v42 = vld [vmem:[#allocation2 + $0xe8] sm:$0xff]  ;;  %v260_v49 = vld [vmem:[#allocation4 + $0x78] sm:$0xff] }
  0xd1   :  { %587 = vst [vmem:[#allocation2 + $0x348] sm:$0xfe] %v416_v50  ;;  %589 = vst [vmem:[#allocation2 + $0x358] sm:$0x1] %v416_v50  ;;  %v16574_v43 = vld [vmem:[#allocation7 + $0x344] ss:$8 sps:$4 sm:$0xff]   ;;  %v17901_v45 = vpack.c.bf16 %v645_v42, %v643_v41  ;;  %987 = vmatmul.mubr.bf16.gmra.mrb[8].mxu0 %v17899_v44 }
  0xd2   :  { %591 = vst [vmem:[#allocation2 + $0x368] sm:$0xfe] %v418_v56  ;;  %593 = vst [vmem:[#allocation2 + $0x378] sm:$0x1] %v418_v56  ;;  %v16572_v46 = vld [vmem:[#allocation7 + $0x340] ss:$8 sps:$4 sm:$0xff]   ;;  %1424 = vmatprep.subr.bf16.mxu0 %v16574_v43 }
  0xd3   :  { %586 = vst [vmem:[#allocation2 + $0x340] sm:$0xfe] %v415_v58  ;;  %588 = vst [vmem:[#allocation2 + $0x350] sm:$0x1] %v415_v58  ;;  %996 = vmatprep.mubr.bf16.mxu0 %v17901_v45  ;;  %v644_v50 = vld [vmem:[#allocation2 + $0xe0] sm:$0xff]  ;;  %1425 = vmatpush1.bf16.msra.mxu0 %v16572_v46  ;;  %v388_v52 = vrot.slane %v260_v49, 7 }
  0xd4   :  { %590 = vst [vmem:[#allocation2 + $0x360] sm:$0xfe] %v417_v59  ;;  %592 = vst [vmem:[#allocation2 + $0x370] sm:$0x1] %v417_v59  ;;  %v16575_v51 = vld [vmem:[#allocation7 + $0x350] ss:$8 sps:$4 sm:$0xff]   ;;  %1426 = vmatprep.subr.bf16.mxu0 %v16577_v47  ;;  %v17905_v58 = vpack.c.bf16 %v644_v50, %v642_v48 }
  0xd5   :  { %599 = vst [vmem:[#allocation2 + $0x3e8] sm:$0xfe] %v422_v1  ;;  %601 = vst [vmem:[#allocation2 + $0x3f8] sm:$0x1] %v422_v1  ;;  %v259_v53 = vld [vmem:[#allocation4 + $0x70] sm:$0xff]  ;;  %v653_v54 = vld [vmem:[#allocation2 + $0x168] sm:$0xff] }
  0xd6   :  { %598 = vst [vmem:[#allocation2 + $0x3e0] sm:$0xfe] %v421_v4  ;;  %600 = vst [vmem:[#allocation2 + $0x3f0] sm:$0x1] %v421_v4  ;;  %v16580_v55 = vld [vmem:[#allocation7 + $0x364] ss:$8 sps:$4 sm:$0xff]  }
  0xd7   :  { %603 = vst [vmem:[#allocation2 + $0x408] sm:$0xfe] %v424_v7  ;;  %605 = vst [vmem:[#allocation2 + $0x418] sm:$0x1] %v424_v7  ;;  %v387_v56 = vrot.slane %v259_v53, 7  ;;  %v17907_v60 = vld [vmem:[#allocation2 + $0x8] sm:$0xff]  ;;  %1427 = vmatpush1.bf16.msra.mxu0 %v16575_v51 }
  0xd8   :  { %607 = vst [vmem:[#allocation2 + $0x428] sm:$0xfe] %v426_v10  ;;  %609 = vst [vmem:[#allocation2 + $0x438] sm:$0x1] %v426_v10  ;;  %v16578_v57 = vld [vmem:[#allocation7 + $0x360] ss:$8 sps:$4 sm:$0xff]   ;;  %v719_v61 = vpack.c.bf16 %v653_v54, %v17907_v60  ;;  %1428 = vmatprep.subr.bf16.mxu0 %v16580_v55 }
  0xd9   :  { %602 = vst [vmem:[#allocation2 + $0x400] sm:$0xfe] %v423_v14  ;;  %604 = vst [vmem:[#allocation2 + $0x410] sm:$0x1] %v423_v14  ;;  %v16583_v59 = vld [vmem:[#allocation7 + $0x374] ss:$8 sps:$4 sm:$0xff]   ;;  %997 = vmatmul.mubr.bf16.gmra.mrb[12].mxu0 %v17905_v58 }
  0xda   :  { %606 = vst [vmem:[#allocation2 + $0x420] sm:$0xfe] %v425_v17  ;;  %608 = vst [vmem:[#allocation2 + $0x430] sm:$0x1] %v425_v17  ;;  %v652_v62 = vld [vmem:[#allocation2 + $0x160] sm:$0xff]  ;;  %v655_v1 = vld [vmem:[#allocation2 + $0x188] sm:$0xff]  ;;  %1006 = vmatprep.mubr.bf16.mxu0 %v719_v61 }
  0xdb   :  { %611 = vst [vmem:[#allocation2 + $0x448] sm:$0xfe] %v428_v22  ;;  %613 = vst [vmem:[#allocation2 + $0x458] sm:$0x1] %v428_v22  ;;  %v657_v2 = vld [vmem:[#allocation2 + $0x1a8] sm:$0xff]  ;;  %1429 = vmatpush1.bf16.msra.mxu0 %v16578_v57  ;;  %v718_v6 = vpack.c.bf16 %v652_v62, %v17907_v60  ;;  %v654_v8 = vld [vmem:[#allocation2 + $0x180] sm:$0xff] }
  0xdc   :  { %615 = vst [vmem:[#allocation2 + $0x468] sm:$0xfe] %v430_v25  ;;  %617 = vst [vmem:[#allocation2 + $0x478] sm:$0x1] %v430_v25  ;;  %v16581_v3 = vld [vmem:[#allocation7 + $0x370] ss:$8 sps:$4 sm:$0xff]   ;;  %1430 = vmatprep.subr.bf16.mxu0 %v16583_v59  ;;  %v17912_v7 = vpack.c.bf16 %v657_v2, %v655_v1 }
  0xdd   :  { %610 = vst [vmem:[#allocation2 + $0x440] sm:$0xfe] %v427_v27  ;;  %612 = vst [vmem:[#allocation2 + $0x450] sm:$0x1] %v427_v27  ;;  %v16586_v4 = vld [vmem:[#allocation7 + $0x384] ss:$8 sps:$4 sm:$0xff]  }
  0xde   :  { %614 = vst [vmem:[#allocation2 + $0x460] sm:$0xfe] %v429_v29  ;;  %616 = vst [vmem:[#allocation2 + $0x470] sm:$0x1] %v429_v29  ;;  %v16584_v5 = vld [vmem:[#allocation7 + $0x380] ss:$8 sps:$4 sm:$0xff]  }
  0xdf   :  { %619 = vst [vmem:[#allocation2 + $0x488] sm:$0xfe] %v432_v34  ;;  %623 = vst [vmem:[#allocation2 + $0x4a8] sm:$0xfe] %v434_v35  ;;  %v16589_v0 = vld [vmem:[#allocation7 + $0x394] ss:$8 sps:$4 sm:$0xff]   ;;  %1431 = vmatpush1.bf16.msra.mxu0 %v16581_v3 }
  0xe0   :  { %621 = vst [vmem:[#allocation2 + $0x498] sm:$0x1] %v432_v34  ;;  %625 = vst [vmem:[#allocation2 + $0x4b8] sm:$0x1] %v434_v35  ;;  %1432 = vmatprep.subr.bf16.mxu0 %v16586_v4  ;;  %v656_v9 = vld [vmem:[#allocation2 + $0x1a0] sm:$0xff]  ;;  %v659_v10 = vld [vmem:[#allocation2 + $0x1c8] sm:$0xff] }
  0xe1   :  { %618 = vst [vmem:[#allocation2 + $0x480] sm:$0xfe] %v431_v39  ;;  %622 = vst [vmem:[#allocation2 + $0x4a0] sm:$0xfe] %v433_v40  ;;  %1007 = vmatmul.mubr.bf16.gmra.mrb[16].mxu0 %v718_v6  ;;  %v661_v11 = vld [vmem:[#allocation2 + $0x1e8] sm:$0xff]  ;;  %v17915_v15 = vpack.c.bf16 %v656_v9, %v654_v8  ;;  %v658_v18 = vld [vmem:[#allocation2 + $0x1c0] sm:$0xff] }
  0xe2   :  { %620 = vst [vmem:[#allocation2 + $0x490] sm:$0x1] %v431_v39  ;;  %624 = vst [vmem:[#allocation2 + $0x4b0] sm:$0x1] %v433_v40  ;;  %v16587_v12 = vld [vmem:[#allocation7 + $0x390] ss:$8 sps:$4 sm:$0xff]   ;;  %1016 = vmatprep.mubr.bf16.mxu0 %v17912_v7  ;;  %v17917_v17 = vpack.c.bf16 %v661_v11, %v659_v10 }
  0xe3   :  { %531 = vst [vmem:[#allocation2 + $0x108] sm:$0xfe] %v388_v52  ;;  %533 = vst [vmem:[#allocation2 + $0x118] sm:$0x1] %v388_v52  ;;  %v16592_v13 = vld [vmem:[#allocation7 + $0x3a4] ss:$8 sps:$4 sm:$0xff]   ;;  %1433 = vmatpush1.bf16.msra.mxu0 %v16584_v5 }
  0xe4   :  { %530 = vst [vmem:[#allocation2 + $0x100] sm:$0xfe] %v387_v56  ;;  %532 = vst [vmem:[#allocation2 + $0x110] sm:$0x1] %v387_v56  ;;  %1434 = vmatprep.subr.bf16.mxu0 %v16589_v0  ;;  %v16590_v14 = vld [vmem:[#allocation7 + $0x3a0] ss:$8 sps:$4 sm:$0xff]  }
  0xe5   :  { %v16595_v16 = vld [vmem:[#allocation7 + $0x3b4] ss:$8 sps:$4 sm:$0xff]   ;;  %v660_v20 = vld [vmem:[#allocation2 + $0x1e0] sm:$0xff]  ;;  %v663_v21 = vld [vmem:[#allocation2 + $0x208] sm:$0xff] }
  0xe6   :  { %v665_v22 = vld [vmem:[#allocation2 + $0x228] sm:$0xff]  ;;  %v16593_v23 = vld [vmem:[#allocation7 + $0x3b0] ss:$8 sps:$4 sm:$0xff]   ;;  %v17921_v30 = vpack.c.bf16 %v660_v20, %v658_v18  ;;  %v16601_v31 = vld [vmem:[#allocation7 + $0x3d4] ss:$8 sps:$4 sm:$0xff]  }
  0xe7   :  { %1435 = vmatpush1.bf16.msra.mxu0 %v16587_v12  ;;  %v16598_v25 = vld [vmem:[#allocation7 + $0x3c4] ss:$8 sps:$4 sm:$0xff]   ;;  %v276_v26 = vld [vmem:[#allocation4 + $0xf8] sm:$0xff]  ;;  %v16596_v27 = vld [vmem:[#allocation7 + $0x3c0] ss:$8 sps:$4 sm:$0xff]   ;;  %v17923_v33 = vpack.c.bf16 %v665_v22, %v663_v21 }
  0xe8   :  { %1436 = vmatprep.subr.bf16.mxu0 %v16592_v13  ;;  %v404_v28 = vrot.slane %v276_v26, 7  ;;  %v275_v29 = vld [vmem:[#allocation4 + $0xf0] sm:$0xff]  ;;  %v17925_v34 = vld [vmem:[#allocation2 + $0x200] sm:$0xff]  ;;  %v673_v36 = vld [vmem:[#allocation2 + $0x2a8] sm:$0xff] }
  0xe9   :  { %1017 = vmatmul.mubr.bf16.gmra.mrb[20].mxu0 %v17915_v15  ;;  %v403_v32 = vrot.slane %v275_v29, 7  ;;  %v664_v35 = vld [vmem:[#allocation2 + $0x220] sm:$0xff]  ;;  %v16599_v37 = vld [vmem:[#allocation7 + $0x3d0] ss:$8 sps:$4 sm:$0xff]   ;;  %v727_v41 = vpack.c.bf16 %v673_v36, %v17907_v60  ;;  %v16607_v42 = vld [vmem:[#allocation7 + $0x3f4] ss:$8 sps:$4 sm:$0xff]  }
  0xea   :  { %1026 = vmatprep.mubr.bf16.mxu0 %v17917_v17  ;;  %563 = vst [vmem:[#allocation2 + $0x248] sm:$0xfe] %v404_v28  ;;  %565 = vst [vmem:[#allocation2 + $0x258] sm:$0x1] %v404_v28  ;;  %v16604_v38 = vld [vmem:[#allocation7 + $0x3e4] ss:$8 sps:$4 sm:$0xff]   ;;  %v17930_v39 = vpack.c.bf16 %v664_v35, %v17925_v34 }
  0xeb   :  { %1437 = vmatpush1.bf16.msra.mxu0 %v16590_v14  ;;  %562 = vst [vmem:[#allocation2 + $0x240] sm:$0xfe] %v403_v32  ;;  %564 = vst [vmem:[#allocation2 + $0x250] sm:$0x1] %v403_v32  ;;  %v16602_v40 = vld [vmem:[#allocation7 + $0x3e0] ss:$8 sps:$4 sm:$0xff]  }
  0xec   :  { %1438 = vmatprep.subr.bf16.mxu0 %v16595_v16  ;;  %v672_v43 = vld [vmem:[#allocation2 + $0x2a0] sm:$0xff]  ;;  %v17934_v46 = vld [vmem:[#allocation2 + $0x2c8] sm:$0xff]  ;;  %v16605_v48 = vld [vmem:[#allocation7 + $0x3f0] ss:$8 sps:$4 sm:$0xff]  }
  0xed   :  { %v677_v47 = vld [vmem:[#allocation2 + $0x2e8] sm:$0xff]  ;;  %v726_v50 = vpack.c.bf16 %v672_v43, %v17907_v60  ;;  %v17940_v52 = vld [vmem:[#allocation2 + $0x2c0] sm:$0xff]  ;;  %v292_v2 = vld [vmem:[#allocation4 + $0x178] sm:$0xff] }
  0xee   :  { %v16610_v49 = vld [vmem:[#allocation7 + $0x604] ss:$8 sps:$4 sm:$0xff]   ;;  %v17938_v51 = vpack.c.bf16 %v677_v47, %v17934_v46  ;;  %v420_v3 = vrot.slane %v292_v2, 7  ;;  %v291_v4 = vld [vmem:[#allocation4 + $0x170] sm:$0xff]  ;;  %v308_v32 = vld [vmem:[#allocation4 + $0x1f8] sm:$0xff] }
  0xef   :  { %1439 = vmatpush1.bf16.msra.mxu0 %v16593_v23  ;;  %v676_v53 = vld [vmem:[#allocation2 + $0x2e0] sm:$0xff]  ;;  %v17942_v54 = vld [vmem:[#allocation2 + $0x308] sm:$0xff]  ;;  %v419_v6 = vrot.slane %v291_v4, 7  ;;  %v436_v35 = vrot.slane %v308_v32, 7  ;;  %v307_v36 = vld [vmem:[#allocation4 + $0x1f0] sm:$0xff] }
  0xf0   :  { %1440 = vmatprep.subr.bf16.mxu0 %v16598_v25  ;;  %v681_v55 = vld [vmem:[#allocation2 + $0x328] sm:$0xff]  ;;  %v17946_v56 = vpack.c.bf16 %v676_v53, %v17940_v52  ;;  %v17951_v59 = vld [vmem:[#allocation2 + $0x300] sm:$0xff]  ;;  %595 = vst [vmem:[#allocation2 + $0x388] sm:$0xfe] %v420_v3  ;;  %597 = vst [vmem:[#allocation2 + $0x398] sm:$0x1] %v420_v3 }
  0xf1   :  { %1027 = vmatmul.mubr.bf16.gmra.mrb[24].mxu0 %v17921_v30  ;;  %v17949_v57 = vpack.c.bf16 %v681_v55, %v17942_v54  ;;  %v680_v61 = vld [vmem:[#allocation2 + $0x320] sm:$0xff]  ;;  %v17954_v62 = vld [vmem:[#allocation2 + $0x348] sm:$0xff]  ;;  %594 = vst [vmem:[#allocation2 + $0x380] sm:$0xfe] %v419_v6  ;;  %596 = vst [vmem:[#allocation2 + $0x390] sm:$0x1] %v419_v6 }
  0xf2   :  { %1036 = vmatprep.mubr.bf16.mxu0 %v17923_v33  ;;  %v685_v1 = vld [vmem:[#allocation2 + $0x368] sm:$0xff]  ;;  %v17958_v5 = vpack.c.bf16 %v680_v61, %v17951_v59  ;;  %v17963_v8 = vld [vmem:[#allocation2 + $0x340] sm:$0xff]  ;;  %627 = vst [vmem:[#allocation2 + $0x4c8] sm:$0xfe] %v436_v35  ;;  %629 = vst [vmem:[#allocation2 + $0x4d8] sm:$0x1] %v436_v35 }
  0xf3   :  { %1441 = vmatpush1.bf16.msra.mxu0 %v16596_v27  ;;  %v17961_v0 = vpack.c.bf16 %v685_v1, %v17954_v62  ;;  %v17966_v9 = vld [vmem:[#allocation2 + $0x360] sm:$0xff]  ;;  %v17968_v10 = vld [vmem:[#allocation2 + $0x3e8] sm:$0xff]  ;;  %v16613_v1 = vld [vmem:[#allocation7 + $0x614] ss:$8 sps:$4 sm:$0xff]  }
  0xf4   :  { %1442 = vmatprep.subr.bf16.mxu0 %v16601_v31  ;;  %v17973_v11 = vpack.c.bf16 %v17966_v9, %v17963_v8  ;;  %v735_v12 = vpack.c.bf16 %v17968_v10, %v17907_v60  ;;  %v17977_v13 = vld [vmem:[#allocation2 + $0x3e0] sm:$0xff]  ;;  %v17980_v14 = vld [vmem:[#allocation2 + $0x408] sm:$0xff]  ;;  %v16611_v6 = vld [vmem:[#allocation7 + $0x610] ss:$8 sps:$4 sm:$0xff]  }
  0xf5   :  { %v17982_v16 = vld [vmem:[#allocation2 + $0x428] sm:$0xff]  ;;  %v734_v18 = vpack.c.bf16 %v17977_v13, %v17907_v60  ;;  %v17990_v21 = vld [vmem:[#allocation2 + $0x400] sm:$0xff] }
  0xf6   :  { %v17988_v20 = vpack.c.bf16 %v17982_v16, %v17980_v14  ;;  %v17992_v22 = vld [vmem:[#allocation2 + $0x420] sm:$0xff]  ;;  %v17994_v23 = vld [vmem:[#allocation2 + $0x448] sm:$0xff] }
  0xf7   :  { %1443 = vmatpush1.bf16.msra.mxu0 %v16599_v37  ;;  %v17996_v25 = vld [vmem:[#allocation2 + $0x468] sm:$0xff]  ;;  %v18001_v26 = vpack.c.bf16 %v17992_v22, %v17990_v21  ;;  %v18007_v27 = vld [vmem:[#allocation2 + $0x440] sm:$0xff] }
  0xf8   :  { %1444 = vmatprep.subr.bf16.mxu0 %v16604_v38  ;;  %v18005_v60 = vpack.c.bf16 %v17996_v25, %v17994_v23  ;;  %v18009_v28 = vld [vmem:[#allocation2 + $0x460] sm:$0xff]  ;;  %v18012_v29 = vld [vmem:[#allocation2 + $0x488] sm:$0xff]  ;;  %v435_v38 = vrot.slane %v307_v36, 7 }
  0xf9   :  { %1037 = vmatmul.mubr.bf16.gmra.mrb[28].mxu0 %v17930_v39  ;;  %v18014_v31 = vld [vmem:[#allocation2 + $0x4a8] sm:$0xff]  ;;  %v18019_v37 = vpack.c.bf16 %v18009_v28, %v18007_v27  ;;  %v17443_v53 = vld [vmem:[#allocation2 + $0x20] sm:$0xff] }
  0xfa   :  { %1046 = vmatprep.mubr.bf16.mxu0 %v727_v41  ;;  %626 = vst [vmem:[#allocation2 + $0x4c0] sm:$0xfe] %v435_v38  ;;  %628 = vst [vmem:[#allocation2 + $0x4d0] sm:$0x1] %v435_v38  ;;  %v18026_v41 = vld [vmem:[#allocation2 + $0x480] sm:$0xff]  ;;  %v17441_v47 = vld [vmem:[#allocation2 + $0x28] sm:$0xff] }
  0xfb   :  { %1445 = vmatpush1.bf16.msra.mxu0 %v16602_v40  ;;  %21312 = vst [vmem:[#allocation18_spill] sm:$0xff] %v18019_v37  ;;  %v18023_v40 = vpack.c.bf16 %v18014_v31, %v18012_v29  ;;  %v17444_v55 = vld [vmem:[#allocation2 + $0x40] sm:$0xff]  ;;  %v17445_v2 = vld [vmem:[#allocation2 + $0x68] sm:$0xff]  ;;  %v16619_v38 = vld [vmem:[#allocation7 + $0x634] ss:$8 sps:$4 sm:$0xff]  }
  0xfc   :  { %1446 = vmatprep.subr.bf16.mxu0 %v16607_v42  ;;  %v18028_v42 = vld [vmem:[#allocation2 + $0x4a0] sm:$0xff]  ;;  %v1191_v61 = vpack.c.bf16 %v17444_v55, %v17443_v53  ;;  %v17446_v3 = vld [vmem:[#allocation2 + $0x88] sm:$0xff]  ;;  %v16617_v53 = vld [vmem:[#allocation7 + $0x630] ss:$8 sps:$4 sm:$0xff]  }
  0xfd   :  { %21313 = vst [vmem:[#allocation19_spill] sm:$0xff] %v18023_v40  ;;  %v18033_v43 = vpack.c.bf16 %v18028_v42, %v18026_v41  ;;  %v1194_v4 = vpack.c.bf16 %v17446_v3, %v17445_v2  ;;  %v17447_v32 = vld [vmem:[#allocation2 + $0x60] sm:$0xff]  ;;  %v18036_v55 = vld [vmem:[#allocation2 + $0x108] sm:$0xff] }
  0xfe   :  { %v17448_v35 = vld [vmem:[#allocation2 + $0x80] sm:$0xff] }
  0xff   :  { %1447 = vmatpush1.bf16.msra.mxu0 %v16605_v48  ;;  %21314 = vst [vmem:[#allocation20_spill] sm:$0xff] %v18033_v43  ;;  %v17442_v48 = vld [vmem:[#allocation2 + $0x48] sm:$0xff]  ;;  %v1193_v36 = vpack.c.bf16 %v17448_v35, %v17447_v32  ;;  %v17452_v2 = vld [vmem:[#allocation2 + $0xc0] sm:$0xff] }
 0x100   :  { %2002 = vmatprep.subr.bf16.mxu0 %v16610_v49  ;;  %v1192_v49 = vpack.c.bf16 %v17442_v48, %v17441_v47  ;;  %v17449_v47 = vld [vmem:[#allocation2 + $0xa8] sm:$0xff]  ;;  %v18039_v35 = vld [vmem:[#allocation2 + $0x100] sm:$0xff] }
 0x101   :  { %1047 = vmatmul.mubr.bf16.gmra.mrb[32].mxu0 %v726_v50  ;;  %v16608_v50 = vld [vmem:[#allocation7 + $0x600] ss:$8 sps:$4 sm:$0xff]  }
 0x102   :  { %1056 = vmatprep.mubr.bf16.mxu0 %v17938_v51  ;;  %v17450_v48 = vld [vmem:[#allocation2 + $0xc8] sm:$0xff] }
 0x103   :  { %v17453_v32 = vld [vmem:[#allocation2 + $0xe8] sm:$0xff] }
 0x109   :  { %1057 = vmatmul.mubr.bf16.gmra.mrb[36].mxu0 %v17946_v56 }
 0x10a   :  { %1066 = vmatprep.mubr.bf16.mxu0 %v17949_v57 }
 0x111   :  { %1067 = vmatmul.mubr.bf16.gmra.mrb[40].mxu0 %v17958_v5 }
 0x112   :  { %1076 = vmatprep.mubr.bf16.mxu0 %v17961_v0 }
 0x119   :  { %1077 = vmatmul.mubr.bf16.gmra.mrb[44].mxu0 %v17973_v11 }
 0x11a   :  { %1086 = vmatprep.mubr.bf16.mxu0 %v735_v12  ;;  %v16616_v12 = vld [vmem:[#allocation7 + $0x624] ss:$8 sps:$4 sm:$0xff]  }
 0x121   :  { %1087 = vmatmul.mubr.bf16.gmra.mrb[48].mxu0 %v734_v18  ;;  %v16614_v18 = vld [vmem:[#allocation7 + $0x620] ss:$8 sps:$4 sm:$0xff]  }
 0x122   :  { %1096 = vmatprep.mubr.bf16.mxu0 %v17988_v20 }
 0x129   :  { %1097 = vmatmul.mubr.bf16.gmra.mrb[52].mxu0 %v18001_v26 }
 0x12a   :  { %1106 = vmatprep.mubr.bf16.mxu0 %v18005_v60 }
 0x131   :  { %1107 = vmatmul.mubr.bf16.gmra.mrb[56].mxu0 %v18019_v37  ;;  %v17464_v37 = vld [vmem:[#allocation2 + $0x208] sm:$0xff] }
 0x132   :  { %1116 = vmatprep.mubr.bf16.mxu0 %v18023_v40  ;;  %v17460_v40 = vld [vmem:[#allocation2 + $0x1c8] sm:$0xff] }
 0x139   :  { %1117 = vmatmul.mubr.bf16.gmra.mrb[60].mxu0 %v18033_v43  ;;  %v17459_v43 = vld [vmem:[#allocation2 + $0x1a8] sm:$0xff] }
 0x13a   :  { %1448 = vmatprep.mubr.bf16.mxu0 %v1192_v49  ;;  %v1196_v49 = vpack.c.bf16 %v17450_v48, %v17449_v47  ;;  %v16631_v48 = vld [vmem:[#allocation7 + $0x674] ss:$8 sps:$4 sm:$0xff]  }
 0x141   :  { %1449 = vmatmul.mubr.bf16.vlgmr.msra.gmra.mrb[0].mxu0 %v1191_v61  ;;  %v16622_v61 = vld [vmem:[#allocation7 + $0x644] ss:$8 sps:$4 sm:$0xff]  }
 0x142   :  { %2003 = vmatpush1.bf16.msra.mxu0 %v16608_v50  ;;  %1458 = vmatprep.mubr.bf16.mxu0 %v1194_v4  ;;  %v16620_v50 = vld [vmem:[#allocation7 + $0x640] ss:$8 sps:$4 sm:$0xff]   ;;  %v16625_v4 = vld [vmem:[#allocation7 + $0x654] ss:$8 sps:$4 sm:$0xff]  }
 0x143   :  { %2004 = vmatprep.subr.bf16.mxu0 %v16613_v1  ;;  %v17451_v1 = vld [vmem:[#allocation2 + $0xa0] sm:$0xff] }
 0x144   :  { %v1195_v3 = vpack.c.bf16 %v17452_v2, %v17451_v1  ;;  %v17456_v1 = vld [vmem:[#allocation2 + $0x188] sm:$0xff] }
 0x146   :  { %2005 = vmatpush1.bf16.msra.mxu0 %v16611_v6  ;;  %v1198_v6 = vpack.c.bf16 %v18036_v55, %v17453_v32  ;;  %v17457_v32 = vld [vmem:[#allocation2 + $0x160] sm:$0xff] }
 0x147   :  { %2006 = vmatprep.subr.bf16.mxu0 %v16616_v12  ;;  %v16623_v12 = vld [vmem:[#allocation7 + $0x650] ss:$8 sps:$4 sm:$0xff]  }
 0x149   :  { %1459 = vmatmul.mubr.bf16.gmra.mrb[4].mxu0 %v1193_v36  ;;  %v16628_v36 = vld [vmem:[#allocation7 + $0x664] ss:$8 sps:$4 sm:$0xff]  }
 0x14a   :  { %1468 = vmatprep.mubr.bf16.mxu0 %v1196_v49  ;;  %2007 = vmatpush1.bf16.msra.mxu0 %v16614_v18  ;;  %v16626_v18 = vld [vmem:[#allocation7 + $0x660] ss:$8 sps:$4 sm:$0xff]  }
 0x14b   :  { %2008 = vmatprep.subr.bf16.mxu0 %v16619_v38  ;;  %v17454_v38 = vld [vmem:[#allocation2 + $0xe0] sm:$0xff]  ;;  %v17455_v49 = vld [vmem:[#allocation2 + $0x168] sm:$0xff] }
 0x14c   :  { %v1197_v47 = vpack.c.bf16 %v18039_v35, %v17454_v38  ;;  %v1200_v2 = vpack.c.bf16 %v17456_v1, %v17455_v49  ;;  %v1202_v38 = vpack.c.bf16 %v17460_v40, %v17459_v43  ;;  %v16635_v49 = vld [vmem:[#allocation7 + $0x690] ss:$8 sps:$4 sm:$0xff]   ;;  %v16643_v1 = vld [vmem:[#allocation7 + $0x6b4] ss:$8 sps:$4 sm:$0xff]   ;;  %v18042_v40 = vld [vmem:[#allocation2 + $0x248] sm:$0xff] }
 0x14d   :  { %v16641_v43 = vld [vmem:[#allocation7 + $0x6b0] ss:$8 sps:$4 sm:$0xff]  }
 0x14e   :  { %2009 = vmatpush1.bf16.msra.mxu0 %v16617_v53  ;;  %v16629_v53 = vld [vmem:[#allocation7 + $0x670] ss:$8 sps:$4 sm:$0xff]  }
 0x14f   :  { %2010 = vmatprep.subr.bf16.mxu0 %v16622_v61  ;;  %v16634_v61 = vld [vmem:[#allocation7 + $0x684] ss:$8 sps:$4 sm:$0xff]  }
 0x151   :  { %1469 = vmatmul.mubr.bf16.gmra.mrb[8].mxu0 %v1195_v3  ;;  %v16632_v3 = vld [vmem:[#allocation7 + $0x680] ss:$8 sps:$4 sm:$0xff]  }
 0x152   :  { %1478 = vmatprep.mubr.bf16.mxu0 %v1198_v6  ;;  %2011 = vmatpush1.bf16.msra.mxu0 %v16620_v50  ;;  %v17458_v50 = vld [vmem:[#allocation2 + $0x180] sm:$0xff]  ;;  %v16637_v6 = vld [vmem:[#allocation7 + $0x694] ss:$8 sps:$4 sm:$0xff]  }
 0x153   :  { %2012 = vmatprep.subr.bf16.mxu0 %v16625_v4  ;;  %v1199_v4 = vpack.c.bf16 %v17458_v50, %v17457_v32 }
 0x156   :  { %2013 = vmatpush1.bf16.msra.mxu0 %v16623_v12  ;;  %v16640_v12 = vld [vmem:[#allocation7 + $0x6a4] ss:$8 sps:$4 sm:$0xff]  }
 0x157   :  { %2014 = vmatprep.subr.bf16.mxu0 %v16628_v36  ;;  %v16638_v36 = vld [vmem:[#allocation7 + $0x6a0] ss:$8 sps:$4 sm:$0xff]  }
 0x159   :  { %1479 = vmatmul.mubr.bf16.gmra.mrb[12].mxu0 %v1197_v47  ;;  %v17461_v47 = vld [vmem:[#allocation2 + $0x1a0] sm:$0xff] }
 0x15a   :  { %1488 = vmatprep.mubr.bf16.mxu0 %v1200_v2  ;;  %2015 = vmatpush1.bf16.msra.mxu0 %v16626_v18  ;;  %v17462_v18 = vld [vmem:[#allocation2 + $0x1c0] sm:$0xff]  ;;  %v17463_v2 = vld [vmem:[#allocation2 + $0x1e8] sm:$0xff] }
 0x15b   :  { %2016 = vmatprep.subr.bf16.mxu0 %v16631_v48  ;;  %v1201_v48 = vpack.c.bf16 %v17462_v18, %v17461_v47  ;;  %v1204_v32 = vpack.c.bf16 %v17464_v37, %v17463_v2  ;;  %v18046_v37 = vld [vmem:[#allocation2 + $0x240] sm:$0xff]  ;;  %v16653_v2 = vld [vmem:[#allocation7 + $0x6f0] ss:$8 sps:$4 sm:$0xff]  }
 0x15c   :  { %v17467_v47 = vld [vmem:[#allocation2 + $0x220] sm:$0xff] }
 0x15d   :  { %v1205_v18 = vpack.c.bf16 %v18046_v37, %v17467_v47  ;;  %v1215_v47 = vpack.c.bf16 %v17990_v21, %v17977_v13  ;;  %v16656_v21 = vld [vmem:[#allocation7 + $0x100] ss:$8 sps:$4 sm:$0xff]  }
 0x15e   :  { %2017 = vmatpush1.bf16.msra.mxu0 %v16629_v53  ;;  %v16646_v53 = vld [vmem:[#allocation7 + $0x6c4] ss:$8 sps:$4 sm:$0xff]  }
 0x15f   :  { %2018 = vmatprep.subr.bf16.mxu0 %v16634_v61  ;;  %v16644_v61 = vld [vmem:[#allocation7 + $0x6c0] ss:$8 sps:$4 sm:$0xff]  }
 0x161   :  { %1489 = vmatmul.mubr.bf16.gmra.mrb[16].mxu0 %v1199_v4  ;;  %v16649_v4 = vld [vmem:[#allocation7 + $0x6d4] ss:$8 sps:$4 sm:$0xff]  }
 0x162   :  { %1498 = vmatprep.mubr.bf16.mxu0 %v1202_v38  ;;  %2019 = vmatpush1.bf16.msra.mxu0 %v16632_v3  ;;  %v17465_v3 = vld [vmem:[#allocation2 + $0x1e0] sm:$0xff] }
 0x163   :  { %2020 = vmatprep.subr.bf16.mxu0 %v16637_v6  ;;  %v1203_v50 = vpack.c.bf16 %v17925_v34, %v17465_v3  ;;  %v17466_v6 = vld [vmem:[#allocation2 + $0x228] sm:$0xff] }
 0x164   :  { %v1206_v38 = vpack.c.bf16 %v18042_v40, %v17466_v6  ;;  %v17468_v34 = vld [vmem:[#allocation2 + $0x2a8] sm:$0xff] }
 0x166   :  { %2021 = vmatpush1.bf16.msra.mxu0 %v16635_v49  ;;  %v16647_v49 = vld [vmem:[#allocation7 + $0x6d0] ss:$8 sps:$4 sm:$0xff]  }
 0x167   :  { %2022 = vmatprep.subr.bf16.mxu0 %v16640_v12  ;;  %v16652_v12 = vld [vmem:[#allocation7 + $0x6e4] ss:$8 sps:$4 sm:$0xff]  }
 0x169   :  { %1499 = vmatmul.mubr.bf16.gmra.mrb[20].mxu0 %v1201_v48  ;;  %v16655_v48 = vld [vmem:[#allocation7 + $0x6f4] ss:$8 sps:$4 sm:$0xff]  }
 0x16a   :  { %1508 = vmatprep.mubr.bf16.mxu0 %v1204_v32  ;;  %2023 = vmatpush1.bf16.msra.mxu0 %v16638_v36  ;;  %v16650_v36 = vld [vmem:[#allocation7 + $0x6e0] ss:$8 sps:$4 sm:$0xff]   ;;  %v16658_v32 = vld [vmem:[#allocation7 + $0x104] ss:$8 sps:$4 sm:$0xff]  }
 0x16b   :  { %2024 = vmatprep.subr.bf16.mxu0 %v16643_v1  ;;  %v1208_v1 = vpack.c.bf16 %v17934_v46, %v17468_v34  ;;  %v2397_v34 = vld [vmem:[#allocation2 + $0x50] sm:$0x1] }
 0x16e   :  { %2025 = vmatpush1.bf16.msra.mxu0 %v16641_v43  ;;  %v17469_v43 = vld [vmem:[#allocation2 + $0x2a0] sm:$0xff] }
 0x16f   :  { %2026 = vmatprep.subr.bf16.mxu0 %v16646_v53  ;;  %v1207_v53 = vpack.c.bf16 %v17940_v52, %v17469_v43  ;;  %v16665_v43 = vld [vmem:[#allocation7 + $0x130] ss:$8 sps:$4 sm:$0xff]  }
 0x171   :  { %1509 = vmatmul.mubr.bf16.gmra.mrb[24].mxu0 %v1203_v50  ;;  %v17471_v50 = vld [vmem:[#allocation2 + $0x2e0] sm:$0xff] }
 0x172   :  { %1518 = vmatprep.mubr.bf16.mxu0 %v1206_v38  ;;  %2027 = vmatpush1.bf16.msra.mxu0 %v16644_v61  ;;  %v17470_v61 = vld [vmem:[#allocation2 + $0x2e8] sm:$0xff]  ;;  %v1209_v46 = vpack.c.bf16 %v17951_v59, %v17471_v50 }
 0x173   :  { %2028 = vmatprep.subr.bf16.mxu0 %v16649_v4  ;;  %v1210_v3 = vpack.c.bf16 %v17942_v54, %v17470_v61  ;;  %v17472_v4 = vld [vmem:[#allocation2 + $0x328] sm:$0xff] }
 0x174   :  { %v1212_v6 = vpack.c.bf16 %v17954_v62, %v17472_v4  ;;  %v18054_v38 = vld [vmem:[#allocation2 + $0x388] sm:$0xff]  ;;  %v1216_v62 = vpack.c.bf16 %v17980_v14, %v17968_v10  ;;  %v1219_v10 = vpack.c.bf16 %v18026_v41, %v18009_v28  ;;  %v18078_v14 = vld [vmem:[#allocation2 + $0x4c0] sm:$0xff] }
 0x175   :  { %v16664_v28 = vld [vmem:[#allocation7 + $0x124] ss:$8 sps:$4 sm:$0xff]   ;;  %v16668_v50 = vld [vmem:[#allocation7 + $0x140] ss:$8 sps:$4 sm:$0xff]  }
 0x176   :  { %2029 = vmatpush1.bf16.msra.mxu0 %v16647_v49  ;;  %v17473_v49 = vld [vmem:[#allocation2 + $0x320] sm:$0xff]  ;;  %v18095_v61 = vld [vmem:[#allocation2 + $0x8] sm:$0xff] }
 0x177   :  { %2030 = vmatprep.subr.bf16.mxu0 %v16652_v12  ;;  %v1211_v52 = vpack.c.bf16 %v17963_v8, %v17473_v49  ;;  %v17474_v12 = vld [vmem:[#allocation2 + $0x368] sm:$0xff]  ;;  %v1218_v8 = vpack.c.bf16 %v17994_v23, %v17982_v16  ;;  %v1221_v16 = vpack.c.bf16 %v18078_v14, %v18028_v42  ;;  %v2391_v23 = vld [vmem:[#allocation2 + $0x20] sm:$0xfe]  ;;  %v1801_v4 = vpack.c.bf16 %v18095_v61, %v18039_v35  ;;  %v16679_v49 = vld [vmem:[#allocation7 + $0x174] ss:$8 sps:$4 sm:$0xff]  }
 0x178   :  { %v1214_v54 = vpack.c.bf16 %v18054_v38, %v17474_v12  ;;  %v2395_v41 = vld [vmem:[#allocation2 + $0x40] sm:$0xfe]  ;;  %v16685_v12 = vld [vmem:[#allocation7 + $0x194] ss:$8 sps:$4 sm:$0xff]   ;;  %v16683_v35 = vld [vmem:[#allocation7 + $0x190] ss:$8 sps:$4 sm:$0xff]  }
 0x179   :  { %1519 = vmatmul.mubr.bf16.gmra.mrb[28].mxu0 %v1205_v18  ;;  %v1217_v18 = vpack.c.bf16 %v18007_v27, %v17992_v22  ;;  %v16661_v22 = vld [vmem:[#allocation7 + $0x114] ss:$8 sps:$4 sm:$0xff]   ;;  %v16659_v27 = vld [vmem:[#allocation7 + $0x110] ss:$8 sps:$4 sm:$0xff]   ;;  %v2688_v42 = vrot.slane %v2395_v41, 1 }
 0x17a   :  { %1528 = vmatprep.mubr.bf16.mxu0 %v1208_v1  ;;  %2031 = vmatpush1.bf16.msra.mxu0 %v16650_v36  ;;  %v18058_v36 = vld [vmem:[#allocation2 + $0x380] sm:$0xff]  ;;  %v2689_v1 = vrot.slane %v2397_v34, 1 }
 0x17b   :  { %2032 = vmatprep.subr.bf16.mxu0 %v16655_v48  ;;  %v1213_v59 = vpack.c.bf16 %v18058_v36, %v17966_v9  ;;  %v1220_v48 = vpack.c.bf16 %v18012_v29, %v17996_v25  ;;  %v18072_v9 = vld [vmem:[#allocation2 + $0x4c8] sm:$0xff]  ;;  %v2393_v25 = vld [vmem:[#allocation2 + $0x30] sm:$0x1]  ;;  %v2682_v29 = vrot.slane %v2391_v23, 1  ;;  %v2387_v23 = vld [vmem:[#allocation2] sm:$0xfe] }
 0x17c   :  { %v1222_v13 = vpack.c.bf16 %v18072_v9, %v18014_v31  ;;  %v2683_v31 = vrot.slane %v2393_v25, 1  ;;  %v2389_v25 = vld [vmem:[#allocation2 + $0x10] sm:$0x1]  ;;  %v2676_v34 = vrot.slane %v2387_v23, 1 }
 0x17e   :  { %2033 = vmatpush1.bf16.msra.mxu0 %v16653_v2  ;;  %v16667_v2 = vld [vmem:[#allocation7 + $0x134] ss:$8 sps:$4 sm:$0xff]  }
 0x17f   :  { %3157 = vmatprep.subr.bf16.mxu0 %v16658_v32  ;;  %v18089_v32 = vsel %vm2675_vm0, %v2688_v42, %v2689_v1  ;;  %v2677_v42 = vrot.slane %v2389_v25, 1  ;;  %v2413_v25 = vld [vmem:[#allocation2 + $0xd0] sm:$0x1] }
 0x181   :  { %1529 = vmatmul.mubr.bf16.gmra.mrb[32].mxu0 %v1207_v53  ;;  %v16670_v53 = vld [vmem:[#allocation7 + $0x144] ss:$8 sps:$4 sm:$0xff]  }
 0x182   :  { %1538 = vmatprep.mubr.bf16.mxu0 %v1210_v3  ;;  %v1802_v3 = vpack.c.bf16 %v18095_v61, %v18036_v55  ;;  %v16677_v55 = vld [vmem:[#allocation7 + $0x170] ss:$8 sps:$4 sm:$0xff]  }
 0x189   :  { %1539 = vmatmul.mubr.bf16.gmra.mrb[36].mxu0 %v1209_v46  ;;  %v16673_v46 = vld [vmem:[#allocation7 + $0x154] ss:$8 sps:$4 sm:$0xff]  }
 0x18a   :  { %1548 = vmatprep.mubr.bf16.mxu0 %v1212_v6  ;;  %v16674_v6 = vld [vmem:[#allocation7 + $0x160] ss:$8 sps:$4 sm:$0xff]  }
 0x191   :  { %1549 = vmatmul.mubr.bf16.gmra.mrb[40].mxu0 %v1211_v52  ;;  %v16682_v52 = vld [vmem:[#allocation7 + $0x184] ss:$8 sps:$4 sm:$0xff]  }
 0x192   :  { %1558 = vmatprep.mubr.bf16.mxu0 %v1214_v54  ;;  %v16688_v54 = vld [vmem:[#allocation7 + $0x1a4] ss:$8 sps:$4 sm:$0xff]  }
 0x199   :  { %1559 = vmatmul.mubr.bf16.gmra.mrb[44].mxu0 %v1213_v59  ;;  %v16686_v59 = vld [vmem:[#allocation7 + $0x1a0] ss:$8 sps:$4 sm:$0xff]  }
 0x19a   :  { %1568 = vmatprep.mubr.bf16.mxu0 %v1216_v62  ;;  %v16689_v62 = vld [vmem:[#allocation7 + $0x1b0] ss:$8 sps:$4 sm:$0xff]  }
 0x1a1   :  { %1569 = vmatmul.mubr.bf16.gmra.mrb[48].mxu0 %v1215_v47  ;;  %v16694_v47 = vld [vmem:[#allocation7 + $0x1c4] ss:$8 sps:$4 sm:$0xff]  }
 0x1a2   :  { %1578 = vmatprep.mubr.bf16.mxu0 %v1218_v8  ;;  %v16697_v8 = vld [vmem:[#allocation7 + $0x1d4] ss:$8 sps:$4 sm:$0xff]  }
 0x1a9   :  { %1579 = vmatmul.mubr.bf16.gmra.mrb[52].mxu0 %v1217_v18  ;;  %v16695_v18 = vld [vmem:[#allocation7 + $0x1d0] ss:$8 sps:$4 sm:$0xff]  }
 0x1aa   :  { %1588 = vmatprep.mubr.bf16.mxu0 %v1220_v48  ;;  %v16698_v48 = vld [vmem:[#allocation7 + $0x1e0] ss:$8 sps:$4 sm:$0xff]  }
 0x1b1   :  { %1589 = vmatmul.mubr.bf16.gmra.mrb[56].mxu0 %v1219_v10  ;;  %v16703_v10 = vld [vmem:[#allocation7 + $0x1f4] ss:$8 sps:$4 sm:$0xff]  }
 0x1b2   :  { %1598 = vmatprep.mubr.bf16.mxu0 %v1222_v13  ;;  %v16706_v13 = vld [vmem:[#allocation7 + $0x404] ss:$8 sps:$4 sm:$0xff]  }
 0x1b9   :  { %1599 = vmatmul.mubr.bf16.gmra.mrb[60].mxu0 %v1221_v16 }
 0x1ba   :  { %2034 = vmatprep.mubr.bf16.mxu0 %v17890_v63  ;;  %v16662_v63 = vld [vmem:[#allocation7 + $0x120] ss:$8 sps:$4 sm:$0xff]  }
 0x1c1   :  { %2035 = vmatmul.mubr.bf16.vlgmr.msra.gmra.mrb[0].mxu0 %v17893_v19  ;;  %v18086_v19 = vsel %vm2675_vm0, %v2682_v29, %v2683_v31  ;;  %v2400_v29 = vld [vmem:[#allocation2 + $0x68] sm:$0xfe]  ;;  %v2402_v31 = vld [vmem:[#allocation2 + $0x78] sm:$0x1] }
 0x1c2   :  { %3158 = vmatpush1.bf16.msra.mxu0 %v16656_v21  ;;  %2044 = vmatprep.mubr.bf16.mxu0 %v17895_v24  ;;  %v2475_v24 = vld [vmem:[#allocation2 + $0x2c0] sm:$0xfe] }
 0x1c3   :  { %3159 = vmatprep.subr.bf16.mxu0 %v16661_v22 }
 0x1c6   :  { %3160 = vmatpush1.bf16.msra.mxu0 %v16659_v27  ;;  %v2396_v27 = vld [vmem:[#allocation2 + $0x48] sm:$0xfe] }
 0x1c7   :  { %3161 = vmatprep.subr.bf16.mxu0 %v16664_v28  ;;  %v2398_v28 = vld [vmem:[#allocation2 + $0x58] sm:$0x1]  ;;  %v2691_v1 = vrot.slane %v2396_v27, 1  ;;  %v2415_v27 = vld [vmem:[#allocation2 + $0xe0] sm:$0xfe] }
 0x1c9   :  { %2045 = vmatmul.mubr.bf16.gmra.mrb[4].mxu0 %v17899_v44  ;;  %v16671_v44 = vld [vmem:[#allocation7 + $0x150] ss:$8 sps:$4 sm:$0xff]  }
 0x1ca   :  { %2054 = vmatprep.mubr.bf16.mxu0 %v17901_v45  ;;  %3162 = vmatpush1.bf16.msra.mxu0 %v16662_v63  ;;  %v16676_v45 = vld [vmem:[#allocation7 + $0x164] ss:$8 sps:$4 sm:$0xff]   ;;  %v2692_v63 = vrot.slane %v2398_v28, 1  ;;  %v16713_v28 = vld [vmem:[#allocation7 + $0x430] ss:$8 sps:$4 sm:$0xff]  }
 0x1cb   :  { %3163 = vmatprep.subr.bf16.mxu0 %v16667_v2  ;;  %v2697_v2 = vrot.slane %v2400_v29, 1 }
 0x1ce   :  { %3164 = vmatpush1.bf16.msra.mxu0 %v16665_v43  ;;  %v2698_v43 = vrot.slane %v2402_v31, 1 }
 0x1cf   :  { %3165 = vmatprep.subr.bf16.mxu0 %v16670_v53  ;;  %v2678_v53 = vsel %vm2675_vm0, %v2676_v34, %v2677_v42  ;;  %v16718_v34 = vld [vmem:[#allocation7 + $0x444] ss:$8 sps:$4 sm:$0xff]   ;;  %v2430_v42 = vld [vmem:[#allocation2 + $0x158] sm:$0x1] }
 0x1d1   :  { %2055 = vmatmul.mubr.bf16.gmra.mrb[8].mxu0 %v17905_v58  ;;  %v16680_v58 = vld [vmem:[#allocation7 + $0x180] ss:$8 sps:$4 sm:$0xff]  }
 0x1d2   :  { %2064 = vmatprep.mubr.bf16.mxu0 %v1802_v3  ;;  %3166 = vmatpush1.bf16.msra.mxu0 %v16668_v50  ;;  %v18139_v3 = vsel %vm2675_vm0, %v2691_v1, %v2692_v63  ;;  %v18142_v50 = vsel %vm2675_vm0, %v2697_v2, %v2698_v43  ;;  %v2432_v1 = vld [vmem:[#allocation2 + $0x168] sm:$0xfe]  ;;  %v2434_v63 = vld [vmem:[#allocation2 + $0x178] sm:$0x1] }
 0x1d3   :  { %3167 = vmatprep.subr.bf16.mxu0 %v16673_v46  ;;  %v2399_v46 = vld [vmem:[#allocation2 + $0x60] sm:$0xfe] }
 0x1d6   :  { %3168 = vmatpush1.bf16.msra.mxu0 %v16671_v44  ;;  %v2406_v44 = vld [vmem:[#allocation2 + $0x98] sm:$0x1] }
 0x1d7   :  { %3169 = vmatprep.subr.bf16.mxu0 %v16676_v45  ;;  %v2408_v45 = vld [vmem:[#allocation2 + $0xa8] sm:$0xfe] }
 0x1d9   :  { %2065 = vmatmul.mubr.bf16.gmra.mrb[12].mxu0 %v1801_v4  ;;  %v2410_v4 = vld [vmem:[#allocation2 + $0xb8] sm:$0x1] }
 0x1da   :  { %2074 = vmatprep.mubr.bf16.mxu0 %v17912_v7  ;;  %3170 = vmatpush1.bf16.msra.mxu0 %v16674_v6  ;;  %v16691_v7 = vld [vmem:[#allocation7 + $0x1b4] ss:$8 sps:$4 sm:$0xff]   ;;  %v2932_v6 = vpack.c.bf16 %v18086_v19, %v2678_v53 }
 0x1db   :  { %3171 = vmatprep.subr.bf16.mxu0 %v16679_v49  ;;  %v16704_v49 = vld [vmem:[#allocation7 + $0x400] ss:$8 sps:$4 sm:$0xff]  }
 0x1de   :  { %3172 = vmatpush1.bf16.msra.mxu0 %v16677_v55  ;;  %v18147_v55 = vpack.c.bf16 %v18142_v50, %v18139_v3 }
 0x1df   :  { %3173 = vmatprep.subr.bf16.mxu0 %v16682_v52  ;;  %v2694_v52 = vrot.slane %v2399_v46, 1  ;;  %v2713_v46 = vrot.slane %v2413_v25, 1 }
 0x1e1   :  { %2075 = vmatmul.mubr.bf16.gmra.mrb[16].mxu0 %v17915_v15  ;;  %v1804_v15 = vpack.c.bf16 %v18095_v61, %v18042_v40  ;;  %v16701_v40 = vld [vmem:[#allocation7 + $0x1f0] ss:$8 sps:$4 sm:$0xff]  }
 0x1e2   :  { %2084 = vmatprep.mubr.bf16.mxu0 %v17917_v17  ;;  %3174 = vmatpush1.bf16.msra.mxu0 %v16680_v58  ;;  %v16692_v17 = vld [vmem:[#allocation7 + $0x1c0] ss:$8 sps:$4 sm:$0xff]  }
 0x1e3   :  { %3175 = vmatprep.subr.bf16.mxu0 %v16685_v12  ;;  %v16709_v12 = vld [vmem:[#allocation7 + $0x414] ss:$8 sps:$4 sm:$0xff]  }
 0x1e6   :  { %3176 = vmatpush1.bf16.msra.mxu0 %v16683_v35 }
 0x1e7   :  { %3177 = vmatprep.subr.bf16.mxu0 %v16688_v54  ;;  %v2704_v54 = vrot.slane %v2406_v44, 1  ;;  %v16716_v44 = vld [vmem:[#allocation7 + $0x440] ss:$8 sps:$4 sm:$0xff]  }
 0x1e9   :  { %2085 = vmatmul.mubr.bf16.gmra.mrb[20].mxu0 %v17921_v30  ;;  %v16700_v30 = vld [vmem:[#allocation7 + $0x1e4] ss:$8 sps:$4 sm:$0xff]  }
 0x1ea   :  { %2094 = vmatprep.mubr.bf16.mxu0 %v17923_v33  ;;  %3178 = vmatpush1.bf16.msra.mxu0 %v16686_v59  ;;  %v1803_v33 = vpack.c.bf16 %v18095_v61, %v18046_v37  ;;  %v2392_v37 = vld [vmem:[#allocation2 + $0x28] sm:$0xfe]  ;;  %v2709_v59 = vrot.slane %v2408_v45, 1 }
 0x1eb   :  { %3179 = vmatprep.subr.bf16.mxu0 %v16691_v7  ;;  %v2685_v21 = vrot.slane %v2392_v37, 1  ;;  %v2710_v7 = vrot.slane %v2410_v4, 1  ;;  %v2728_v4 = vrot.slane %v2430_v42, 1 }
 0x1ee   :  { %3180 = vmatpush1.bf16.msra.mxu0 %v16689_v62  ;;  %v16707_v62 = vld [vmem:[#allocation7 + $0x410] ss:$8 sps:$4 sm:$0xff]  }
 0x1ef   :  { %3181 = vmatprep.subr.bf16.mxu0 %v16694_v47 }
 0x1f1   :  { %2095 = vmatmul.mubr.bf16.gmra.mrb[24].mxu0 %v17930_v39  ;;  %v1806_v39 = vpack.c.bf16 %v18095_v61, %v18054_v38  ;;  %v2394_v38 = vld [vmem:[#allocation2 + $0x38] sm:$0x1] }
 0x1f2   :  { %2104 = vmatprep.mubr.bf16.mxu0 %v1804_v15  ;;  %3182 = vmatpush1.bf16.msra.mxu0 %v16692_v17  ;;  %v2686_v22 = vrot.slane %v2394_v38, 1  ;;  %v2403_v15 = vld [vmem:[#allocation2 + $0x80] sm:$0xfe]  ;;  %v2405_v17 = vld [vmem:[#allocation2 + $0x90] sm:$0x1] }
 0x1f3   :  { %3183 = vmatprep.subr.bf16.mxu0 %v16697_v8  ;;  %v2407_v8 = vld [vmem:[#allocation2 + $0xa0] sm:$0xfe] }
 0x1f4   :  { %v16710_v38 = vld [vmem:[#allocation7 + $0x420] ss:$8 sps:$4 sm:$0xff]  }
 0x1f6   :  { %3184 = vmatpush1.bf16.msra.mxu0 %v16695_v18 }
 0x1f7   :  { %3185 = vmatprep.subr.bf16.mxu0 %v16700_v30  ;;  %v18157_v30 = vsel %vm2675_vm0, %v2709_v59, %v2710_v7  ;;  %v2431_v59 = vld [vmem:[#allocation2 + $0x160] sm:$0xfe]  ;;  %v16719_v7 = vld [vmem:[#allocation7 + $0x450] ss:$8 sps:$4 sm:$0xff]  }
 0x1f9   :  { %2105 = vmatmul.mubr.bf16.gmra.mrb[28].mxu0 %v1803_v33  ;;  %v2409_v33 = vld [vmem:[#allocation2 + $0xb0] sm:$0x1] }
 0x1fa   :  { %2114 = vmatprep.mubr.bf16.mxu0 %v17938_v51  ;;  %3186 = vmatpush1.bf16.msra.mxu0 %v16698_v48  ;;  %v1805_v51 = vpack.c.bf16 %v18095_v61, %v18058_v36  ;;  %v16712_v48 = vld [vmem:[#allocation7 + $0x424] ss:$8 sps:$4 sm:$0xff]   ;;  %v2707_v37 = vrot.slane %v2409_v33, 1 }
 0x1fb   :  { %3187 = vmatprep.subr.bf16.mxu0 %v16703_v10  ;;  %v2412_v10 = vld [vmem:[#allocation2 + $0xc8] sm:$0xfe] }
 0x1fc   :  { %v16724_v33 = vld [vmem:[#allocation7 + $0x464] ss:$8 sps:$4 sm:$0xff]  }
 0x1fe   :  { %3188 = vmatpush1.bf16.msra.mxu0 %v16701_v40  ;;  %v2414_v40 = vld [vmem:[#allocation2 + $0xd8] sm:$0x1] }
 0x1ff   :  { %3815 = vmatprep.subr.bf16.mxu0 %v16706_v13  ;;  %v2416_v13 = vld [vmem:[#allocation2 + $0xe8] sm:$0xfe] }
 0x201   :  { %2115 = vmatmul.mubr.bf16.gmra.mrb[32].mxu0 %v17946_v56  ;;  %v21315_v56 = vld [vmem:[#allocation18_spill] sm:$0xff] }
 0x202   :  { %2124 = vmatprep.mubr.bf16.mxu0 %v17949_v57  ;;  %v21316_v57 = vld [vmem:[#allocation19_spill] sm:$0xff]  ;;  %21318 = vst [vmem:[#allocation18_spill] sm:$0xff] %v18147_v55 }
 0x209   :  { %2125 = vmatmul.mubr.bf16.gmra.mrb[36].mxu0 %v17958_v5  ;;  %v2388_v5 = vld [vmem:[#allocation2 + $0x8] sm:$0xfe] }
 0x20a   :  { %2134 = vmatprep.mubr.bf16.mxu0 %v17961_v0  ;;  %v2390_v0 = vld [vmem:[#allocation2 + $0x18] sm:$0x1]  ;;  %v2679_v16 = vrot.slane %v2388_v5, 1  ;;  %v2701_v5 = vrot.slane %v2405_v17, 1  ;;  %v2433_v17 = vld [vmem:[#allocation2 + $0x170] sm:$0x1] }
 0x20b   :  { %v2680_v36 = vrot.slane %v2390_v0, 1  ;;  %v2706_v0 = vrot.slane %v2407_v8, 1  ;;  %v2436_v8 = vld [vmem:[#allocation2 + $0x188] sm:$0xfe] }
 0x20d   :  { %v18173_v23 = vsel %vm2675_vm0, %v2706_v0, %v2707_v37  ;;  %v2730_v0 = vrot.slane %v2431_v59, 1  ;;  %v2731_v37 = vrot.slane %v2433_v17, 1  ;;  %v16733_v17 = vld [vmem:[#allocation7 + $0x494] ss:$8 sps:$4 sm:$0xff]  }
 0x211   :  { %2135 = vmatmul.mubr.bf16.gmra.mrb[40].mxu0 %v17973_v11  ;;  %v1808_v11 = vpack.c.bf16 %v18095_v61, %v18072_v9  ;;  %v1807_v9 = vpack.c.bf16 %v18095_v61, %v18078_v14  ;;  %v2401_v14 = vld [vmem:[#allocation2 + $0x70] sm:$0x1]  ;;  %v2404_v61 = vld [vmem:[#allocation2 + $0x88] sm:$0xfe] }
 0x212   :  { %2144 = vmatprep.mubr.bf16.mxu0 %v1806_v39  ;;  %v2695_v58 = vrot.slane %v2401_v14, 1  ;;  %v2703_v35 = vrot.slane %v2404_v61, 1  ;;  %v2418_v39 = vld [vmem:[#allocation2 + $0xf8] sm:$0x1]  ;;  %v2718_v14 = vrot.slane %v2415_v27, 1  ;;  %v18209_v27 = vsel %vm2675_vm0, %v2730_v0, %v2731_v37 }
 0x213   :  { %v2449_v0 = vld [vmem:[#allocation2 + $0x1f0] sm:$0x1]  ;;  %v2452_v37 = vld [vmem:[#allocation2 + $0x208] sm:$0xfe] }
 0x214   :  { %v18151_v47 = vsel %vm2675_vm0, %v2694_v52, %v2695_v58  ;;  %v18154_v18 = vsel %vm2675_vm0, %v2703_v35, %v2704_v54  ;;  %v16721_v52 = vld [vmem:[#allocation7 + $0x454] ss:$8 sps:$4 sm:$0xff]   ;;  %v2427_v58 = vld [vmem:[#allocation2 + $0x140] sm:$0xfe]  ;;  %v2429_v54 = vld [vmem:[#allocation2 + $0x150] sm:$0x1] }
 0x219   :  { %2145 = vmatmul.mubr.bf16.gmra.mrb[44].mxu0 %v1805_v51  ;;  %v18161_v51 = vpack.c.bf16 %v18151_v47, %v18089_v32 }
 0x21a   :  { %2154 = vmatprep.mubr.bf16.mxu0 %v17988_v20  ;;  %v21317_v20 = vld [vmem:[#allocation20_spill] sm:$0xff] }
 0x21b   :  { %21319 = vst [vmem:[#allocation19_spill] sm:$0xff] %v18161_v51 }
 0x221   :  { %2155 = vmatmul.mubr.bf16.gmra.mrb[48].mxu0 %v18001_v26  ;;  %v2681_v26 = vsel %vm2675_vm0, %v2679_v16, %v2680_v36  ;;  %v2716_v16 = vrot.slane %v2414_v40, 1  ;;  %v2721_v36 = vrot.slane %v2416_v13, 1  ;;  %v2442_v40 = vld [vmem:[#allocation2 + $0x1b8] sm:$0x1] }
 0x222   :  { %2164 = vmatprep.mubr.bf16.mxu0 %v18005_v60  ;;  %v18132_v60 = vsel %vm2675_vm0, %v2685_v21, %v2686_v22  ;;  %v2722_v21 = vrot.slane %v2418_v39, 1  ;;  %v16715_v22 = vld [vmem:[#allocation7 + $0x434] ss:$8 sps:$4 sm:$0xff]   ;;  %v2724_v39 = vrot.slane %v2427_v58, 1  ;;  %v16728_v58 = vld [vmem:[#allocation7 + $0x480] ss:$8 sps:$4 sm:$0xff]  }
 0x223   :  { %v2933_v41 = vpack.c.bf16 %v18132_v60, %v2681_v26 }
 0x224   :  { %v18179_v31 = vsel %vm2675_vm0, %v2721_v36, %v2722_v21  ;;  %v2746_v21 = vrot.slane %v2442_v40, 1  ;;  %v2447_v40 = vld [vmem:[#allocation2 + $0x1e0] sm:$0xfe] }
 0x229   :  { %2165 = vmatmul.mubr.bf16.gmra.mrb[52].mxu0 %v21315_v56  ;;  %v2700_v56 = vrot.slane %v2403_v15, 1 }
 0x22a   :  { %2174 = vmatprep.mubr.bf16.mxu0 %v21316_v57  ;;  %v18165_v57 = vpack.c.bf16 %v18157_v30, %v18154_v18 }
 0x22b   :  { %v18170_v26 = vsel %vm2675_vm0, %v2700_v56, %v2701_v5  ;;  %v2725_v5 = vrot.slane %v2429_v54, 1 }
 0x22c   :  { %21320 = vst [vmem:[#allocation20_spill] sm:$0xff] %v18165_v57  ;;  %v18183_v2 = vpack.c.bf16 %v18173_v23, %v18170_v26 }
 0x22d   :  { %v2726_v25 = vsel %vm2675_vm0, %v2724_v39, %v2725_v5  ;;  %v16731_v39 = vld [vmem:[#allocation7 + $0x490] ss:$8 sps:$4 sm:$0xff]  }
 0x22e   :  { %21321 = vst [vmem:[#allocation21_spill] sm:$0xff] %v18183_v2 }
 0x231   :  { %2175 = vmatmul.mubr.bf16.gmra.mrb[56].mxu0 %v21317_v20  ;;  %v2411_v20 = vld [vmem:[#allocation2 + $0xc0] sm:$0xfe] }
 0x232   :  { %2184 = vmatprep.mubr.bf16.mxu0 %v1808_v11  ;;  %v2715_v11 = vrot.slane %v2412_v10, 1  ;;  %v2712_v43 = vrot.slane %v2411_v20, 1  ;;  %v2440_v10 = vld [vmem:[#allocation2 + $0x1a8] sm:$0xfe]  ;;  %v2435_v20 = vld [vmem:[#allocation2 + $0x180] sm:$0xfe] }
 0x233   :  { %v2745_v36 = vrot.slane %v2440_v10, 1  ;;  %v2445_v10 = vld [vmem:[#allocation2 + $0x1d0] sm:$0x1] }
 0x234   :  { %v18176_v29 = vsel %vm2675_vm0, %v2715_v11, %v2716_v16  ;;  %v2739_v11 = vrot.slane %v2436_v8, 1  ;;  %v2443_v8 = vld [vmem:[#allocation2 + $0x1c0] sm:$0xfe] }
 0x235   :  { %v18187_v53 = vpack.c.bf16 %v18179_v31, %v18176_v29  ;;  %v18215_v42 = vsel %vm2675_vm0, %v2745_v36, %v2746_v21  ;;  %v2458_v36 = vld [vmem:[#allocation2 + $0x238] sm:$0x1] }
 0x237   :  { %21322 = vst [vmem:[#allocation22_spill] sm:$0xff] %v18187_v53 }
 0x239   :  { %2185 = vmatmul.mubr.bf16.gmra.mrb[60].mxu0 %v1807_v9  ;;  %v2417_v9 = vld [vmem:[#allocation2 + $0xf0] sm:$0x1] }
 0x23a   :  { %3189 = vmatprep.mubr.bf16.mxu0 %v2933_v41  ;;  %v2428_v41 = vld [vmem:[#allocation2 + $0x148] sm:$0xfe]  ;;  %v2719_v61 = vrot.slane %v2417_v9, 1  ;;  %v2439_v9 = vld [vmem:[#allocation2 + $0x1a0] sm:$0xfe] }
 0x23b   :  { %v2727_v45 = vrot.slane %v2428_v41, 1  ;;  %v16725_v41 = vld [vmem:[#allocation7 + $0x470] ss:$8 sps:$4 sm:$0xff]  }
 0x23c   :  { %v18195_v35 = vsel %vm2675_vm0, %v2718_v14, %v2719_v61  ;;  %v2448_v14 = vld [vmem:[#allocation2 + $0x1e8] sm:$0xfe]  ;;  %v2450_v61 = vld [vmem:[#allocation2 + $0x1f8] sm:$0x1] }
 0x241   :  { %3190 = vmatmul.mubr.bf16.vlgmr.msra.gmra.mrb[0].mxu0 %v2932_v6  ;;  %v2733_v6 = vrot.slane %v2432_v1, 1  ;;  %v2441_v1 = vld [vmem:[#allocation2 + $0x1b0] sm:$0x1] }
 0x242   :  { %3816 = vmatpush1.bf16.msra.mxu0 %v16704_v49  ;;  %3199 = vmatprep.mubr.bf16.mxu0 %v18147_v55  ;;  %v2734_v49 = vrot.slane %v2434_v63, 1  ;;  %v2444_v63 = vld [vmem:[#allocation2 + $0x1c8] sm:$0xfe] }
 0x243   :  { %3817 = vmatprep.subr.bf16.mxu0 %v16709_v12  ;;  %v18192_v12 = vsel %vm2675_vm0, %v2712_v43, %v2713_v46  ;;  %v16730_v43 = vld [vmem:[#allocation7 + $0x484] ss:$8 sps:$4 sm:$0xff]   ;;  %v2446_v46 = vld [vmem:[#allocation2 + $0x1d8] sm:$0x1]  ;;  %v2751_v54 = vrot.slane %v2444_v63, 1 }
 0x244   :  { %v18199_v15 = vsel %vm2675_vm0, %v2733_v6, %v2734_v49  ;;  %v18203_v13 = vpack.c.bf16 %v18195_v35, %v18192_v12  ;;  %v2742_v49 = vrot.slane %v2439_v9, 1  ;;  %v2752_v59 = vrot.slane %v2446_v46, 1 }
 0x245   :  { %v2755_v9 = vrot.slane %v2449_v0, 1  ;;  %v2770_v46 = vrot.slane %v2458_v36, 1 }
 0x246   :  { %3818 = vmatpush1.bf16.msra.mxu0 %v16707_v62  ;;  %v2729_v62 = vsel %vm2675_vm0, %v2727_v45, %v2728_v4  ;;  %21323 = vst [vmem:[#allocation23_spill] sm:$0xff] %v18203_v13  ;;  %v2736_v45 = vrot.slane %v2435_v20, 1 }
 0x247   :  { %3819 = vmatprep.subr.bf16.mxu0 %v16712_v48  ;;  %v2438_v48 = vld [vmem:[#allocation2 + $0x198] sm:$0x1]  ;;  %v2941_v56 = vpack.c.bf16 %v18199_v15, %v2729_v62  ;;  %v2758_v62 = vrot.slane %v2450_v61, 1  ;;  %v2451_v61 = vld [vmem:[#allocation2 + $0x200] sm:$0xfe] }
 0x248   :  { %v2740_v16 = vrot.slane %v2438_v48, 1 }
 0x249   :  { %3200 = vmatmul.mubr.bf16.gmra.mrb[4].mxu0 %v18161_v51 }
 0x24a   :  { %3209 = vmatprep.mubr.bf16.mxu0 %v18165_v57  ;;  %3820 = vmatpush1.bf16.msra.mxu0 %v16710_v38  ;;  %v16722_v38 = vld [vmem:[#allocation7 + $0x460] ss:$8 sps:$4 sm:$0xff]  }
 0x24b   :  { %3821 = vmatprep.subr.bf16.mxu0 %v16715_v22  ;;  %v16727_v22 = vld [vmem:[#allocation7 + $0x474] ss:$8 sps:$4 sm:$0xff]  }
 0x24e   :  { %3822 = vmatpush1.bf16.msra.mxu0 %v16713_v28  ;;  %v2437_v28 = vld [vmem:[#allocation2 + $0x190] sm:$0x1] }
 0x24f   :  { %3823 = vmatprep.subr.bf16.mxu0 %v16718_v34  ;;  %v18212_v34 = vsel %vm2675_vm0, %v2739_v11, %v2740_v16  ;;  %v2737_v6 = vrot.slane %v2437_v28, 1  ;;  %v2454_v11 = vld [vmem:[#allocation2 + $0x218] sm:$0x1]  ;;  %v2456_v16 = vld [vmem:[#allocation2 + $0x228] sm:$0xfe]  ;;  %v2754_v28 = vrot.slane %v2447_v40, 1 }
 0x250   :  { %v18220_v4 = vpack.c.bf16 %v18215_v42, %v18212_v34  ;;  %v2764_v63 = vrot.slane %v2454_v11, 1 }
 0x251   :  { %3210 = vmatmul.mubr.bf16.gmra.mrb[8].mxu0 %v18183_v2  ;;  %v2509_v2 = vld [vmem:[#allocation2 + $0x3d0] sm:$0x1] }
 0x252   :  { %3219 = vmatprep.mubr.bf16.mxu0 %v18187_v53  ;;  %3824 = vmatpush1.bf16.msra.mxu0 %v16716_v44  ;;  %v2940_v44 = vpack.c.bf16 %v18209_v27, %v2726_v25  ;;  %21324 = vst [vmem:[#allocation24_spill] sm:$0xff] %v18220_v4  ;;  %v2749_v25 = vrot.slane %v2445_v10, 1  ;;  %v2474_v10 = vld [vmem:[#allocation2 + $0x2b8] sm:$0x1]  ;;  %v2507_v53 = vld [vmem:[#allocation2 + $0x3c0] sm:$0xfe] }
 0x253   :  { %3825 = vmatprep.subr.bf16.mxu0 %v16721_v52  ;;  %v2743_v52 = vrot.slane %v2441_v1, 1  ;;  %v2763_v1 = vrot.slane %v2452_v37, 1 }
 0x255   :  { %v18227_v48 = vsel %vm2675_vm0, %v2742_v49, %v2743_v52  ;;  %v2455_v49 = vld [vmem:[#allocation2 + $0x220] sm:$0xfe]  ;;  %v16737_v52 = vld [vmem:[#allocation7 + $0x4b0] ss:$8 sps:$4 sm:$0xff]  }
 0x256   :  { %3826 = vmatpush1.bf16.msra.mxu0 %v16719_v7  ;;  %v2757_v7 = vrot.slane %v2448_v14, 1  ;;  %v16739_v14 = vld [vmem:[#allocation7 + $0x4b4] ss:$8 sps:$4 sm:$0xff]  }
 0x257   :  { %3827 = vmatprep.subr.bf16.mxu0 %v16724_v33  ;;  %v18224_v33 = vsel %vm2675_vm0, %v2736_v45, %v2737_v6  ;;  %v18249_v45 = vsel %vm2675_vm0, %v2754_v28, %v2755_v9  ;;  %v2453_v6 = vld [vmem:[#allocation2 + $0x210] sm:$0x1]  ;;  %v2782_v28 = vrot.slane %v2474_v10, 1  ;;  %v16745_v9 = vld [vmem:[#allocation7 + $0x4d4] ss:$8 sps:$4 sm:$0xff]  }
 0x258   :  { %v18233_v5 = vsel %vm2675_vm0, %v2757_v7, %v2758_v62  ;;  %v18237_v21 = vpack.c.bf16 %v18227_v48, %v18224_v33  ;;  %v2468_v7 = vld [vmem:[#allocation2 + $0x288] sm:$0xfe]  ;;  %v2761_v37 = vrot.slane %v2453_v6, 1 }
 0x259   :  { %3220 = vmatmul.mubr.bf16.gmra.mrb[12].mxu0 %v18203_v13  ;;  %v16742_v62 = vld [vmem:[#allocation7 + $0x4c4] ss:$8 sps:$4 sm:$0xff]   ;;  %v2775_v36 = vrot.slane %v2468_v7, 1  ;;  %v2478_v7 = vld [vmem:[#allocation2 + $0x2d8] sm:$0x1] }
 0x25a   :  { %3229 = vmatprep.mubr.bf16.mxu0 %v2941_v56  ;;  %3828 = vmatpush1.bf16.msra.mxu0 %v16722_v38  ;;  %v18230_v56 = vsel %vm2675_vm0, %v2751_v54, %v2752_v59  ;;  %v16736_v38 = vld [vmem:[#allocation7 + $0x4a4] ss:$8 sps:$4 sm:$0xff]   ;;  %21325 = vst [vmem:[#allocation25_spill] sm:$0xff] %v18237_v21  ;;  %v2457_v59 = vld [vmem:[#allocation2 + $0x230] sm:$0x1] }
 0x25b   :  { %3829 = vmatprep.subr.bf16.mxu0 %v16727_v22  ;;  %v2748_v22 = vrot.slane %v2443_v8, 1  ;;  %v18241_v20 = vpack.c.bf16 %v18233_v5, %v18230_v56  ;;  %v2472_v8 = vld [vmem:[#allocation2 + $0x2a8] sm:$0xfe]  ;;  %v2767_v11 = vrot.slane %v2457_v59, 1 }
 0x25c   :  { %v16748_v59 = vld [vmem:[#allocation7 + $0x4e4] ss:$8 sps:$4 sm:$0xff]  }
 0x25d   :  { %21326 = vst [vmem:[#allocation26_spill] sm:$0xff] %v18241_v20 }
 0x25e   :  { %3830 = vmatpush1.bf16.msra.mxu0 %v16725_v41  ;;  %v16734_v41 = vld [vmem:[#allocation7 + $0x4a0] ss:$8 sps:$4 sm:$0xff]  }
 0x25f   :  { %3831 = vmatprep.subr.bf16.mxu0 %v16730_v43  ;;  %v2769_v43 = vrot.slane %v2456_v16, 1  ;;  %v16740_v16 = vld [vmem:[#allocation7 + $0x4c0] ss:$8 sps:$4 sm:$0xff]  }
 0x261   :  { %3230 = vmatmul.mubr.bf16.gmra.mrb[16].mxu0 %v2940_v44  ;;  %v18246_v44 = vsel %vm2675_vm0, %v2748_v22, %v2749_v25  ;;  %v18255_v54 = vsel %vm2675_vm0, %v2769_v43, %v2770_v46  ;;  %v2781_v25 = vrot.slane %v2472_v8, 1  ;;  %v2469_v43 = vld [vmem:[#allocation2 + $0x290] sm:$0x1]  ;;  %v2471_v46 = vld [vmem:[#allocation2 + $0x2a0] sm:$0xfe] }
 0x262   :  { %3239 = vmatprep.mubr.bf16.mxu0 %v18220_v4  ;;  %3832 = vmatpush1.bf16.msra.mxu0 %v16728_v58  ;;  %v18252_v58 = vsel %vm2675_vm0, %v2763_v1, %v2764_v63  ;;  %v18259_v40 = vpack.c.bf16 %v18249_v45, %v18246_v44 }
 0x263   :  { %3833 = vmatprep.subr.bf16.mxu0 %v16733_v17  ;;  %v2470_v17 = vld [vmem:[#allocation2 + $0x298] sm:$0x1]  ;;  %v18263_v0 = vpack.c.bf16 %v18255_v54, %v18252_v58  ;;  %v18275_v6 = vsel %vm2675_vm0, %v2781_v25, %v2782_v28 }
 0x264   :  { %21327 = vst [vmem:[#allocation27_spill] sm:$0xff] %v18259_v40  ;;  %v2776_v22 = vrot.slane %v2470_v17, 1  ;;  %v2482_v17 = vld [vmem:[#allocation2 + $0x2f8] sm:$0x1] }
 0x265   :  { %21328 = vst [vmem:[#allocation28_spill] sm:$0xff] %v18263_v0  ;;  %v2794_v28 = vrot.slane %v2482_v17, 1  ;;  %v2488_v17 = vld [vmem:[#allocation2 + $0x328] sm:$0xfe] }
 0x266   :  { %3834 = vmatpush1.bf16.msra.mxu0 %v16731_v39  ;;  %v2760_v39 = vrot.slane %v2451_v61, 1  ;;  %v2777_v61 = vsel %vm2675_vm0, %v2775_v36, %v2776_v22  ;;  %v2788_v22 = vrot.slane %v2478_v7, 1  ;;  %v16754_v7 = vld [vmem:[#allocation7 + $0x704] ss:$8 sps:$4 sm:$0xff]  }
 0x267   :  { %3835 = vmatprep.subr.bf16.mxu0 %v16736_v38  ;;  %v2766_v38 = vrot.slane %v2455_v49, 1  ;;  %v2473_v49 = vld [vmem:[#allocation2 + $0x2b0] sm:$0x1] }
 0x268   :  { %v18268_v1 = vsel %vm2675_vm0, %v2760_v39, %v2761_v37  ;;  %v2949_v39 = vpack.c.bf16 %v18275_v6, %v2777_v61  ;;  %v2773_v37 = vrot.slane %v2469_v43, 1  ;;  %v2477_v43 = vld [vmem:[#allocation2 + $0x2d0] sm:$0x1] }
 0x269   :  { %3240 = vmatmul.mubr.bf16.gmra.mrb[20].mxu0 %v18237_v21  ;;  %v18271_v63 = vsel %vm2675_vm0, %v2766_v38, %v2767_v11  ;;  %v2778_v38 = vrot.slane %v2471_v46, 1  ;;  %v2779_v11 = vrot.slane %v2473_v49, 1  ;;  %v2479_v46 = vld [vmem:[#allocation2 + $0x2e0] sm:$0xfe]  ;;  %v2493_v21 = vld [vmem:[#allocation2 + $0x350] sm:$0x1] }
 0x26a   :  { %3249 = vmatprep.mubr.bf16.mxu0 %v18241_v20  ;;  %3836 = vmatpush1.bf16.msra.mxu0 %v16734_v41  ;;  %v2467_v41 = vld [vmem:[#allocation2 + $0x280] sm:$0xfe]  ;;  %v18279_v8 = vpack.c.bf16 %v18271_v63, %v18268_v1 }
 0x26b   :  { %3837 = vmatprep.subr.bf16.mxu0 %v16739_v14  ;;  %v16743_v14 = vld [vmem:[#allocation7 + $0x4d0] ss:$8 sps:$4 sm:$0xff]   ;;  %v2772_v10 = vrot.slane %v2467_v41, 1  ;;  %v18285_v41 = vsel %vm2675_vm0, %v2778_v38, %v2779_v11  ;;  %v2785_v11 = vrot.slane %v2477_v43, 1  ;;  %v2491_v20 = vld [vmem:[#allocation2 + $0x340] sm:$0xfe] }
 0x26c   :  { %21329 = vst [vmem:[#allocation29_spill] sm:$0xff] %v18279_v8 }
 0x26e   :  { %3838 = vmatpush1.bf16.msra.mxu0 %v16737_v52  ;;  %v2476_v52 = vld [vmem:[#allocation2 + $0x2c8] sm:$0xfe] }
 0x26f   :  { %3839 = vmatprep.subr.bf16.mxu0 %v16742_v62  ;;  %v2480_v62 = vld [vmem:[#allocation2 + $0x2e8] sm:$0xfe]  ;;  %v2787_v36 = vrot.slane %v2476_v52, 1  ;;  %v2481_v52 = vld [vmem:[#allocation2 + $0x2f0] sm:$0x1] }
 0x270   :  { %v2793_v25 = vrot.slane %v2480_v62, 1  ;;  %v2486_v62 = vld [vmem:[#allocation2 + $0x318] sm:$0x1] }
 0x271   :  { %3250 = vmatmul.mubr.bf16.gmra.mrb[24].mxu0 %v18259_v40  ;;  %v18288_v61 = vsel %vm2675_vm0, %v2787_v36, %v2788_v22  ;;  %v2791_v36 = vrot.slane %v2481_v52, 1  ;;  %v2485_v40 = vld [vmem:[#allocation2 + $0x310] sm:$0x1] }
 0x272   :  { %3259 = vmatprep.mubr.bf16.mxu0 %v18263_v0  ;;  %3840 = vmatpush1.bf16.msra.mxu0 %v16740_v16  ;;  %v16746_v16 = vld [vmem:[#allocation7 + $0x4e0] ss:$8 sps:$4 sm:$0xff]   ;;  %v2774_v0 = vsel %vm2675_vm0, %v2772_v10, %v2773_v37  ;;  %v18291_v49 = vsel %vm2675_vm0, %v2793_v25, %v2794_v28  ;;  %v2490_v10 = vld [vmem:[#allocation2 + $0x338] sm:$0x1]  ;;  %v2784_v37 = vrot.slane %v2475_v24, 1  ;;  %v2800_v25 = vrot.slane %v2486_v62, 1 }
 0x273   :  { %3841 = vmatprep.subr.bf16.mxu0 %v16745_v9  ;;  %v16751_v9 = vld [vmem:[#allocation7 + $0x4f4] ss:$8 sps:$4 sm:$0xff]   ;;  %v18296_v38 = vpack.c.bf16 %v18291_v49, %v18288_v61  ;;  %v2805_v28 = vrot.slane %v2488_v17, 1  ;;  %v2489_v52 = vld [vmem:[#allocation2 + $0x330] sm:$0x1] }
 0x274   :  { %v2496_v62 = vld [vmem:[#allocation2 + $0x368] sm:$0xfe]  ;;  %v2498_v17 = vld [vmem:[#allocation2 + $0x378] sm:$0x1] }
 0x275   :  { %21330 = vst [vmem:[#allocation30_spill] sm:$0xff] %v18296_v38 }
 0x276   :  { %3842 = vmatpush1.bf16.msra.mxu0 %v16743_v14  ;;  %v16749_v14 = vld [vmem:[#allocation7 + $0x4f0] ss:$8 sps:$4 sm:$0xff]  }
 0x277   :  { %3843 = vmatprep.subr.bf16.mxu0 %v16748_v59  ;;  %v2484_v59 = vld [vmem:[#allocation2 + $0x308] sm:$0xfe] }
 0x278   :  { %v2799_v22 = vrot.slane %v2484_v59, 1  ;;  %v2492_v59 = vld [vmem:[#allocation2 + $0x348] sm:$0xfe] }
 0x279   :  { %3260 = vmatmul.mubr.bf16.gmra.mrb[28].mxu0 %v18279_v8  ;;  %v2806_v8 = vrot.slane %v2490_v10, 1 }
 0x27a   :  { %3269 = vmatprep.mubr.bf16.mxu0 %v2949_v39  ;;  %3844 = vmatpush1.bf16.msra.mxu0 %v16746_v16  ;;  %v2948_v39 = vpack.c.bf16 %v18285_v41, %v2774_v0  ;;  %v2790_v16 = vrot.slane %v2479_v46, 1  ;;  %v2483_v0 = vld [vmem:[#allocation2 + $0x300] sm:$0xfe]  ;;  %v18306_v43 = vsel %vm2675_vm0, %v2799_v22, %v2800_v25  ;;  %v2817_v25 = vrot.slane %v2496_v62, 1  ;;  %v2510_v62 = vld [vmem:[#allocation2 + $0x3d8] sm:$0x1] }
 0x27b   :  { %3845 = vmatprep.subr.bf16.mxu0 %v16751_v9  ;;  %v18300_v9 = vsel %vm2675_vm0, %v2784_v37, %v2785_v11  ;;  %v18309_v46 = vsel %vm2675_vm0, %v2805_v28, %v2806_v8  ;;  %v2797_v11 = vrot.slane %v2485_v40, 1  ;;  %v2811_v8 = vrot.slane %v2492_v59, 1  ;;  %v2497_v59 = vld [vmem:[#allocation2 + $0x370] sm:$0x1] }
 0x27c   :  { %v18303_v24 = vsel %vm2675_vm0, %v2790_v16, %v2791_v36  ;;  %v18317_v37 = vpack.c.bf16 %v18309_v46, %v18306_v43  ;;  %v2803_v36 = vrot.slane %v2489_v52, 1  ;;  %v2818_v28 = vrot.slane %v2498_v17, 1  ;;  %v2495_v52 = vld [vmem:[#allocation2 + $0x360] sm:$0xfe]  ;;  %v2512_v17 = vld [vmem:[#allocation2 + $0x3e8] sm:$0xfe] }
 0x27d   :  { %v18313_v10 = vpack.c.bf16 %v18303_v24, %v18300_v9 }
 0x27e   :  { %3846 = vmatpush1.bf16.msra.mxu0 %v16749_v14  ;;  %v2487_v14 = vld [vmem:[#allocation2 + $0x320] sm:$0xfe]  ;;  %21332 = vst [vmem:[#allocation32_spill] sm:$0xff] %v18317_v37 }
 0x27f   :  { %4449 = vmatprep.subr.bf16.mxu0 %v16754_v7  ;;  %v2494_v7 = vld [vmem:[#allocation2 + $0x358] sm:$0x1]  ;;  %21331 = vst [vmem:[#allocation31_spill] sm:$0xff] %v18313_v10  ;;  %v2802_v16 = vrot.slane %v2487_v14, 1  ;;  %v18331_v14 = vsel %vm2675_vm0, %v2817_v25, %v2818_v28  ;;  %v2824_v28 = vrot.slane %v2510_v62, 1 }
 0x280   :  { %v2812_v22 = vrot.slane %v2494_v7, 1  ;;  %21333 = vst [vmem:[#allocation33_spill] sm:$0xff] %v18331_v14  ;;  %v2508_v7 = vld [vmem:[#allocation2 + $0x3c8] sm:$0xfe]  ;;  %v2518_v62 = vld [vmem:[#allocation2 + $0x418] sm:$0x1] }
 0x281   :  { %3270 = vmatmul.mubr.bf16.gmra.mrb[32].mxu0 %v2948_v39  ;;  %v2796_v39 = vrot.slane %v2483_v0, 1  ;;  %v18325_v0 = vsel %vm2675_vm0, %v2802_v16, %v2803_v36  ;;  %v2809_v36 = vrot.slane %v2493_v21, 1  ;;  %v2823_v25 = vrot.slane %v2508_v7, 1  ;;  %v2513_v7 = vld [vmem:[#allocation2 + $0x3f0] sm:$0x1] }
 0x282   :  { %3279 = vmatprep.mubr.bf16.mxu0 %v18296_v38  ;;  %v18328_v40 = vsel %vm2675_vm0, %v2811_v8, %v2812_v22  ;;  %v2814_v8 = vrot.slane %v2495_v52, 1  ;;  %v2815_v22 = vrot.slane %v2497_v59, 1  ;;  %v2511_v59 = vld [vmem:[#allocation2 + $0x3e0] sm:$0xfe]  ;;  %v2827_v57 = vrot.slane %v2513_v7, 1 }
 0x283   :  { %v18322_v38 = vsel %vm2675_vm0, %v2796_v39, %v2797_v11  ;;  %v2808_v11 = vrot.slane %v2491_v20, 1  ;;  %v18339_v16 = vpack.c.bf16 %v18331_v14, %v18328_v40  ;;  %v2825_v21 = vsel %vm2675_vm0, %v2823_v25, %v2824_v28  ;;  %v2517_v14 = vld [vmem:[#allocation2 + $0x410] sm:$0x1]  ;;  %v2524_v7 = vld [vmem:[#allocation2 + $0x448] sm:$0xfe] }
 0x284   :  { %v18335_v39 = vpack.c.bf16 %v18325_v0, %v18322_v38  ;;  %v18347_v20 = vsel %vm2675_vm0, %v2814_v8, %v2815_v22  ;;  %v2821_v22 = vrot.slane %v2509_v2, 1  ;;  %v2836_v28 = vrot.slane %v2518_v62, 1  ;;  %v2530_v62 = vld [vmem:[#allocation2 + $0x478] sm:$0x1] }
 0x285   :  { %21335 = vst [vmem:[#allocation35_spill] sm:$0xff] %v18339_v16  ;;  %v18344_v13 = vsel %vm2675_vm0, %v2808_v11, %v2809_v36  ;;  %21336 = vst [vmem:[#allocation36_spill] sm:$0xff] %v18347_v20  ;;  %v2820_v36 = vrot.slane %v2507_v53, 1 }
 0x286   :  { %21334 = vst [vmem:[#allocation34_spill] sm:$0xff] %v18335_v39  ;;  %v18355_v11 = vpack.c.bf16 %v18347_v20, %v18344_v13  ;;  %v2515_v20 = vld [vmem:[#allocation2 + $0x400] sm:$0xfe] }
 0x287   :  { %v2822_v51 = vsel %vm2675_vm0, %v2820_v36, %v2821_v22  ;;  %v2832_v36 = vrot.slane %v2515_v20, 1  ;;  %v2523_v20 = vld [vmem:[#allocation2 + $0x440] sm:$0xfe] }
 0x288   :  { %21337 = vst [vmem:[#allocation37_spill] sm:$0xff] %v18355_v11 }
 0x289   :  { %3280 = vmatmul.mubr.bf16.gmra.mrb[36].mxu0 %v18313_v10  ;;  %v2829_v10 = vrot.slane %v2512_v17, 1  ;;  %v2520_v17 = vld [vmem:[#allocation2 + $0x428] sm:$0xfe] }
 0x28a   :  { %3289 = vmatprep.mubr.bf16.mxu0 %v18317_v37  ;;  %v2514_v37 = vld [vmem:[#allocation2 + $0x3f8] sm:$0x1] }
 0x28b   :  { %v2830_v4 = vrot.slane %v2514_v37, 1  ;;  %v2516_v37 = vld [vmem:[#allocation2 + $0x408] sm:$0xfe] }
 0x28c   :  { %v2835_v25 = vrot.slane %v2516_v37, 1  ;;  %v2528_v37 = vld [vmem:[#allocation2 + $0x468] sm:$0xfe] }
 0x28d   :  { %v18351_v52 = vsel %vm2675_vm0, %v2829_v10, %v2830_v4  ;;  %v2841_v4 = vrot.slane %v2520_v17, 1 }
 0x28e   :  { %v2957_v8 = vpack.c.bf16 %v18351_v52, %v2825_v21  ;;  %v18364_v53 = vsel %vm2675_vm0, %v2835_v25, %v2836_v28  ;;  %v2519_v21 = vld [vmem:[#allocation2 + $0x420] sm:$0xfe]  ;;  %v2847_v25 = vrot.slane %v2524_v7, 1  ;;  %v2532_v7 = vld [vmem:[#allocation2 + $0x488] sm:$0xfe] }
 0x28f   :  { %21339 = vst [vmem:[#allocation39_spill] sm:$0xff] %v18364_v53 }
 0x291   :  { %3290 = vmatmul.mubr.bf16.gmra.mrb[40].mxu0 %v18335_v39  ;;  %v2522_v39 = vld [vmem:[#allocation2 + $0x438] sm:$0x1] }
 0x292   :  { %3299 = vmatprep.mubr.bf16.mxu0 %v18339_v16  ;;  %v2826_v16 = vrot.slane %v2511_v59, 1  ;;  %v2842_v10 = vrot.slane %v2522_v39, 1  ;;  %v2521_v59 = vld [vmem:[#allocation2 + $0x430] sm:$0x1]  ;;  %v2526_v39 = vld [vmem:[#allocation2 + $0x458] sm:$0x1] }
 0x293   :  { %v2839_v22 = vrot.slane %v2521_v59, 1  ;;  %v2848_v28 = vrot.slane %v2526_v39, 1  ;;  %v2529_v59 = vld [vmem:[#allocation2 + $0x470] sm:$0x1]  ;;  %v2534_v39 = vld [vmem:[#allocation2 + $0x498] sm:$0x1] }
 0x294   :  { %v18361_v55 = vsel %vm2675_vm0, %v2826_v16, %v2827_v57  ;;  %v18367_v2 = vsel %vm2675_vm0, %v2841_v4, %v2842_v10  ;;  %v2833_v16 = vrot.slane %v2517_v14, 1  ;;  %v2853_v4 = vrot.slane %v2528_v37, 1  ;;  %v2536_v37 = vld [vmem:[#allocation2 + $0x4a8] sm:$0xfe] }
 0x295   :  { %21338 = vst [vmem:[#allocation38_spill] sm:$0xff] %v18361_v55  ;;  %21340 = vst [vmem:[#allocation40_spill] sm:$0xff] %v18367_v2  ;;  %v2956_v17 = vpack.c.bf16 %v18361_v55, %v2822_v51  ;;  %v18372_v57 = vpack.c.bf16 %v18367_v2, %v18364_v53  ;;  %v2854_v10 = vrot.slane %v2530_v62, 1  ;;  %v2525_v55 = vld [vmem:[#allocation2 + $0x450] sm:$0x1]  ;;  %v18382_v2 = vsel %vm2675_vm0, %v2847_v25, %v2848_v28 }
 0x296   :  { %v2538_v62 = vld [vmem:[#allocation2 + $0x4b8] sm:$0x1]  ;;  %v2851_v25 = vrot.slane %v2529_v59, 1  ;;  %v2859_v28 = vrot.slane %v2532_v7, 1  ;;  %v2535_v59 = vld [vmem:[#allocation2 + $0x4a0] sm:$0xfe] }
 0x297   :  { %21341 = vst [vmem:[#allocation41_spill] sm:$0xff] %v18372_v57  ;;  %v18385_v14 = vsel %vm2675_vm0, %v2853_v4, %v2854_v10  ;;  %v2860_v4 = vrot.slane %v2534_v39, 1  ;;  %v2865_v10 = vrot.slane %v2536_v37, 1  ;;  %v2537_v7 = vld [vmem:[#allocation2 + $0x4b0] sm:$0x1] }
 0x298   :  { %21343 = vst [vmem:[#allocation43_spill] sm:$0xff] %v18385_v14 }
 0x299   :  { %3300 = vmatmul.mubr.bf16.gmra.mrb[44].mxu0 %v18355_v11  ;;  %v18376_v11 = vsel %vm2675_vm0, %v2832_v36, %v2833_v16  ;;  %v2844_v36 = vrot.slane %v2523_v20, 1  ;;  %v18393_v16 = vpack.c.bf16 %v18385_v14, %v18382_v2  ;;  %v18404_v14 = vsel %vm2675_vm0, %v2859_v28, %v2860_v4  ;;  %v16752_v4 = vld [vmem:[#allocation7 + $0x700] ss:$8 sps:$4 sm:$0xff]  }
 0x29a   :  { %3309 = vmatprep.mubr.bf16.mxu0 %v2957_v8  ;;  %v2838_v8 = vrot.slane %v2519_v21, 1  ;;  %v2527_v21 = vld [vmem:[#allocation2 + $0x460] sm:$0xfe]  ;;  %v3591_v28 = vpack.c.bf16 %v18139_v3, %v18132_v60  ;;  %v3592_v60 = vpack.c.bf16 %v18170_v26, %v18151_v47  ;;  %v3595_v3 = vpack.c.bf16 %v18176_v29, %v18157_v30 }
 0x29b   :  { %v16766_v47 = vld [vmem:[#allocation7 + $0x744] ss:$8 sps:$4 sm:$0xff]   ;;  %v3594_v26 = vpack.c.bf16 %v18192_v12, %v18173_v23  ;;  %v16770_v12 = vld [vmem:[#allocation7 + $0x760] ss:$8 sps:$4 sm:$0xff]  }
 0x29c   :  { %v18379_v51 = vsel %vm2675_vm0, %v2838_v8, %v2839_v22  ;;  %v2845_v8 = vrot.slane %v2525_v55, 1  ;;  %v2850_v22 = vrot.slane %v2527_v21, 1  ;;  %v2533_v21 = vld [vmem:[#allocation2 + $0x490] sm:$0x1] }
 0x29d   :  { %21342 = vst [vmem:[#allocation42_spill] sm:$0xff] %v18379_v51 }
 0x29e   :  { %v18398_v53 = vsel %vm2675_vm0, %v2844_v36, %v2845_v8  ;;  %v18401_v20 = vsel %vm2675_vm0, %v2850_v22, %v2851_v25  ;;  %v2857_v36 = vrot.slane %v2533_v21, 1  ;;  %v2862_v8 = vrot.slane %v2535_v59, 1  ;;  %v16757_v21 = vld [vmem:[#allocation7 + $0x714] ss:$8 sps:$4 sm:$0xff]  }
 0x29f   :  { %v18411_v39 = vpack.c.bf16 %v18401_v20, %v18398_v53  ;;  %v2863_v22 = vrot.slane %v2537_v7, 1  ;;  %v21344_v59 = vpack.c.bf16 %v18089_v32, %v18086_v19  ;;  %v16755_v7 = vld [vmem:[#allocation7 + $0x710] ss:$8 sps:$4 sm:$0xff]   ;;  %v16763_v19 = vld [vmem:[#allocation7 + $0x734] ss:$8 sps:$4 sm:$0xff]  }
 0x2a0   :  { %v16761_v32 = vld [vmem:[#allocation7 + $0x730] ss:$8 sps:$4 sm:$0xff]  }
 0x2a1   :  { %3310 = vmatmul.mubr.bf16.gmra.mrb[48].mxu0 %v2956_v17  ;;  %v18389_v17 = vpack.c.bf16 %v18379_v51, %v18376_v11  ;;  %v2531_v51 = vld [vmem:[#allocation2 + $0x480] sm:$0xfe]  ;;  %v18423_v25 = vsel %vm2675_vm0, %v2862_v8, %v2863_v22  ;;  %v2422_v8 = vld [vmem:[#allocation2 + $0x118] sm:$0x1] }
 0x2a2   :  { %3319 = vmatprep.mubr.bf16.mxu0 %v18372_v57  ;;  %v2866_v57 = vrot.slane %v2538_v62, 1  ;;  %v2856_v37 = vrot.slane %v2531_v51, 1  ;;  %v3562_v22 = vrot.slane %v2422_v8, 1  ;;  %v16772_v8 = vld [vmem:[#allocation7 + $0x764] ss:$8 sps:$4 sm:$0xff]  }
 0x2a4   :  { %v18407_v55 = vsel %vm2675_vm0, %v2865_v10, %v2866_v57  ;;  %v18420_v57 = vsel %vm2675_vm0, %v2856_v37, %v2857_v36  ;;  %v3593_v10 = vpack.c.bf16 %v18154_v18, %v18142_v50  ;;  %v16760_v37 = vld [vmem:[#allocation7 + $0x724] ss:$8 sps:$4 sm:$0xff]   ;;  %v16758_v50 = vld [vmem:[#allocation7 + $0x720] ss:$8 sps:$4 sm:$0xff]  }
 0x2a5   :  { %v18415_v62 = vpack.c.bf16 %v18407_v55, %v18404_v14  ;;  %v18427_v51 = vpack.c.bf16 %v18423_v25, %v18420_v57  ;;  %v2420_v36 = vld [vmem:[#allocation2 + $0x108] sm:$0xfe] }
 0x2a6   :  { %v3561_v18 = vrot.slane %v2420_v36, 1  ;;  %v16767_v36 = vld [vmem:[#allocation7 + $0x750] ss:$8 sps:$4 sm:$0xff]  }
 0x2a9   :  { %3320 = vmatmul.mubr.bf16.gmra.mrb[52].mxu0 %v18389_v17 }
 0x2aa   :  { %3329 = vmatprep.mubr.bf16.mxu0 %v18393_v16 }
 0x2b1   :  { %3330 = vmatmul.mubr.bf16.gmra.mrb[56].mxu0 %v18411_v39 }
 0x2b2   :  { %3339 = vmatprep.mubr.bf16.mxu0 %v18415_v62 }
 0x2b9   :  { %3340 = vmatmul.mubr.bf16.gmra.mrb[60].mxu0 %v18427_v51 }
 0x2ba   :  { %3847 = vmatprep.mubr.bf16.mxu0 %v3591_v28  ;;  %v18442_v28 = vsel %vm2675_vm0, %v3561_v18, %v3562_v22  ;;  %v3598_v18 = vpack.c.bf16 %v18224_v33, %v18209_v27  ;;  %v3601_v22 = vpack.c.bf16 %v18230_v56, %v18215_v42  ;;  %v3603_v27 = vpack.c.bf16 %v18252_v58, %v18233_v5  ;;  %v16782_v42 = vld [vmem:[#allocation7 + $0x7a0] ss:$8 sps:$4 sm:$0xff]  }
 0x2bb   :  { %v3597_v30 = vpack.c.bf16 %v18442_v28, %v18179_v31  ;;  %v3599_v31 = vpack.c.bf16 %v18212_v34, %v18199_v15  ;;  %v16781_v15 = vld [vmem:[#allocation7 + $0x794] ss:$8 sps:$4 sm:$0xff]   ;;  %v16779_v34 = vld [vmem:[#allocation7 + $0x790] ss:$8 sps:$4 sm:$0xff]   ;;  %v3602_v5 = vpack.c.bf16 %v18268_v1, %v18249_v45  ;;  %v16794_v1 = vld [vmem:[#allocation7 + $0x7e0] ss:$8 sps:$4 sm:$0xff]  }
 0x2c1   :  { %3848 = vmatmul.mubr.bf16.vlgmr.msra.gmra.mrb[0].mxu0 %v21344_v59  ;;  %v16764_v59 = vld [vmem:[#allocation7 + $0x740] ss:$8 sps:$4 sm:$0xff]  }
 0x2c2   :  { %4450 = vmatpush1.bf16.msra.mxu0 %v16752_v4  ;;  %3857 = vmatprep.mubr.bf16.mxu0 %v3593_v10  ;;  %v2419_v4 = vld [vmem:[#allocation2 + $0x100] sm:$0xfe]  ;;  %v2421_v10 = vld [vmem:[#allocation2 + $0x110] sm:$0x1] }
 0x2c3   :  { %4451 = vmatprep.subr.bf16.mxu0 %v16757_v21  ;;  %v3558_v29 = vrot.slane %v2419_v4, 1  ;;  %v3559_v21 = vrot.slane %v2421_v10, 1  ;;  %v2462_v4 = vld [vmem:[#allocation2 + $0x258] sm:$0x1]  ;;  %v3600_v10 = vpack.c.bf16 %v18246_v44, %v18227_v48  ;;  %v16790_v48 = vld [vmem:[#allocation7 + $0x7c4] ss:$8 sps:$4 sm:$0xff]  }
 0x2c4   :  { %v3568_v56 = vrot.slane %v2462_v4, 1  ;;  %v21347_v4 = vld [vmem:[#allocation39_spill] sm:$0xff] }
 0x2c6   :  { %4452 = vmatpush1.bf16.msra.mxu0 %v16755_v7  ;;  %v16769_v7 = vld [vmem:[#allocation7 + $0x754] ss:$8 sps:$4 sm:$0xff]  }
 0x2c7   :  { %4453 = vmatprep.subr.bf16.mxu0 %v16760_v37  ;;  %v18449_v37 = vsel %vm2675_vm0, %v3558_v29, %v3559_v21  ;;  %v2459_v29 = vld [vmem:[#allocation2 + $0x240] sm:$0xfe]  ;;  %v2461_v21 = vld [vmem:[#allocation2 + $0x250] sm:$0x1] }
 0x2c8   :  { %v3596_v23 = vpack.c.bf16 %v18449_v37, %v18195_v35  ;;  %v16776_v35 = vld [vmem:[#allocation7 + $0x780] ss:$8 sps:$4 sm:$0xff]   ;;  %v3564_v58 = vrot.slane %v2459_v29, 1  ;;  %v21351_v29 = vld [vmem:[#allocation43_spill] sm:$0xff] }
 0x2c9   :  { %3858 = vmatmul.mubr.bf16.gmra.mrb[4].mxu0 %v3592_v60  ;;  %v16775_v60 = vld [vmem:[#allocation7 + $0x774] ss:$8 sps:$4 sm:$0xff]  }
 0x2ca   :  { %3867 = vmatprep.mubr.bf16.mxu0 %v3595_v3  ;;  %4454 = vmatpush1.bf16.msra.mxu0 %v16758_v50  ;;  %v16773_v3 = vld [vmem:[#allocation7 + $0x770] ss:$8 sps:$4 sm:$0xff]   ;;  %v16778_v50 = vld [vmem:[#allocation7 + $0x784] ss:$8 sps:$4 sm:$0xff]  }
 0x2cb   :  { %4455 = vmatprep.subr.bf16.mxu0 %v16763_v19  ;;  %v16784_v19 = vld [vmem:[#allocation7 + $0x7a4] ss:$8 sps:$4 sm:$0xff]  }
 0x2ce   :  { %4456 = vmatpush1.bf16.msra.mxu0 %v16761_v32  ;;  %v2460_v32 = vld [vmem:[#allocation2 + $0x248] sm:$0xfe] }
 0x2cf   :  { %4457 = vmatprep.subr.bf16.mxu0 %v16766_v47  ;;  %v3567_v33 = vrot.slane %v2460_v32, 1  ;;  %v16787_v47 = vld [vmem:[#allocation7 + $0x7b4] ss:$8 sps:$4 sm:$0xff]  }
 0x2d1   :  { %3868 = vmatmul.mubr.bf16.gmra.mrb[8].mxu0 %v3594_v26  ;;  %v16785_v26 = vld [vmem:[#allocation7 + $0x7b0] ss:$8 sps:$4 sm:$0xff]  }
 0x2d2   :  { %3877 = vmatprep.mubr.bf16.mxu0 %v3597_v30  ;;  %4458 = vmatpush1.bf16.msra.mxu0 %v16764_v59  ;;  %v18464_v30 = vsel %vm2675_vm0, %v3567_v33, %v3568_v56  ;;  %v3565_v59 = vrot.slane %v2461_v21, 1  ;;  %v2540_v33 = vld [vmem:[#allocation2 + $0x4c8] sm:$0xfe]  ;;  %v2542_v56 = vld [vmem:[#allocation2 + $0x4d8] sm:$0x1]  ;;  %v3619_v21 = vpack.c.bf16 %v18404_v14, %v21351_v29 }
 0x2d3   :  { %4459 = vmatprep.subr.bf16.mxu0 %v16769_v7  ;;  %v3605_v44 = vpack.c.bf16 %v18464_v30, %v18255_v54  ;;  %v16788_v7 = vld [vmem:[#allocation7 + $0x7c0] ss:$8 sps:$4 sm:$0xff]   ;;  %v3607_v54 = vpack.c.bf16 %v18288_v61, %v18275_v6  ;;  %v2502_v6 = vld [vmem:[#allocation2 + $0x398] sm:$0x1]  ;;  %v3608_v61 = vpack.c.bf16 %v18322_v38, %v18303_v24 }
 0x2d6   :  { %4460 = vmatpush1.bf16.msra.mxu0 %v16767_v36  ;;  %v16793_v36 = vld [vmem:[#allocation7 + $0x7d4] ss:$8 sps:$4 sm:$0xff]  }
 0x2d7   :  { %4461 = vmatprep.subr.bf16.mxu0 %v16772_v8  ;;  %v18471_v8 = vsel %vm2675_vm0, %v3564_v58, %v3565_v59 }
 0x2d8   :  { %v3604_v45 = vpack.c.bf16 %v18471_v8, %v18271_v63  ;;  %v2500_v63 = vld [vmem:[#allocation2 + $0x388] sm:$0xfe] }
 0x2d9   :  { %3878 = vmatmul.mubr.bf16.gmra.mrb[12].mxu0 %v3596_v23  ;;  %v16791_v23 = vld [vmem:[#allocation7 + $0x7d0] ss:$8 sps:$4 sm:$0xff]  }
 0x2da   :  { %3887 = vmatprep.mubr.bf16.mxu0 %v3599_v31  ;;  %4462 = vmatpush1.bf16.msra.mxu0 %v16770_v12  ;;  %v16796_v31 = vld [vmem:[#allocation7 + $0x7e4] ss:$8 sps:$4 sm:$0xff]   ;;  %v16799_v12 = vld [vmem:[#allocation7 + $0x7f4] ss:$8 sps:$4 sm:$0xff]  }
 0x2db   :  { %4463 = vmatprep.subr.bf16.mxu0 %v16775_v60  ;;  %v16797_v60 = vld [vmem:[#allocation7 + $0x7f0] ss:$8 sps:$4 sm:$0xff]  }
 0x2de   :  { %4464 = vmatpush1.bf16.msra.mxu0 %v16773_v3  ;;  %v16802_v3 = vld [vmem:[#allocation7 + $0x204] ss:$8 sps:$4 sm:$0xff]  }
 0x2df   :  { %4465 = vmatprep.subr.bf16.mxu0 %v16778_v50  ;;  %v3606_v50 = vpack.c.bf16 %v18300_v9, %v18285_v41  ;;  %v2501_v9 = vld [vmem:[#allocation2 + $0x390] sm:$0x1] }
 0x2e0   :  { %v3571_v38 = vrot.slane %v2501_v9, 1 }
 0x2e1   :  { %3888 = vmatmul.mubr.bf16.gmra.mrb[16].mxu0 %v3598_v18  ;;  %v3609_v18 = vpack.c.bf16 %v18306_v43, %v18291_v49  ;;  %v2499_v49 = vld [vmem:[#allocation2 + $0x380] sm:$0xfe]  ;;  %v3610_v43 = vpack.c.bf16 %v18344_v13, %v18325_v0  ;;  %v21349_v0 = vld [vmem:[#allocation40_spill] sm:$0xff] }
 0x2e2   :  { %3897 = vmatprep.mubr.bf16.mxu0 %v3601_v22  ;;  %4466 = vmatpush1.bf16.msra.mxu0 %v16776_v35  ;;  %v3611_v22 = vpack.c.bf16 %v18328_v40, %v18309_v46  ;;  %v3573_v35 = vrot.slane %v2500_v63, 1  ;;  %v3570_v32 = vrot.slane %v2499_v49, 1  ;;  %v21346_v46 = vld [vmem:[#allocation36_spill] sm:$0xff] }
 0x2e3   :  { %4467 = vmatprep.subr.bf16.mxu0 %v16781_v15  ;;  %v3574_v15 = vrot.slane %v2502_v6, 1 }
 0x2e4   :  { %v18493_v24 = vsel %vm2675_vm0, %v3570_v32, %v3571_v38  ;;  %v16809_v32 = vld [vmem:[#allocation7 + $0x230] ss:$8 sps:$4 sm:$0xff]  }
 0x2e5   :  { %v18486_v41 = vsel %vm2675_vm0, %v3573_v35, %v3574_v15  ;;  %v3612_v40 = vpack.c.bf16 %v18493_v24, %v21346_v46  ;;  %v16811_v15 = vld [vmem:[#allocation7 + $0x234] ss:$8 sps:$4 sm:$0xff]   ;;  %v2423_v46 = vld [vmem:[#allocation2 + $0x120] sm:$0xfe] }
 0x2e6   :  { %4468 = vmatpush1.bf16.msra.mxu0 %v16779_v34  ;;  %v21345_v34 = vld [vmem:[#allocation33_spill] sm:$0xff] }
 0x2e7   :  { %4469 = vmatprep.subr.bf16.mxu0 %v16784_v19  ;;  %v3613_v19 = vpack.c.bf16 %v18486_v41, %v21345_v34  ;;  %v4922_v34 = vld [vmem:[#allocation2 + $0x2c0] sm:$0xfc] }
 0x2e9   :  { %3898 = vmatmul.mubr.bf16.gmra.mrb[20].mxu0 %v3600_v10  ;;  %v3615_v10 = vpack.c.bf16 %v21347_v4, %v18351_v52  ;;  %v3580_v52 = vrot.slane %v2542_v56, 1  ;;  %v16814_v4 = vld [vmem:[#allocation7 + $0x244] ss:$8 sps:$4 sm:$0xff]  }
 0x2ea   :  { %3907 = vmatprep.mubr.bf16.mxu0 %v3603_v27  ;;  %4470 = vmatpush1.bf16.msra.mxu0 %v16782_v42  ;;  %v21348_v27 = vld [vmem:[#allocation38_spill] sm:$0xff]  ;;  %v3617_v42 = vpack.c.bf16 %v18382_v2, %v21349_v0  ;;  %v3618_v2 = vpack.c.bf16 %v18420_v57, %v18401_v20  ;;  %v4840_v57 = vld [vmem:[#allocation2 + $0x30] sm:$0x3] }
 0x2eb   :  { %4471 = vmatprep.subr.bf16.mxu0 %v16787_v47  ;;  %v3614_v13 = vpack.c.bf16 %v18376_v11, %v21348_v27  ;;  %v21350_v47 = vld [vmem:[#allocation42_spill] sm:$0xff]  ;;  %v4216_v27 = vrot.slane %v2423_v46, 1 }
 0x2ec   :  { %v2539_v11 = vld [vmem:[#allocation2 + $0x4c0] sm:$0xfe] }
 0x2ed   :  { %v3576_v59 = vrot.slane %v2539_v11, 1  ;;  %v4838_v20 = vld [vmem:[#allocation2 + $0x20] sm:$0xfc] }
 0x2ee   :  { %4472 = vmatpush1.bf16.msra.mxu0 %v16785_v26  ;;  %v3616_v26 = vpack.c.bf16 %v18398_v53, %v21350_v47  ;;  %v16812_v0 = vld [vmem:[#allocation7 + $0x240] ss:$8 sps:$4 sm:$0xff]   ;;  %v16815_v47 = vld [vmem:[#allocation7 + $0x250] ss:$8 sps:$4 sm:$0xff]   ;;  %v16826_v11 = vld [vmem:[#allocation7 + $0x284] ss:$8 sps:$4 sm:$0xff]  }
 0x2ef   :  { %4473 = vmatprep.subr.bf16.mxu0 %v16790_v48  ;;  %v3579_v48 = vrot.slane %v2540_v33, 1  ;;  %v21357_v33 = vld [vmem:[#allocation23_spill] sm:$0xff] }
 0x2f0   :  { %v16850_v46 = vld [vmem:[#allocation7 + $0x504] ss:$8 sps:$4 sm:$0xff]  }
 0x2f1   :  { %3908 = vmatmul.mubr.bf16.gmra.mrb[24].mxu0 %v3602_v5  ;;  %v18508_v5 = vsel %vm2675_vm0, %v3579_v48, %v3580_v52  ;;  %v21358_v48 = vld [vmem:[#allocation24_spill] sm:$0xff] }
 0x2f2   :  { %3917 = vmatprep.mubr.bf16.mxu0 %v3605_v44  ;;  %4474 = vmatpush1.bf16.msra.mxu0 %v16788_v7  ;;  %v2541_v44 = vld [vmem:[#allocation2 + $0x4d0] sm:$0x1]  ;;  %v3621_v58 = vpack.c.bf16 %v18508_v5, %v18407_v55  ;;  %v21354_v55 = vld [vmem:[#allocation20_spill] sm:$0xff] }
 0x2f3   :  { %4475 = vmatprep.subr.bf16.mxu0 %v16793_v36  ;;  %v3577_v53 = vrot.slane %v2541_v44, 1  ;;  %v21352_v36 = vld [vmem:[#allocation18_spill] sm:$0xff]  ;;  %v16821_v52 = vld [vmem:[#allocation7 + $0x270] ss:$8 sps:$4 sm:$0xff]  }
 0x2f4   :  { %v16824_v44 = vld [vmem:[#allocation7 + $0x280] ss:$8 sps:$4 sm:$0xff]  }
 0x2f5   :  { %v18515_v14 = vsel %vm2675_vm0, %v3576_v59, %v3577_v53  ;;  %v21360_v59 = vld [vmem:[#allocation26_spill] sm:$0xff] }
 0x2f6   :  { %4476 = vmatpush1.bf16.msra.mxu0 %v16791_v23  ;;  %v3620_v7 = vpack.c.bf16 %v18515_v14, %v18423_v25  ;;  %v16800_v23 = vld [vmem:[#allocation7 + $0x200] ss:$8 sps:$4 sm:$0xff]   ;;  %v16832_v53 = vld [vmem:[#allocation7 + $0x2a4] ss:$8 sps:$4 sm:$0xff]  }
 0x2f7   :  { %4477 = vmatprep.subr.bf16.mxu0 %v16796_v31  ;;  %v16805_v31 = vld [vmem:[#allocation7 + $0x214] ss:$8 sps:$4 sm:$0xff]   ;;  %v4842_v25 = vld [vmem:[#allocation2 + $0x40] sm:$0xfc] }
 0x2f8   :  { %v5135_v63 = vrot.slane %v4842_v25, 2 }
 0x2f9   :  { %3918 = vmatmul.mubr.bf16.gmra.mrb[28].mxu0 %v3604_v45  ;;  %v21353_v45 = vld [vmem:[#allocation19_spill] sm:$0xff] }
 0x2fa   :  { %3927 = vmatprep.mubr.bf16.mxu0 %v3607_v54  ;;  %4478 = vmatpush1.bf16.msra.mxu0 %v16794_v1  ;;  %v16803_v54 = vld [vmem:[#allocation7 + $0x210] ss:$8 sps:$4 sm:$0xff]   ;;  %v16808_v1 = vld [vmem:[#allocation7 + $0x224] ss:$8 sps:$4 sm:$0xff]  }
 0x2fb   :  { %4479 = vmatprep.subr.bf16.mxu0 %v16799_v12  ;;  %v2424_v12 = vld [vmem:[#allocation2 + $0x128] sm:$0xfe] }
 0x2fe   :  { %4480 = vmatpush1.bf16.msra.mxu0 %v16797_v60  ;;  %v2426_v60 = vld [vmem:[#allocation2 + $0x138] sm:$0x1] }
 0x2ff   :  { %5604 = vmatprep.subr.bf16.mxu0 %v16802_v3  ;;  %v5129_v3 = vrot.slane %v4838_v20, 2  ;;  %v4220_v35 = vrot.slane %v2426_v60, 1  ;;  %v16835_v20 = vld [vmem:[#allocation7 + $0x2b4] ss:$8 sps:$4 sm:$0xff]   ;;  %v2465_v60 = vld [vmem:[#allocation2 + $0x270] sm:$0x1] }
 0x301   :  { %3928 = vmatmul.mubr.bf16.gmra.mrb[32].mxu0 %v3606_v50  ;;  %v5130_v50 = vrot.slane %v4840_v57, 2  ;;  %v21361_v57 = vld [vmem:[#allocation27_spill] sm:$0xff] }
 0x302   :  { %3937 = vmatprep.mubr.bf16.mxu0 %v3609_v18  ;;  %v4844_v18 = vld [vmem:[#allocation2 + $0x50] sm:$0x3] }
 0x303   :  { %v5136_v6 = vrot.slane %v4844_v18, 2  ;;  %v18523_v49 = vsel %vm5122_vm1, %v5129_v3, %v5130_v50  ;;  %v16838_v3 = vld [vmem:[#allocation7 + $0x2c4] ss:$8 sps:$4 sm:$0xff]   ;;  %v4223_v18 = vrot.slane %v2465_v60, 1 }
 0x304   :  { %v4843_v60 = vld [vmem:[#allocation2 + $0x48] sm:$0xfc] }
 0x305   :  { %v18526_v9 = vsel %vm5122_vm1, %v5135_v63, %v5136_v6  ;;  %v16836_v63 = vld [vmem:[#allocation7 + $0x2c0] ss:$8 sps:$4 sm:$0xff]   ;;  %v16841_v6 = vld [vmem:[#allocation7 + $0x2d4] ss:$8 sps:$4 sm:$0xff]  }
 0x309   :  { %3938 = vmatmul.mubr.bf16.gmra.mrb[36].mxu0 %v3608_v61  ;;  %v16806_v61 = vld [vmem:[#allocation7 + $0x220] ss:$8 sps:$4 sm:$0xff]  }
 0x30a   :  { %3947 = vmatprep.mubr.bf16.mxu0 %v3611_v22  ;;  %v4219_v22 = vrot.slane %v2424_v12, 1  ;;  %v2463_v12 = vld [vmem:[#allocation2 + $0x260] sm:$0xfe] }
 0x30b   :  { %v4222_v25 = vrot.slane %v2463_v12, 1  ;;  %v4836_v12 = vld [vmem:[#allocation2 + $0x10] sm:$0x3] }
 0x30c   :  { %v4221_v38 = vsel %vm2675_vm0, %v4219_v22, %v4220_v35  ;;  %v16839_v35 = vld [vmem:[#allocation7 + $0x2d0] ss:$8 sps:$4 sm:$0xff]  }
 0x30d   :  { %v4224_v22 = vsel %vm2675_vm0, %v4222_v25, %v4223_v18 }
 0x311   :  { %3948 = vmatmul.mubr.bf16.gmra.mrb[40].mxu0 %v3610_v43  ;;  %v21355_v43 = vld [vmem:[#allocation21_spill] sm:$0xff] }
 0x312   :  { %3957 = vmatprep.mubr.bf16.mxu0 %v3613_v19  ;;  %v21356_v19 = vld [vmem:[#allocation22_spill] sm:$0xff] }
 0x319   :  { %3958 = vmatmul.mubr.bf16.gmra.mrb[44].mxu0 %v3612_v40  ;;  %v2425_v40 = vld [vmem:[#allocation2 + $0x130] sm:$0x1] }
 0x31a   :  { %3967 = vmatprep.mubr.bf16.mxu0 %v3615_v10  ;;  %v4249_v10 = vpack.c.bf16 %v4221_v38, %v18442_v28  ;;  %v16823_v28 = vld [vmem:[#allocation7 + $0x274] ss:$8 sps:$4 sm:$0xff]   ;;  %v16845_v38 = vld [vmem:[#allocation7 + $0x2f0] ss:$8 sps:$4 sm:$0xff]  }
 0x321   :  { %3968 = vmatmul.mubr.bf16.gmra.mrb[48].mxu0 %v3614_v13  ;;  %v4217_v13 = vrot.slane %v2425_v40, 1  ;;  %v21365_v40 = vld [vmem:[#allocation31_spill] sm:$0xff] }
 0x322   :  { %3977 = vmatprep.mubr.bf16.mxu0 %v3617_v42  ;;  %v16817_v42 = vld [vmem:[#allocation7 + $0x254] ss:$8 sps:$4 sm:$0xff]  }
 0x323   :  { %v4218_v56 = vsel %vm2675_vm0, %v4216_v27, %v4217_v13  ;;  %v2506_v27 = vld [vmem:[#allocation2 + $0x3b8] sm:$0x1] }
 0x324   :  { %v4248_v29 = vpack.c.bf16 %v4218_v56, %v18449_v37  ;;  %v16827_v37 = vld [vmem:[#allocation7 + $0x290] ss:$8 sps:$4 sm:$0xff]   ;;  %v4232_v13 = vrot.slane %v2506_v27, 1  ;;  %v2503_v56 = vld [vmem:[#allocation2 + $0x3a0] sm:$0xfe] }
 0x329   :  { %3978 = vmatmul.mubr.bf16.gmra.mrb[52].mxu0 %v3616_v26  ;;  %v16820_v26 = vld [vmem:[#allocation7 + $0x264] ss:$8 sps:$4 sm:$0xff]  }
 0x32a   :  { %3987 = vmatprep.mubr.bf16.mxu0 %v3619_v21  ;;  %v16818_v21 = vld [vmem:[#allocation7 + $0x260] ss:$8 sps:$4 sm:$0xff]  }
 0x331   :  { %3988 = vmatmul.mubr.bf16.gmra.mrb[56].mxu0 %v3618_v2  ;;  %v16829_v2 = vld [vmem:[#allocation7 + $0x294] ss:$8 sps:$4 sm:$0xff]  }
 0x332   :  { %3997 = vmatprep.mubr.bf16.mxu0 %v3621_v58  ;;  %v21359_v58 = vld [vmem:[#allocation25_spill] sm:$0xff] }
 0x339   :  { %3998 = vmatmul.mubr.bf16.gmra.mrb[60].mxu0 %v3620_v7  ;;  %v2464_v7 = vld [vmem:[#allocation2 + $0x268] sm:$0xfe] }
 0x33a   :  { %4481 = vmatprep.mubr.bf16.mxu0 %v21352_v36  ;;  %v2466_v36 = vld [vmem:[#allocation2 + $0x278] sm:$0x1] }
 0x341   :  { %4482 = vmatmul.mubr.bf16.vlgmr.msra.gmra.mrb[0].mxu0 %v21353_v45  ;;  %v4226_v45 = vrot.slane %v2466_v36, 1  ;;  %v4839_v36 = vld [vmem:[#allocation2 + $0x28] sm:$0xfc] }
 0x342   :  { %5605 = vmatpush1.bf16.msra.mxu0 %v16800_v23  ;;  %4491 = vmatprep.mubr.bf16.mxu0 %v21354_v55  ;;  %v16830_v23 = vld [vmem:[#allocation7 + $0x2a0] ss:$8 sps:$4 sm:$0xff]   ;;  %v21362_v55 = vld [vmem:[#allocation28_spill] sm:$0xff] }
 0x343   :  { %5606 = vmatprep.subr.bf16.mxu0 %v16805_v31  ;;  %v4225_v31 = vrot.slane %v2464_v7, 1  ;;  %v4837_v7 = vld [vmem:[#allocation2 + $0x18] sm:$0x3] }
 0x346   :  { %5607 = vmatpush1.bf16.msra.mxu0 %v16803_v54  ;;  %v16833_v54 = vld [vmem:[#allocation7 + $0x2b0] ss:$8 sps:$4 sm:$0xff]  }
 0x347   :  { %5608 = vmatprep.subr.bf16.mxu0 %v16808_v1  ;;  %v4227_v1 = vsel %vm2675_vm0, %v4225_v31, %v4226_v45 }
 0x348   :  { %v4251_v50 = vpack.c.bf16 %v4227_v1, %v18464_v30  ;;  %v16847_v30 = vld [vmem:[#allocation7 + $0x2f4] ss:$8 sps:$4 sm:$0xff]   ;;  %v4834_v1 = vld [vmem:[#allocation2] sm:$0xfc] }
 0x349   :  { %4492 = vmatmul.mubr.bf16.gmra.mrb[4].mxu0 %v21355_v43  ;;  %v4250_v43 = vpack.c.bf16 %v4224_v22, %v18471_v8 }
 0x34a   :  { %4501 = vmatprep.mubr.bf16.mxu0 %v21356_v19  ;;  %5609 = vmatpush1.bf16.msra.mxu0 %v16806_v61  ;;  %v21363_v61 = vld [vmem:[#allocation29_spill] sm:$0xff] }
 0x34b   :  { %5610 = vmatprep.subr.bf16.mxu0 %v16811_v15  ;;  %v16844_v15 = vld [vmem:[#allocation7 + $0x2e4] ss:$8 sps:$4 sm:$0xff]   ;;  %v16842_v19 = vld [vmem:[#allocation7 + $0x2e0] ss:$8 sps:$4 sm:$0xff]  }
 0x34e   :  { %5611 = vmatpush1.bf16.msra.mxu0 %v16809_v32  ;;  %v21364_v32 = vld [vmem:[#allocation30_spill] sm:$0xff] }
 0x34f   :  { %5612 = vmatprep.subr.bf16.mxu0 %v16814_v4  ;;  %v21366_v4 = vld [vmem:[#allocation32_spill] sm:$0xff] }
 0x351   :  { %4502 = vmatmul.mubr.bf16.gmra.mrb[8].mxu0 %v21357_v33 }
 0x352   :  { %4511 = vmatprep.mubr.bf16.mxu0 %v4249_v10  ;;  %5613 = vmatpush1.bf16.msra.mxu0 %v16812_v0  ;;  %v2504_v10 = vld [vmem:[#allocation2 + $0x3a8] sm:$0xfe] }
 0x353   :  { %5614 = vmatprep.subr.bf16.mxu0 %v16817_v42  ;;  %v4231_v8 = vrot.slane %v2504_v10, 1  ;;  %v21367_v0 = vld [vmem:[#allocation34_spill] sm:$0xff]  ;;  %v21368_v42 = vld [vmem:[#allocation35_spill] sm:$0xff] }
 0x354   :  { %v16848_v10 = vld [vmem:[#allocation7 + $0x500] ss:$8 sps:$4 sm:$0xff]  }
 0x355   :  { %v4233_v33 = vsel %vm2675_vm0, %v4231_v8, %v4232_v13 }
 0x356   :  { %5615 = vmatpush1.bf16.msra.mxu0 %v16815_v47  ;;  %v2505_v47 = vld [vmem:[#allocation2 + $0x3b0] sm:$0x1] }
 0x357   :  { %5616 = vmatprep.subr.bf16.mxu0 %v16820_v26  ;;  %v4253_v26 = vpack.c.bf16 %v4233_v33, %v18486_v41 }
 0x359   :  { %4512 = vmatmul.mubr.bf16.gmra.mrb[12].mxu0 %v4248_v29  ;;  %v4228_v29 = vrot.slane %v2503_v56, 1 }
 0x35a   :  { %4521 = vmatprep.mubr.bf16.mxu0 %v21358_v48  ;;  %5617 = vmatpush1.bf16.msra.mxu0 %v16818_v21  ;;  %v4229_v21 = vrot.slane %v2505_v47, 1 }
 0x35b   :  { %5618 = vmatprep.subr.bf16.mxu0 %v16823_v28  ;;  %v21369_v28 = vld [vmem:[#allocation37_spill] sm:$0xff] }
 0x35c   :  { %v4230_v48 = vsel %vm2675_vm0, %v4228_v29, %v4229_v21  ;;  %v4850_v21 = vld [vmem:[#allocation2 + $0x80] sm:$0xfc] }
 0x35e   :  { %5619 = vmatpush1.bf16.msra.mxu0 %v16821_v52  ;;  %v4252_v52 = vpack.c.bf16 %v4230_v48, %v18493_v24  ;;  %v4835_v24 = vld [vmem:[#allocation2 + $0x8] sm:$0xfc]  ;;  %v4854_v48 = vld [vmem:[#allocation2 + $0xa0] sm:$0xfc] }
 0x35f   :  { %5620 = vmatprep.subr.bf16.mxu0 %v16826_v11  ;;  %v21370_v11 = vld [vmem:[#allocation41_spill] sm:$0xff]  ;;  %v5126_v45 = vrot.slane %v4835_v24, 2  ;;  %v5147_v24 = vrot.slane %v4850_v21, 2 }
 0x361   :  { %4522 = vmatmul.mubr.bf16.gmra.mrb[16].mxu0 %v21359_v58 }
 0x362   :  { %4531 = vmatprep.mubr.bf16.mxu0 %v21360_v59  ;;  %5621 = vmatpush1.bf16.msra.mxu0 %v16824_v44  ;;  %v2544_v44 = vld [vmem:[#allocation2 + $0x4e8] sm:$0xfe] }
 0x363   :  { %5622 = vmatprep.subr.bf16.mxu0 %v16829_v2  ;;  %v2546_v2 = vld [vmem:[#allocation2 + $0x4f8] sm:$0x1]  ;;  %v4237_v58 = vrot.slane %v2544_v44, 1  ;;  %v4856_v44 = vld [vmem:[#allocation2 + $0xb0] sm:$0x3] }
 0x364   :  { %v4238_v41 = vrot.slane %v2546_v2, 1  ;;  %v16856_v2 = vld [vmem:[#allocation7 + $0x524] ss:$8 sps:$4 sm:$0xff]  }
 0x366   :  { %5623 = vmatpush1.bf16.msra.mxu0 %v16827_v37  ;;  %v4239_v59 = vsel %vm2675_vm0, %v4237_v58, %v4238_v41  ;;  %v2543_v37 = vld [vmem:[#allocation2 + $0x4e0] sm:$0xfe]  ;;  %v4859_v58 = vld [vmem:[#allocation2 + $0xc8] sm:$0xfc]  ;;  %v4861_v41 = vld [vmem:[#allocation2 + $0xd8] sm:$0x3] }
 0x367   :  { %5624 = vmatprep.subr.bf16.mxu0 %v16832_v53  ;;  %v2545_v53 = vld [vmem:[#allocation2 + $0x4f0] sm:$0x1]  ;;  %v4234_v31 = vrot.slane %v2543_v37, 1  ;;  %v4865_v37 = vld [vmem:[#allocation2 + $0xf8] sm:$0x3] }
 0x369   :  { %4532 = vmatmul.mubr.bf16.gmra.mrb[20].mxu0 %v21361_v57  ;;  %v5132_v57 = vrot.slane %v4839_v36, 2 }
 0x36a   :  { %4541 = vmatprep.mubr.bf16.mxu0 %v21362_v55  ;;  %5625 = vmatpush1.bf16.msra.mxu0 %v16830_v23  ;;  %v4841_v23 = vld [vmem:[#allocation2 + $0x38] sm:$0x3] }
 0x36b   :  { %5626 = vmatprep.subr.bf16.mxu0 %v16835_v20  ;;  %v5127_v20 = vrot.slane %v4837_v7, 2  ;;  %v5133_v55 = vrot.slane %v4841_v23, 2  ;;  %v5153_v23 = vrot.slane %v4854_v48, 2  ;;  %v4883_v48 = vld [vmem:[#allocation2 + $0x188] sm:$0xfc] }
 0x36e   :  { %5627 = vmatpush1.bf16.msra.mxu0 %v16833_v54  ;;  %v18568_v54 = vsel %vm5122_vm1, %v5132_v57, %v5133_v55  ;;  %v5169_v57 = vrot.slane %v4865_v37, 2  ;;  %v16859_v55 = vld [vmem:[#allocation7 + $0x534] ss:$8 sps:$4 sm:$0xff]  }
 0x36f   :  { %5628 = vmatprep.subr.bf16.mxu0 %v16838_v3  ;;  %v4847_v3 = vld [vmem:[#allocation2 + $0x68] sm:$0xfc] }
 0x370   :  { %v5144_v22 = vrot.slane %v4847_v3, 2 }
 0x371   :  { %4542 = vmatmul.mubr.bf16.gmra.mrb[24].mxu0 %v21363_v61 }
 0x372   :  { %4551 = vmatprep.mubr.bf16.mxu0 %v4251_v50  ;;  %5629 = vmatpush1.bf16.msra.mxu0 %v16836_v63  ;;  %v4849_v50 = vld [vmem:[#allocation2 + $0x78] sm:$0x3]  ;;  %v5123_v63 = vrot.slane %v4834_v1, 2 }
 0x373   :  { %5630 = vmatprep.subr.bf16.mxu0 %v16841_v6  ;;  %v5138_v6 = vrot.slane %v4843_v60, 2  ;;  %v4862_v60 = vld [vmem:[#allocation2 + $0xe0] sm:$0xfc] }
 0x376   :  { %5631 = vmatpush1.bf16.msra.mxu0 %v16839_v35  ;;  %v5145_v35 = vrot.slane %v4849_v50, 2 }
 0x377   :  { %5632 = vmatprep.subr.bf16.mxu0 %v16844_v15 }
 0x379   :  { %4552 = vmatmul.mubr.bf16.gmra.mrb[28].mxu0 %v4250_v43 }
 0x37a   :  { %4561 = vmatprep.mubr.bf16.mxu0 %v21364_v32  ;;  %5633 = vmatpush1.bf16.msra.mxu0 %v16842_v19  ;;  %v18577_v19 = vsel %vm5122_vm1, %v5144_v22, %v5145_v35  ;;  %v4851_v32 = vld [vmem:[#allocation2 + $0x88] sm:$0xfc] }
 0x37b   :  { %5634 = vmatprep.subr.bf16.mxu0 %v16847_v30  ;;  %v4846_v30 = vld [vmem:[#allocation2 + $0x60] sm:$0xfc] }
 0x37c   :  { %v5141_v8 = vrot.slane %v4846_v30, 2 }
 0x37e   :  { %5635 = vmatpush1.bf16.msra.mxu0 %v16845_v38  ;;  %v4853_v38 = vld [vmem:[#allocation2 + $0x98] sm:$0x3] }
 0x37f   :  { %6262 = vmatprep.subr.bf16.mxu0 %v16850_v46  ;;  %v4855_v46 = vld [vmem:[#allocation2 + $0xa8] sm:$0xfc]  ;;  %v5151_v33 = vrot.slane %v4853_v38, 2 }
 0x380   :  { %v5156_v56 = vrot.slane %v4855_v46, 2  ;;  %v16860_v38 = vld [vmem:[#allocation7 + $0x540] ss:$8 sps:$4 sm:$0xff]  }
 0x381   :  { %4562 = vmatmul.mubr.bf16.gmra.mrb[32].mxu0 %v21365_v40  ;;  %v4857_v40 = vld [vmem:[#allocation2 + $0xb8] sm:$0x3] }
 0x382   :  { %4571 = vmatprep.mubr.bf16.mxu0 %v21366_v4  ;;  %v5157_v47 = vrot.slane %v4857_v40, 2 }
 0x389   :  { %4572 = vmatmul.mubr.bf16.gmra.mrb[36].mxu0 %v21367_v0  ;;  %v16853_v0 = vld [vmem:[#allocation7 + $0x514] ss:$8 sps:$4 sm:$0xff]  }
 0x38a   :  { %4581 = vmatprep.mubr.bf16.mxu0 %v21368_v42  ;;  %v5150_v42 = vrot.slane %v4851_v32, 2 }
 0x391   :  { %4582 = vmatmul.mubr.bf16.gmra.mrb[40].mxu0 %v21369_v28  ;;  %v4852_v28 = vld [vmem:[#allocation2 + $0x90] sm:$0x3] }
 0x392   :  { %4591 = vmatprep.mubr.bf16.mxu0 %v4253_v26  ;;  %v16851_v26 = vld [vmem:[#allocation7 + $0x510] ss:$8 sps:$4 sm:$0xff]   ;;  %v5148_v36 = vrot.slane %v4852_v28, 2 }
 0x393   :  { %v4880_v28 = vld [vmem:[#allocation2 + $0x170] sm:$0x3] }
 0x399   :  { %4592 = vmatmul.mubr.bf16.gmra.mrb[44].mxu0 %v4252_v52  ;;  %v18589_v52 = vsel %vm5122_vm1, %v5150_v42, %v5151_v33  ;;  %v4876_v33 = vld [vmem:[#allocation2 + $0x150] sm:$0x3] }
 0x39a   :  { %4601 = vmatprep.mubr.bf16.mxu0 %v21370_v11  ;;  %v18592_v11 = vsel %vm5122_vm1, %v5156_v56, %v5157_v47  ;;  %v4878_v56 = vld [vmem:[#allocation2 + $0x160] sm:$0xfc]  ;;  %v16863_v47 = vld [vmem:[#allocation7 + $0x550] ss:$8 sps:$4 sm:$0xff]  }
 0x39b   :  { %v18600_v7 = vpack.c.bf16 %v18592_v11, %v18589_v52 }
 0x39d   :  { %21373 = vst [vmem:[#allocation39_spill] sm:$0xff] %v18600_v7 }
 0x3a1   :  { %4602 = vmatmul.mubr.bf16.gmra.mrb[48].mxu0 %v18389_v17  ;;  %v4255_v17 = vpack.c.bf16 %v4239_v59, %v18508_v5  ;;  %v4845_v5 = vld [vmem:[#allocation2 + $0x58] sm:$0x3]  ;;  %v4863_v59 = vld [vmem:[#allocation2 + $0xe8] sm:$0xfc] }
 0x3a2   :  { %4611 = vmatprep.mubr.bf16.mxu0 %v18393_v16  ;;  %v4235_v16 = vrot.slane %v2545_v53, 1  ;;  %v5139_v61 = vrot.slane %v4845_v5, 2  ;;  %v16857_v5 = vld [vmem:[#allocation7 + $0x530] ss:$8 sps:$4 sm:$0xff]  }
 0x3a4   :  { %v18574_v43 = vsel %vm5122_vm1, %v5138_v6, %v5139_v61  ;;  %v4879_v6 = vld [vmem:[#allocation2 + $0x168] sm:$0xfc]  ;;  %v4881_v61 = vld [vmem:[#allocation2 + $0x178] sm:$0x3] }
 0x3a5   :  { %v18582_v27 = vpack.c.bf16 %v18577_v19, %v18574_v43 }
 0x3a7   :  { %21371 = vst [vmem:[#allocation33_spill] sm:$0xff] %v18582_v27 }
 0x3a9   :  { %4612 = vmatmul.mubr.bf16.gmra.mrb[52].mxu0 %v18411_v39  ;;  %v4236_v39 = vsel %vm2675_vm0, %v4234_v31, %v4235_v16  ;;  %v16854_v31 = vld [vmem:[#allocation7 + $0x520] ss:$8 sps:$4 sm:$0xff]   ;;  %v5162_v16 = vrot.slane %v4859_v58, 2 }
 0x3aa   :  { %4621 = vmatprep.mubr.bf16.mxu0 %v18415_v62  ;;  %v5128_v62 = vsel %vm5122_vm1, %v5126_v45, %v5127_v20  ;;  %v4254_v25 = vpack.c.bf16 %v4236_v39, %v18515_v14  ;;  %v4848_v14 = vld [vmem:[#allocation2 + $0x70] sm:$0x3]  ;;  %v5163_v45 = vrot.slane %v4861_v41, 2  ;;  %v5168_v20 = vrot.slane %v4863_v59, 2  ;;  %v4858_v39 = vld [vmem:[#allocation2 + $0xc0] sm:$0xfc] }
 0x3ab   :  { %v5380_v18 = vpack.c.bf16 %v18568_v54, %v5128_v62  ;;  %v5142_v13 = vrot.slane %v4848_v14, 2  ;;  %v18605_v62 = vsel %vm5122_vm1, %v5147_v24, %v5148_v36  ;;  %v5159_v35 = vrot.slane %v4858_v39, 2  ;;  %v4887_v58 = vld [vmem:[#allocation2 + $0x1a8] sm:$0xfc]  ;;  %v4889_v41 = vld [vmem:[#allocation2 + $0x1b8] sm:$0x3] }
 0x3ac   :  { %v18611_v3 = vsel %vm5122_vm1, %v5162_v16, %v5163_v45  ;;  %v18614_v50 = vsel %vm5122_vm1, %v5168_v20, %v5169_v57  ;;  %v5165_v14 = vrot.slane %v4862_v60, 2  ;;  %v5172_v36 = vrot.slane %v4876_v33, 2  ;;  %v4882_v39 = vld [vmem:[#allocation2 + $0x180] sm:$0xfc] }
 0x3ad   :  { %v18586_v29 = vsel %vm5122_vm1, %v5141_v8, %v5142_v13  ;;  %v16865_v8 = vld [vmem:[#allocation7 + $0x554] ss:$8 sps:$4 sm:$0xff]   ;;  %v4874_v13 = vld [vmem:[#allocation2 + $0x140] sm:$0xfc]  ;;  %v5186_v16 = vrot.slane %v4883_v48, 2  ;;  %v5192_v20 = vrot.slane %v4887_v58, 2 }
 0x3ae   :  { %v18596_v53 = vpack.c.bf16 %v18586_v29, %v18526_v9  ;;  %v5171_v37 = vrot.slane %v4874_v13, 2  ;;  %v5193_v57 = vrot.slane %v4889_v41, 2  ;;  %v16872_v13 = vld [vmem:[#allocation7 + $0x580] ss:$8 sps:$4 sm:$0xff]   ;;  %v4892_v58 = vld [vmem:[#allocation2 + $0x1d0] sm:$0x3] }
 0x3af   :  { %v4890_v48 = vld [vmem:[#allocation2 + $0x1c0] sm:$0xfc] }
 0x3b0   :  { %21372 = vst [vmem:[#allocation36_spill] sm:$0xff] %v18596_v53  ;;  %v4894_v41 = vld [vmem:[#allocation2 + $0x1e0] sm:$0xfc] }
 0x3b1   :  { %4622 = vmatmul.mubr.bf16.gmra.mrb[56].mxu0 %v18427_v51  ;;  %v5124_v51 = vrot.slane %v4836_v12, 2  ;;  %v4860_v12 = vld [vmem:[#allocation2 + $0xd0] sm:$0x3] }
 0x3b2   :  { %4631 = vmatprep.mubr.bf16.mxu0 %v4255_v17  ;;  %v5154_v17 = vrot.slane %v4856_v44, 2  ;;  %v5160_v30 = vrot.slane %v4860_v12, 2  ;;  %v16868_v44 = vld [vmem:[#allocation7 + $0x564] ss:$8 sps:$4 sm:$0xff]   ;;  %v5173_v12 = vsel %vm5122_vm1, %v5171_v37, %v5172_v36  ;;  %v16875_v37 = vld [vmem:[#allocation7 + $0x590] ss:$8 sps:$4 sm:$0xff]  }
 0x3b3   :  { %v5125_v15 = vsel %vm5122_vm1, %v5123_v63, %v5124_v51  ;;  %v16862_v63 = vld [vmem:[#allocation7 + $0x544] ss:$8 sps:$4 sm:$0xff]   ;;  %v4877_v51 = vld [vmem:[#allocation2 + $0x158] sm:$0x3] }
 0x3b4   :  { %v5379_v4 = vpack.c.bf16 %v18523_v49, %v5125_v15  ;;  %v18608_v1 = vsel %vm5122_vm1, %v5153_v23, %v5154_v17  ;;  %v18622_v15 = vpack.c.bf16 %v18614_v50, %v18611_v3  ;;  %v5175_v40 = vrot.slane %v4877_v51, 2 }
 0x3b5   :  { %v18618_v22 = vpack.c.bf16 %v18608_v1, %v18605_v62  ;;  %v5177_v23 = vrot.slane %v4878_v56, 2  ;;  %v5178_v17 = vrot.slane %v4880_v28, 2  ;;  %v18650_v51 = vsel %vm5122_vm1, %v5192_v20, %v5193_v57  ;;  %v16877_v28 = vld [vmem:[#allocation7 + $0x594] ss:$8 sps:$4 sm:$0xff]   ;;  %v4905_v20 = vld [vmem:[#allocation2 + $0x238] sm:$0x3] }
 0x3b6   :  { %21375 = vst [vmem:[#allocation40_spill] sm:$0xff] %v18622_v15 }
 0x3b7   :  { %21374 = vst [vmem:[#allocation38_spill] sm:$0xff] %v18618_v22  ;;  %v18644_v60 = vsel %vm5122_vm1, %v5177_v23, %v5178_v17  ;;  %v4896_v23 = vld [vmem:[#allocation2 + $0x1f0] sm:$0x3]  ;;  %v4899_v17 = vld [vmem:[#allocation2 + $0x208] sm:$0xfc] }
 0x3b9   :  { %4632 = vmatmul.mubr.bf16.gmra.mrb[60].mxu0 %v4254_v25  ;;  %v4864_v25 = vld [vmem:[#allocation2 + $0xf0] sm:$0x3] }
 0x3ba   :  { %5636 = vmatprep.mubr.bf16.mxu0 %v5380_v18  ;;  %v4875_v18 = vld [vmem:[#allocation2 + $0x148] sm:$0xfc]  ;;  %v5166_v32 = vrot.slane %v4864_v25, 2  ;;  %v4886_v25 = vld [vmem:[#allocation2 + $0x1a0] sm:$0xfc] }
 0x3bb   :  { %v5174_v46 = vrot.slane %v4875_v18, 2  ;;  %v16869_v18 = vld [vmem:[#allocation7 + $0x570] ss:$8 sps:$4 sm:$0xff]  }
 0x3bc   :  { %v18630_v42 = vsel %vm5122_vm1, %v5165_v14, %v5166_v32  ;;  %v4895_v14 = vld [vmem:[#allocation2 + $0x1e8] sm:$0xfc]  ;;  %v4897_v32 = vld [vmem:[#allocation2 + $0x1f8] sm:$0x3] }
 0x3c1   :  { %5637 = vmatmul.mubr.bf16.vlgmr.msra.gmra.mrb[0].mxu0 %v5379_v4  ;;  %v5180_v4 = vrot.slane %v4879_v6, 2  ;;  %v4888_v6 = vld [vmem:[#allocation2 + $0x1b0] sm:$0x3] }
 0x3c2   :  { %6263 = vmatpush1.bf16.msra.mxu0 %v16848_v10  ;;  %5646 = vmatprep.mubr.bf16.mxu0 %v18582_v27  ;;  %v5181_v10 = vrot.slane %v4881_v61, 2  ;;  %v4891_v61 = vld [vmem:[#allocation2 + $0x1c8] sm:$0xfc] }
 0x3c3   :  { %6264 = vmatprep.subr.bf16.mxu0 %v16853_v0  ;;  %v18627_v0 = vsel %vm5122_vm1, %v5159_v35, %v5160_v30  ;;  %v16874_v35 = vld [vmem:[#allocation7 + $0x584] ss:$8 sps:$4 sm:$0xff]   ;;  %v4893_v30 = vld [vmem:[#allocation2 + $0x1d8] sm:$0x3]  ;;  %v5198_v33 = vrot.slane %v4891_v61, 2 }
 0x3c4   :  { %v18634_v21 = vsel %vm5122_vm1, %v5180_v4, %v5181_v10  ;;  %v18638_v59 = vpack.c.bf16 %v18630_v42, %v18627_v0  ;;  %v5189_v10 = vrot.slane %v4886_v25, 2  ;;  %v5199_v56 = vrot.slane %v4893_v30, 2 }
 0x3c5   :  { %v5202_v25 = vrot.slane %v4896_v23, 2  ;;  %v5217_v30 = vrot.slane %v4905_v20, 2 }
 0x3c6   :  { %6265 = vmatpush1.bf16.msra.mxu0 %v16851_v26  ;;  %v5176_v26 = vsel %vm5122_vm1, %v5174_v46, %v5175_v40  ;;  %21376 = vst [vmem:[#allocation42_spill] sm:$0xff] %v18638_v59  ;;  %v5183_v46 = vrot.slane %v4882_v39, 2 }
 0x3c7   :  { %6266 = vmatprep.subr.bf16.mxu0 %v16856_v2  ;;  %v4885_v2 = vld [vmem:[#allocation2 + $0x198] sm:$0x3]  ;;  %v5388_v24 = vpack.c.bf16 %v18634_v21, %v5176_v26  ;;  %v5205_v26 = vrot.slane %v4897_v32, 2  ;;  %v4898_v32 = vld [vmem:[#allocation2 + $0x200] sm:$0xfc] }
 0x3c8   :  { %v5187_v45 = vrot.slane %v4885_v2, 2 }
 0x3c9   :  { %5647 = vmatmul.mubr.bf16.gmra.mrb[4].mxu0 %v18596_v53 }
 0x3ca   :  { %5656 = vmatprep.mubr.bf16.mxu0 %v18600_v7  ;;  %6267 = vmatpush1.bf16.msra.mxu0 %v16854_v31  ;;  %v16866_v31 = vld [vmem:[#allocation7 + $0x560] ss:$8 sps:$4 sm:$0xff]  }
 0x3cb   :  { %6268 = vmatprep.subr.bf16.mxu0 %v16859_v55  ;;  %v16871_v55 = vld [vmem:[#allocation7 + $0x574] ss:$8 sps:$4 sm:$0xff]  }
 0x3ce   :  { %6269 = vmatpush1.bf16.msra.mxu0 %v16857_v5  ;;  %v4884_v5 = vld [vmem:[#allocation2 + $0x190] sm:$0x3] }
 0x3cf   :  { %6270 = vmatprep.subr.bf16.mxu0 %v16862_v63  ;;  %v18647_v63 = vsel %vm5122_vm1, %v5186_v16, %v5187_v45  ;;  %v5184_v4 = vrot.slane %v4884_v5, 2  ;;  %v4901_v16 = vld [vmem:[#allocation2 + $0x218] sm:$0x3]  ;;  %v4903_v45 = vld [vmem:[#allocation2 + $0x228] sm:$0xfc]  ;;  %v5201_v5 = vrot.slane %v4894_v41, 2 }
 0x3d0   :  { %v18655_v40 = vpack.c.bf16 %v18650_v51, %v18647_v63  ;;  %v5211_v61 = vrot.slane %v4901_v16, 2 }
 0x3d1   :  { %5657 = vmatmul.mubr.bf16.gmra.mrb[8].mxu0 %v18618_v22  ;;  %v4956_v22 = vld [vmem:[#allocation2 + $0x3d0] sm:$0x3] }
 0x3d2   :  { %5666 = vmatprep.mubr.bf16.mxu0 %v18622_v15  ;;  %6271 = vmatpush1.bf16.msra.mxu0 %v16860_v38  ;;  %v5387_v38 = vpack.c.bf16 %v18644_v60, %v5173_v12  ;;  %21377 = vst [vmem:[#allocation43_spill] sm:$0xff] %v18655_v40  ;;  %v5196_v12 = vrot.slane %v4892_v58, 2  ;;  %v4921_v58 = vld [vmem:[#allocation2 + $0x2b8] sm:$0x3]  ;;  %v4954_v15 = vld [vmem:[#allocation2 + $0x3c0] sm:$0xfc] }
 0x3d3   :  { %6272 = vmatprep.subr.bf16.mxu0 %v16865_v8  ;;  %v5190_v8 = vrot.slane %v4888_v6, 2  ;;  %v5210_v6 = vrot.slane %v4899_v17, 2 }
 0x3d5   :  { %v18662_v2 = vsel %vm5122_vm1, %v5189_v10, %v5190_v8  ;;  %v4902_v10 = vld [vmem:[#allocation2 + $0x220] sm:$0xfc]  ;;  %v16881_v8 = vld [vmem:[#allocation7 + $0x5b0] ss:$8 sps:$4 sm:$0xff]  }
 0x3d6   :  { %6273 = vmatpush1.bf16.msra.mxu0 %v16863_v47  ;;  %v5204_v47 = vrot.slane %v4895_v14, 2  ;;  %v16883_v14 = vld [vmem:[#allocation7 + $0x5b4] ss:$8 sps:$4 sm:$0xff]  }
 0x3d7   :  { %6274 = vmatprep.subr.bf16.mxu0 %v16868_v44  ;;  %v18659_v44 = vsel %vm5122_vm1, %v5183_v46, %v5184_v4  ;;  %v18684_v46 = vsel %vm5122_vm1, %v5201_v5, %v5202_v25  ;;  %v4900_v4 = vld [vmem:[#allocation2 + $0x210] sm:$0x3]  ;;  %v5229_v5 = vrot.slane %v4921_v58, 2  ;;  %v16889_v25 = vld [vmem:[#allocation7 + $0x5d4] ss:$8 sps:$4 sm:$0xff]  }
 0x3d8   :  { %v18668_v36 = vsel %vm5122_vm1, %v5204_v47, %v5205_v26  ;;  %v18672_v57 = vpack.c.bf16 %v18662_v2, %v18659_v44  ;;  %v4915_v47 = vld [vmem:[#allocation2 + $0x288] sm:$0xfc]  ;;  %v5208_v17 = vrot.slane %v4900_v4, 2 }
 0x3d9   :  { %5667 = vmatmul.mubr.bf16.gmra.mrb[12].mxu0 %v18638_v59  ;;  %v16886_v26 = vld [vmem:[#allocation7 + $0x5c4] ss:$8 sps:$4 sm:$0xff]   ;;  %v5222_v20 = vrot.slane %v4915_v47, 2  ;;  %v4925_v47 = vld [vmem:[#allocation2 + $0x2d8] sm:$0x3] }
 0x3da   :  { %5676 = vmatprep.mubr.bf16.mxu0 %v5388_v24  ;;  %6275 = vmatpush1.bf16.msra.mxu0 %v16866_v31  ;;  %v18665_v24 = vsel %vm5122_vm1, %v5198_v33, %v5199_v56  ;;  %v16880_v31 = vld [vmem:[#allocation7 + $0x5a4] ss:$8 sps:$4 sm:$0xff]   ;;  %21378 = vst [vmem:[#allocation18_spill] sm:$0xff] %v18672_v57  ;;  %v4904_v56 = vld [vmem:[#allocation2 + $0x230] sm:$0x3] }
 0x3db   :  { %6276 = vmatprep.subr.bf16.mxu0 %v16871_v55  ;;  %v5195_v55 = vrot.slane %v4890_v48, 2  ;;  %v18676_v39 = vpack.c.bf16 %v18668_v36, %v18665_v24  ;;  %v4919_v48 = vld [vmem:[#allocation2 + $0x2a8] sm:$0xfc]  ;;  %v5214_v16 = vrot.slane %v4904_v56, 2 }
 0x3dc   :  { %v16892_v56 = vld [vmem:[#allocation7 + $0x5e4] ss:$8 sps:$4 sm:$0xff]  }
 0x3dd   :  { %21379 = vst [vmem:[#allocation19_spill] sm:$0xff] %v18676_v39 }
 0x3de   :  { %6277 = vmatpush1.bf16.msra.mxu0 %v16869_v18  ;;  %v16878_v18 = vld [vmem:[#allocation7 + $0x5a0] ss:$8 sps:$4 sm:$0xff]  }
 0x3df   :  { %6278 = vmatprep.subr.bf16.mxu0 %v16874_v35  ;;  %v5216_v35 = vrot.slane %v4903_v45, 2  ;;  %v16884_v45 = vld [vmem:[#allocation7 + $0x5c0] ss:$8 sps:$4 sm:$0xff]  }
 0x3e1   :  { %5677 = vmatmul.mubr.bf16.gmra.mrb[16].mxu0 %v5387_v38  ;;  %v18681_v38 = vsel %vm5122_vm1, %v5195_v55, %v5196_v12  ;;  %v18690_v33 = vsel %vm5122_vm1, %v5216_v35, %v5217_v30  ;;  %v5228_v12 = vrot.slane %v4919_v48, 2  ;;  %v4916_v35 = vld [vmem:[#allocation2 + $0x290] sm:$0x3]  ;;  %v4918_v30 = vld [vmem:[#allocation2 + $0x2a0] sm:$0xfc] }
 0x3e2   :  { %5686 = vmatprep.mubr.bf16.mxu0 %v18655_v40  ;;  %6279 = vmatpush1.bf16.msra.mxu0 %v16872_v13  ;;  %v18687_v13 = vsel %vm5122_vm1, %v5210_v6, %v5211_v61  ;;  %v18694_v41 = vpack.c.bf16 %v18684_v46, %v18681_v38 }
 0x3e3   :  { %6280 = vmatprep.subr.bf16.mxu0 %v16877_v28  ;;  %v4917_v28 = vld [vmem:[#allocation2 + $0x298] sm:$0x3]  ;;  %v18698_v23 = vpack.c.bf16 %v18690_v33, %v18687_v13  ;;  %v18710_v4 = vsel %vm5122_vm1, %v5228_v12, %v5229_v5 }
 0x3e4   :  { %21380 = vst [vmem:[#allocation20_spill] sm:$0xff] %v18694_v41  ;;  %v5223_v55 = vrot.slane %v4917_v28, 2  ;;  %v4929_v28 = vld [vmem:[#allocation2 + $0x2f8] sm:$0x3] }
 0x3e5   :  { %21381 = vst [vmem:[#allocation21_spill] sm:$0xff] %v18698_v23  ;;  %v5241_v5 = vrot.slane %v4929_v28, 2  ;;  %v4935_v28 = vld [vmem:[#allocation2 + $0x328] sm:$0xfc] }
 0x3e6   :  { %6281 = vmatpush1.bf16.msra.mxu0 %v16875_v37  ;;  %v5207_v37 = vrot.slane %v4898_v32, 2  ;;  %v5224_v32 = vsel %vm5122_vm1, %v5222_v20, %v5223_v55  ;;  %v5235_v55 = vrot.slane %v4925_v47, 2  ;;  %v16898_v47 = vld [vmem:[#allocation7 + $0x804] ss:$8 sps:$4 sm:$0xff]  }
 0x3e7   :  { %6282 = vmatprep.subr.bf16.mxu0 %v16880_v31  ;;  %v5213_v31 = vrot.slane %v4902_v10, 2  ;;  %v4920_v10 = vld [vmem:[#allocation2 + $0x2b0] sm:$0x3] }
 0x3e8   :  { %v18703_v6 = vsel %vm5122_vm1, %v5207_v37, %v5208_v17  ;;  %v5396_v37 = vpack.c.bf16 %v18710_v4, %v5224_v32  ;;  %v5220_v17 = vrot.slane %v4916_v35, 2  ;;  %v4924_v35 = vld [vmem:[#allocation2 + $0x2d0] sm:$0x3] }
 0x3e9   :  { %5687 = vmatmul.mubr.bf16.gmra.mrb[20].mxu0 %v18672_v57  ;;  %v18706_v61 = vsel %vm5122_vm1, %v5213_v31, %v5214_v16  ;;  %v5225_v31 = vrot.slane %v4918_v30, 2  ;;  %v5226_v16 = vrot.slane %v4920_v10, 2  ;;  %v4926_v30 = vld [vmem:[#allocation2 + $0x2e0] sm:$0xfc]  ;;  %v4940_v57 = vld [vmem:[#allocation2 + $0x350] sm:$0x3] }
 0x3ea   :  { %5696 = vmatprep.mubr.bf16.mxu0 %v18676_v39  ;;  %6283 = vmatpush1.bf16.msra.mxu0 %v16878_v18  ;;  %v4914_v18 = vld [vmem:[#allocation2 + $0x280] sm:$0xfc]  ;;  %v18714_v48 = vpack.c.bf16 %v18706_v61, %v18703_v6 }
 0x3eb   :  { %6284 = vmatprep.subr.bf16.mxu0 %v16883_v14  ;;  %v16887_v14 = vld [vmem:[#allocation7 + $0x5d0] ss:$8 sps:$4 sm:$0xff]   ;;  %v5219_v58 = vrot.slane %v4914_v18, 2  ;;  %v18720_v18 = vsel %vm5122_vm1, %v5225_v31, %v5226_v16  ;;  %v5232_v16 = vrot.slane %v4924_v35, 2  ;;  %v4938_v39 = vld [vmem:[#allocation2 + $0x340] sm:$0xfc] }
 0x3ec   :  { %21382 = vst [vmem:[#allocation22_spill] sm:$0xff] %v18714_v48 }
 0x3ee   :  { %6285 = vmatpush1.bf16.msra.mxu0 %v16881_v8  ;;  %v4923_v8 = vld [vmem:[#allocation2 + $0x2c8] sm:$0xfc] }
 0x3ef   :  { %6286 = vmatprep.subr.bf16.mxu0 %v16886_v26  ;;  %v4927_v26 = vld [vmem:[#allocation2 + $0x2e8] sm:$0xfc]  ;;  %v5234_v20 = vrot.slane %v4923_v8, 2  ;;  %v4928_v8 = vld [vmem:[#allocation2 + $0x2f0] sm:$0x3] }
 0x3f0   :  { %v5240_v12 = vrot.slane %v4927_v26, 2  ;;  %v4933_v26 = vld [vmem:[#allocation2 + $0x318] sm:$0x3] }
 0x3f1   :  { %5697 = vmatmul.mubr.bf16.gmra.mrb[24].mxu0 %v18694_v41  ;;  %v18723_v32 = vsel %vm5122_vm1, %v5234_v20, %v5235_v55  ;;  %v5238_v20 = vrot.slane %v4928_v8, 2  ;;  %v4932_v41 = vld [vmem:[#allocation2 + $0x310] sm:$0x3] }
 0x3f2   :  { %5706 = vmatprep.mubr.bf16.mxu0 %v18698_v23  ;;  %6287 = vmatpush1.bf16.msra.mxu0 %v16884_v45  ;;  %v16890_v45 = vld [vmem:[#allocation7 + $0x5e0] ss:$8 sps:$4 sm:$0xff]   ;;  %v5221_v23 = vsel %vm5122_vm1, %v5219_v58, %v5220_v17  ;;  %v18726_v10 = vsel %vm5122_vm1, %v5240_v12, %v5241_v5  ;;  %v4937_v58 = vld [vmem:[#allocation2 + $0x338] sm:$0x3]  ;;  %v5231_v17 = vrot.slane %v4922_v34, 2  ;;  %v5247_v12 = vrot.slane %v4933_v26, 2 }
 0x3f3   :  { %6288 = vmatprep.subr.bf16.mxu0 %v16889_v25  ;;  %v16895_v25 = vld [vmem:[#allocation7 + $0x5f4] ss:$8 sps:$4 sm:$0xff]   ;;  %v18731_v31 = vpack.c.bf16 %v18726_v10, %v18723_v32  ;;  %v5252_v5 = vrot.slane %v4935_v28, 2  ;;  %v4936_v8 = vld [vmem:[#allocation2 + $0x330] sm:$0x3] }
 0x3f4   :  { %v4943_v26 = vld [vmem:[#allocation2 + $0x368] sm:$0xfc]  ;;  %v4945_v28 = vld [vmem:[#allocation2 + $0x378] sm:$0x3] }
 0x3f5   :  { %21383 = vst [vmem:[#allocation23_spill] sm:$0xff] %v18731_v31 }
 0x3f6   :  { %6289 = vmatpush1.bf16.msra.mxu0 %v16887_v14  ;;  %v16893_v14 = vld [vmem:[#allocation7 + $0x5f0] ss:$8 sps:$4 sm:$0xff]  }
 0x3f7   :  { %6290 = vmatprep.subr.bf16.mxu0 %v16892_v56  ;;  %v4931_v56 = vld [vmem:[#allocation2 + $0x308] sm:$0xfc] }
 0x3f8   :  { %v5246_v55 = vrot.slane %v4931_v56, 2  ;;  %v4939_v56 = vld [vmem:[#allocation2 + $0x348] sm:$0xfc] }
 0x3f9   :  { %5707 = vmatmul.mubr.bf16.gmra.mrb[28].mxu0 %v18714_v48  ;;  %v5253_v48 = vrot.slane %v4937_v58, 2 }
 0x3fa   :  { %5716 = vmatprep.mubr.bf16.mxu0 %v5396_v37  ;;  %6291 = vmatpush1.bf16.msra.mxu0 %v16890_v45  ;;  %v5395_v37 = vpack.c.bf16 %v18720_v18, %v5221_v23  ;;  %v5237_v45 = vrot.slane %v4926_v30, 2  ;;  %v4930_v23 = vld [vmem:[#allocation2 + $0x300] sm:$0xfc]  ;;  %v18741_v35 = vsel %vm5122_vm1, %v5246_v55, %v5247_v12  ;;  %v5264_v12 = vrot.slane %v4943_v26, 2  ;;  %v4957_v26 = vld [vmem:[#allocation2 + $0x3d8] sm:$0x3] }
 0x3fb   :  { %6292 = vmatprep.subr.bf16.mxu0 %v16895_v25  ;;  %v18735_v25 = vsel %vm5122_vm1, %v5231_v17, %v5232_v16  ;;  %v18744_v30 = vsel %vm5122_vm1, %v5252_v5, %v5253_v48  ;;  %v5244_v16 = vrot.slane %v4932_v41, 2  ;;  %v5258_v48 = vrot.slane %v4939_v56, 2  ;;  %v4944_v56 = vld [vmem:[#allocation2 + $0x370] sm:$0x3] }
 0x3fc   :  { %v18738_v34 = vsel %vm5122_vm1, %v5237_v45, %v5238_v20  ;;  %v18752_v17 = vpack.c.bf16 %v18744_v30, %v18741_v35  ;;  %v5250_v20 = vrot.slane %v4936_v8, 2  ;;  %v5265_v5 = vrot.slane %v4945_v28, 2  ;;  %v4942_v8 = vld [vmem:[#allocation2 + $0x360] sm:$0xfc]  ;;  %v4959_v28 = vld [vmem:[#allocation2 + $0x3e8] sm:$0xfc] }
 0x3fd   :  { %v18748_v58 = vpack.c.bf16 %v18738_v34, %v18735_v25 }
 0x3fe   :  { %6293 = vmatpush1.bf16.msra.mxu0 %v16893_v14  ;;  %v4934_v14 = vld [vmem:[#allocation2 + $0x320] sm:$0xfc]  ;;  %21385 = vst [vmem:[#allocation25_spill] sm:$0xff] %v18752_v17 }
 0x3ff   :  { %6896 = vmatprep.subr.bf16.mxu0 %v16898_v47  ;;  %v4941_v47 = vld [vmem:[#allocation2 + $0x358] sm:$0x3]  ;;  %21384 = vst [vmem:[#allocation24_spill] sm:$0xff] %v18748_v58  ;;  %v5249_v45 = vrot.slane %v4934_v14, 2  ;;  %v18766_v14 = vsel %vm5122_vm1, %v5264_v12, %v5265_v5  ;;  %v5271_v5 = vrot.slane %v4957_v26, 2 }
 0x400   :  { %v5259_v55 = vrot.slane %v4941_v47, 2  ;;  %21386 = vst [vmem:[#allocation26_spill] sm:$0xff] %v18766_v14  ;;  %v4955_v47 = vld [vmem:[#allocation2 + $0x3c8] sm:$0xfc]  ;;  %v4965_v26 = vld [vmem:[#allocation2 + $0x418] sm:$0x3] }
 0x401   :  { %5717 = vmatmul.mubr.bf16.gmra.mrb[32].mxu0 %v5395_v37  ;;  %v5243_v37 = vrot.slane %v4930_v23, 2  ;;  %v18760_v23 = vsel %vm5122_vm1, %v5249_v45, %v5250_v20  ;;  %v5256_v20 = vrot.slane %v4940_v57, 2  ;;  %v5270_v12 = vrot.slane %v4955_v47, 2  ;;  %v4960_v47 = vld [vmem:[#allocation2 + $0x3f0] sm:$0x3] }
 0x402   :  { %5726 = vmatprep.mubr.bf16.mxu0 %v18731_v31  ;;  %v18763_v41 = vsel %vm5122_vm1, %v5258_v48, %v5259_v55  ;;  %v5261_v48 = vrot.slane %v4942_v8, 2  ;;  %v5262_v55 = vrot.slane %v4944_v56, 2  ;;  %v4958_v56 = vld [vmem:[#allocation2 + $0x3e0] sm:$0xfc]  ;;  %v5274_v7 = vrot.slane %v4960_v47, 2 }
 0x403   :  { %v18757_v31 = vsel %vm5122_vm1, %v5243_v37, %v5244_v16  ;;  %v5255_v16 = vrot.slane %v4938_v39, 2  ;;  %v18774_v45 = vpack.c.bf16 %v18766_v14, %v18763_v41  ;;  %v5272_v57 = vsel %vm5122_vm1, %v5270_v12, %v5271_v5  ;;  %v4964_v14 = vld [vmem:[#allocation2 + $0x410] sm:$0x3]  ;;  %v4971_v47 = vld [vmem:[#allocation2 + $0x448] sm:$0xfc] }
 0x404   :  { %v18770_v37 = vpack.c.bf16 %v18760_v23, %v18757_v31  ;;  %v18782_v39 = vsel %vm5122_vm1, %v5261_v48, %v5262_v55  ;;  %v5268_v55 = vrot.slane %v4956_v22, 2  ;;  %v5283_v5 = vrot.slane %v4965_v26, 2  ;;  %v4977_v26 = vld [vmem:[#allocation2 + $0x478] sm:$0x3] }
 0x405   :  { %21388 = vst [vmem:[#allocation28_spill] sm:$0xff] %v18774_v45  ;;  %v18779_v59 = vsel %vm5122_vm1, %v5255_v16, %v5256_v20  ;;  %21389 = vst [vmem:[#allocation29_spill] sm:$0xff] %v18782_v39  ;;  %v5267_v20 = vrot.slane %v4954_v15, 2 }
 0x406   :  { %21387 = vst [vmem:[#allocation27_spill] sm:$0xff] %v18770_v37  ;;  %v18790_v16 = vpack.c.bf16 %v18782_v39, %v18779_v59  ;;  %v4962_v39 = vld [vmem:[#allocation2 + $0x400] sm:$0xfc] }
 0x407   :  { %v5269_v53 = vsel %vm5122_vm1, %v5267_v20, %v5268_v55  ;;  %v5279_v20 = vrot.slane %v4962_v39, 2  ;;  %v4970_v39 = vld [vmem:[#allocation2 + $0x440] sm:$0xfc] }
 0x408   :  { %21390 = vst [vmem:[#allocation30_spill] sm:$0xff] %v18790_v16 }
 0x409   :  { %5727 = vmatmul.mubr.bf16.gmra.mrb[36].mxu0 %v18748_v58  ;;  %v5276_v58 = vrot.slane %v4959_v28, 2  ;;  %v4967_v28 = vld [vmem:[#allocation2 + $0x428] sm:$0xfc] }
 0x40a   :  { %5736 = vmatprep.mubr.bf16.mxu0 %v18752_v17  ;;  %v4961_v17 = vld [vmem:[#allocation2 + $0x3f8] sm:$0x3] }
 0x40b   :  { %v5277_v40 = vrot.slane %v4961_v17, 2  ;;  %v4963_v17 = vld [vmem:[#allocation2 + $0x408] sm:$0xfc] }
 0x40c   :  { %v5282_v12 = vrot.slane %v4963_v17, 2  ;;  %v4975_v17 = vld [vmem:[#allocation2 + $0x468] sm:$0xfc] }
 0x40d   :  { %v18786_v8 = vsel %vm5122_vm1, %v5276_v58, %v5277_v40  ;;  %v5288_v40 = vrot.slane %v4967_v28, 2 }
 0x40e   :  { %v5404_v48 = vpack.c.bf16 %v18786_v8, %v5272_v57  ;;  %v18799_v15 = vsel %vm5122_vm1, %v5282_v12, %v5283_v5  ;;  %v4966_v57 = vld [vmem:[#allocation2 + $0x420] sm:$0xfc]  ;;  %v5294_v12 = vrot.slane %v4971_v47, 2  ;;  %v4979_v47 = vld [vmem:[#allocation2 + $0x488] sm:$0xfc] }
 0x40f   :  { %21392 = vst [vmem:[#allocation32_spill] sm:$0xff] %v18799_v15 }
 0x411   :  { %5737 = vmatmul.mubr.bf16.gmra.mrb[40].mxu0 %v18770_v37  ;;  %v4969_v37 = vld [vmem:[#allocation2 + $0x438] sm:$0x3] }
 0x412   :  { %5746 = vmatprep.mubr.bf16.mxu0 %v18774_v45  ;;  %v5273_v45 = vrot.slane %v4958_v56, 2  ;;  %v5289_v58 = vrot.slane %v4969_v37, 2  ;;  %v4968_v56 = vld [vmem:[#allocation2 + $0x430] sm:$0x3]  ;;  %v4973_v37 = vld [vmem:[#allocation2 + $0x458] sm:$0x3] }
 0x413   :  { %v5286_v55 = vrot.slane %v4968_v56, 2  ;;  %v5295_v5 = vrot.slane %v4973_v37, 2  ;;  %v4976_v56 = vld [vmem:[#allocation2 + $0x470] sm:$0x3]  ;;  %v4981_v37 = vld [vmem:[#allocation2 + $0x498] sm:$0x3] }
 0x414   :  { %v18796_v27 = vsel %vm5122_vm1, %v5273_v45, %v5274_v7  ;;  %v18802_v22 = vsel %vm5122_vm1, %v5288_v40, %v5289_v58  ;;  %v5280_v45 = vrot.slane %v4964_v14, 2  ;;  %v5300_v40 = vrot.slane %v4975_v17, 2  ;;  %v4983_v17 = vld [vmem:[#allocation2 + $0x4a8] sm:$0xfc] }
 0x415   :  { %21391 = vst [vmem:[#allocation31_spill] sm:$0xff] %v18796_v27  ;;  %21393 = vst [vmem:[#allocation34_spill] sm:$0xff] %v18802_v22  ;;  %v5403_v28 = vpack.c.bf16 %v18796_v27, %v5269_v53  ;;  %v18807_v7 = vpack.c.bf16 %v18802_v22, %v18799_v15  ;;  %v5301_v58 = vrot.slane %v4977_v26, 2  ;;  %v4972_v27 = vld [vmem:[#allocation2 + $0x450] sm:$0x3]  ;;  %v18817_v22 = vsel %vm5122_vm1, %v5294_v12, %v5295_v5 }
 0x416   :  { %v4985_v26 = vld [vmem:[#allocation2 + $0x4b8] sm:$0x3]  ;;  %v5298_v12 = vrot.slane %v4976_v56, 2  ;;  %v5306_v5 = vrot.slane %v4979_v47, 2  ;;  %v4982_v56 = vld [vmem:[#allocation2 + $0x4a0] sm:$0xfc] }
 0x417   :  { %21394 = vst [vmem:[#allocation35_spill] sm:$0xff] %v18807_v7  ;;  %v18820_v14 = vsel %vm5122_vm1, %v5300_v40, %v5301_v58  ;;  %v5307_v40 = vrot.slane %v4981_v37, 2  ;;  %v5312_v58 = vrot.slane %v4983_v17, 2  ;;  %v4984_v47 = vld [vmem:[#allocation2 + $0x4b0] sm:$0x3] }
 0x418   :  { %21396 = vst [vmem:[#allocation41_spill] sm:$0xff] %v18820_v14 }
 0x419   :  { %5747 = vmatmul.mubr.bf16.gmra.mrb[44].mxu0 %v18790_v16  ;;  %v18811_v16 = vsel %vm5122_vm1, %v5279_v20, %v5280_v45  ;;  %v5291_v20 = vrot.slane %v4970_v39, 2  ;;  %v18828_v45 = vpack.c.bf16 %v18820_v14, %v18817_v22  ;;  %v18839_v14 = vsel %vm5122_vm1, %v5306_v5, %v5307_v40  ;;  %v16896_v40 = vld [vmem:[#allocation7 + $0x800] ss:$8 sps:$4 sm:$0xff]  }
 0x41a   :  { %5756 = vmatprep.mubr.bf16.mxu0 %v5404_v48  ;;  %v5285_v48 = vrot.slane %v4966_v57, 2  ;;  %v4974_v57 = vld [vmem:[#allocation2 + $0x460] sm:$0xfc]  ;;  %v6038_v5 = vpack.c.bf16 %v18574_v43, %v18568_v54  ;;  %v6039_v54 = vpack.c.bf16 %v18605_v62, %v18586_v29  ;;  %v6042_v43 = vpack.c.bf16 %v18611_v3, %v18592_v11 }
 0x41b   :  { %v16910_v29 = vld [vmem:[#allocation7 + $0x844] ss:$8 sps:$4 sm:$0xff]   ;;  %v6041_v62 = vpack.c.bf16 %v18627_v0, %v18608_v1  ;;  %v16914_v0 = vld [vmem:[#allocation7 + $0x860] ss:$8 sps:$4 sm:$0xff]  }
 0x41c   :  { %v18814_v53 = vsel %vm5122_vm1, %v5285_v48, %v5286_v55  ;;  %v5292_v48 = vrot.slane %v4972_v27, 2  ;;  %v5297_v55 = vrot.slane %v4974_v57, 2  ;;  %v4980_v57 = vld [vmem:[#allocation2 + $0x490] sm:$0x3] }
 0x41d   :  { %21395 = vst [vmem:[#allocation37_spill] sm:$0xff] %v18814_v53 }
 0x41e   :  { %v18833_v15 = vsel %vm5122_vm1, %v5291_v20, %v5292_v48  ;;  %v18836_v39 = vsel %vm5122_vm1, %v5297_v55, %v5298_v12  ;;  %v5304_v20 = vrot.slane %v4980_v57, 2  ;;  %v5309_v48 = vrot.slane %v4982_v56, 2  ;;  %v16901_v57 = vld [vmem:[#allocation7 + $0x814] ss:$8 sps:$4 sm:$0xff]  }
 0x41f   :  { %v18846_v37 = vpack.c.bf16 %v18836_v39, %v18833_v15  ;;  %v5310_v55 = vrot.slane %v4984_v47, 2  ;;  %v21397_v56 = vpack.c.bf16 %v18526_v9, %v18523_v49  ;;  %v16899_v47 = vld [vmem:[#allocation7 + $0x810] ss:$8 sps:$4 sm:$0xff]   ;;  %v16907_v49 = vld [vmem:[#allocation7 + $0x834] ss:$8 sps:$4 sm:$0xff]  }
 0x420   :  { %v16905_v9 = vld [vmem:[#allocation7 + $0x830] ss:$8 sps:$4 sm:$0xff]  }
 0x421   :  { %5757 = vmatmul.mubr.bf16.gmra.mrb[48].mxu0 %v5403_v28  ;;  %v18824_v28 = vpack.c.bf16 %v18814_v53, %v18811_v16  ;;  %v4978_v53 = vld [vmem:[#allocation2 + $0x480] sm:$0xfc]  ;;  %v18858_v12 = vsel %vm5122_vm1, %v5309_v48, %v5310_v55  ;;  %v4869_v48 = vld [vmem:[#allocation2 + $0x118] sm:$0x3] }
 0x422   :  { %5766 = vmatprep.mubr.bf16.mxu0 %v18807_v7  ;;  %v5313_v7 = vrot.slane %v4985_v26, 2  ;;  %v5303_v17 = vrot.slane %v4978_v53, 2  ;;  %v6009_v55 = vrot.slane %v4869_v48, 2  ;;  %v16916_v48 = vld [vmem:[#allocation7 + $0x864] ss:$8 sps:$4 sm:$0xff]  }
 0x424   :  { %v18842_v27 = vsel %vm5122_vm1, %v5312_v58, %v5313_v7  ;;  %v18855_v7 = vsel %vm5122_vm1, %v5303_v17, %v5304_v20  ;;  %v6040_v58 = vpack.c.bf16 %v18589_v52, %v18577_v19  ;;  %v16904_v17 = vld [vmem:[#allocation7 + $0x824] ss:$8 sps:$4 sm:$0xff]   ;;  %v16902_v19 = vld [vmem:[#allocation7 + $0x820] ss:$8 sps:$4 sm:$0xff]  }
 0x425   :  { %v18850_v26 = vpack.c.bf16 %v18842_v27, %v18839_v14  ;;  %v18862_v53 = vpack.c.bf16 %v18858_v12, %v18855_v7  ;;  %v4867_v20 = vld [vmem:[#allocation2 + $0x108] sm:$0xfc] }
 0x426   :  { %v6008_v52 = vrot.slane %v4867_v20, 2  ;;  %v16911_v20 = vld [vmem:[#allocation7 + $0x850] ss:$8 sps:$4 sm:$0xff]  }
 0x429   :  { %5767 = vmatmul.mubr.bf16.gmra.mrb[52].mxu0 %v18824_v28 }
 0x42a   :  { %5776 = vmatprep.mubr.bf16.mxu0 %v18828_v45 }
 0x431   :  { %5777 = vmatmul.mubr.bf16.gmra.mrb[56].mxu0 %v18846_v37 }
 0x432   :  { %5786 = vmatprep.mubr.bf16.mxu0 %v18850_v26 }
 0x439   :  { %5787 = vmatmul.mubr.bf16.gmra.mrb[60].mxu0 %v18862_v53 }
 0x43a   :  { %6294 = vmatprep.mubr.bf16.mxu0 %v6038_v5  ;;  %v18877_v5 = vsel %vm5122_vm1, %v6008_v52, %v6009_v55  ;;  %v6045_v52 = vpack.c.bf16 %v18659_v44, %v18644_v60  ;;  %v6048_v55 = vpack.c.bf16 %v18665_v24, %v18650_v51  ;;  %v6050_v60 = vpack.c.bf16 %v18687_v13, %v18668_v36  ;;  %v16926_v51 = vld [vmem:[#allocation7 + $0x8a0] ss:$8 sps:$4 sm:$0xff]  }
 0x43b   :  { %v6044_v11 = vpack.c.bf16 %v18877_v5, %v18614_v50  ;;  %v6046_v50 = vpack.c.bf16 %v18647_v63, %v18634_v21  ;;  %v16925_v21 = vld [vmem:[#allocation7 + $0x894] ss:$8 sps:$4 sm:$0xff]   ;;  %v16923_v63 = vld [vmem:[#allocation7 + $0x890] ss:$8 sps:$4 sm:$0xff]   ;;  %v6049_v36 = vpack.c.bf16 %v18703_v6, %v18684_v46  ;;  %v16938_v6 = vld [vmem:[#allocation7 + $0x8e0] ss:$8 sps:$4 sm:$0xff]  }
 0x441   :  { %6295 = vmatmul.mubr.bf16.vlgmr.msra.gmra.mrb[0].mxu0 %v21397_v56  ;;  %v16908_v56 = vld [vmem:[#allocation7 + $0x840] ss:$8 sps:$4 sm:$0xff]  }
 0x442   :  { %6897 = vmatpush1.bf16.msra.mxu0 %v16896_v40  ;;  %6304 = vmatprep.mubr.bf16.mxu0 %v6040_v58  ;;  %v4866_v40 = vld [vmem:[#allocation2 + $0x100] sm:$0xfc]  ;;  %v4868_v58 = vld [vmem:[#allocation2 + $0x110] sm:$0x3] }
 0x443   :  { %6898 = vmatprep.subr.bf16.mxu0 %v16901_v57  ;;  %v6005_v3 = vrot.slane %v4866_v40, 2  ;;  %v6006_v57 = vrot.slane %v4868_v58, 2  ;;  %v4909_v40 = vld [vmem:[#allocation2 + $0x258] sm:$0x3]  ;;  %v6047_v58 = vpack.c.bf16 %v18681_v38, %v18662_v2  ;;  %v16934_v2 = vld [vmem:[#allocation7 + $0x8c4] ss:$8 sps:$4 sm:$0xff]  }
 0x444   :  { %v6015_v24 = vrot.slane %v4909_v40, 2 }
 0x446   :  { %6899 = vmatpush1.bf16.msra.mxu0 %v16899_v47  ;;  %v16913_v47 = vld [vmem:[#allocation7 + $0x854] ss:$8 sps:$4 sm:$0xff]  }
 0x447   :  { %6900 = vmatprep.subr.bf16.mxu0 %v16904_v17  ;;  %v18884_v17 = vsel %vm5122_vm1, %v6005_v3, %v6006_v57  ;;  %v4906_v3 = vld [vmem:[#allocation2 + $0x240] sm:$0xfc]  ;;  %v4908_v57 = vld [vmem:[#allocation2 + $0x250] sm:$0x3] }
 0x448   :  { %v6043_v1 = vpack.c.bf16 %v18884_v17, %v18630_v42  ;;  %v16920_v42 = vld [vmem:[#allocation7 + $0x880] ss:$8 sps:$4 sm:$0xff]   ;;  %v6011_v13 = vrot.slane %v4906_v3, 2 }
 0x449   :  { %6305 = vmatmul.mubr.bf16.gmra.mrb[4].mxu0 %v6039_v54  ;;  %v16919_v54 = vld [vmem:[#allocation7 + $0x874] ss:$8 sps:$4 sm:$0xff]  }
 0x44a   :  { %6314 = vmatprep.mubr.bf16.mxu0 %v6042_v43  ;;  %6901 = vmatpush1.bf16.msra.mxu0 %v16902_v19  ;;  %v16917_v43 = vld [vmem:[#allocation7 + $0x870] ss:$8 sps:$4 sm:$0xff]   ;;  %v16922_v19 = vld [vmem:[#allocation7 + $0x884] ss:$8 sps:$4 sm:$0xff]  }
 0x44b   :  { %6902 = vmatprep.subr.bf16.mxu0 %v16907_v49  ;;  %v16928_v49 = vld [vmem:[#allocation7 + $0x8a4] ss:$8 sps:$4 sm:$0xff]  }
 0x44e   :  { %6903 = vmatpush1.bf16.msra.mxu0 %v16905_v9  ;;  %v4907_v9 = vld [vmem:[#allocation2 + $0x248] sm:$0xfc] }
 0x44f   :  { %6904 = vmatprep.subr.bf16.mxu0 %v16910_v29  ;;  %v6014_v44 = vrot.slane %v4907_v9, 2  ;;  %v16931_v29 = vld [vmem:[#allocation7 + $0x8b4] ss:$8 sps:$4 sm:$0xff]  }
 0x450   :  { %v21400_v9 = vld [vmem:[#allocation32_spill] sm:$0xff] }
 0x451   :  { %6315 = vmatmul.mubr.bf16.gmra.mrb[8].mxu0 %v6041_v62  ;;  %v16929_v62 = vld [vmem:[#allocation7 + $0x8b0] ss:$8 sps:$4 sm:$0xff]   ;;  %v6062_v40 = vpack.c.bf16 %v21400_v9, %v18786_v8 }
 0x452   :  { %6324 = vmatprep.mubr.bf16.mxu0 %v6044_v11  ;;  %6905 = vmatpush1.bf16.msra.mxu0 %v16908_v56  ;;  %v18899_v11 = vsel %vm5122_vm1, %v6014_v44, %v6015_v24  ;;  %v6012_v56 = vrot.slane %v4908_v57, 2  ;;  %v4989_v44 = vld [vmem:[#allocation2 + $0x4d8] sm:$0x3]  ;;  %v21403_v24 = vld [vmem:[#allocation37_spill] sm:$0xff] }
 0x453   :  { %6906 = vmatprep.subr.bf16.mxu0 %v16913_v47  ;;  %v6052_v38 = vpack.c.bf16 %v18899_v11, %v18690_v33  ;;  %v16932_v47 = vld [vmem:[#allocation7 + $0x8c0] ss:$8 sps:$4 sm:$0xff]   ;;  %v6054_v33 = vpack.c.bf16 %v18723_v32, %v18710_v4  ;;  %v4949_v4 = vld [vmem:[#allocation2 + $0x398] sm:$0x3]  ;;  %v6055_v32 = vpack.c.bf16 %v18757_v31, %v18738_v34  ;;  %v6027_v8 = vrot.slane %v4989_v44, 2 }
 0x454   :  { %v16965_v9 = vld [vmem:[#allocation10 + $0x74] ss:$8 sps:$4 sm:$0xff]   ;;  %v16973_v44 = vld [vmem:[#allocation10 + $0x90] ss:$8 sps:$4 sm:$0xff]  }
 0x456   :  { %6907 = vmatpush1.bf16.msra.mxu0 %v16911_v20  ;;  %v16937_v20 = vld [vmem:[#allocation7 + $0x8d4] ss:$8 sps:$4 sm:$0xff]  }
 0x457   :  { %6908 = vmatprep.subr.bf16.mxu0 %v16916_v48  ;;  %v18906_v48 = vsel %vm5122_vm1, %v6011_v13, %v6012_v56 }
 0x458   :  { %v6051_v46 = vpack.c.bf16 %v18906_v48, %v18706_v61  ;;  %v4947_v61 = vld [vmem:[#allocation2 + $0x388] sm:$0xfc] }
 0x459   :  { %6325 = vmatmul.mubr.bf16.gmra.mrb[12].mxu0 %v6043_v1  ;;  %v16935_v1 = vld [vmem:[#allocation7 + $0x8d0] ss:$8 sps:$4 sm:$0xff]  }
 0x45a   :  { %6334 = vmatprep.mubr.bf16.mxu0 %v6046_v50  ;;  %6909 = vmatpush1.bf16.msra.mxu0 %v16914_v0  ;;  %v16940_v50 = vld [vmem:[#allocation7 + $0x8e4] ss:$8 sps:$4 sm:$0xff]   ;;  %v16943_v0 = vld [vmem:[#allocation7 + $0x8f4] ss:$8 sps:$4 sm:$0xff]  }
 0x45b   :  { %6910 = vmatprep.subr.bf16.mxu0 %v16919_v54  ;;  %v16941_v54 = vld [vmem:[#allocation7 + $0x8f0] ss:$8 sps:$4 sm:$0xff]  }
 0x45e   :  { %6911 = vmatpush1.bf16.msra.mxu0 %v16917_v43  ;;  %v6053_v43 = vpack.c.bf16 %v18735_v25, %v18720_v18  ;;  %v4946_v25 = vld [vmem:[#allocation2 + $0x380] sm:$0xfc] }
 0x45f   :  { %6912 = vmatprep.subr.bf16.mxu0 %v16922_v19  ;;  %v6056_v19 = vpack.c.bf16 %v18741_v35, %v18726_v10  ;;  %v4948_v10 = vld [vmem:[#allocation2 + $0x390] sm:$0x3]  ;;  %v6057_v35 = vpack.c.bf16 %v18779_v59, %v18760_v23  ;;  %v21402_v23 = vld [vmem:[#allocation34_spill] sm:$0xff] }
 0x460   :  { %v6018_v31 = vrot.slane %v4948_v10, 2  ;;  %v4872_v10 = vld [vmem:[#allocation2 + $0x130] sm:$0x3] }
 0x461   :  { %6335 = vmatmul.mubr.bf16.gmra.mrb[16].mxu0 %v6045_v52  ;;  %v6058_v52 = vpack.c.bf16 %v18763_v41, %v18744_v30  ;;  %v21399_v30 = vld [vmem:[#allocation29_spill] sm:$0xff] }
 0x462   :  { %6344 = vmatprep.mubr.bf16.mxu0 %v6048_v55  ;;  %6913 = vmatpush1.bf16.msra.mxu0 %v16920_v42  ;;  %v6020_v55 = vrot.slane %v4947_v61, 2  ;;  %v6021_v42 = vrot.slane %v4949_v4, 2  ;;  %v16958_v4 = vld [vmem:[#allocation10 + $0x40] ss:$8 sps:$4 sm:$0xff]  }
 0x463   :  { %6914 = vmatprep.subr.bf16.mxu0 %v16925_v21  ;;  %v21398_v21 = vld [vmem:[#allocation26_spill] sm:$0xff] }
 0x464   :  { %v18921_v18 = vsel %vm5122_vm1, %v6020_v55, %v6021_v42  ;;  %v21409_v55 = vld [vmem:[#allocation40_spill] sm:$0xff] }
 0x466   :  { %6915 = vmatpush1.bf16.msra.mxu0 %v16923_v63  ;;  %v6060_v63 = vpack.c.bf16 %v18921_v18, %v21398_v21  ;;  %v16962_v21 = vld [vmem:[#allocation10 + $0x64] ss:$8 sps:$4 sm:$0xff]  }
 0x467   :  { %6916 = vmatprep.subr.bf16.mxu0 %v16928_v49  ;;  %v6017_v49 = vrot.slane %v4946_v25, 2  ;;  %v4870_v25 = vld [vmem:[#allocation2 + $0x120] sm:$0xfc] }
 0x469   :  { %6345 = vmatmul.mubr.bf16.gmra.mrb[20].mxu0 %v6047_v58  ;;  %v18928_v34 = vsel %vm5122_vm1, %v6017_v49, %v6018_v31  ;;  %v21401_v58 = vld [vmem:[#allocation31_spill] sm:$0xff]  ;;  %v6663_v49 = vrot.slane %v4870_v25, 2  ;;  %v6664_v31 = vrot.slane %v4872_v10, 2 }
 0x46a   :  { %6354 = vmatprep.mubr.bf16.mxu0 %v6050_v60  ;;  %6917 = vmatpush1.bf16.msra.mxu0 %v16926_v51  ;;  %v6059_v41 = vpack.c.bf16 %v18928_v34, %v21399_v30  ;;  %v6061_v59 = vpack.c.bf16 %v18811_v16, %v21401_v58  ;;  %v6064_v60 = vpack.c.bf16 %v18817_v22, %v21402_v23  ;;  %v4987_v51 = vld [vmem:[#allocation2 + $0x4c8] sm:$0xfc]  ;;  %v4986_v16 = vld [vmem:[#allocation2 + $0x4c0] sm:$0xfc]  ;;  %v16967_v58 = vld [vmem:[#allocation10 + $0x70] ss:$8 sps:$4 sm:$0xff]  }
 0x46b   :  { %6918 = vmatprep.subr.bf16.mxu0 %v16931_v29  ;;  %v6063_v29 = vpack.c.bf16 %v18833_v15, %v21403_v24  ;;  %v6026_v57 = vrot.slane %v4987_v51, 2  ;;  %v6065_v22 = vpack.c.bf16 %v18855_v7, %v18836_v39  ;;  %v6023_v13 = vrot.slane %v4986_v16, 2  ;;  %v16949_v39 = vld [vmem:[#allocation10 + $0x10] ss:$8 sps:$4 sm:$0xff]   ;;  %v16952_v7 = vld [vmem:[#allocation10 + $0x20] ss:$8 sps:$4 sm:$0xff]  }
 0x46c   :  { %v16964_v30 = vld [vmem:[#allocation10 + $0x60] ss:$8 sps:$4 sm:$0xff]   ;;  %v16968_v23 = vld [vmem:[#allocation10 + $0x84] ss:$8 sps:$4 sm:$0xff]   ;;  %v16979_v16 = vld [vmem:[#allocation10 + $0xb0] ss:$8 sps:$4 sm:$0xff]  }
 0x46d   :  { %v21411_v51 = vld [vmem:[#allocation43_spill] sm:$0xff] }
 0x46e   :  { %6919 = vmatpush1.bf16.msra.mxu0 %v16929_v62  ;;  %v21404_v62 = vld [vmem:[#allocation41_spill] sm:$0xff]  ;;  %v16974_v24 = vld [vmem:[#allocation10 + $0xa4] ss:$8 sps:$4 sm:$0xff]  }
 0x46f   :  { %6920 = vmatprep.subr.bf16.mxu0 %v16934_v2  ;;  %v6066_v3 = vpack.c.bf16 %v18839_v14, %v21404_v62  ;;  %v18943_v2 = vsel %vm5122_vm1, %v6026_v57, %v6027_v8  ;;  %v21412_v62 = vld [vmem:[#allocation18_spill] sm:$0xff]  ;;  %v4913_v8 = vld [vmem:[#allocation2 + $0x278] sm:$0x3] }
 0x470   :  { %v4911_v57 = vld [vmem:[#allocation2 + $0x268] sm:$0xfc] }
 0x471   :  { %6355 = vmatmul.mubr.bf16.gmra.mrb[24].mxu0 %v6049_v36  ;;  %v4988_v36 = vld [vmem:[#allocation2 + $0x4d0] sm:$0x3] }
 0x472   :  { %6364 = vmatprep.mubr.bf16.mxu0 %v6052_v38  ;;  %6921 = vmatpush1.bf16.msra.mxu0 %v16932_v47  ;;  %v6068_v38 = vpack.c.bf16 %v18943_v2, %v18842_v27  ;;  %v6024_v15 = vrot.slane %v4988_v36, 2  ;;  %v16944_v47 = vld [vmem:[#allocation10 + $0x4] ss:$8 sps:$4 sm:$0xff]   ;;  %v6672_v36 = vrot.slane %v4911_v57, 2 }
 0x473   :  { %6922 = vmatprep.subr.bf16.mxu0 %v16937_v20  ;;  %v16946_v20 = vld [vmem:[#allocation10] ss:$8 sps:$4 sm:$0xff]   ;;  %8045 = vmatprep.subr.bf16.mxu1 %v16944_v47  ;;  %v16950_v27 = vld [vmem:[#allocation10 + $0x24] ss:$8 sps:$4 sm:$0xff]  }
 0x474   :  { %v18950_v14 = vsel %vm5122_vm1, %v6023_v13, %v6024_v15  ;;  %8046 = vmatpush1.bf16.msra.mxu1 %v16946_v20  ;;  %v21415_v13 = vld [vmem:[#allocation21_spill] sm:$0xff]  ;;  %v4912_v47 = vld [vmem:[#allocation2 + $0x270] sm:$0x3] }
 0x475   :  { %v6067_v56 = vpack.c.bf16 %v18950_v14, %v18858_v12  ;;  %v4871_v12 = vld [vmem:[#allocation2 + $0x128] sm:$0xfc] }
 0x476   :  { %6923 = vmatpush1.bf16.msra.mxu0 %v16935_v1  ;;  %v16947_v1 = vld [vmem:[#allocation10 + $0x14] ss:$8 sps:$4 sm:$0xff]   ;;  %v16980_v10 = vld [vmem:[#allocation10 + $0xc4] ss:$8 sps:$4 sm:$0xff]  }
 0x477   :  { %6924 = vmatprep.subr.bf16.mxu0 %v16940_v50  ;;  %v21405_v50 = vld [vmem:[#allocation33_spill] sm:$0xff]  ;;  %8047 = vmatprep.subr.bf16.mxu1 %v16947_v1 }
 0x478   :  { %8048 = vmatpush1.bf16.msra.mxu1 %v16949_v39  ;;  %v21416_v39 = vld [vmem:[#allocation22_spill] sm:$0xff] }
 0x479   :  { %6365 = vmatmul.mubr.bf16.gmra.mrb[28].mxu0 %v6051_v46  ;;  %v21406_v46 = vld [vmem:[#allocation36_spill] sm:$0xff]  ;;  %8049 = vmatprep.subr.bf16.mxu1 %v16950_v27 }
 0x47a   :  { %6374 = vmatprep.mubr.bf16.mxu0 %v6054_v33  ;;  %6925 = vmatpush1.bf16.msra.mxu0 %v16938_v6  ;;  %v16953_v33 = vld [vmem:[#allocation10 + $0x34] ss:$8 sps:$4 sm:$0xff]   ;;  %v21407_v6 = vld [vmem:[#allocation39_spill] sm:$0xff] }
 0x47b   :  { %6926 = vmatprep.subr.bf16.mxu0 %v16943_v0  ;;  %v4873_v0 = vld [vmem:[#allocation2 + $0x138] sm:$0x3] }
 0x47c   :  { %8050 = vmatpush1.bf16.msra.mxu1 %v16952_v7  ;;  %v6667_v61 = vrot.slane %v4873_v0, 2  ;;  %v4953_v0 = vld [vmem:[#allocation2 + $0x3b8] sm:$0x3] }
 0x47d   :  { %8051 = vmatprep.subr.bf16.mxu1 %v16953_v33  ;;  %v21418_v33 = vld [vmem:[#allocation24_spill] sm:$0xff] }
 0x47e   :  { %6927 = vmatpush1.bf16.msra.mxu0 %v16941_v54  ;;  %v16955_v54 = vld [vmem:[#allocation10 + $0x30] ss:$8 sps:$4 sm:$0xff]  }
 0x480   :  { %8052 = vmatpush1.bf16.msra.mxu1 %v16955_v54 }
 0x481   :  { %6375 = vmatmul.mubr.bf16.gmra.mrb[32].mxu0 %v6053_v43  ;;  %v16956_v43 = vld [vmem:[#allocation10 + $0x44] ss:$8 sps:$4 sm:$0xff]  }
 0x482   :  { %6384 = vmatprep.mubr.bf16.mxu0 %v6056_v19  ;;  %v6666_v19 = vrot.slane %v4871_v12, 2  ;;  %8053 = vmatprep.subr.bf16.mxu1 %v16956_v43  ;;  %v4951_v12 = vld [vmem:[#allocation2 + $0x3a8] sm:$0xfc] }
 0x483   :  { %v6678_v54 = vrot.slane %v4951_v12, 2  ;;  %v21420_v43 = vld [vmem:[#allocation27_spill] sm:$0xff] }
 0x484   :  { %v6668_v42 = vsel %vm5122_vm1, %v6666_v19, %v6667_v61  ;;  %8054 = vmatpush1.bf16.msra.mxu1 %v16958_v4  ;;  %v21421_v19 = vld [vmem:[#allocation28_spill] sm:$0xff]  ;;  %v4950_v4 = vld [vmem:[#allocation2 + $0x3a0] sm:$0xfc] }
 0x489   :  { %6385 = vmatmul.mubr.bf16.gmra.mrb[36].mxu0 %v6055_v32  ;;  %v21408_v32 = vld [vmem:[#allocation38_spill] sm:$0xff] }
 0x48a   :  { %6394 = vmatprep.mubr.bf16.mxu0 %v6058_v52  ;;  %v16959_v52 = vld [vmem:[#allocation10 + $0x54] ss:$8 sps:$4 sm:$0xff]  }
 0x48b   :  { %8055 = vmatprep.subr.bf16.mxu1 %v16959_v52  ;;  %v6675_v52 = vrot.slane %v4950_v4, 2 }
 0x491   :  { %6395 = vmatmul.mubr.bf16.gmra.mrb[40].mxu0 %v6057_v35  ;;  %v16961_v35 = vld [vmem:[#allocation10 + $0x50] ss:$8 sps:$4 sm:$0xff]  }
 0x492   :  { %6404 = vmatprep.mubr.bf16.mxu0 %v6060_v63  ;;  %v6696_v63 = vpack.c.bf16 %v6668_v42, %v18877_v5  ;;  %8056 = vmatpush1.bf16.msra.mxu1 %v16961_v35  ;;  %v16971_v5 = vld [vmem:[#allocation10 + $0x94] ss:$8 sps:$4 sm:$0xff]   ;;  %v21422_v42 = vld [vmem:[#allocation30_spill] sm:$0xff] }
 0x493   :  { %8057 = vmatprep.subr.bf16.mxu1 %v16962_v21  ;;  %v16982_v35 = vld [vmem:[#allocation10 + $0xc0] ss:$8 sps:$4 sm:$0xff]  }
 0x496   :  { %8058 = vmatpush1.bf16.msra.mxu1 %v16964_v30  ;;  %v16988_v30 = vld [vmem:[#allocation10 + $0xe0] ss:$8 sps:$4 sm:$0xff]  }
 0x497   :  { %8059 = vmatprep.subr.bf16.mxu1 %v16965_v9  ;;  %v16991_v9 = vld [vmem:[#allocation10 + $0xf0] ss:$8 sps:$4 sm:$0xff]  }
 0x499   :  { %6405 = vmatmul.mubr.bf16.gmra.mrb[44].mxu0 %v6059_v41  ;;  %v21410_v41 = vld [vmem:[#allocation42_spill] sm:$0xff] }
 0x49a   :  { %6414 = vmatprep.mubr.bf16.mxu0 %v6062_v40  ;;  %v6665_v40 = vsel %vm5122_vm1, %v6663_v49, %v6664_v31  ;;  %8060 = vmatpush1.bf16.msra.mxu1 %v16967_v58  ;;  %v16985_v49 = vld [vmem:[#allocation10 + $0xd0] ss:$8 sps:$4 sm:$0xff]  }
 0x49b   :  { %8061 = vmatprep.subr.bf16.mxu1 %v16968_v23  ;;  %v21423_v31 = vld [vmem:[#allocation35_spill] sm:$0xff] }
 0x49c   :  { %v16994_v23 = vld [vmem:[#allocation10 + $0x304] ss:$8 sps:$4 sm:$0xff]  }
 0x4a1   :  { %6415 = vmatmul.mubr.bf16.gmra.mrb[48].mxu0 %v6061_v59  ;;  %v6695_v59 = vpack.c.bf16 %v6665_v40, %v18884_v17  ;;  %v21413_v17 = vld [vmem:[#allocation19_spill] sm:$0xff]  ;;  %v4993_v40 = vld [vmem:[#allocation2 + $0x4f8] sm:$0x3] }
 0x4a2   :  { %6424 = vmatprep.mubr.bf16.mxu0 %v6064_v60  ;;  %v16970_v60 = vld [vmem:[#allocation10 + $0x80] ss:$8 sps:$4 sm:$0xff]  }
 0x4a3   :  { %8062 = vmatpush1.bf16.msra.mxu1 %v16970_v60 }
 0x4a4   :  { %8063 = vmatprep.subr.bf16.mxu1 %v16971_v5  ;;  %v4990_v5 = vld [vmem:[#allocation2 + $0x4e0] sm:$0xfc] }
 0x4a7   :  { %8064 = vmatpush1.bf16.msra.mxu1 %v16973_v44  ;;  %v6681_v44 = vrot.slane %v4990_v5, 2 }
 0x4a8   :  { %8065 = vmatprep.subr.bf16.mxu1 %v16974_v24 }
 0x4a9   :  { %6425 = vmatmul.mubr.bf16.gmra.mrb[52].mxu0 %v6063_v29  ;;  %v16976_v29 = vld [vmem:[#allocation10 + $0xa0] ss:$8 sps:$4 sm:$0xff]  }
 0x4aa   :  { %6434 = vmatprep.mubr.bf16.mxu0 %v6066_v3  ;;  %v16977_v3 = vld [vmem:[#allocation10 + $0xb4] ss:$8 sps:$4 sm:$0xff]  }
 0x4ab   :  { %8066 = vmatpush1.bf16.msra.mxu1 %v16976_v29 }
 0x4ac   :  { %8067 = vmatprep.subr.bf16.mxu1 %v16977_v3  ;;  %v7345_v3 = vld [vmem:[#allocation9] sm:$0x3] }
 0x4af   :  { %8068 = vmatpush1.bf16.msra.mxu1 %v16979_v16 }
 0x4b0   :  { %8069 = vmatprep.subr.bf16.mxu1 %v16980_v10 }
 0x4b1   :  { %6435 = vmatmul.mubr.bf16.gmra.mrb[56].mxu0 %v6065_v22  ;;  %v6673_v22 = vrot.slane %v4913_v8, 2 }
 0x4b2   :  { %6444 = vmatprep.mubr.bf16.mxu0 %v6068_v38  ;;  %v21414_v38 = vld [vmem:[#allocation20_spill] sm:$0xff] }
 0x4b3   :  { %v6674_v15 = vsel %vm5122_vm1, %v6672_v36, %v6673_v22  ;;  %8070 = vmatpush1.bf16.msra.mxu1 %v16982_v35 }
 0x4b4   :  { %v6698_v20 = vpack.c.bf16 %v6674_v15, %v18899_v11  ;;  %v6679_v11 = vrot.slane %v4953_v0, 2 }
 0x4b6   :  { %v6680_v61 = vsel %vm5122_vm1, %v6678_v54, %v6679_v11  ;;  %v16992_v11 = vld [vmem:[#allocation10 + $0x300] ss:$8 sps:$4 sm:$0xff]  }
 0x4b9   :  { %6445 = vmatmul.mubr.bf16.gmra.mrb[60].mxu0 %v6067_v56  ;;  %v4910_v56 = vld [vmem:[#allocation2 + $0x260] sm:$0xfc] }
 0x4ba   :  { %6928 = vmatprep.mubr.bf16.mxu0 %v21405_v50  ;;  %v6669_v1 = vrot.slane %v4910_v56, 2  ;;  %v6670_v50 = vrot.slane %v4912_v47, 2 }
 0x4bc   :  { %v6671_v27 = vsel %vm5122_vm1, %v6669_v1, %v6670_v50 }
 0x4bd   :  { %v6697_v7 = vpack.c.bf16 %v6671_v27, %v18906_v48  ;;  %v6700_v48 = vpack.c.bf16 %v6680_v61, %v18921_v18  ;;  %v16986_v18 = vld [vmem:[#allocation10 + $0xe4] ss:$8 sps:$4 sm:$0xff]  }
 0x4c1   :  { %6929 = vmatmul.mubr.bf16.vlgmr.msra.gmra.mrb[0].mxu0 %v21406_v46  ;;  %v21417_v46 = vld [vmem:[#allocation23_spill] sm:$0xff] }
 0x4c2   :  { %6938 = vmatprep.mubr.bf16.mxu0 %v21407_v6  ;;  %v21419_v6 = vld [vmem:[#allocation25_spill] sm:$0xff] }
 0x4c9   :  { %6939 = vmatmul.mubr.bf16.gmra.mrb[4].mxu0 %v21408_v32  ;;  %v4952_v32 = vld [vmem:[#allocation2 + $0x3b0] sm:$0x3] }
 0x4ca   :  { %6948 = vmatprep.mubr.bf16.mxu0 %v21409_v55  ;;  %v6676_v55 = vrot.slane %v4952_v32, 2  ;;  %v19018_v32 = vld [vmem:[#allocation2 + $0x8] sm:$0xff] }
 0x4cc   :  { %v6677_v25 = vsel %vm5122_vm1, %v6675_v52, %v6676_v55  ;;  %v16997_v52 = vld [vmem:[#allocation10 + $0x314] ss:$8 sps:$4 sm:$0xff]  }
 0x4cd   :  { %v6699_v21 = vpack.c.bf16 %v6677_v25, %v18928_v34  ;;  %v4991_v34 = vld [vmem:[#allocation2 + $0x4e8] sm:$0xfc] }
 0x4ce   :  { %v6684_v58 = vrot.slane %v4991_v34, 2 }
 0x4d1   :  { %6949 = vmatmul.mubr.bf16.gmra.mrb[8].mxu0 %v21410_v41  ;;  %v16989_v41 = vld [vmem:[#allocation10 + $0xf4] ss:$8 sps:$4 sm:$0xff]  }
 0x4d2   :  { %6958 = vmatprep.mubr.bf16.mxu0 %v6696_v63  ;;  %v16983_v63 = vld [vmem:[#allocation10 + $0xd4] ss:$8 sps:$4 sm:$0xff]  }
 0x4d3   :  { %8071 = vmatprep.subr.bf16.mxu1 %v16983_v63 }
 0x4d4   :  { %8072 = vmatpush1.bf16.msra.mxu1 %v16985_v49 }
 0x4d5   :  { %8073 = vmatprep.subr.bf16.mxu1 %v16986_v18 }
 0x4d8   :  { %8074 = vmatpush1.bf16.msra.mxu1 %v16988_v30 }
 0x4d9   :  { %6959 = vmatmul.mubr.bf16.gmra.mrb[12].mxu0 %v6695_v59  ;;  %8075 = vmatprep.subr.bf16.mxu1 %v16989_v41  ;;  %v6685_v59 = vrot.slane %v4993_v40, 2 }
 0x4da   :  { %6968 = vmatprep.mubr.bf16.mxu0 %v21411_v51  ;;  %v4992_v51 = vld [vmem:[#allocation2 + $0x4f0] sm:$0x3] }
 0x4db   :  { %v6686_v60 = vsel %vm5122_vm1, %v6684_v58, %v6685_v59  ;;  %v6682_v24 = vrot.slane %v4992_v51, 2 }
 0x4dc   :  { %8076 = vmatpush1.bf16.msra.mxu1 %v16991_v9 }
 0x4dd   :  { %8527 = vmatprep.subr.bf16.mxu1 %v16994_v23 }
 0x4e1   :  { %6969 = vmatmul.mubr.bf16.gmra.mrb[16].mxu0 %v21412_v62 }
 0x4e2   :  { %6978 = vmatprep.mubr.bf16.mxu0 %v21413_v17 }
 0x4e9   :  { %6979 = vmatmul.mubr.bf16.gmra.mrb[20].mxu0 %v21414_v38 }
 0x4ea   :  { %6988 = vmatprep.mubr.bf16.mxu0 %v21415_v13 }
 0x4f1   :  { %6989 = vmatmul.mubr.bf16.gmra.mrb[24].mxu0 %v21416_v39 }
 0x4f2   :  { %6998 = vmatprep.mubr.bf16.mxu0 %v6698_v20 }
 0x4f9   :  { %6999 = vmatmul.mubr.bf16.gmra.mrb[28].mxu0 %v6697_v7 }
 0x4fa   :  { %7008 = vmatprep.mubr.bf16.mxu0 %v21417_v46 }
 0x501   :  { %7009 = vmatmul.mubr.bf16.gmra.mrb[32].mxu0 %v21418_v33 }
 0x502   :  { %7018 = vmatprep.mubr.bf16.mxu0 %v21419_v6 }
 0x509   :  { %7019 = vmatmul.mubr.bf16.gmra.mrb[36].mxu0 %v21420_v43 }
 0x50a   :  { %7028 = vmatprep.mubr.bf16.mxu0 %v21421_v19 }
 0x511   :  { %7029 = vmatmul.mubr.bf16.gmra.mrb[40].mxu0 %v21422_v42 }
 0x512   :  { %7038 = vmatprep.mubr.bf16.mxu0 %v6700_v48 }
 0x519   :  { %7039 = vmatmul.mubr.bf16.gmra.mrb[44].mxu0 %v6699_v21 }
 0x51a   :  { %7048 = vmatprep.mubr.bf16.mxu0 %v21423_v31 }
 0x521   :  { %7049 = vmatmul.mubr.bf16.gmra.mrb[48].mxu0 %v18824_v28  ;;  %v6702_v28 = vpack.c.bf16 %v6686_v60, %v18943_v2 }
 0x522   :  { %7058 = vmatprep.mubr.bf16.mxu0 %v18828_v45  ;;  %v6683_v45 = vsel %vm5122_vm1, %v6681_v44, %v6682_v24 }
 0x523   :  { %v6701_v29 = vpack.c.bf16 %v6683_v45, %v18950_v14  ;;  %v16995_v45 = vld [vmem:[#allocation10 + $0x310] ss:$8 sps:$4 sm:$0xff]  }
 0x529   :  { %7059 = vmatmul.mubr.bf16.gmra.mrb[52].mxu0 %v18846_v37  ;;  %v7347_v37 = vlaneseq }
 0x52a   :  { %7068 = vmatprep.mubr.bf16.mxu0 %v18850_v26 }
 0x52b   :  { %v18994_v26 = vshrl.u32 %v7347_v37, 7 }
 0x52d   :  { %21424 = vst [vmem:[#allocation26_spill] sm:$0xff] %v18994_v26  ;;  %v21012_v62 = vsub.s32 0, %v18994_v26  ;;  %v21011_v17 = vsub.s32 1, %v18994_v26 }
 0x52f   :  { %v19000_v2 = vrot.slane %v7345_v3, %v21012_v62 }
 0x531   :  { %7069 = vmatmul.mubr.bf16.gmra.mrb[56].mxu0 %v18862_v53  ;;  %v19004_v53 = vrot.slane %v7345_v3, %v21011_v17 }
 0x532   :  { %7078 = vmatprep.mubr.bf16.mxu0 %v6702_v28 }
 0x539   :  { %7079 = vmatmul.mubr.bf16.gmra.mrb[60].mxu0 %v6701_v29 }
 0x594   :  { %v6930_v57 = vpop.f32.mrb[0].mxu0 }
 0x595   :  { %v7357_v14 = vadd.f32 %v19000_v2, %v6930_v57  ;;  %v6932_v8 = vpop.f32.mrb[1].mxu0 }
 0x596   :  { %v7358_v16 = vadd.f32 %v19004_v53, %v6932_v8  ;;  %v6934_v36 = vpop.f32.mrb[2].mxu0  ;;  %v17000_v8 = vld [vmem:[#allocation10 + $0x324] ss:$8 sps:$4 sm:$0xff]  }
 0x597   :  { %v7485_v22 = vrot.slane %v7357_v14, 7  ;;  %v7359_v38 = vadd.f32 %v19000_v2, %v6934_v36  ;;  %v6936_v13 = vpop.f32.mrb[3].mxu0 }
 0x598   :  { %v7486_v15 = vrot.slane %v7358_v16, 7  ;;  %v7360_v56 = vadd.f32 %v19004_v53, %v6936_v13 }
 0x599   :  { %7613 = vst [vmem:[#allocation2 + $0x20] sm:$0xfe] %v7485_v22  ;;  %7615 = vst [vmem:[#allocation2 + $0x30] sm:$0x1] %v7485_v22  ;;  %v7487_v47 = vrot.slane %v7359_v38, 7 }
 0x59a   :  { %7614 = vst [vmem:[#allocation2 + $0x28] sm:$0xfe] %v7486_v15  ;;  %7616 = vst [vmem:[#allocation2 + $0x38] sm:$0x1] %v7486_v15  ;;  %v7488_v20 = vrot.slane %v7360_v56, 7 }
 0x59b   :  { %7617 = vst [vmem:[#allocation2 + $0x40] sm:$0xfe] %v7487_v47  ;;  %7619 = vst [vmem:[#allocation2 + $0x50] sm:$0x1] %v7487_v47  ;;  %v16998_v15 = vld [vmem:[#allocation10 + $0x320] ss:$8 sps:$4 sm:$0xff]  }
 0x59c   :  { %7618 = vst [vmem:[#allocation2 + $0x48] sm:$0xfe] %v7488_v20  ;;  %7620 = vst [vmem:[#allocation2 + $0x58] sm:$0x1] %v7488_v20  ;;  %v6940_v1 = vpop.f32.mrb[4].mxu0 }
 0x59d   :  { %v7361_v50 = vadd.f32 %v19000_v2, %v6940_v1  ;;  %v6942_v39 = vpop.f32.mrb[5].mxu0 }
 0x59e   :  { %v7362_v27 = vadd.f32 %v19004_v53, %v6942_v39  ;;  %v6944_v7 = vpop.f32.mrb[6].mxu0 }
 0x59f   :  { %v7489_v46 = vrot.slane %v7361_v50, 7  ;;  %v7363_v33 = vadd.f32 %v19000_v2, %v6944_v7  ;;  %v6946_v6 = vpop.f32.mrb[7].mxu0  ;;  %v17003_v7 = vld [vmem:[#allocation10 + $0x334] ss:$8 sps:$4 sm:$0xff]  }
 0x5a0   :  { %v7490_v12 = vrot.slane %v7362_v27, 7  ;;  %v7364_v0 = vadd.f32 %v19004_v53, %v6946_v6  ;;  %v19014_v54 = vld [vmem:[#allocation2 + $0x20] sm:$0xff]  ;;  %v9504_v19 = vld [vmem:[#allocation2 + $0x30] sm:$0x1] }
 0x5a1   :  { %v9502_v43 = vld [vmem:[#allocation2 + $0x20] sm:$0xfe]  ;;  %7621 = vst [vmem:[#allocation2 + $0x60] sm:$0xfe] %v7489_v46  ;;  %7623 = vst [vmem:[#allocation2 + $0x70] sm:$0x1] %v7489_v46  ;;  %v7821_v48 = vpack.c.bf16 %v19014_v54, %v19018_v32 }
 0x5a2   :  { %v7491_v61 = vrot.slane %v7363_v33, 7  ;;  %v19016_v4 = vld [vmem:[#allocation2 + $0x28] sm:$0xff]  ;;  %v9505_v42 = vld [vmem:[#allocation2 + $0x38] sm:$0x1]  ;;  %7622 = vst [vmem:[#allocation2 + $0x68] sm:$0xfe] %v7490_v12 }
 0x5a3   :  { %v9503_v55 = vld [vmem:[#allocation2 + $0x28] sm:$0xfe]  ;;  %7624 = vst [vmem:[#allocation2 + $0x78] sm:$0x1] %v7490_v12  ;;  %v7492_v25 = vrot.slane %v7364_v0, 7  ;;  %v7822_v10 = vpack.c.bf16 %v19016_v4, %v19018_v32  ;;  %v19024_v35 = vld [vmem:[#allocation2 + $0x40] sm:$0xff] }
 0x5a4   :  { %v9795_v21 = vrot.slane %v9503_v55, 1  ;;  %v9796_v63 = vrot.slane %v9505_v42, 1  ;;  %v9506_v49 = vld [vmem:[#allocation2 + $0x40] sm:$0xfe]  ;;  %7625 = vst [vmem:[#allocation2 + $0x80] sm:$0xfe] %v7491_v61 }
 0x5a5   :  { %7627 = vst [vmem:[#allocation2 + $0x90] sm:$0x1] %v7491_v61  ;;  %v19026_v31 = vld [vmem:[#allocation2 + $0x48] sm:$0xff]  ;;  %v9792_v30 = vrot.slane %v9502_v43, 1  ;;  %v9793_v41 = vrot.slane %v9504_v19, 1  ;;  %v9798_v34 = vrot.slane %v9506_v49, 1  ;;  %8077 = vmatprep.mubr.bf16.mxu1 %v7822_v10 }
 0x5a6   :  { %v9507_v9 = vld [vmem:[#allocation2 + $0x48] sm:$0xfe]  ;;  %7626 = vst [vmem:[#allocation2 + $0x88] sm:$0xfe] %v7492_v25  ;;  %7628 = vst [vmem:[#allocation2 + $0x98] sm:$0x1] %v7492_v25  ;;  %8078 = vmatmul.mubr.bf16.vlgmr.msra.gmra.mrb[0].mxu1 %v7821_v48  ;;  %v19035_v29 = vsel %vm2675_vm0, %v9795_v21, %v9796_v63 }
 0x5a7   :  { %v6950_v40 = vpop.f32.mrb[8].mxu0  ;;  %v9509_v59 = vld [vmem:[#allocation2 + $0x58] sm:$0x1]  ;;  %v9801_v23 = vrot.slane %v9507_v9, 1  ;;  %v9508_v60 = vld [vmem:[#allocation2 + $0x50] sm:$0x1]  ;;  %8528 = vmatpush1.bf16.msra.mxu1 %v16992_v11  ;;  %v19039_v16 = vsel %vm2675_vm0, %v9792_v30, %v9793_v41 }
 0x5a8   :  { %v7365_v5 = vadd.f32 %v19000_v2, %v6950_v40  ;;  %v6952_v51 = vpop.f32.mrb[9].mxu0  ;;  %v9802_v28 = vrot.slane %v9509_v59, 1  ;;  %21425 = vst [vmem:[#allocation29_spill] sm:$0xff] %v19035_v29  ;;  %v9799_v37 = vrot.slane %v9508_v60, 1  ;;  %8529 = vmatprep.subr.bf16.mxu1 %v16997_v52  ;;  %21426 = vst [vmem:[#allocation32_spill] sm:$0xff] %v19039_v16  ;;  %v19045_v13 = vld [vmem:[#allocation2 + $0x60] sm:$0xff] }
 0x5a9   :  { %v7366_v44 = vadd.f32 %v19004_v53, %v6952_v51  ;;  %v6954_v24 = vpop.f32.mrb[10].mxu0  ;;  %v9510_v56 = vld [vmem:[#allocation2 + $0x60] sm:$0xfe]  ;;  %v9512_v47 = vld [vmem:[#allocation2 + $0x70] sm:$0x1]  ;;  %v19052_v39 = vld [vmem:[#allocation2 + $0x68] sm:$0xff]  ;;  %v19056_v27 = vpack.c.bf16 %v19045_v13, %v19024_v35 }
 0x5aa   :  { %v7493_v3 = vrot.slane %v7365_v5, 7  ;;  %v7367_v57 = vadd.f32 %v19000_v2, %v6954_v24  ;;  %v6956_v14 = vpop.f32.mrb[11].mxu0  ;;  %v19042_v36 = vsel %vm2675_vm0, %v9801_v23, %v9802_v28  ;;  %v19048_v20 = vsel %vm2675_vm0, %v9798_v34, %v9799_v37  ;;  %v9511_v46 = vld [vmem:[#allocation2 + $0x68] sm:$0xfe]  ;;  %v9513_v33 = vld [vmem:[#allocation2 + $0x78] sm:$0x1] }
 0x5ab   :  { %21427 = vst [vmem:[#allocation31_spill] sm:$0xff] %v19042_v36  ;;  %v7494_v22 = vrot.slane %v7366_v44, 7  ;;  %v7368_v38 = vadd.f32 %v19004_v53, %v6956_v14  ;;  %21428 = vst [vmem:[#allocation34_spill] sm:$0xff] %v19048_v20  ;;  %v19062_v0 = vpack.c.bf16 %v19052_v39, %v19026_v31  ;;  %8530 = vmatpush1.bf16.msra.mxu1 %v16995_v45  ;;  %v19064_v11 = vld [vmem:[#allocation2 + $0x80] sm:$0xff]  ;;  %v9807_v43 = vrot.slane %v9511_v46, 1 }
 0x5ac   :  { %7629 = vst [vmem:[#allocation2 + $0xa0] sm:$0xfe] %v7493_v3  ;;  %7631 = vst [vmem:[#allocation2 + $0xb0] sm:$0x1] %v7493_v3  ;;  %v7495_v50 = vrot.slane %v7367_v57, 7  ;;  %v9808_v19 = vrot.slane %v9513_v33, 1  ;;  %8531 = vmatprep.subr.bf16.mxu1 %v17000_v8 }
 0x5ad   :  { %21429 = vst [vmem:[#allocation37_spill] sm:$0xff] %v19056_v27  ;;  %7630 = vst [vmem:[#allocation2 + $0xa8] sm:$0xfe] %v7494_v22  ;;  %v7496_v12 = vrot.slane %v7368_v38, 7  ;;  %v9514_v61 = vld [vmem:[#allocation2 + $0x80] sm:$0xfe]  ;;  %8087 = vmatprep.mubr.bf16.mxu1 %v19062_v0 }
 0x5ae   :  { %7632 = vst [vmem:[#allocation2 + $0xb8] sm:$0x1] %v7494_v22  ;;  %21430 = vst [vmem:[#allocation41_spill] sm:$0xff] %v19062_v0  ;;  %v19066_v48 = vld [vmem:[#allocation2 + $0x88] sm:$0xff]  ;;  %v9804_v55 = vrot.slane %v9510_v56, 1  ;;  %v9805_v42 = vrot.slane %v9512_v47, 1  ;;  %8088 = vmatmul.mubr.bf16.gmra.mrb[4].mxu1 %v19056_v27  ;;  %v19077_v5 = vsel %vm2675_vm0, %v9807_v43, %v9808_v19 }
 0x5af   :  { %7633 = vst [vmem:[#allocation2 + $0xc0] sm:$0xfe] %v7495_v50  ;;  %7635 = vst [vmem:[#allocation2 + $0xd0] sm:$0x1] %v7495_v50  ;;  %v9515_v25 = vld [vmem:[#allocation2 + $0x88] sm:$0xfe]  ;;  %8532 = vmatpush1.bf16.msra.mxu1 %v16998_v15 }
 0x5b0   :  { %v9810_v10 = vrot.slane %v9514_v61, 1  ;;  %7634 = vst [vmem:[#allocation2 + $0xc8] sm:$0xfe] %v7496_v12  ;;  %7636 = vst [vmem:[#allocation2 + $0xd8] sm:$0x1] %v7496_v12  ;;  %v6960_v21 = vpop.f32.mrb[12].mxu0  ;;  %8533 = vmatprep.subr.bf16.mxu1 %v17003_v7  ;;  %v19081_v37 = vsel %vm2675_vm0, %v9804_v55, %v9805_v42 }
 0x5b1   :  { %v9517_v49 = vld [vmem:[#allocation2 + $0x98] sm:$0x1]  ;;  %v9813_v30 = vrot.slane %v9515_v25, 1  ;;  %v9516_v41 = vld [vmem:[#allocation2 + $0x90] sm:$0x1]  ;;  %v7369_v9 = vadd.f32 %v19000_v2, %v6960_v21  ;;  %v6962_v34 = vpop.f32.mrb[13].mxu0 }
 0x5b2   :  { %v9814_v40 = vrot.slane %v9517_v49, 1  ;;  %v7370_v59 = vadd.f32 %v19004_v53, %v6962_v34  ;;  %v6964_v23 = vpop.f32.mrb[14].mxu0  ;;  %v17001_v60 = vld [vmem:[#allocation10 + $0x330] ss:$8 sps:$4 sm:$0xff]   ;;  %21431 = vst [vmem:[#allocation33_spill] sm:$0xff] %v19077_v5  ;;  %v9811_v51 = vrot.slane %v9516_v41, 1 }
 0x5b3   :  { %v7497_v28 = vrot.slane %v7369_v9, 7  ;;  %v7371_v44 = vadd.f32 %v19000_v2, %v6964_v23  ;;  %v6966_v24 = vpop.f32.mrb[15].mxu0  ;;  %v17006_v45 = vld [vmem:[#allocation10 + $0x344] ss:$8 sps:$4 sm:$0xff]   ;;  %21432 = vst [vmem:[#allocation36_spill] sm:$0xff] %v19081_v37  ;;  %8534 = vmatpush1.bf16.msra.mxu1 %v17001_v60 }
 0x5b4   :  { %v19084_v3 = vsel %vm2675_vm0, %v9813_v30, %v9814_v40  ;;  %v7498_v57 = vrot.slane %v7370_v59, 7  ;;  %v7372_v14 = vadd.f32 %v19004_v53, %v6966_v24  ;;  %v19087_v8 = vld [vmem:[#allocation2 + $0xa0] sm:$0xff]  ;;  %v9520_v15 = vld [vmem:[#allocation2 + $0xb0] sm:$0x1]  ;;  %v19090_v56 = vsel %vm2675_vm0, %v9810_v10, %v9811_v51  ;;  %v19094_v7 = vld [vmem:[#allocation2 + $0xa8] sm:$0xff]  ;;  %8535 = vmatprep.subr.bf16.mxu1 %v17006_v45  ;;  %v6970_v59 = vpop.f32.mrb[16].mxu0 }
 0x5b5   :  { %21433 = vst [vmem:[#allocation39_spill] sm:$0xff] %v19084_v3  ;;  %v17004_v22 = vld [vmem:[#allocation10 + $0x340] ss:$8 sps:$4 sm:$0xff]   ;;  %21434 = vst [vmem:[#allocation38_spill] sm:$0xff] %v19090_v56  ;;  %v7499_v50 = vrot.slane %v7371_v44, 7  ;;  %v19098_v46 = vpack.c.bf16 %v19087_v8, %v19064_v11  ;;  %v19104_v55 = vpack.c.bf16 %v19094_v7, %v19066_v48  ;;  %v9817_v9 = vrot.slane %v9520_v15, 1 }
 0x5b6   :  { %v9518_v38 = vld [vmem:[#allocation2 + $0xa0] sm:$0xfe]  ;;  %7637 = vst [vmem:[#allocation2 + $0xe0] sm:$0xfe] %v7497_v28  ;;  %7639 = vst [vmem:[#allocation2 + $0xf0] sm:$0x1] %v7497_v28  ;;  %v7373_v44 = vadd.f32 %v19000_v2, %v6970_v59 }
 0x5b7   :  { %21435 = vst [vmem:[#allocation40_spill] sm:$0xff] %v19098_v46  ;;  %v17009_v33 = vld [vmem:[#allocation10 + $0x354] ss:$8 sps:$4 sm:$0xff]   ;;  %v9519_v12 = vld [vmem:[#allocation2 + $0xa8] sm:$0xfe]  ;;  %v7500_v61 = vrot.slane %v7372_v14, 7  ;;  %8097 = vmatprep.mubr.bf16.mxu1 %v19104_v55  ;;  %8536 = vmatpush1.bf16.msra.mxu1 %v17004_v22 }
 0x5b8   :  { %v9521_v43 = vld [vmem:[#allocation2 + $0xb8] sm:$0x1]  ;;  %7638 = vst [vmem:[#allocation2 + $0xe8] sm:$0xfe] %v7498_v57  ;;  %7640 = vst [vmem:[#allocation2 + $0xf8] sm:$0x1] %v7498_v57  ;;  %8098 = vmatmul.mubr.bf16.gmra.mrb[8].mxu1 %v19098_v46  ;;  %8537 = vmatprep.subr.bf16.mxu1 %v17009_v33 }
 0x5b9   :  { %21436 = vst [vmem:[#allocation42_spill] sm:$0xff] %v19104_v55  ;;  %v19106_v42 = vld [vmem:[#allocation2 + $0xc0] sm:$0xff]  ;;  %v9819_v25 = vrot.slane %v9519_v12, 1  ;;  %v9820_v10 = vrot.slane %v9521_v43, 1  ;;  %7641 = vst [vmem:[#allocation2 + $0x100] sm:$0xfe] %v7499_v50 }
 0x5ba   :  { %v9522_v21 = vld [vmem:[#allocation2 + $0xc0] sm:$0xfe]  ;;  %7643 = vst [vmem:[#allocation2 + $0x110] sm:$0x1] %v7499_v50  ;;  %v19108_v49 = vld [vmem:[#allocation2 + $0xc8] sm:$0xff]  ;;  %v9816_v41 = vrot.slane %v9518_v38, 1 }
 0x5bb   :  { %v9523_v34 = vld [vmem:[#allocation2 + $0xc8] sm:$0xfe]  ;;  %v9822_v40 = vrot.slane %v9522_v21, 1  ;;  %7642 = vst [vmem:[#allocation2 + $0x108] sm:$0xfe] %v7500_v61  ;;  %v6972_v24 = vpop.f32.mrb[17].mxu0  ;;  %v19119_v15 = vsel %vm2675_vm0, %v9819_v25, %v9820_v10 }
 0x5bc   :  { %7644 = vst [vmem:[#allocation2 + $0x118] sm:$0x1] %v7500_v61  ;;  %v9525_v60 = vld [vmem:[#allocation2 + $0xd8] sm:$0x1]  ;;  %v9825_v51 = vrot.slane %v9523_v34, 1  ;;  %v7374_v57 = vadd.f32 %v19004_v53, %v6972_v24  ;;  %v6974_v14 = vpop.f32.mrb[18].mxu0  ;;  %v19123_v34 = vsel %vm2675_vm0, %v9816_v41, %v9817_v9 }
 0x5bd   :  { %v9524_v28 = vld [vmem:[#allocation2 + $0xd0] sm:$0x1]  ;;  %v9826_v45 = vrot.slane %v9525_v60, 1  ;;  %v17007_v38 = vld [vmem:[#allocation10 + $0x350] ss:$8 sps:$4 sm:$0xff]   ;;  %21437 = vst [vmem:[#allocation43_spill] sm:$0xff] %v19119_v15  ;;  %v7375_v43 = vadd.f32 %v19000_v2, %v6974_v14 }
 0x5be   :  { %v9823_v50 = vrot.slane %v9524_v28, 1  ;;  %v7501_v12 = vrot.slane %v7373_v44, 7  ;;  %v6976_v61 = vpop.f32.mrb[19].mxu0  ;;  %v17012_v21 = vld [vmem:[#allocation10 + $0x364] ss:$8 sps:$4 sm:$0xff]   ;;  %21438 = vst [vmem:[#allocation18_spill] sm:$0xff] %v19123_v34  ;;  %8538 = vmatpush1.bf16.msra.mxu1 %v17007_v38 }
 0x5bf   :  { %v19126_v59 = vsel %vm2675_vm0, %v9825_v51, %v9826_v45  ;;  %v7502_v60 = vrot.slane %v7374_v57, 7  ;;  %v7376_v22 = vadd.f32 %v19004_v53, %v6976_v61  ;;  %v7755_v24 = vld [vmem:[#allocation2 + $0xe0] sm:$0xff]  ;;  %v7503_v33 = vrot.slane %v7375_v43, 7  ;;  %v7756_v28 = vld [vmem:[#allocation2 + $0xe8] sm:$0xff]  ;;  %8539 = vmatprep.subr.bf16.mxu1 %v17012_v21  ;;  %v6980_v57 = vpop.f32.mrb[20].mxu0 }
 0x5c0   :  { %21439 = vst [vmem:[#allocation19_spill] sm:$0xff] %v19126_v59  ;;  %v19130_v25 = vsel %vm2675_vm0, %v9822_v40, %v9823_v50  ;;  %7645 = vst [vmem:[#allocation2 + $0x160] sm:$0xfe] %v7501_v12  ;;  %v19137_v51 = vpack.c.bf16 %v7756_v28, %v19108_v49  ;;  %v17010_v44 = vld [vmem:[#allocation10 + $0x360] ss:$8 sps:$4 sm:$0xff]   ;;  %v19140_v40 = vpack.c.bf16 %v7755_v24, %v19106_v42  ;;  %v6982_v50 = vpop.f32.mrb[21].mxu0 }
 0x5c1   :  { %21440 = vst [vmem:[#allocation20_spill] sm:$0xff] %v19130_v25  ;;  %7647 = vst [vmem:[#allocation2 + $0x170] sm:$0x1] %v7501_v12  ;;  %v7504_v9 = vrot.slane %v7376_v22, 7  ;;  %v17015_v45 = vld [vmem:[#allocation10 + $0x374] ss:$8 sps:$4 sm:$0xff]   ;;  %v7377_v14 = vadd.f32 %v19000_v2, %v6980_v57  ;;  %v7378_v38 = vadd.f32 %v19004_v53, %v6982_v50 }
 0x5c2   :  { %7646 = vst [vmem:[#allocation2 + $0x168] sm:$0xfe] %v7502_v60  ;;  %7648 = vst [vmem:[#allocation2 + $0x178] sm:$0x1] %v7502_v60  ;;  %8107 = vmatprep.mubr.bf16.mxu1 %v19137_v51  ;;  %v6984_v12 = vpop.f32.mrb[22].mxu0  ;;  %8540 = vmatpush1.bf16.msra.mxu1 %v17010_v44 }
 0x5c3   :  { %21441 = vst [vmem:[#allocation21_spill] sm:$0xff] %v19137_v51  ;;  %7649 = vst [vmem:[#allocation2 + $0x180] sm:$0xfe] %v7503_v33  ;;  %8108 = vmatmul.mubr.bf16.gmra.mrb[12].mxu1 %v19140_v40  ;;  %v17013_v43 = vld [vmem:[#allocation10 + $0x370] ss:$8 sps:$4 sm:$0xff]   ;;  %v7505_v61 = vrot.slane %v7377_v14, 7  ;;  %v7379_v60 = vadd.f32 %v19000_v2, %v6984_v12  ;;  %8541 = vmatprep.subr.bf16.mxu1 %v17015_v45 }
 0x5c4   :  { %7651 = vst [vmem:[#allocation2 + $0x190] sm:$0x1] %v7503_v33  ;;  %21442 = vst [vmem:[#allocation22_spill] sm:$0xff] %v19140_v40  ;;  %v6986_v21 = vpop.f32.mrb[23].mxu0  ;;  %v17018_v22 = vld [vmem:[#allocation10 + $0x384] ss:$8 sps:$4 sm:$0xff]  }
 0x5c5   :  { %7650 = vst [vmem:[#allocation2 + $0x188] sm:$0xfe] %v7504_v9  ;;  %7652 = vst [vmem:[#allocation2 + $0x198] sm:$0x1] %v7504_v9  ;;  %v7506_v24 = vrot.slane %v7378_v38, 7  ;;  %v7380_v33 = vadd.f32 %v19004_v53, %v6986_v21  ;;  %v7507_v50 = vrot.slane %v7379_v60, 7 }
 0x5c6   :  { %v17016_v9 = vld [vmem:[#allocation10 + $0x380] ss:$8 sps:$4 sm:$0xff]   ;;  %7653 = vst [vmem:[#allocation2 + $0x1a0] sm:$0xfe] %v7505_v61  ;;  %7655 = vst [vmem:[#allocation2 + $0x1b0] sm:$0x1] %v7505_v61  ;;  %8542 = vmatpush1.bf16.msra.mxu1 %v17013_v43 }
 0x5c7   :  { %v19148_v28 = vld [vmem:[#allocation2 + $0x160] sm:$0xff]  ;;  %7654 = vst [vmem:[#allocation2 + $0x1a8] sm:$0xfe] %v7506_v24  ;;  %7656 = vst [vmem:[#allocation2 + $0x1b8] sm:$0x1] %v7506_v24  ;;  %v7508_v38 = vrot.slane %v7380_v33, 7  ;;  %8543 = vmatprep.subr.bf16.mxu1 %v17018_v22 }
 0x5c8   :  { %v9542_v57 = vld [vmem:[#allocation2 + $0x160] sm:$0xfe]  ;;  %v9544_v17 = vld [vmem:[#allocation2 + $0x170] sm:$0x1]  ;;  %v7829_v44 = vpack.c.bf16 %v19148_v28, %v19018_v32  ;;  %7657 = vst [vmem:[#allocation2 + $0x1c0] sm:$0xfe] %v7507_v50 }
 0x5c9   :  { %v19150_v62 = vld [vmem:[#allocation2 + $0x168] sm:$0xff]  ;;  %v17021_v14 = vld [vmem:[#allocation10 + $0x394] ss:$8 sps:$4 sm:$0xff]   ;;  %7659 = vst [vmem:[#allocation2 + $0x1d0] sm:$0x1] %v7507_v50  ;;  %v9840_v6 = vrot.slane %v9542_v57, 1 }
 0x5ca   :  { %v9543_v12 = vld [vmem:[#allocation2 + $0x168] sm:$0xfe]  ;;  %v9545_v45 = vld [vmem:[#allocation2 + $0x178] sm:$0x1]  ;;  %v7830_v21 = vpack.c.bf16 %v19150_v62, %v19018_v32  ;;  %v19156_v41 = vld [vmem:[#allocation2 + $0x180] sm:$0xff]  ;;  %v9841_v24 = vrot.slane %v9544_v17, 1  ;;  %8544 = vmatpush1.bf16.msra.mxu1 %v17016_v9 }
 0x5cb   :  { %v9843_v10 = vrot.slane %v9543_v12, 1  ;;  %v9844_v61 = vrot.slane %v9545_v45, 1  ;;  %v9546_v60 = vld [vmem:[#allocation2 + $0x180] sm:$0xfe]  ;;  %7658 = vst [vmem:[#allocation2 + $0x1c8] sm:$0xfe] %v7508_v38  ;;  %8545 = vmatprep.subr.bf16.mxu1 %v17021_v14 }
 0x5cc   :  { %v19158_v19 = vld [vmem:[#allocation2 + $0x188] sm:$0xff]  ;;  %v9846_v1 = vrot.slane %v9546_v60, 1  ;;  %7660 = vst [vmem:[#allocation2 + $0x1d8] sm:$0x1] %v7508_v38  ;;  %v6990_v30 = vpop.f32.mrb[24].mxu0  ;;  %8117 = vmatprep.mubr.bf16.mxu1 %v7830_v21 }
 0x5cd   :  { %v9547_v33 = vld [vmem:[#allocation2 + $0x188] sm:$0xfe]  ;;  %v9549_v12 = vld [vmem:[#allocation2 + $0x198] sm:$0x1]  ;;  %v9548_v50 = vld [vmem:[#allocation2 + $0x190] sm:$0x1]  ;;  %v7381_v23 = vadd.f32 %v19000_v2, %v6990_v30  ;;  %8118 = vmatmul.mubr.bf16.gmra.mrb[16].mxu1 %v7829_v44  ;;  %v19167_v38 = vsel %vm2675_vm0, %v9843_v10, %v9844_v61  ;;  %v19171_v30 = vsel %vm2675_vm0, %v9840_v6, %v9841_v24 }
 0x5ce   :  { %v9849_v45 = vrot.slane %v9547_v33, 1  ;;  %v6992_v22 = vpop.f32.mrb[25].mxu0  ;;  %v9850_v52 = vrot.slane %v9549_v12, 1  ;;  %v17019_v60 = vld [vmem:[#allocation10 + $0x390] ss:$8 sps:$4 sm:$0xff]   ;;  %21443 = vst [vmem:[#allocation23_spill] sm:$0xff] %v19167_v38 }
 0x5cf   :  { %v7382_v57 = vadd.f32 %v19004_v53, %v6992_v22  ;;  %v6994_v17 = vpop.f32.mrb[26].mxu0  ;;  %v9847_v21 = vrot.slane %v9548_v50, 1  ;;  %v7509_v47 = vrot.slane %v7381_v23, 7  ;;  %v17024_v33 = vld [vmem:[#allocation10 + $0x3a4] ss:$8 sps:$4 sm:$0xff]   ;;  %21444 = vst [vmem:[#allocation24_spill] sm:$0xff] %v19171_v30  ;;  %8546 = vmatpush1.bf16.msra.mxu1 %v17019_v60 }
 0x5d0   :  { %v7383_v43 = vadd.f32 %v19000_v2, %v6994_v17  ;;  %v6996_v63 = vpop.f32.mrb[27].mxu0  ;;  %v19174_v44 = vsel %vm2675_vm0, %v9849_v45, %v9850_v52  ;;  %v19177_v22 = vld [vmem:[#allocation2 + $0x1a0] sm:$0xff]  ;;  %v9552_v50 = vld [vmem:[#allocation2 + $0x1b0] sm:$0x1]  ;;  %v19184_v24 = vld [vmem:[#allocation2 + $0x1a8] sm:$0xff]  ;;  %8547 = vmatprep.subr.bf16.mxu1 %v17024_v33 }
 0x5d1   :  { %21445 = vst [vmem:[#allocation25_spill] sm:$0xff] %v19174_v44  ;;  %v7510_v12 = vrot.slane %v7382_v57, 7  ;;  %v7384_v9 = vadd.f32 %v19004_v53, %v6996_v63  ;;  %v17022_v10 = vld [vmem:[#allocation10 + $0x3a0] ss:$8 sps:$4 sm:$0xff]   ;;  %v19180_v23 = vsel %vm2675_vm0, %v9846_v1, %v9847_v21  ;;  %7661 = vst [vmem:[#allocation2 + $0x1e0] sm:$0xfe] %v7509_v47  ;;  %v19188_v52 = vpack.c.bf16 %v19177_v22, %v19156_v41 }
 0x5d2   :  { %v9550_v61 = vld [vmem:[#allocation2 + $0x1a0] sm:$0xfe]  ;;  %21446 = vst [vmem:[#allocation27_spill] sm:$0xff] %v19180_v23  ;;  %7663 = vst [vmem:[#allocation2 + $0x1f0] sm:$0x1] %v7509_v47  ;;  %v7511_v6 = vrot.slane %v7383_v43, 7  ;;  %v19194_v21 = vpack.c.bf16 %v19184_v24, %v19158_v19 }
 0x5d3   :  { %21447 = vst [vmem:[#allocation28_spill] sm:$0xff] %v19188_v52  ;;  %v17027_v63 = vld [vmem:[#allocation10 + $0x3b4] ss:$8 sps:$4 sm:$0xff]   ;;  %v9551_v45 = vld [vmem:[#allocation2 + $0x1a8] sm:$0xfe]  ;;  %v7512_v1 = vrot.slane %v7384_v9, 7  ;;  %8548 = vmatpush1.bf16.msra.mxu1 %v17022_v10 }
 0x5d4   :  { %v9553_v57 = vld [vmem:[#allocation2 + $0x1b8] sm:$0x1]  ;;  %7662 = vst [vmem:[#allocation2 + $0x1e8] sm:$0xfe] %v7510_v12  ;;  %7664 = vst [vmem:[#allocation2 + $0x1f8] sm:$0x1] %v7510_v12  ;;  %8127 = vmatprep.mubr.bf16.mxu1 %v19194_v21  ;;  %8549 = vmatprep.subr.bf16.mxu1 %v17027_v63 }
 0x5d5   :  { %21448 = vst [vmem:[#allocation30_spill] sm:$0xff] %v19194_v21  ;;  %v19196_v47 = vld [vmem:[#allocation2 + $0x1c0] sm:$0xff]  ;;  %v9855_v43 = vrot.slane %v9551_v45, 1  ;;  %v9856_v14 = vrot.slane %v9553_v57, 1  ;;  %7665 = vst [vmem:[#allocation2 + $0x200] sm:$0xfe] %v7511_v6  ;;  %8128 = vmatmul.mubr.bf16.gmra.mrb[20].mxu1 %v19188_v52 }
 0x5d6   :  { %v9554_v18 = vld [vmem:[#allocation2 + $0x1c0] sm:$0xfe]  ;;  %7667 = vst [vmem:[#allocation2 + $0x210] sm:$0x1] %v7511_v6  ;;  %v19198_v58 = vld [vmem:[#allocation2 + $0x1c8] sm:$0xff]  ;;  %v9852_v12 = vrot.slane %v9550_v61, 1 }
 0x5d7   :  { %v9853_v9 = vrot.slane %v9552_v50, 1  ;;  %v9555_v26 = vld [vmem:[#allocation2 + $0x1c8] sm:$0xfe]  ;;  %v9858_v23 = vrot.slane %v9554_v18, 1  ;;  %7666 = vst [vmem:[#allocation2 + $0x208] sm:$0xfe] %v7512_v1  ;;  %v19209_v17 = vsel %vm2675_vm0, %v9855_v43, %v9856_v14 }
 0x5d8   :  { %7668 = vst [vmem:[#allocation2 + $0x218] sm:$0x1] %v7512_v1  ;;  %v7000_v44 = vpop.f32.mrb[28].mxu0  ;;  %v9557_v45 = vld [vmem:[#allocation2 + $0x1d8] sm:$0x1]  ;;  %v9861_v6 = vrot.slane %v9555_v26, 1 }
 0x5d9   :  { %v9556_v57 = vld [vmem:[#allocation2 + $0x1d0] sm:$0x1]  ;;  %v7385_v33 = vadd.f32 %v19000_v2, %v7000_v44  ;;  %v7002_v30 = vpop.f32.mrb[29].mxu0  ;;  %v9862_v61 = vrot.slane %v9557_v45, 1  ;;  %v17025_v1 = vld [vmem:[#allocation10 + $0x3b0] ss:$8 sps:$4 sm:$0xff]   ;;  %v19213_v44 = vsel %vm2675_vm0, %v9852_v12, %v9853_v9 }
 0x5da   :  { %v7386_v50 = vadd.f32 %v19004_v53, %v7002_v30  ;;  %v7004_v18 = vpop.f32.mrb[30].mxu0  ;;  %21449 = vst [vmem:[#allocation35_spill] sm:$0xff] %v19209_v17  ;;  %v9859_v38 = vrot.slane %v9556_v57, 1  ;;  %v17030_v59 = vld [vmem:[#allocation10 + $0x3c4] ss:$8 sps:$4 sm:$0xff]   ;;  %21450 = vst [vmem:[#allocation44_spill] sm:$0xff] %v19213_v44  ;;  %8550 = vmatpush1.bf16.msra.mxu1 %v17025_v1 }
 0x5db   :  { %v7513_v25 = vrot.slane %v7385_v33, 7  ;;  %v7387_v60 = vadd.f32 %v19000_v2, %v7004_v18  ;;  %v7006_v26 = vpop.f32.mrb[31].mxu0  ;;  %v19216_v45 = vsel %vm2675_vm0, %v9861_v6, %v9862_v61  ;;  %v19219_v34 = vld [vmem:[#allocation2 + $0x1e0] sm:$0xff]  ;;  %v9560_v57 = vld [vmem:[#allocation2 + $0x1f0] sm:$0x1]  ;;  %v19226_v9 = vld [vmem:[#allocation2 + $0x1e8] sm:$0xff]  ;;  %8551 = vmatprep.subr.bf16.mxu1 %v17030_v59 }
 0x5dc   :  { %21451 = vst [vmem:[#allocation45_spill] sm:$0xff] %v19216_v45  ;;  %v7514_v30 = vrot.slane %v7386_v50, 7  ;;  %v7388_v10 = vadd.f32 %v19004_v53, %v7006_v26  ;;  %v17028_v14 = vld [vmem:[#allocation10 + $0x3c0] ss:$8 sps:$4 sm:$0xff]   ;;  %v19222_v33 = vsel %vm2675_vm0, %v9858_v23, %v9859_v38  ;;  %v19230_v6 = vpack.c.bf16 %v19219_v34, %v19196_v47  ;;  %v17033_v61 = vld [vmem:[#allocation10 + $0x3d4] ss:$8 sps:$4 sm:$0xff]  }
 0x5dd   :  { %v9558_v43 = vld [vmem:[#allocation2 + $0x1e0] sm:$0xfe]  ;;  %21452 = vst [vmem:[#allocation46_spill] sm:$0xff] %v19222_v33  ;;  %7669 = vst [vmem:[#allocation2 + $0x220] sm:$0xfe] %v7513_v25  ;;  %v7515_v12 = vrot.slane %v7387_v60, 7  ;;  %v19236_v23 = vpack.c.bf16 %v19226_v9, %v19198_v58 }
 0x5de   :  { %7671 = vst [vmem:[#allocation2 + $0x230] sm:$0x1] %v7513_v25  ;;  %21453 = vst [vmem:[#allocation47_spill] sm:$0xff] %v19230_v6  ;;  %v9559_v50 = vld [vmem:[#allocation2 + $0x1e8] sm:$0xfe]  ;;  %v7516_v38 = vrot.slane %v7388_v10, 7  ;;  %8552 = vmatpush1.bf16.msra.mxu1 %v17028_v14 }
 0x5df   :  { %v9561_v18 = vld [vmem:[#allocation2 + $0x1f8] sm:$0x1]  ;;  %7670 = vst [vmem:[#allocation2 + $0x228] sm:$0xfe] %v7514_v30  ;;  %7672 = vst [vmem:[#allocation2 + $0x238] sm:$0x1] %v7514_v30  ;;  %8137 = vmatprep.mubr.bf16.mxu1 %v19236_v23  ;;  %8553 = vmatprep.subr.bf16.mxu1 %v17033_v61 }
 0x5e0   :  { %21454 = vst [vmem:[#allocation48_spill] sm:$0xff] %v19236_v23  ;;  %v19238_v25 = vld [vmem:[#allocation2 + $0x200] sm:$0xff]  ;;  %v9867_v60 = vrot.slane %v9559_v50, 1  ;;  %v9868_v63 = vrot.slane %v9561_v18, 1  ;;  %7673 = vst [vmem:[#allocation2 + $0x240] sm:$0xfe] %v7515_v12  ;;  %8138 = vmatmul.mubr.bf16.gmra.mrb[24].mxu1 %v19230_v6 }
 0x5e1   :  { %v9562_v45 = vld [vmem:[#allocation2 + $0x200] sm:$0xfe]  ;;  %7675 = vst [vmem:[#allocation2 + $0x250] sm:$0x1] %v7515_v12  ;;  %v19240_v17 = vld [vmem:[#allocation2 + $0x208] sm:$0xff]  ;;  %v9864_v30 = vrot.slane %v9558_v43, 1 }
 0x5e2   :  { %v9865_v10 = vrot.slane %v9560_v57, 1  ;;  %v9563_v33 = vld [vmem:[#allocation2 + $0x208] sm:$0xfe]  ;;  %v9870_v44 = vrot.slane %v9562_v45, 1  ;;  %7674 = vst [vmem:[#allocation2 + $0x248] sm:$0xfe] %v7516_v38  ;;  %v19251_v26 = vsel %vm2675_vm0, %v9867_v60, %v9868_v63 }
 0x5e3   :  { %7676 = vst [vmem:[#allocation2 + $0x258] sm:$0x1] %v7516_v38  ;;  %v7010_v56 = vpop.f32.mrb[32].mxu0  ;;  %v9565_v50 = vld [vmem:[#allocation2 + $0x218] sm:$0x1]  ;;  %v9873_v12 = vrot.slane %v9563_v33, 1 }
 0x5e4   :  { %v9564_v18 = vld [vmem:[#allocation2 + $0x210] sm:$0x1]  ;;  %v7389_v59 = vadd.f32 %v19000_v2, %v7010_v56  ;;  %v7012_v15 = vpop.f32.mrb[33].mxu0  ;;  %v9874_v43 = vrot.slane %v9565_v50, 1  ;;  %v17031_v38 = vld [vmem:[#allocation10 + $0x3d0] ss:$8 sps:$4 sm:$0xff]   ;;  %v19255_v56 = vsel %vm2675_vm0, %v9864_v30, %v9865_v10 }
 0x5e5   :  { %v7390_v57 = vadd.f32 %v19004_v53, %v7012_v15  ;;  %v7014_v45 = vpop.f32.mrb[34].mxu0  ;;  %21455 = vst [vmem:[#allocation49_spill] sm:$0xff] %v19251_v26  ;;  %v9871_v3 = vrot.slane %v9564_v18, 1  ;;  %v17036_v20 = vld [vmem:[#allocation10 + $0x3e4] ss:$8 sps:$4 sm:$0xff]   ;;  %21456 = vst [vmem:[#allocation50_spill] sm:$0xff] %v19255_v56  ;;  %8554 = vmatpush1.bf16.msra.mxu1 %v17031_v38 }
 0x5e6   :  { %v7517_v37 = vrot.slane %v7389_v59, 7  ;;  %v7391_v1 = vadd.f32 %v19000_v2, %v7014_v45  ;;  %v7016_v33 = vpop.f32.mrb[35].mxu0  ;;  %v19258_v50 = vsel %vm2675_vm0, %v9873_v12, %v9874_v43  ;;  %v7775_v5 = vld [vmem:[#allocation2 + $0x220] sm:$0xff]  ;;  %v7776_v18 = vld [vmem:[#allocation2 + $0x228] sm:$0xff]  ;;  %8555 = vmatprep.subr.bf16.mxu1 %v17036_v20  ;;  %v17037_v38 = vld [vmem:[#allocation10 + $0x3f0] ss:$8 sps:$4 sm:$0xff]  }
 0x5e7   :  { %21457 = vst [vmem:[#allocation51_spill] sm:$0xff] %v19258_v50  ;;  %v7518_v15 = vrot.slane %v7390_v57, 7  ;;  %v7392_v14 = vadd.f32 %v19004_v53, %v7016_v33  ;;  %v19262_v63 = vsel %vm2675_vm0, %v9870_v44, %v9871_v3  ;;  %v19269_v12 = vpack.c.bf16 %v7776_v18, %v19240_v17  ;;  %v17034_v59 = vld [vmem:[#allocation10 + $0x3e0] ss:$8 sps:$4 sm:$0xff]   ;;  %v7020_v44 = vpop.f32.mrb[36].mxu0 }
 0x5e8   :  { %21458 = vst [vmem:[#allocation52_spill] sm:$0xff] %v19262_v63  ;;  %7677 = vst [vmem:[#allocation2 + $0x2a0] sm:$0xfe] %v7517_v37  ;;  %v7519_v61 = vrot.slane %v7391_v1, 7  ;;  %v19272_v3 = vpack.c.bf16 %v7775_v5, %v19238_v25  ;;  %v7393_v1 = vadd.f32 %v19000_v2, %v7020_v44  ;;  %v7022_v43 = vpop.f32.mrb[37].mxu0 }
 0x5e9   :  { %7679 = vst [vmem:[#allocation2 + $0x2b0] sm:$0x1] %v7517_v37  ;;  %7678 = vst [vmem:[#allocation2 + $0x2a8] sm:$0xfe] %v7518_v15  ;;  %v7520_v10 = vrot.slane %v7392_v14, 7  ;;  %8147 = vmatprep.mubr.bf16.mxu1 %v19269_v12  ;;  %v7394_v57 = vadd.f32 %v19004_v53, %v7022_v43  ;;  %v7024_v45 = vpop.f32.mrb[38].mxu0  ;;  %8556 = vmatpush1.bf16.msra.mxu1 %v17034_v59 }
 0x5ea   :  { %7680 = vst [vmem:[#allocation2 + $0x2b8] sm:$0x1] %v7518_v15  ;;  %21459 = vst [vmem:[#allocation53_spill] sm:$0xff] %v19269_v12  ;;  %v17039_v37 = vld [vmem:[#allocation10 + $0x3f4] ss:$8 sps:$4 sm:$0xff]   ;;  %8148 = vmatmul.mubr.bf16.gmra.mrb[28].mxu1 %v19272_v3  ;;  %v7521_v33 = vrot.slane %v7393_v1, 7  ;;  %v7395_v5 = vadd.f32 %v19000_v2, %v7024_v45 }
 0x5eb   :  { %7681 = vst [vmem:[#allocation2 + $0x2c0] sm:$0xfe] %v7519_v61  ;;  %7683 = vst [vmem:[#allocation2 + $0x2d0] sm:$0x1] %v7519_v61  ;;  %v7026_v20 = vpop.f32.mrb[39].mxu0  ;;  %8557 = vmatprep.subr.bf16.mxu1 %v17039_v37  ;;  %v7522_v14 = vrot.slane %v7394_v57, 7 }
 0x5ec   :  { %21460 = vst [vmem:[#allocation54_spill] sm:$0xff] %v19272_v3  ;;  %7682 = vst [vmem:[#allocation2 + $0x2c8] sm:$0xfe] %v7520_v10  ;;  %v17042_v15 = vld [vmem:[#allocation10 + $0x604] ss:$8 sps:$4 sm:$0xff]   ;;  %v7396_v61 = vadd.f32 %v19004_v53, %v7026_v20  ;;  %v7523_v43 = vrot.slane %v7395_v5, 7 }
 0x5ed   :  { %7684 = vst [vmem:[#allocation2 + $0x2d8] sm:$0x1] %v7520_v10  ;;  %v19282_v30 = vld [vmem:[#allocation2 + $0x20] sm:$0xfc]  ;;  %7685 = vst [vmem:[#allocation2 + $0x2e0] sm:$0xfe] %v7521_v33  ;;  %8558 = vmatpush1.bf16.msra.mxu1 %v17037_v38 }
 0x5ee   :  { %7687 = vst [vmem:[#allocation2 + $0x2f0] sm:$0x1] %v7521_v33  ;;  %v19288_v60 = vld [vmem:[#allocation2 + $0x30] sm:$0x3]  ;;  %7686 = vst [vmem:[#allocation2 + $0x2e8] sm:$0xfe] %v7522_v14  ;;  %9113 = vmatprep.subr.bf16.mxu1 %v17042_v15 }
 0x5ef   :  { %v19280_v18 = vld [vmem:[#allocation2 + $0x2a0] sm:$0xff]  ;;  %7688 = vst [vmem:[#allocation2 + $0x2f8] sm:$0x1] %v7522_v14  ;;  %v7524_v57 = vrot.slane %v7396_v61, 7  ;;  %7689 = vst [vmem:[#allocation2 + $0x300] sm:$0xfe] %v7523_v43 }
 0x5f0   :  { %v9582_v10 = vld [vmem:[#allocation2 + $0x2a0] sm:$0xfe]  ;;  %v9584_v44 = vld [vmem:[#allocation2 + $0x2b0] sm:$0x1]  ;;  %v19284_v59 = vld [vmem:[#allocation2 + $0x2a8] sm:$0xff]  ;;  %v7837_v1 = vpack.c.bf16 %v19280_v18, %v19018_v32  ;;  %v12239_v26 = vrot.slane %v19288_v60, 2 }
 0x5f1   :  { %v9583_v45 = vld [vmem:[#allocation2 + $0x2a8] sm:$0xfe]  ;;  %v9585_v37 = vld [vmem:[#allocation2 + $0x2b8] sm:$0x1]  ;;  %v7838_v20 = vpack.c.bf16 %v19284_v59, %v19018_v32  ;;  %7691 = vst [vmem:[#allocation2 + $0x310] sm:$0x1] %v7523_v43 }
 0x5f2   :  { %v19292_v63 = vld [vmem:[#allocation2 + $0x2c0] sm:$0xff]  ;;  %v9891_v33 = vrot.slane %v9583_v45, 1  ;;  %v9892_v5 = vrot.slane %v9585_v37, 1  ;;  %v9888_v36 = vrot.slane %v9582_v10, 1  ;;  %v9889_v14 = vrot.slane %v9584_v44, 1  ;;  %v7030_v32 = vpop.f32.mrb[40].mxu0 }
 0x5f3   :  { %v9586_v50 = vld [vmem:[#allocation2 + $0x2c0] sm:$0xfe]  ;;  %v19294_v56 = vld [vmem:[#allocation2 + $0x2c8] sm:$0xff]  ;;  %7690 = vst [vmem:[#allocation2 + $0x308] sm:$0xfe] %v7524_v57  ;;  %8157 = vmatprep.mubr.bf16.mxu1 %v7838_v20  ;;  %v7397_v29 = vadd.f32 %v19000_v2, %v7030_v32  ;;  %v7032_v15 = vpop.f32.mrb[41].mxu0 }
 0x5f4   :  { %v9587_v61 = vld [vmem:[#allocation2 + $0x2c8] sm:$0xfe]  ;;  %v9894_v16 = vrot.slane %v9586_v50, 1  ;;  %7692 = vst [vmem:[#allocation2 + $0x318] sm:$0x1] %v7524_v57  ;;  %8158 = vmatmul.mubr.bf16.gmra.mrb[32].mxu1 %v7837_v1  ;;  %v12238_v10 = vrot.slane %v19282_v30, 2  ;;  %v7398_v44 = vadd.f32 %v19004_v53, %v7032_v15  ;;  %v19304_v57 = vsel %vm2675_vm0, %v9891_v33, %v9892_v5 }
 0x5f5   :  { %v9589_v45 = vld [vmem:[#allocation2 + $0x2d8] sm:$0x1]  ;;  %v9897_v37 = vrot.slane %v9587_v61, 1  ;;  %v9588_v43 = vld [vmem:[#allocation2 + $0x2d0] sm:$0x1]  ;;  %v7034_v50 = vpop.f32.mrb[42].mxu0  ;;  %v19309_v32 = vsel %vm2675_vm0, %v9888_v36, %v9889_v14 }
 0x5f6   :  { %v9898_v3 = vrot.slane %v9589_v45, 1  ;;  %21461 = vst [vmem:[#allocation55_spill] sm:$0xff] %v19304_v57  ;;  %v9895_v20 = vrot.slane %v9588_v43, 1  ;;  %v7525_v38 = vrot.slane %v7397_v29, 7  ;;  %v7399_v61 = vadd.f32 %v19000_v2, %v7034_v50  ;;  %v7036_v12 = vpop.f32.mrb[43].mxu0  ;;  %21462 = vst [vmem:[#allocation56_spill] sm:$0xff] %v19309_v32 }
 0x5f7   :  { %v7526_v30 = vrot.slane %v7398_v44, 7  ;;  %v7400_v45 = vadd.f32 %v19004_v53, %v7036_v12  ;;  %v19315_v15 = vld [vmem:[#allocation2 + $0x2e0] sm:$0xff]  ;;  %v9592_v5 = vld [vmem:[#allocation2 + $0x2f0] sm:$0x1]  ;;  %v9591_v14 = vld [vmem:[#allocation2 + $0x2e8] sm:$0xfe] }
 0x5f8   :  { %v19312_v1 = vsel %vm2675_vm0, %v9897_v37, %v9898_v3  ;;  %21464 = vst [vmem:[#allocation58_spill] sm:$0xff] %v19315_v15  ;;  %v9590_v33 = vld [vmem:[#allocation2 + $0x2e0] sm:$0xfe]  ;;  %v19318_v43 = vsel %vm2675_vm0, %v9894_v16, %v9895_v20  ;;  %7693 = vst [vmem:[#allocation2 + $0x320] sm:$0xfe] %v7525_v38  ;;  %v7527_v36 = vrot.slane %v7399_v61, 7  ;;  %v19328_v12 = vpack.c.bf16 %v19315_v15, %v19292_v63 }
 0x5f9   :  { %21463 = vst [vmem:[#allocation57_spill] sm:$0xff] %v19312_v1  ;;  %21465 = vst [vmem:[#allocation59_spill] sm:$0xff] %v19318_v43  ;;  %v19322_v60 = vld [vmem:[#allocation2 + $0x40] sm:$0xfc]  ;;  %v19324_v3 = vld [vmem:[#allocation2 + $0x2e8] sm:$0xff]  ;;  %v7528_v50 = vrot.slane %v7400_v45, 7 }
 0x5fa   :  { %7695 = vst [vmem:[#allocation2 + $0x330] sm:$0x1] %v7525_v38  ;;  %21466 = vst [vmem:[#allocation60_spill] sm:$0xff] %v19328_v12  ;;  %v9593_v37 = vld [vmem:[#allocation2 + $0x2f8] sm:$0x1]  ;;  %v19334_v20 = vpack.c.bf16 %v19324_v3, %v19294_v56  ;;  %v19336_v38 = vld [vmem:[#allocation2 + $0x300] sm:$0xff] }
 0x5fb   :  { %v11954_v44 = vld [vmem:[#allocation2 + $0x50] sm:$0x3]  ;;  %7694 = vst [vmem:[#allocation2 + $0x328] sm:$0xfe] %v7526_v30  ;;  %7696 = vst [vmem:[#allocation2 + $0x338] sm:$0x1] %v7526_v30 }
 0x5fc   :  { %21467 = vst [vmem:[#allocation61_spill] sm:$0xff] %v19334_v20  ;;  %21468 = vst [vmem:[#allocation62_spill] sm:$0xff] %v19336_v38  ;;  %v9903_v61 = vrot.slane %v9591_v14, 1  ;;  %v9904_v29 = vrot.slane %v9593_v37, 1  ;;  %v9594_v1 = vld [vmem:[#allocation2 + $0x300] sm:$0xfe]  ;;  %8167 = vmatprep.mubr.bf16.mxu1 %v19334_v20 }
 0x5fd   :  { %7697 = vst [vmem:[#allocation2 + $0x340] sm:$0xfe] %v7527_v36  ;;  %7699 = vst [vmem:[#allocation2 + $0x350] sm:$0x1] %v7527_v36  ;;  %v19338_v57 = vld [vmem:[#allocation2 + $0x308] sm:$0xff]  ;;  %v9900_v43 = vrot.slane %v9590_v33, 1  ;;  %8168 = vmatmul.mubr.bf16.gmra.mrb[36].mxu1 %v19328_v12 }
 0x5fe   :  { %v9901_v32 = vrot.slane %v9592_v5, 1  ;;  %v9595_v30 = vld [vmem:[#allocation2 + $0x308] sm:$0xfe]  ;;  %v9906_v45 = vrot.slane %v9594_v1, 1  ;;  %7698 = vst [vmem:[#allocation2 + $0x348] sm:$0xfe] %v7528_v50  ;;  %v19348_v5 = vsel %vm5122_vm1, %v12238_v10, %v12239_v26  ;;  %v19353_v20 = vsel %vm2675_vm0, %v9903_v61, %v9904_v29 }
 0x5ff   :  { %7700 = vst [vmem:[#allocation2 + $0x358] sm:$0x1] %v7528_v50  ;;  %v7040_v6 = vpop.f32.mrb[44].mxu0  ;;  %v9597_v37 = vld [vmem:[#allocation2 + $0x318] sm:$0x1]  ;;  %v9909_v23 = vrot.slane %v9595_v30, 1 }
 0x600   :  { %v9596_v36 = vld [vmem:[#allocation2 + $0x310] sm:$0x1]  ;;  %v7401_v52 = vadd.f32 %v19000_v2, %v7040_v6  ;;  %v7042_v21 = vpop.f32.mrb[45].mxu0  ;;  %v9910_v33 = vrot.slane %v9597_v37, 1  ;;  %21469 = vst [vmem:[#allocation63_spill] sm:$0xff] %v19348_v5  ;;  %v12244_v1 = vrot.slane %v19322_v60, 2  ;;  %v19357_v12 = vsel %vm2675_vm0, %v9900_v43, %v9901_v32 }
 0x601   :  { %v7402_v50 = vadd.f32 %v19004_v53, %v7042_v21  ;;  %v7044_v16 = vpop.f32.mrb[46].mxu0  ;;  %21470 = vst [vmem:[#allocation64_spill] sm:$0xff] %v19353_v20  ;;  %v9907_v14 = vrot.slane %v9596_v36, 1  ;;  %v12245_v30 = vrot.slane %v11954_v44, 2  ;;  %21471 = vst [vmem:[#allocation65_spill] sm:$0xff] %v19357_v12  ;;  %v19363_v21 = vld [vmem:[#allocation2 + $0x320] sm:$0xff] }
 0x602   :  { %v7529_v40 = vrot.slane %v7401_v52, 7  ;;  %v7403_v6 = vadd.f32 %v19000_v2, %v7044_v16  ;;  %v7046_v51 = vpop.f32.mrb[47].mxu0  ;;  %v19360_v26 = vsel %vm2675_vm0, %v9909_v23, %v9910_v33  ;;  %21473 = vst [vmem:[#allocation67_spill] sm:$0xff] %v19363_v21  ;;  %v9598_v37 = vld [vmem:[#allocation2 + $0x320] sm:$0xfe]  ;;  %v19370_v43 = vld [vmem:[#allocation2 + $0x328] sm:$0xff]  ;;  %v19374_v23 = vpack.c.bf16 %v19363_v21, %v19336_v38 }
 0x603   :  { %21472 = vst [vmem:[#allocation66_spill] sm:$0xff] %v19360_v26  ;;  %v7530_v10 = vrot.slane %v7402_v50, 7  ;;  %v7404_v60 = vadd.f32 %v19004_v53, %v7046_v51  ;;  %v9600_v29 = vld [vmem:[#allocation2 + $0x330] sm:$0x1]  ;;  %v19366_v61 = vsel %vm2675_vm0, %v9906_v45, %v9907_v14  ;;  %21475 = vst [vmem:[#allocation69_spill] sm:$0xff] %v19370_v43  ;;  %v19379_v45 = vsel %vm5122_vm1, %v12244_v1, %v12245_v30 }
 0x604   :  { %21474 = vst [vmem:[#allocation68_spill] sm:$0xff] %v19366_v61  ;;  %7701 = vst [vmem:[#allocation2 + $0x360] sm:$0xfe] %v7529_v40  ;;  %v7531_v32 = vrot.slane %v7403_v6, 7  ;;  %v9599_v51 = vld [vmem:[#allocation2 + $0x328] sm:$0xfe] }
 0x605   :  { %7703 = vst [vmem:[#allocation2 + $0x370] sm:$0x1] %v7529_v40  ;;  %21476 = vst [vmem:[#allocation70_spill] sm:$0xff] %v19374_v23  ;;  %v9601_v16 = vld [vmem:[#allocation2 + $0x338] sm:$0x1]  ;;  %v7532_v14 = vrot.slane %v7404_v60, 7  ;;  %v19383_v40 = vpack.c.bf16 %v19370_v43, %v19338_v57 }
 0x606   :  { %21477 = vst [vmem:[#allocation71_spill] sm:$0xff] %v19379_v45  ;;  %7702 = vst [vmem:[#allocation2 + $0x368] sm:$0xfe] %v7530_v10  ;;  %v19385_v36 = vld [vmem:[#allocation2 + $0x340] sm:$0xff]  ;;  %v9915_v33 = vrot.slane %v9599_v51, 1  ;;  %v9916_v50 = vrot.slane %v9601_v16, 1 }
 0x607   :  { %7704 = vst [vmem:[#allocation2 + $0x378] sm:$0x1] %v7530_v10  ;;  %21478 = vst [vmem:[#allocation72_spill] sm:$0xff] %v19383_v40  ;;  %v9602_v6 = vld [vmem:[#allocation2 + $0x340] sm:$0xfe]  ;;  %v19387_v52 = vld [vmem:[#allocation2 + $0x348] sm:$0xff]  ;;  %8177 = vmatprep.mubr.bf16.mxu1 %v19383_v40 }
 0x608   :  { %21479 = vst [vmem:[#allocation73_spill] sm:$0xff] %v19385_v36  ;;  %7705 = vst [vmem:[#allocation2 + $0x380] sm:$0xfe] %v7531_v32  ;;  %v9912_v30 = vrot.slane %v9598_v37, 1  ;;  %v9913_v44 = vrot.slane %v9600_v29, 1  ;;  %v9918_v60 = vrot.slane %v9602_v6, 1  ;;  %8178 = vmatmul.mubr.bf16.gmra.mrb[40].mxu1 %v19374_v23  ;;  %v19400_v20 = vsel %vm2675_vm0, %v9915_v33, %v9916_v50 }
 0x609   :  { %7707 = vst [vmem:[#allocation2 + $0x390] sm:$0x1] %v7531_v32  ;;  %21480 = vst [vmem:[#allocation74_spill] sm:$0xff] %v19387_v52  ;;  %v9603_v10 = vld [vmem:[#allocation2 + $0x348] sm:$0xfe]  ;;  %v7050_v61 = vpop.f32.mrb[48].mxu0 }
 0x60a   :  { %7706 = vst [vmem:[#allocation2 + $0x388] sm:$0xfe] %v7532_v14  ;;  %7708 = vst [vmem:[#allocation2 + $0x398] sm:$0x1] %v7532_v14  ;;  %v9605_v16 = vld [vmem:[#allocation2 + $0x358] sm:$0x1]  ;;  %v7405_v1 = vadd.f32 %v19000_v2, %v7050_v61  ;;  %v19404_v55 = vsel %vm2675_vm0, %v9912_v30, %v9913_v44 }
 0x60b   :  { %v9921_v26 = vrot.slane %v9603_v10, 1  ;;  %v9604_v32 = vld [vmem:[#allocation2 + $0x350] sm:$0x1]  ;;  %v7052_v37 = vpop.f32.mrb[49].mxu0  ;;  %v9922_v29 = vrot.slane %v9605_v16, 1  ;;  %21481 = vst [vmem:[#allocation75_spill] sm:$0xff] %v19400_v20 }
 0x60c   :  { %v7406_v14 = vadd.f32 %v19004_v53, %v7052_v37  ;;  %v7054_v6 = vpop.f32.mrb[50].mxu0  ;;  %v9919_v40 = vrot.slane %v9604_v32, 1  ;;  %v7533_v51 = vrot.slane %v7405_v1, 7  ;;  %21482 = vst [vmem:[#allocation76_spill] sm:$0xff] %v19404_v55  ;;  %v7795_v45 = vld [vmem:[#allocation2 + $0x360] sm:$0xff]  ;;  %v17477_v33 = vld [vmem:[#allocation2 + $0x8] sm:$0xff] }
 0x60d   :  { %v7407_v10 = vadd.f32 %v19000_v2, %v7054_v6  ;;  %v7056_v46 = vpop.f32.mrb[51].mxu0  ;;  %v19407_v61 = vsel %vm2675_vm0, %v9921_v26, %v9922_v29  ;;  %v19415_v1 = vld [vmem:[#allocation2 + $0x368] sm:$0xff]  ;;  %v12011_v15 = vld [vmem:[#allocation2 + $0x218] sm:$0x3] }
 0x60e   :  { %21483 = vst [vmem:[#allocation77_spill] sm:$0xff] %v19407_v61  ;;  %v7534_v12 = vrot.slane %v7406_v14, 7  ;;  %v7408_v16 = vadd.f32 %v19004_v53, %v7056_v46  ;;  %v19411_v37 = vsel %vm2675_vm0, %v9918_v60, %v9919_v40  ;;  %7709 = vst [vmem:[#allocation2 + $0x3e0] sm:$0xfe] %v7533_v51  ;;  %v19421_v46 = vpack.c.bf16 %v19415_v1, %v19387_v52  ;;  %v7060_v30 = vpop.f32.mrb[52].mxu0 }
 0x60f   :  { %21484 = vst [vmem:[#allocation78_spill] sm:$0xff] %v19411_v37  ;;  %7711 = vst [vmem:[#allocation2 + $0x3f0] sm:$0x1] %v7533_v51  ;;  %v7535_v50 = vrot.slane %v7407_v10, 7  ;;  %v19424_v40 = vpack.c.bf16 %v7795_v45, %v19385_v36  ;;  %v7409_v60 = vadd.f32 %v19000_v2, %v7060_v30  ;;  %v7062_v51 = vpop.f32.mrb[53].mxu0 }
 0x610   :  { %21485 = vst [vmem:[#allocation79_spill] sm:$0xff] %v19415_v1  ;;  %7710 = vst [vmem:[#allocation2 + $0x3e8] sm:$0xfe] %v7534_v12  ;;  %v7536_v26 = vrot.slane %v7408_v16, 7  ;;  %8187 = vmatprep.mubr.bf16.mxu1 %v19421_v46  ;;  %v7064_v32 = vpop.f32.mrb[54].mxu0 }
 0x611   :  { %7712 = vst [vmem:[#allocation2 + $0x3f8] sm:$0x1] %v7534_v12  ;;  %21486 = vst [vmem:[#allocation80_spill] sm:$0xff] %v19421_v46  ;;  %8188 = vmatmul.mubr.bf16.gmra.mrb[44].mxu1 %v19424_v40  ;;  %v7410_v12 = vadd.f32 %v19004_v53, %v7062_v51  ;;  %v7537_v29 = vrot.slane %v7409_v60, 7  ;;  %v7411_v14 = vadd.f32 %v19000_v2, %v7064_v32  ;;  %v7066_v6 = vpop.f32.mrb[55].mxu0 }
 0x612   :  { %7713 = vst [vmem:[#allocation2 + $0x400] sm:$0xfe] %v7535_v50  ;;  %7715 = vst [vmem:[#allocation2 + $0x410] sm:$0x1] %v7535_v50  ;;  %v7412_v45 = vadd.f32 %v19004_v53, %v7066_v6 }
 0x613   :  { %21487 = vst [vmem:[#allocation81_spill] sm:$0xff] %v19424_v40  ;;  %7714 = vst [vmem:[#allocation2 + $0x408] sm:$0xfe] %v7536_v26  ;;  %v7538_v10 = vrot.slane %v7410_v12, 7  ;;  %v7539_v30 = vrot.slane %v7411_v14, 7 }
 0x614   :  { %7716 = vst [vmem:[#allocation2 + $0x418] sm:$0x1] %v7536_v26  ;;  %7717 = vst [vmem:[#allocation2 + $0x420] sm:$0xfe] %v7537_v29  ;;  %v7540_v32 = vrot.slane %v7412_v45, 7 }
 0x615   :  { %v19432_v16 = vld [vmem:[#allocation2 + $0x3e0] sm:$0xff]  ;;  %7719 = vst [vmem:[#allocation2 + $0x430] sm:$0x1] %v7537_v29  ;;  %7718 = vst [vmem:[#allocation2 + $0x428] sm:$0xfe] %v7538_v10 }
 0x616   :  { %21488 = vst [vmem:[#allocation82_spill] sm:$0xff] %v19432_v16  ;;  %v9622_v50 = vld [vmem:[#allocation2 + $0x3e0] sm:$0xfe]  ;;  %v9624_v26 = vld [vmem:[#allocation2 + $0x3f0] sm:$0x1]  ;;  %v7845_v51 = vpack.c.bf16 %v19432_v16, %v17477_v33 }
 0x617   :  { %v19434_v44 = vld [vmem:[#allocation2 + $0x3e8] sm:$0xff]  ;;  %7720 = vst [vmem:[#allocation2 + $0x438] sm:$0x1] %v7538_v10  ;;  %7721 = vst [vmem:[#allocation2 + $0x440] sm:$0xfe] %v7539_v30  ;;  %v9936_v20 = vrot.slane %v9622_v50, 1 }
 0x618   :  { %21489 = vst [vmem:[#allocation83_spill] sm:$0xff] %v19434_v44  ;;  %v9623_v5 = vld [vmem:[#allocation2 + $0x3e8] sm:$0xfe]  ;;  %v9625_v60 = vld [vmem:[#allocation2 + $0x3f8] sm:$0x1]  ;;  %v7846_v12 = vpack.c.bf16 %v19434_v44, %v17477_v33  ;;  %v9937_v40 = vrot.slane %v9624_v26, 1 }
 0x619   :  { %v19438_v6 = vld [vmem:[#allocation2 + $0x400] sm:$0xff]  ;;  %v9939_v37 = vrot.slane %v9623_v5, 1  ;;  %v9940_v61 = vrot.slane %v9625_v60, 1  ;;  %7723 = vst [vmem:[#allocation2 + $0x450] sm:$0x1] %v7539_v30  ;;  %v7070_v10 = vpop.f32.mrb[56].mxu0 }
 0x61a   :  { %21490 = vst [vmem:[#allocation84_spill] sm:$0xff] %v19438_v6  ;;  %v9626_v55 = vld [vmem:[#allocation2 + $0x400] sm:$0xfe]  ;;  %v19440_v29 = vld [vmem:[#allocation2 + $0x408] sm:$0xff]  ;;  %7722 = vst [vmem:[#allocation2 + $0x448] sm:$0xfe] %v7540_v32  ;;  %8197 = vmatprep.mubr.bf16.mxu1 %v7846_v12  ;;  %v7413_v30 = vadd.f32 %v19000_v2, %v7070_v10  ;;  %v19453_v5 = vsel %vm2675_vm0, %v9936_v20, %v9937_v40 }
 0x61b   :  { %21491 = vst [vmem:[#allocation85_spill] sm:$0xff] %v19440_v29  ;;  %v9627_v46 = vld [vmem:[#allocation2 + $0x408] sm:$0xfe]  ;;  %v9942_v23 = vrot.slane %v9626_v55, 1  ;;  %7724 = vst [vmem:[#allocation2 + $0x458] sm:$0x1] %v7540_v32  ;;  %8198 = vmatmul.mubr.bf16.gmra.mrb[48].mxu1 %v7845_v51  ;;  %v19449_v55 = vsel %vm2675_vm0, %v9939_v37, %v9940_v61 }
 0x61c   :  { %v9629_v33 = vld [vmem:[#allocation2 + $0x418] sm:$0x1]  ;;  %v9945_v45 = vrot.slane %v9627_v46, 1  ;;  %v9628_v60 = vld [vmem:[#allocation2 + $0x410] sm:$0x1]  ;;  %v7072_v27 = vpop.f32.mrb[57].mxu0 }
 0x61d   :  { %v9946_v0 = vrot.slane %v9629_v33, 1  ;;  %v7414_v50 = vadd.f32 %v19004_v53, %v7072_v27  ;;  %v7074_v26 = vpop.f32.mrb[58].mxu0  ;;  %21492 = vst [vmem:[#allocation86_spill] sm:$0xff] %v19449_v55  ;;  %v9943_v32 = vrot.slane %v9628_v60, 1  ;;  %v7541_v14 = vrot.slane %v7413_v30, 7  ;;  %21493 = vst [vmem:[#allocation87_spill] sm:$0xff] %v19453_v5 }
 0x61e   :  { %v7415_v12 = vadd.f32 %v19000_v2, %v7074_v26  ;;  %v7076_v16 = vpop.f32.mrb[59].mxu0  ;;  %v19459_v33 = vld [vmem:[#allocation2 + $0x420] sm:$0xff]  ;;  %v9632_v44 = vld [vmem:[#allocation2 + $0x430] sm:$0x1]  ;;  %v19466_v40 = vld [vmem:[#allocation2 + $0x428] sm:$0xff] }
 0x61f   :  { %v19456_v46 = vsel %vm2675_vm0, %v9945_v45, %v9946_v0  ;;  %v7542_v10 = vrot.slane %v7414_v50, 7  ;;  %v7416_v51 = vadd.f32 %v19004_v53, %v7076_v16  ;;  %21495 = vst [vmem:[#allocation89_spill] sm:$0xff] %v19459_v33  ;;  %v9630_v27 = vld [vmem:[#allocation2 + $0x420] sm:$0xfe]  ;;  %v19462_v61 = vsel %vm2675_vm0, %v9942_v23, %v9943_v32  ;;  %7725 = vst [vmem:[#allocation2 + $0x460] sm:$0xfe] %v7541_v14 }
 0x620   :  { %21494 = vst [vmem:[#allocation88_spill] sm:$0xff] %v19456_v46  ;;  %21496 = vst [vmem:[#allocation90_spill] sm:$0xff] %v19462_v61  ;;  %v7543_v20 = vrot.slane %v7415_v12, 7  ;;  %v19470_v0 = vpack.c.bf16 %v19459_v33, %v19438_v6  ;;  %v9631_v16 = vld [vmem:[#allocation2 + $0x428] sm:$0xfe]  ;;  %v19480_v50 = vld [vmem:[#allocation2 + $0x440] sm:$0xff] }
 0x621   :  { %7727 = vst [vmem:[#allocation2 + $0x470] sm:$0x1] %v7541_v14  ;;  %21497 = vst [vmem:[#allocation91_spill] sm:$0xff] %v19466_v40  ;;  %v9633_v45 = vld [vmem:[#allocation2 + $0x438] sm:$0x1]  ;;  %v7544_v23 = vrot.slane %v7416_v51, 7  ;;  %v19478_v14 = vpack.c.bf16 %v19466_v40, %v19440_v29 }
 0x622   :  { %21498 = vst [vmem:[#allocation92_spill] sm:$0xff] %v19470_v0  ;;  %v19474_v30 = vld [vmem:[#allocation2 + $0x88] sm:$0xfc]  ;;  %7726 = vst [vmem:[#allocation2 + $0x468] sm:$0xfe] %v7542_v10  ;;  %v9951_v26 = vrot.slane %v9631_v16, 1 }
 0x623   :  { %7728 = vst [vmem:[#allocation2 + $0x478] sm:$0x1] %v7542_v10  ;;  %21499 = vst [vmem:[#allocation93_spill] sm:$0xff] %v19478_v14  ;;  %v9952_v32 = vrot.slane %v9633_v45, 1  ;;  %v9634_v12 = vld [vmem:[#allocation2 + $0x440] sm:$0xfe]  ;;  %8207 = vmatprep.mubr.bf16.mxu1 %v19478_v14 }
 0x624   :  { %21500 = vst [vmem:[#allocation94_spill] sm:$0xff] %v19480_v50  ;;  %7729 = vst [vmem:[#allocation2 + $0x480] sm:$0xfe] %v7543_v20  ;;  %v19482_v37 = vld [vmem:[#allocation2 + $0x448] sm:$0xff]  ;;  %v9948_v61 = vrot.slane %v9630_v27, 1  ;;  %v9949_v46 = vrot.slane %v9632_v44, 1  ;;  %8208 = vmatmul.mubr.bf16.gmra.mrb[52].mxu1 %v19470_v0 }
 0x625   :  { %7731 = vst [vmem:[#allocation2 + $0x490] sm:$0x1] %v7543_v20  ;;  %21501 = vst [vmem:[#allocation95_spill] sm:$0xff] %v19482_v37  ;;  %v9635_v10 = vld [vmem:[#allocation2 + $0x448] sm:$0xfe]  ;;  %v9954_v51 = vrot.slane %v9634_v12, 1 }
 0x626   :  { %7730 = vst [vmem:[#allocation2 + $0x488] sm:$0xfe] %v7544_v23  ;;  %7732 = vst [vmem:[#allocation2 + $0x498] sm:$0x1] %v7544_v23  ;;  %v7080_v5 = vpop.f32.mrb[60].mxu0  ;;  %v9957_v55 = vrot.slane %v9635_v10, 1  ;;  %v19493_v23 = vsel %vm2675_vm0, %v9951_v26, %v9952_v32  ;;  %v19498_v40 = vsel %vm2675_vm0, %v9948_v61, %v9949_v46 }
 0x627   :  { %v9637_v45 = vld [vmem:[#allocation2 + $0x458] sm:$0x1]  ;;  %v9636_v20 = vld [vmem:[#allocation2 + $0x450] sm:$0x1]  ;;  %v7417_v6 = vadd.f32 %v19000_v2, %v7080_v5  ;;  %v7082_v29 = vpop.f32.mrb[61].mxu0  ;;  %21502 = vst [vmem:[#allocation96_spill] sm:$0xff] %v19493_v23 }
 0x628   :  { %v9958_v27 = vrot.slane %v9637_v45, 1  ;;  %v7418_v44 = vadd.f32 %v19004_v53, %v7082_v29  ;;  %v7084_v12 = vpop.f32.mrb[62].mxu0  ;;  %v9955_v60 = vrot.slane %v9636_v20, 1  ;;  %v12259_v14 = vrot.slane %v19474_v30, 2  ;;  %21503 = vst [vmem:[#allocation97_spill] sm:$0xff] %v19498_v40  ;;  %v19504_v21 = vld [vmem:[#allocation2 + $0x460] sm:$0xff] }
 0x629   :  { %v7545_v33 = vrot.slane %v7417_v6, 7  ;;  %v7419_v16 = vadd.f32 %v19000_v2, %v7084_v12  ;;  %v7086_v10 = vpop.f32.mrb[63].mxu0  ;;  %v11963_v45 = vld [vmem:[#allocation2 + $0x98] sm:$0x3]  ;;  %21505 = vst [vmem:[#allocation99_spill] sm:$0xff] %v19504_v21  ;;  %v19511_v46 = vld [vmem:[#allocation2 + $0x468] sm:$0xff] }
 0x62a   :  { %v19501_v5 = vsel %vm2675_vm0, %v9957_v55, %v9958_v27  ;;  %v7546_v0 = vrot.slane %v7418_v44, 7  ;;  %v7420_v29 = vadd.f32 %v19004_v53, %v7086_v10  ;;  %v9638_v26 = vld [vmem:[#allocation2 + $0x460] sm:$0xfe]  ;;  %v9640_v32 = vld [vmem:[#allocation2 + $0x470] sm:$0x1]  ;;  %v19507_v30 = vsel %vm2675_vm0, %v9954_v51, %v9955_v60  ;;  %21507 = vst [vmem:[#allocation101_spill] sm:$0xff] %v19511_v46 }
 0x62b   :  { %21504 = vst [vmem:[#allocation98_spill] sm:$0xff] %v19501_v5  ;;  %21506 = vst [vmem:[#allocation100_spill] sm:$0xff] %v19507_v30  ;;  %v7547_v6 = vrot.slane %v7419_v16, 7  ;;  %v19515_v55 = vpack.c.bf16 %v19504_v21, %v19480_v50  ;;  %v9639_v53 = vld [vmem:[#allocation2 + $0x468] sm:$0xfe]  ;;  %v19523_v16 = vld [vmem:[#allocation2 + $0x480] sm:$0xff] }
 0x62c   :  { %7733 = vst [vmem:[#allocation2 + $0x4a0] sm:$0xfe] %v7545_v33  ;;  %7735 = vst [vmem:[#allocation2 + $0x4b0] sm:$0x1] %v7545_v33  ;;  %v9641_v61 = vld [vmem:[#allocation2 + $0x478] sm:$0x1]  ;;  %v19521_v33 = vpack.c.bf16 %v19511_v46, %v19482_v37 }
 0x62d   :  { %21508 = vst [vmem:[#allocation102_spill] sm:$0xff] %v19515_v55  ;;  %v11957_v27 = vld [vmem:[#allocation2 + $0x68] sm:$0xfc]  ;;  %v11959_v60 = vld [vmem:[#allocation2 + $0x78] sm:$0x3]  ;;  %v7548_v51 = vrot.slane %v7420_v29, 7 }
 0x62e   :  { %7734 = vst [vmem:[#allocation2 + $0x4a8] sm:$0xfe] %v7546_v0  ;;  %7736 = vst [vmem:[#allocation2 + $0x4b8] sm:$0x1] %v7546_v0  ;;  %v9963_v44 = vrot.slane %v9639_v53, 1  ;;  %v9964_v12 = vrot.slane %v9641_v61, 1  ;;  %8217 = vmatprep.mubr.bf16.mxu1 %v19521_v33 }
 0x62f   :  { %21509 = vst [vmem:[#allocation103_spill] sm:$0xff] %v19521_v33  ;;  %21510 = vst [vmem:[#allocation104_spill] sm:$0xff] %v19523_v16  ;;  %v9642_v10 = vld [vmem:[#allocation2 + $0x480] sm:$0xfe]  ;;  %v19525_v2 = vld [vmem:[#allocation2 + $0x488] sm:$0xff]  ;;  %v9960_v30 = vrot.slane %v9638_v26, 1  ;;  %8218 = vmatmul.mubr.bf16.gmra.mrb[56].mxu1 %v19515_v55 }
 0x630   :  { %7737 = vst [vmem:[#allocation2 + $0x4c0] sm:$0xfe] %v7547_v6  ;;  %7739 = vst [vmem:[#allocation2 + $0x4d0] sm:$0x1] %v7547_v6  ;;  %v9961_v5 = vrot.slane %v9640_v32, 1  ;;  %v9966_v29 = vrot.slane %v9642_v10, 1  ;;  %v19534_v32 = vsel %vm2675_vm0, %v9963_v44, %v9964_v12 }
 0x631   :  { %21511 = vst [vmem:[#allocation105_spill] sm:$0xff] %v19525_v2  ;;  %v9643_v0 = vld [vmem:[#allocation2 + $0x488] sm:$0xfe]  ;;  %7738 = vst [vmem:[#allocation2 + $0x4c8] sm:$0xfe] %v7548_v51  ;;  %v12260_v6 = vrot.slane %v11963_v45, 2 }
 0x632   :  { %7740 = vst [vmem:[#allocation2 + $0x4d8] sm:$0x1] %v7548_v51  ;;  %v9645_v61 = vld [vmem:[#allocation2 + $0x498] sm:$0x1]  ;;  %v9969_v40 = vrot.slane %v9643_v0, 1  ;;  %v12253_v20 = vrot.slane %v11957_v27, 2  ;;  %v19537_v51 = vsel %vm2675_vm0, %v9960_v30, %v9961_v5  ;;  %v21522_v30 = vpack.c.bf16 %v19026_v31, %v19016_v4 }
 0x633   :  { %v9644_v23 = vld [vmem:[#allocation2 + $0x490] sm:$0x1]  ;;  %v9970_v50 = vrot.slane %v9645_v61, 1  ;;  %v12254_v26 = vrot.slane %v11959_v60, 2  ;;  %21512 = vst [vmem:[#allocation106_spill] sm:$0xff] %v19534_v32  ;;  %21513 = vst [vmem:[#allocation107_spill] sm:$0xff] %v19537_v51  ;;  %v19552_v27 = vsel %vm5122_vm1, %v12259_v14, %v12260_v6 }
 0x634   :  { %v9967_v37 = vrot.slane %v9644_v23, 1  ;;  %v19545_v0 = vld [vmem:[#allocation2 + $0x4a0] sm:$0xff]  ;;  %21517 = vst [vmem:[#allocation111_spill] sm:$0xff] %v19552_v27  ;;  %v19576_v44 = vld [vmem:[#allocation2 + $0x70] sm:$0x3] }
 0x635   :  { %v19540_v10 = vsel %vm2675_vm0, %v9969_v40, %v9970_v50  ;;  %21516 = vst [vmem:[#allocation110_spill] sm:$0xff] %v19545_v0  ;;  %v19554_v60 = vld [vmem:[#allocation2 + $0x4a8] sm:$0xff]  ;;  %v19565_v50 = vpack.c.bf16 %v19545_v0, %v19523_v16  ;;  %v19571_v14 = vld [vmem:[#allocation2 + $0x60] sm:$0xfc]  ;;  %v19580_v12 = vld [vmem:[#allocation2 + $0xb8] sm:$0x3] }
 0x636   :  { %21514 = vst [vmem:[#allocation108_spill] sm:$0xff] %v19540_v10  ;;  %v19543_v53 = vsel %vm2675_vm0, %v9966_v29, %v9967_v37  ;;  %21518 = vst [vmem:[#allocation112_spill] sm:$0xff] %v19554_v60  ;;  %v19558_v40 = vpack.c.bf16 %v19554_v60, %v19525_v2  ;;  %v19561_v37 = vsel %vm5122_vm1, %v12253_v20, %v12254_v26  ;;  %v19578_v20 = vld [vmem:[#allocation2 + $0xa8] sm:$0xfc]  ;;  %v11960_v29 = vld [vmem:[#allocation2 + $0x80] sm:$0xfc] }
 0x637   :  { %21515 = vst [vmem:[#allocation109_spill] sm:$0xff] %v19543_v53  ;;  %21520 = vst [vmem:[#allocation114_spill] sm:$0xff] %v19561_v37  ;;  %v11962_v61 = vld [vmem:[#allocation2 + $0x90] sm:$0x3]  ;;  %v11964_v6 = vld [vmem:[#allocation2 + $0xa0] sm:$0xfc] }
 0x638   :  { %21519 = vst [vmem:[#allocation113_spill] sm:$0xff] %v19558_v40  ;;  %21521 = vst [vmem:[#allocation115_spill] sm:$0xff] %v19565_v50  ;;  %8227 = vmatprep.mubr.bf16.mxu1 %v19558_v40  ;;  %v11966_v26 = vld [vmem:[#allocation2 + $0xb0] sm:$0x3]  ;;  %v11969_v5 = vld [vmem:[#allocation2 + $0xc8] sm:$0xfc] }
 0x639   :  { %8228 = vmatmul.mubr.bf16.gmra.mrb[60].mxu1 %v19565_v50  ;;  %v11971_v23 = vld [vmem:[#allocation2 + $0xd8] sm:$0x3]  ;;  %v17040_v45 = vld [vmem:[#allocation10 + $0x600] ss:$8 sps:$4 sm:$0xff]   ;;  %v12250_v37 = vrot.slane %v19571_v14, 2  ;;  %v12251_v53 = vrot.slane %v19576_v44, 2  ;;  %v21523_v14 = vpack.c.bf16 %v19024_v35, %v19014_v54 }
 0x63a   :  { %8559 = vmatprep.mubr.bf16.mxu1 %v21522_v30  ;;  %v17045_v27 = vld [vmem:[#allocation10 + $0x614] ss:$8 sps:$4 sm:$0xff]   ;;  %v12265_v4 = vrot.slane %v19578_v20, 2  ;;  %v12266_v31 = vrot.slane %v19580_v12, 2  ;;  %v12256_v30 = vrot.slane %v11960_v29, 2  ;;  %v12257_v10 = vrot.slane %v11962_v61, 2 }
 0x63b   :  { %v11968_v51 = vld [vmem:[#allocation2 + $0xc0] sm:$0xfc]  ;;  %v12262_v32 = vrot.slane %v11964_v6, 2  ;;  %v12263_v50 = vrot.slane %v11966_v26, 2  ;;  %v12271_v40 = vrot.slane %v11969_v5, 2  ;;  %v12272_v55 = vrot.slane %v11971_v23, 2 }
 0x63c   :  { %v11970_v33 = vld [vmem:[#allocation2 + $0xd0] sm:$0x3]  ;;  %v17043_v0 = vld [vmem:[#allocation10 + $0x610] ss:$8 sps:$4 sm:$0xff]   ;;  %v11989_v21 = vld [vmem:[#allocation2 + $0x168] sm:$0xfc]  ;;  %v21524_v61 = vpack.c.bf16 %v19066_v48, %v19052_v39 }
 0x63d   :  { %v11991_v16 = vld [vmem:[#allocation2 + $0x178] sm:$0x3]  ;;  %v19586_v60 = vld [vmem:[#allocation2 + $0x160] sm:$0xfc]  ;;  %v19591_v20 = vld [vmem:[#allocation2 + $0x170] sm:$0x3] }
 0x63e   :  { %v17048_v44 = vld [vmem:[#allocation10 + $0x624] ss:$8 sps:$4 sm:$0xff]   ;;  %v11995_v29 = vld [vmem:[#allocation2 + $0x198] sm:$0x3]  ;;  %v12268_v23 = vrot.slane %v11968_v51, 2  ;;  %v12269_v5 = vrot.slane %v11970_v33, 2  ;;  %v19615_v33 = vsel %vm5122_vm1, %v12265_v4, %v12266_v31 }
 0x63f   :  { %v11993_v12 = vld [vmem:[#allocation2 + $0x188] sm:$0xfc]  ;;  %v19598_v26 = vld [vmem:[#allocation2 + $0x1b8] sm:$0x3]  ;;  %v12289_v46 = vrot.slane %v11989_v21, 2  ;;  %v12290_v54 = vrot.slane %v11991_v16, 2  ;;  %v19607_v21 = vsel %vm5122_vm1, %v12256_v30, %v12257_v10 }
 0x640   :  { %v19596_v6 = vld [vmem:[#allocation2 + $0x1a8] sm:$0xfc]  ;;  %v11992_v35 = vld [vmem:[#allocation2 + $0x180] sm:$0xfc]  ;;  %v12286_v36 = vrot.slane %v19586_v60, 2  ;;  %v12287_v1 = vrot.slane %v19591_v20, 2 }
 0x641   :  { %8560 = vmatmul.mubr.bf16.vlgmr.msra.gmra.mrb[0].mxu1 %v21523_v14  ;;  %v11994_v14 = vld [vmem:[#allocation2 + $0x190] sm:$0x3]  ;;  %v17046_v2 = vld [vmem:[#allocation10 + $0x620] ss:$8 sps:$4 sm:$0xff]   ;;  %v12295_v43 = vrot.slane %v11993_v12, 2  ;;  %v12296_v39 = vrot.slane %v11995_v29, 2  ;;  %v19612_v29 = vsel %vm5122_vm1, %v12250_v37, %v12251_v53 }
 0x642   :  { %8569 = vmatprep.mubr.bf16.mxu1 %v21524_v61  ;;  %9114 = vmatpush1.bf16.msra.mxu1 %v17040_v45  ;;  %v19602_v48 = vld [vmem:[#allocation2 + $0x1a0] sm:$0xfc]  ;;  %v17051_v51 = vld [vmem:[#allocation10 + $0x634] ss:$8 sps:$4 sm:$0xff]   ;;  %v12001_v61 = vld [vmem:[#allocation2 + $0x1c8] sm:$0xfc]  ;;  %v19618_v45 = vsel %vm5122_vm1, %v12262_v32, %v12263_v50  ;;  %v21532_v32 = vpack.c.bf16 %v19064_v11, %v19045_v13 }
 0x643   :  { %9115 = vmatprep.subr.bf16.mxu1 %v17045_v27  ;;  %v12003_v27 = vld [vmem:[#allocation2 + $0x1d8] sm:$0x3]  ;;  %21525 = vst [vmem:[#allocation116_spill] sm:$0xff] %v19607_v21  ;;  %v19609_v16 = vld [vmem:[#allocation2 + $0x1b0] sm:$0x3]  ;;  %v12292_v60 = vrot.slane %v11992_v35, 2 }
 0x644   :  { %v12293_v52 = vrot.slane %v11994_v14, 2  ;;  %v12005_v20 = vld [vmem:[#allocation2 + $0x1e8] sm:$0xfc]  ;;  %v12000_v12 = vld [vmem:[#allocation2 + $0x1c0] sm:$0xfc]  ;;  %21526 = vst [vmem:[#allocation117_spill] sm:$0xff] %v19612_v29  ;;  %v19624_v14 = vsel %vm5122_vm1, %v12268_v23, %v12269_v5  ;;  %v21534_v5 = vpack.c.bf16 %v19108_v49, %v19094_v7  ;;  %v19650_v49 = vsel %vm5122_vm1, %v12286_v36, %v12287_v1 }
 0x645   :  { %21527 = vst [vmem:[#allocation118_spill] sm:$0xff] %v19615_v33  ;;  %21528 = vst [vmem:[#allocation119_spill] sm:$0xff] %v19618_v45  ;;  %v12002_v10 = vld [vmem:[#allocation2 + $0x1d0] sm:$0x3]  ;;  %v12009_v30 = vld [vmem:[#allocation2 + $0x208] sm:$0xfc] }
 0x646   :  { %9116 = vmatpush1.bf16.msra.mxu1 %v17043_v0  ;;  %v19621_v0 = vsel %vm5122_vm1, %v12271_v40, %v12272_v55  ;;  %v17049_v35 = vld [vmem:[#allocation10 + $0x630] ss:$8 sps:$4 sm:$0xff]   ;;  %21530 = vst [vmem:[#allocation121_spill] sm:$0xff] %v19624_v14  ;;  %v12298_v53 = vrot.slane %v19602_v48, 2  ;;  %v12007_v37 = vld [vmem:[#allocation2 + $0x1f8] sm:$0x3]  ;;  %v19634_v55 = vsel %vm5122_vm1, %v12295_v43, %v12296_v39 }
 0x647   :  { %9117 = vmatprep.subr.bf16.mxu1 %v17048_v44  ;;  %21529 = vst [vmem:[#allocation120_spill] sm:$0xff] %v19621_v0  ;;  %v19627_v44 = vsel %vm5122_vm1, %v12289_v46, %v12290_v54  ;;  %v12307_v4 = vrot.slane %v12001_v61, 2  ;;  %v12004_v31 = vld [vmem:[#allocation2 + $0x1e0] sm:$0xfc]  ;;  %21533 = vst [vmem:[#allocation123_spill] sm:$0xff] %v19634_v55  ;;  %v12308_v40 = vrot.slane %v12003_v27, 2  ;;  %v19646_v27 = vsel %vm5122_vm1, %v12292_v60, %v12293_v52 }
 0x648   :  { %21531 = vst [vmem:[#allocation122_spill] sm:$0xff] %v19627_v44  ;;  %v12006_v50 = vld [vmem:[#allocation2 + $0x1f0] sm:$0x3]  ;;  %v12304_v38 = vrot.slane %v12000_v12, 2  ;;  %v12008_v23 = vld [vmem:[#allocation2 + $0x200] sm:$0xfc] }
 0x649   :  { %8570 = vmatmul.mubr.bf16.gmra.mrb[4].mxu1 %v21532_v32  ;;  %v12305_v54 = vrot.slane %v12002_v10, 2  ;;  %v12319_v48 = vrot.slane %v12009_v30, 2  ;;  %v12320_v61 = vrot.slane %v12011_v15, 2  ;;  %v12010_v13 = vld [vmem:[#allocation2 + $0x210] sm:$0x3]  ;;  %v19643_v43 = vld [vmem:[#allocation2 + $0x108] sm:$0xff] }
 0x64a   :  { %8579 = vmatprep.mubr.bf16.mxu1 %v21534_v5  ;;  %9118 = vmatpush1.bf16.msra.mxu1 %v17046_v2  ;;  %v17054_v39 = vld [vmem:[#allocation10 + $0x644] ss:$8 sps:$4 sm:$0xff]   ;;  %21535 = vst [vmem:[#allocation124_spill] sm:$0xff] %v19646_v27  ;;  %v12299_v12 = vrot.slane %v19609_v16, 2  ;;  %v12313_v32 = vrot.slane %v12005_v20, 2  ;;  %v12314_v7 = vrot.slane %v12007_v37, 2  ;;  %v19655_v5 = vsel %vm5122_vm1, %v12307_v4, %v12308_v40 }
 0x64b   :  { %9119 = vmatprep.subr.bf16.mxu1 %v17051_v51  ;;  %21536 = vst [vmem:[#allocation125_spill] sm:$0xff] %v19650_v49  ;;  %v12316_v2 = vrot.slane %v12008_v23, 2  ;;  %v12317_v15 = vrot.slane %v12010_v13, 2  ;;  %v12029_v10 = vld [vmem:[#allocation2 + $0x2a8] sm:$0xfc]  ;;  %21537 = vst [vmem:[#allocation126_spill] sm:$0xff] %v19655_v5  ;;  %v19661_v37 = vsel %vm5122_vm1, %v12304_v38, %v12305_v54  ;;  %v19664_v23 = vsel %vm5122_vm1, %v12319_v48, %v12320_v61 }
 0x64c   :  { %v12310_v51 = vrot.slane %v12004_v31, 2  ;;  %v12311_v11 = vrot.slane %v12006_v50, 2  ;;  %v12031_v52 = vld [vmem:[#allocation2 + $0x2b8] sm:$0x3]  ;;  %v17478_v60 = vld [vmem:[#allocation2 + $0xe8] sm:$0xff]  ;;  %21538 = vst [vmem:[#allocation127_spill] sm:$0xff] %v19661_v37  ;;  %v19679_v38 = vsel %vm5122_vm1, %v12313_v32, %v12314_v7 }
 0x64d   :  { %v8309_v20 = vpack.c.bf16 %v19643_v43, %v17478_v60  ;;  %v17052_v36 = vld [vmem:[#allocation10 + $0x640] ss:$8 sps:$4 sm:$0xff]   ;;  %v17057_v1 = vld [vmem:[#allocation10 + $0x654] ss:$8 sps:$4 sm:$0xff]   ;;  %21539 = vst [vmem:[#allocation128_spill] sm:$0xff] %v19664_v23  ;;  %v21540_v40 = vrot.slane %v19598_v26, 2  ;;  %v19682_v31 = vsel %vm5122_vm1, %v12316_v2, %v12317_v15 }
 0x64e   :  { %9120 = vmatpush1.bf16.msra.mxu1 %v17049_v35  ;;  %v12028_v4 = vld [vmem:[#allocation2 + $0x2a0] sm:$0xfc]  ;;  %v21541_v50 = vrot.slane %v19596_v6, 2  ;;  %v19676_v35 = vsel %vm5122_vm1, %v12298_v53, %v12299_v12  ;;  %21544 = vst [vmem:[#allocation131_spill] sm:$0xff] %v19679_v38  ;;  %v12337_v54 = vrot.slane %v12029_v10, 2  ;;  %21545 = vst [vmem:[#allocation132_spill] sm:$0xff] %v19682_v31  ;;  %v21546_v53 = vpack.c.bf16 %v19106_v42, %v19087_v8 }
 0x64f   :  { %9121 = vmatprep.subr.bf16.mxu1 %v17054_v39  ;;  %21543 = vst [vmem:[#allocation130_spill] sm:$0xff] %v19676_v35  ;;  %v12030_v48 = vld [vmem:[#allocation2 + $0x2b0] sm:$0x3]  ;;  %v12033_v61 = vld [vmem:[#allocation2 + $0x2c8] sm:$0xfc]  ;;  %v12338_v39 = vrot.slane %v12031_v52, 2  ;;  %v19690_v32 = vsel %vm5122_vm1, %v12310_v51, %v12311_v11 }
 0x650   :  { %v19673_v13 = vsel %vm5122_vm1, %v21541_v50, %v21540_v40  ;;  %v17055_v60 = vld [vmem:[#allocation10 + $0x650] ss:$8 sps:$4 sm:$0xff]   ;;  %v12035_v26 = vld [vmem:[#allocation2 + $0x2d8] sm:$0x3]  ;;  %v12037_v16 = vld [vmem:[#allocation2 + $0x2e8] sm:$0xfc] }
 0x651   :  { %21542 = vst [vmem:[#allocation129_spill] sm:$0xff] %v19673_v13  ;;  %v12343_v6 = vrot.slane %v12033_v61, 2  ;;  %8580 = vmatmul.mubr.bf16.gmra.mrb[8].mxu1 %v21546_v53  ;;  %v17060_v12 = vld [vmem:[#allocation10 + $0x664] ss:$8 sps:$4 sm:$0xff]   ;;  %21547 = vst [vmem:[#allocation133_spill] sm:$0xff] %v19690_v32  ;;  %v12334_v7 = vrot.slane %v12028_v4, 2  ;;  %v19701_v30 = vsel %vm5122_vm1, %v12337_v54, %v12338_v39 }
 0x652   :  { %v12039_v10 = vld [vmem:[#allocation2 + $0x2f8] sm:$0x3]  ;;  %8589 = vmatprep.mubr.bf16.mxu1 %v8309_v20  ;;  %v19696_v52 = vld [vmem:[#allocation2 + $0x100] sm:$0xff]  ;;  %9122 = vmatpush1.bf16.msra.mxu1 %v17052_v36  ;;  %v12335_v50 = vrot.slane %v12030_v48, 2  ;;  %v12344_v61 = vrot.slane %v12035_v26, 2  ;;  %v12349_v8 = vrot.slane %v12037_v16, 2 }
 0x653   :  { %v12350_v42 = vrot.slane %v12039_v10, 2  ;;  %v12032_v53 = vld [vmem:[#allocation2 + $0x2c0] sm:$0xfc]  ;;  %9123 = vmatprep.subr.bf16.mxu1 %v17057_v1  ;;  %v12034_v11 = vld [vmem:[#allocation2 + $0x2d0] sm:$0x3]  ;;  %21548 = vst [vmem:[#allocation134_spill] sm:$0xff] %v19701_v30 }
 0x654   :  { %v12036_v51 = vld [vmem:[#allocation2 + $0x2e0] sm:$0xfc]  ;;  %v12038_v4 = vld [vmem:[#allocation2 + $0x2f0] sm:$0x3]  ;;  %v19704_v20 = vsel %vm5122_vm1, %v12343_v6, %v12344_v61  ;;  %v12340_v36 = vrot.slane %v12032_v53, 2  ;;  %v12341_v48 = vrot.slane %v12034_v11, 2  ;;  %v19709_v40 = vsel %vm5122_vm1, %v12334_v7, %v12335_v50 }
 0x655   :  { %v17058_v2 = vld [vmem:[#allocation10 + $0x660] ss:$8 sps:$4 sm:$0xff]   ;;  %21549 = vst [vmem:[#allocation135_spill] sm:$0xff] %v19704_v20  ;;  %v12043_v16 = vld [vmem:[#allocation2 + $0x318] sm:$0x3]  ;;  %v12346_v15 = vrot.slane %v12036_v51, 2  ;;  %v19718_v7 = vsel %vm5122_vm1, %v12349_v8, %v12350_v42 }
 0x656   :  { %v12041_v26 = vld [vmem:[#allocation2 + $0x308] sm:$0xfc]  ;;  %v17063_v10 = vld [vmem:[#allocation10 + $0x674] ss:$8 sps:$4 sm:$0xff]   ;;  %9124 = vmatpush1.bf16.msra.mxu1 %v17055_v60  ;;  %21550 = vst [vmem:[#allocation136_spill] sm:$0xff] %v19709_v40  ;;  %v19712_v54 = vsel %vm5122_vm1, %v12340_v36, %v12341_v48  ;;  %v12356_v61 = vrot.slane %v12043_v16, 2 }
 0x657   :  { %v12045_v1 = vld [vmem:[#allocation2 + $0x328] sm:$0xfc]  ;;  %21551 = vst [vmem:[#allocation137_spill] sm:$0xff] %v19712_v54  ;;  %v12047_v39 = vld [vmem:[#allocation2 + $0x338] sm:$0x3]  ;;  %v12355_v6 = vrot.slane %v12041_v26, 2  ;;  %9125 = vmatprep.subr.bf16.mxu1 %v17060_v12 }
 0x658   :  { %v12040_v53 = vld [vmem:[#allocation2 + $0x300] sm:$0xfc]  ;;  %v12347_v51 = vrot.slane %v12038_v4, 2  ;;  %v12042_v23 = vld [vmem:[#allocation2 + $0x310] sm:$0x3]  ;;  %21552 = vst [vmem:[#allocation138_spill] sm:$0xff] %v19718_v7 }
 0x659   :  { %v17479_v11 = vld [vmem:[#allocation2 + $0xe0] sm:$0xff]  ;;  %v12352_v37 = vrot.slane %v12040_v53, 2  ;;  %v19721_v50 = vsel %vm5122_vm1, %v12355_v6, %v12356_v61  ;;  %v12046_v36 = vld [vmem:[#allocation2 + $0x330] sm:$0x3]  ;;  %v12353_v48 = vrot.slane %v12042_v23, 2  ;;  %v12361_v16 = vrot.slane %v12045_v1, 2 }
 0x65a   :  { %v8308_v31 = vpack.c.bf16 %v19696_v52, %v17479_v11  ;;  %v12044_v32 = vld [vmem:[#allocation2 + $0x320] sm:$0xfc]  ;;  %21553 = vst [vmem:[#allocation139_spill] sm:$0xff] %v19721_v50  ;;  %v12049_v26 = vld [vmem:[#allocation2 + $0x348] sm:$0xfc]  ;;  %v12362_v11 = vrot.slane %v12047_v39, 2  ;;  %v21554_v53 = vpack.c.bf16 %v19158_v19, %v19150_v62  ;;  %9126 = vmatpush1.bf16.msra.mxu1 %v17058_v2  ;;  %v19732_v23 = vsel %vm5122_vm1, %v12346_v15, %v12347_v51 }
 0x65b   :  { %v12367_v12 = vrot.slane %v12049_v26, 2  ;;  %v17061_v8 = vld [vmem:[#allocation10 + $0x670] ss:$8 sps:$4 sm:$0xff]   ;;  %v17066_v42 = vld [vmem:[#allocation10 + $0x684] ss:$8 sps:$4 sm:$0xff]   ;;  %v19729_v6 = vsel %vm5122_vm1, %v12352_v37, %v12353_v48  ;;  %9127 = vmatprep.subr.bf16.mxu1 %v17063_v10  ;;  %21556 = vst [vmem:[#allocation141_spill] sm:$0xff] %v19732_v23 }
 0x65c   :  { %8590 = vmatmul.mubr.bf16.gmra.mrb[12].mxu1 %v8308_v31  ;;  %21555 = vst [vmem:[#allocation140_spill] sm:$0xff] %v19729_v6  ;;  %v12051_v61 = vld [vmem:[#allocation2 + $0x358] sm:$0x3]  ;;  %v12358_v31 = vrot.slane %v12044_v32, 2  ;;  %v12359_v1 = vrot.slane %v12046_v36, 2  ;;  %v19737_v19 = vsel %vm5122_vm1, %v12361_v16, %v12362_v11  ;;  %v21664_v54 = vld [vmem:[#allocation46_spill] sm:$0xff] }
 0x65d   :  { %8599 = vmatprep.mubr.bf16.mxu1 %v21554_v53  ;;  %v12368_v39 = vrot.slane %v12051_v61, 2  ;;  %v12048_v26 = vld [vmem:[#allocation2 + $0x340] sm:$0xfc]  ;;  %v12050_v4 = vld [vmem:[#allocation2 + $0x350] sm:$0x3]  ;;  %21557 = vst [vmem:[#allocation142_spill] sm:$0xff] %v19737_v19 }
 0x65e   :  { %v12364_v37 = vrot.slane %v12048_v26, 2  ;;  %v12365_v48 = vrot.slane %v12050_v4, 2  ;;  %9128 = vmatpush1.bf16.msra.mxu1 %v17061_v8  ;;  %v17064_v10 = vld [vmem:[#allocation10 + $0x680] ss:$8 sps:$4 sm:$0xff]   ;;  %v17069_v15 = vld [vmem:[#allocation10 + $0x694] ss:$8 sps:$4 sm:$0xff]   ;;  %v19745_v51 = vsel %vm5122_vm1, %v12358_v31, %v12359_v1  ;;  %v21561_v4 = vpack.c.bf16 %v19156_v41, %v19148_v28 }
 0x65f   :  { %v19740_v2 = vsel %vm5122_vm1, %v12367_v12, %v12368_v39  ;;  %9129 = vmatprep.subr.bf16.mxu1 %v17066_v42  ;;  %21559 = vst [vmem:[#allocation144_spill] sm:$0xff] %v19745_v51  ;;  %v12069_v16 = vld [vmem:[#allocation2 + $0x3e8] sm:$0xfc]  ;;  %v12071_v11 = vld [vmem:[#allocation2 + $0x3f8] sm:$0x3]  ;;  %v21562_v31 = vpack.c.bf16 %v19198_v58, %v19184_v24  ;;  %v21673_v55 = vld [vmem:[#allocation57_spill] sm:$0xff] }
 0x660   :  { %21558 = vst [vmem:[#allocation143_spill] sm:$0xff] %v19740_v2  ;;  %v19748_v36 = vsel %vm5122_vm1, %v12364_v37, %v12365_v48  ;;  %v12068_v53 = vld [vmem:[#allocation2 + $0x3e0] sm:$0xfc]  ;;  %v17067_v8 = vld [vmem:[#allocation10 + $0x690] ss:$8 sps:$4 sm:$0xff]   ;;  %v12385_v1 = vrot.slane %v12069_v16, 2 }
 0x661   :  { %21560 = vst [vmem:[#allocation145_spill] sm:$0xff] %v19748_v36  ;;  %v17072_v61 = vld [vmem:[#allocation10 + $0x6a4] ss:$8 sps:$4 sm:$0xff]   ;;  %v12386_v39 = vrot.slane %v12071_v11, 2  ;;  %v12382_v26 = vrot.slane %v12068_v53, 2  ;;  %v21682_v45 = vld [vmem:[#allocation68_spill] sm:$0xff] }
 0x662   :  { %v12070_v42 = vld [vmem:[#allocation2 + $0x3f0] sm:$0x3]  ;;  %9130 = vmatpush1.bf16.msra.mxu1 %v17064_v10  ;;  %v12073_v48 = vld [vmem:[#allocation2 + $0x408] sm:$0xfc]  ;;  %v12075_v32 = vld [vmem:[#allocation2 + $0x418] sm:$0x3] }
 0x663   :  { %v12383_v37 = vrot.slane %v12070_v42, 2  ;;  %9131 = vmatprep.subr.bf16.mxu1 %v17069_v15  ;;  %v12077_v12 = vld [vmem:[#allocation2 + $0x428] sm:$0xfc]  ;;  %v12079_v62 = vld [vmem:[#allocation2 + $0x438] sm:$0x3]  ;;  %v12391_v41 = vrot.slane %v12073_v48, 2  ;;  %v19759_v58 = vsel %vm5122_vm1, %v12385_v1, %v12386_v39 }
 0x664   :  { %8600 = vmatmul.mubr.bf16.gmra.mrb[16].mxu1 %v21561_v4  ;;  %v17070_v60 = vld [vmem:[#allocation10 + $0x6a0] ss:$8 sps:$4 sm:$0xff]   ;;  %v12392_v28 = vrot.slane %v12075_v32, 2  ;;  %v12074_v46 = vld [vmem:[#allocation2 + $0x410] sm:$0x3]  ;;  %v12397_v2 = vrot.slane %v12077_v12, 2 }
 0x665   :  { %8609 = vmatprep.mubr.bf16.mxu1 %v21562_v31  ;;  %v12072_v4 = vld [vmem:[#allocation2 + $0x400] sm:$0xfc]  ;;  %v17075_v36 = vld [vmem:[#allocation10 + $0x6b4] ss:$8 sps:$4 sm:$0xff]   ;;  %21563 = vst [vmem:[#allocation146_spill] sm:$0xff] %v19759_v58  ;;  %v12389_v16 = vrot.slane %v12074_v46, 2  ;;  %v21567_v46 = vpack.c.bf16 %v19196_v47, %v19177_v22 }
 0x666   :  { %v12076_v51 = vld [vmem:[#allocation2 + $0x420] sm:$0xfc]  ;;  %9132 = vmatpush1.bf16.msra.mxu1 %v17067_v8  ;;  %v19762_v24 = vsel %vm5122_vm1, %v12391_v41, %v12392_v28  ;;  %v12078_v10 = vld [vmem:[#allocation2 + $0x430] sm:$0x3]  ;;  %v12388_v15 = vrot.slane %v12072_v4, 2  ;;  %v12398_v53 = vrot.slane %v12079_v62, 2  ;;  %v19767_v8 = vsel %vm5122_vm1, %v12382_v26, %v12383_v37 }
 0x667   :  { %21564 = vst [vmem:[#allocation147_spill] sm:$0xff] %v19762_v24  ;;  %v12081_v11 = vld [vmem:[#allocation2 + $0x448] sm:$0xfc]  ;;  %9133 = vmatprep.subr.bf16.mxu1 %v17072_v61  ;;  %v12083_v42 = vld [vmem:[#allocation2 + $0x458] sm:$0x3]  ;;  %21565 = vst [vmem:[#allocation148_spill] sm:$0xff] %v19767_v8  ;;  %v21568_v26 = vpack.c.bf16 %v19240_v17, %v19226_v9 }
 0x668   :  { %v12085_v32 = vld [vmem:[#allocation2 + $0x468] sm:$0xfc]  ;;  %v12403_v31 = vrot.slane %v12081_v11, 2  ;;  %v17073_v48 = vld [vmem:[#allocation10 + $0x6b0] ss:$8 sps:$4 sm:$0xff]   ;;  %v19770_v1 = vsel %vm5122_vm1, %v12388_v15, %v12389_v16  ;;  %v12404_v41 = vrot.slane %v12083_v42, 2  ;;  %v19784_v22 = vsel %vm5122_vm1, %v12397_v2, %v12398_v53 }
 0x669   :  { %21566 = vst [vmem:[#allocation149_spill] sm:$0xff] %v19770_v1  ;;  %v12087_v39 = vld [vmem:[#allocation2 + $0x478] sm:$0x3]  ;;  %v12080_v28 = vld [vmem:[#allocation2 + $0x440] sm:$0xfc]  ;;  %v12394_v61 = vrot.slane %v12076_v51, 2 }
 0x66a   :  { %v17078_v62 = vld [vmem:[#allocation10 + $0x6c4] ss:$8 sps:$4 sm:$0xff]   ;;  %v12395_v4 = vrot.slane %v12078_v10, 2  ;;  %v12400_v11 = vrot.slane %v12080_v28, 2  ;;  %9134 = vmatpush1.bf16.msra.mxu1 %v17070_v60  ;;  %v19781_v37 = vsel %vm5122_vm1, %v12403_v31, %v12404_v41  ;;  %21570 = vst [vmem:[#allocation151_spill] sm:$0xff] %v19784_v22  ;;  %v12409_v47 = vrot.slane %v12085_v32, 2 }
 0x66b   :  { %21569 = vst [vmem:[#allocation150_spill] sm:$0xff] %v19781_v37  ;;  %v12082_v15 = vld [vmem:[#allocation2 + $0x450] sm:$0x3]  ;;  %v12084_v16 = vld [vmem:[#allocation2 + $0x460] sm:$0xfc]  ;;  %9135 = vmatprep.subr.bf16.mxu1 %v17075_v36  ;;  %v12410_v51 = vrot.slane %v12087_v39, 2 }
 0x66c   :  { %8610 = vmatmul.mubr.bf16.gmra.mrb[20].mxu1 %v21567_v46  ;;  %v12086_v42 = vld [vmem:[#allocation2 + $0x470] sm:$0x3]  ;;  %v12401_v10 = vrot.slane %v12082_v15, 2  ;;  %v12089_v28 = vld [vmem:[#allocation2 + $0x488] sm:$0xfc]  ;;  %v12406_v12 = vrot.slane %v12084_v16, 2  ;;  %v19791_v31 = vsel %vm5122_vm1, %v12394_v61, %v12395_v4 }
 0x66d   :  { %8619 = vmatprep.mubr.bf16.mxu1 %v21568_v26  ;;  %v19786_v46 = vld [vmem:[#allocation2 + $0x248] sm:$0xff]  ;;  %v12407_v17 = vrot.slane %v12086_v42, 2  ;;  %v12091_v9 = vld [vmem:[#allocation2 + $0x498] sm:$0x3]  ;;  %21571 = vst [vmem:[#allocation152_spill] sm:$0xff] %v19791_v31  ;;  %v12415_v2 = vrot.slane %v12089_v28, 2  ;;  %v19799_v16 = vsel %vm5122_vm1, %v12409_v47, %v12410_v51  ;;  %v21575_v28 = vpack.c.bf16 %v19238_v25, %v19219_v34 }
 0x66e   :  { %v19794_v36 = vsel %vm5122_vm1, %v12400_v11, %v12401_v10  ;;  %v12416_v53 = vrot.slane %v12091_v9, 2  ;;  %v12088_v32 = vld [vmem:[#allocation2 + $0x480] sm:$0xfc]  ;;  %v12090_v39 = vld [vmem:[#allocation2 + $0x490] sm:$0x3]  ;;  %9136 = vmatpush1.bf16.msra.mxu1 %v17073_v48  ;;  %21573 = vst [vmem:[#allocation154_spill] sm:$0xff] %v19799_v16 }
 0x66f   :  { %21572 = vst [vmem:[#allocation153_spill] sm:$0xff] %v19794_v36  ;;  %v17076_v41 = vld [vmem:[#allocation10 + $0x6c0] ss:$8 sps:$4 sm:$0xff]   ;;  %9137 = vmatprep.subr.bf16.mxu1 %v17078_v62  ;;  %v17081_v15 = vld [vmem:[#allocation10 + $0x6d4] ss:$8 sps:$4 sm:$0xff]   ;;  %v12412_v4 = vrot.slane %v12088_v32, 2  ;;  %v19811_v62 = vsel %vm5122_vm1, %v12406_v12, %v12407_v17  ;;  %v21578_v17 = vpack.c.bf16 %v19294_v56, %v19284_v59 }
 0x670   :  { %v19802_v61 = vsel %vm5122_vm1, %v12415_v2, %v12416_v53  ;;  %v12413_v11 = vrot.slane %v12090_v39, 2  ;;  %v17480_v42 = vld [vmem:[#allocation2 + $0x228] sm:$0xff]  ;;  %21576 = vst [vmem:[#allocation156_spill] sm:$0xff] %v19811_v62  ;;  %v17079_v51 = vld [vmem:[#allocation10 + $0x6d0] ss:$8 sps:$4 sm:$0xff]   ;;  %v19818_v53 = vld [vmem:[#allocation2 + $0x240] sm:$0xff] }
 0x671   :  { %21574 = vst [vmem:[#allocation155_spill] sm:$0xff] %v19802_v61  ;;  %v8317_v10 = vpack.c.bf16 %v19786_v46, %v17480_v42  ;;  %v17084_v2 = vld [vmem:[#allocation10 + $0x6e4] ss:$8 sps:$4 sm:$0xff]   ;;  %v17082_v32 = vld [vmem:[#allocation10 + $0x6e0] ss:$8 sps:$4 sm:$0xff]   ;;  %v21683_v21 = vld [vmem:[#allocation76_spill] sm:$0xff] }
 0x672   :  { %v19814_v47 = vsel %vm5122_vm1, %v12412_v4, %v12413_v11  ;;  %9138 = vmatpush1.bf16.msra.mxu1 %v17076_v41  ;;  %v17481_v34 = vld [vmem:[#allocation2 + $0x220] sm:$0xff]  ;;  %v17085_v39 = vld [vmem:[#allocation10 + $0x6f0] ss:$8 sps:$4 sm:$0xff]   ;;  %v21580_v4 = vpack.c.bf16 %v19338_v57, %v19324_v3  ;;  %v9540_v36 = vld [vmem:[#allocation2 + $0x150] sm:$0x1]  ;;  %v20018_v33 = vpack.c.bf16 %v21683_v21, %v21682_v45 }
 0x673   :  { %21577 = vst [vmem:[#allocation157_spill] sm:$0xff] %v19814_v47  ;;  %9139 = vmatprep.subr.bf16.mxu1 %v17081_v15  ;;  %v8316_v25 = vpack.c.bf16 %v19818_v53, %v17481_v34  ;;  %v17087_v12 = vld [vmem:[#allocation10 + $0x6f4] ss:$8 sps:$4 sm:$0xff]   ;;  %v17090_v41 = vld [vmem:[#allocation10 + $0x104] ss:$8 sps:$4 sm:$0xff]   ;;  %v21579_v15 = vpack.c.bf16 %v19292_v63, %v19280_v18 }
 0x674   :  { %8620 = vmatmul.mubr.bf16.gmra.mrb[24].mxu1 %v21575_v28  ;;  %v21581_v11 = vld [vmem:[#allocation62_spill] sm:$0xff]  ;;  %v21585_v59 = vld [vmem:[#allocation69_spill] sm:$0xff]  ;;  %v21589_v63 = vld [vmem:[#allocation67_spill] sm:$0xff] }
 0x675   :  { %8629 = vmatprep.mubr.bf16.mxu1 %v8317_v10  ;;  %v21582_v42 = vld [vmem:[#allocation58_spill] sm:$0xff]  ;;  %v21588_v34 = vld [vmem:[#allocation73_spill] sm:$0xff]  ;;  %v21656_v22 = vld [vmem:[#allocation35_spill] sm:$0xff] }
 0x676   :  { %9140 = vmatpush1.bf16.msra.mxu1 %v17079_v51  ;;  %v21583_v10 = vpack.c.bf16 %v21581_v11, %v21582_v42  ;;  %v21584_v56 = vld [vmem:[#allocation74_spill] sm:$0xff]  ;;  %v21590_v18 = vpack.c.bf16 %v21588_v34, %v21589_v63  ;;  %v21597_v11 = vld [vmem:[#allocation95_spill] sm:$0xff]  ;;  %v21655_v1 = vld [vmem:[#allocation25_spill] sm:$0xff] }
 0x677   :  { %9141 = vmatprep.subr.bf16.mxu1 %v17084_v2  ;;  %v21586_v28 = vpack.c.bf16 %v21584_v56, %v21585_v59  ;;  %v19836_v51 = vld [vmem:[#allocation2 + $0x388] sm:$0xff]  ;;  %v19843_v57 = vld [vmem:[#allocation2 + $0x380] sm:$0xff]  ;;  %v9581_v50 = vld [vmem:[#allocation2 + $0x298] sm:$0x1] }
 0x678   :  { %v21587_v2 = vld [vmem:[#allocation79_spill] sm:$0xff]  ;;  %v17482_v3 = vld [vmem:[#allocation2 + $0x360] sm:$0xff]  ;;  %v9621_v0 = vld [vmem:[#allocation2 + $0x3d8] sm:$0x1] }
 0x679   :  { %v21598_v42 = vld [vmem:[#allocation91_spill] sm:$0xff]  ;;  %v21600_v56 = vld [vmem:[#allocation94_spill] sm:$0xff]  ;;  %v21601_v59 = vld [vmem:[#allocation89_spill] sm:$0xff] }
 0x67a   :  { %9142 = vmatpush1.bf16.msra.mxu1 %v17082_v32  ;;  %v8325_v32 = vpack.c.bf16 %v19836_v51, %v21587_v2  ;;  %v21603_v2 = vld [vmem:[#allocation105_spill] sm:$0xff]  ;;  %v19861_v63 = vld [vmem:[#allocation2 + $0x4c8] sm:$0xff]  ;;  %v9580_v35 = vld [vmem:[#allocation2 + $0x290] sm:$0x1] }
 0x67b   :  { %9143 = vmatprep.subr.bf16.mxu1 %v17087_v12  ;;  %v21591_v12 = vld [vmem:[#allocation85_spill] sm:$0xff]  ;;  %v21646_v9 = vld [vmem:[#allocation38_spill] sm:$0xff]  ;;  %v21680_v44 = vld [vmem:[#allocation75_spill] sm:$0xff]  ;;  %21684 = vst [vmem:[#allocation105_spill] sm:$0xff] %v20018_v33 }
 0x67c   :  { %8630 = vmatmul.mubr.bf16.gmra.mrb[28].mxu1 %v8316_v25  ;;  %v8324_v25 = vpack.c.bf16 %v19843_v57, %v17482_v3  ;;  %v21647_v48 = vld [vmem:[#allocation18_spill] sm:$0xff]  ;;  %v21662_v24 = vld [vmem:[#allocation49_spill] sm:$0xff] }
 0x67d   :  { %8639 = vmatprep.mubr.bf16.mxu1 %v21578_v17  ;;  %v21592_v17 = vld [vmem:[#allocation83_spill] sm:$0xff]  ;;  %v19938_v26 = vpack.c.bf16 %v21647_v48, %v21646_v9  ;;  %v9538_v62 = vld [vmem:[#allocation2 + $0x140] sm:$0xfe] }
 0x67e   :  { %9144 = vmatpush1.bf16.msra.mxu1 %v17085_v39  ;;  %v21593_v39 = vpack.c.bf16 %v21591_v12, %v21592_v17  ;;  %v21608_v12 = vld [vmem:[#allocation99_spill] sm:$0xff]  ;;  %v9834_v37 = vrot.slane %v9538_v62, 1  ;;  %v9566_v6 = vld [vmem:[#allocation2 + $0x220] sm:$0xfe] }
 0x67f   :  { %10267 = vmatprep.subr.bf16.mxu1 %v17090_v41  ;;  %v21594_v41 = vld [vmem:[#allocation84_spill] sm:$0xff]  ;;  %21648 = vst [vmem:[#allocation69_spill] sm:$0xff] %v19938_v26  ;;  %v17156_v47 = vld [vmem:[#allocation10 + $0x464] ss:$8 sps:$4 sm:$0xff]   ;;  %v17172_v23 = vld [vmem:[#allocation10 + $0x4c0] ss:$8 sps:$4 sm:$0xff]  }
 0x680   :  { %v17168_v62 = vld [vmem:[#allocation10 + $0x4a4] ss:$8 sps:$4 sm:$0xff]   ;;  %v21685_v29 = vld [vmem:[#allocation77_spill] sm:$0xff] }
 0x681   :  { %v9579_v19 = vld [vmem:[#allocation2 + $0x288] sm:$0xfe]  ;;  %v9578_v5 = vld [vmem:[#allocation2 + $0x280] sm:$0xfe] }
 0x682   :  { %v21665_v7 = vld [vmem:[#allocation50_spill] sm:$0xff]  ;;  %v9882_v13 = vrot.slane %v9578_v5, 1 }
 0x683   :  { %v19978_v20 = vpack.c.bf16 %v21665_v7, %v21664_v54  ;;  %v17180_v30 = vld [vmem:[#allocation10 + $0x4e4] ss:$8 sps:$4 sm:$0xff]  }
 0x684   :  { %8640 = vmatmul.mubr.bf16.gmra.mrb[32].mxu1 %v21579_v15  ;;  %v21595_v15 = vld [vmem:[#allocation82_spill] sm:$0xff] }
 0x685   :  { %8649 = vmatprep.mubr.bf16.mxu1 %v21580_v4  ;;  %v21596_v4 = vpack.c.bf16 %v21594_v41, %v21595_v15  ;;  %v21610_v41 = vld [vmem:[#allocation110_spill] sm:$0xff]  ;;  %21666 = vst [vmem:[#allocation84_spill] sm:$0xff] %v19978_v20 }
 0x686   :  { %v9607_v5 = vld [vmem:[#allocation2 + $0x368] sm:$0xfe] }
 0x687   :  { %v9619_v14 = vld [vmem:[#allocation2 + $0x3c8] sm:$0xfe] }
 0x68c   :  { %8650 = vmatmul.mubr.bf16.gmra.mrb[36].mxu1 %v21583_v10  ;;  %v21599_v10 = vpack.c.bf16 %v21597_v11, %v21598_v42  ;;  %v17088_v11 = vld [vmem:[#allocation10 + $0x100] ss:$8 sps:$4 sm:$0xff]   ;;  %v17093_v42 = vld [vmem:[#allocation10 + $0x114] ss:$8 sps:$4 sm:$0xff]  }
 0x68d   :  { %8659 = vmatprep.mubr.bf16.mxu1 %v21586_v28  ;;  %v21602_v28 = vpack.c.bf16 %v21600_v56, %v21601_v59  ;;  %v21613_v56 = vld [vmem:[#allocation42_spill] sm:$0xff]  ;;  %v17091_v59 = vld [vmem:[#allocation10 + $0x110] ss:$8 sps:$4 sm:$0xff]  }
 0x694   :  { %8660 = vmatmul.mubr.bf16.gmra.mrb[40].mxu1 %v21590_v18  ;;  %v21606_v18 = vld [vmem:[#allocation112_spill] sm:$0xff] }
 0x695   :  { %8669 = vmatprep.mubr.bf16.mxu1 %v8325_v32  ;;  %v21604_v32 = vld [vmem:[#allocation101_spill] sm:$0xff]  ;;  %v8333_v3 = vpack.c.bf16 %v19861_v63, %v21606_v18 }
 0x696   :  { %v21605_v34 = vpack.c.bf16 %v21603_v2, %v21604_v32  ;;  %v17094_v2 = vld [vmem:[#allocation10 + $0x120] ss:$8 sps:$4 sm:$0xff]   ;;  %v17099_v32 = vld [vmem:[#allocation10 + $0x134] ss:$8 sps:$4 sm:$0xff]  }
 0x697   :  { %v21615_v18 = vld [vmem:[#allocation21_spill] sm:$0xff] }
 0x69c   :  { %8670 = vmatmul.mubr.bf16.gmra.mrb[44].mxu1 %v8324_v25  ;;  %v21607_v25 = vld [vmem:[#allocation104_spill] sm:$0xff] }
 0x69d   :  { %8679 = vmatprep.mubr.bf16.mxu1 %v21593_v39  ;;  %v21609_v17 = vpack.c.bf16 %v21607_v25, %v21608_v12  ;;  %v19868_v39 = vld [vmem:[#allocation2 + $0x4c0] sm:$0xff] }
 0x69e   :  { %v8332_v15 = vpack.c.bf16 %v19868_v39, %v21610_v41  ;;  %v17102_v25 = vld [vmem:[#allocation10 + $0x144] ss:$8 sps:$4 sm:$0xff]   ;;  %v17100_v12 = vld [vmem:[#allocation10 + $0x140] ss:$8 sps:$4 sm:$0xff]  }
 0x69f   :  { %v19877_v41 = vld [vmem:[#allocation2 + $0x8] sm:$0xff] }
 0x6a4   :  { %8680 = vmatmul.mubr.bf16.gmra.mrb[48].mxu1 %v21596_v4  ;;  %v21611_v4 = vld [vmem:[#allocation41_spill] sm:$0xff] }
 0x6a5   :  { %8689 = vmatprep.mubr.bf16.mxu1 %v21599_v10  ;;  %v21612_v10 = vld [vmem:[#allocation37_spill] sm:$0xff] }
 0x6ac   :  { %8690 = vmatmul.mubr.bf16.gmra.mrb[52].mxu1 %v21602_v28  ;;  %v17096_v28 = vld [vmem:[#allocation10 + $0x124] ss:$8 sps:$4 sm:$0xff]  }
 0x6ad   :  { %8699 = vmatprep.mubr.bf16.mxu1 %v21605_v34  ;;  %v21614_v34 = vld [vmem:[#allocation40_spill] sm:$0xff] }
 0x6b4   :  { %8700 = vmatmul.mubr.bf16.gmra.mrb[56].mxu1 %v21609_v17  ;;  %v17105_v17 = vld [vmem:[#allocation10 + $0x154] ss:$8 sps:$4 sm:$0xff]  }
 0x6b5   :  { %8709 = vmatprep.mubr.bf16.mxu1 %v8333_v3  ;;  %v17097_v3 = vld [vmem:[#allocation10 + $0x130] ss:$8 sps:$4 sm:$0xff]  }
 0x6bc   :  { %8710 = vmatmul.mubr.bf16.gmra.mrb[60].mxu1 %v8332_v15  ;;  %v8913_v15 = vpack.c.bf16 %v19877_v41, %v19643_v43  ;;  %v17114_v43 = vld [vmem:[#allocation10 + $0x184] ss:$8 sps:$4 sm:$0xff]  }
 0x6bd   :  { %9145 = vmatprep.mubr.bf16.mxu1 %v21611_v4  ;;  %v21616_v4 = vld [vmem:[#allocation22_spill] sm:$0xff] }
 0x6c4   :  { %9146 = vmatmul.mubr.bf16.vlgmr.msra.gmra.mrb[0].mxu1 %v21612_v10  ;;  %v17106_v10 = vld [vmem:[#allocation10 + $0x160] ss:$8 sps:$4 sm:$0xff]  }
 0x6c5   :  { %9155 = vmatprep.mubr.bf16.mxu1 %v21613_v56  ;;  %10268 = vmatpush1.bf16.msra.mxu1 %v17088_v11  ;;  %v17103_v11 = vld [vmem:[#allocation10 + $0x150] ss:$8 sps:$4 sm:$0xff]   ;;  %v8912_v56 = vpack.c.bf16 %v19877_v41, %v19696_v52  ;;  %v17120_v52 = vld [vmem:[#allocation10 + $0x1a4] ss:$8 sps:$4 sm:$0xff]  }
 0x6c6   :  { %10269 = vmatprep.subr.bf16.mxu1 %v17093_v42  ;;  %v17108_v42 = vld [vmem:[#allocation10 + $0x164] ss:$8 sps:$4 sm:$0xff]  }
 0x6c9   :  { %10270 = vmatpush1.bf16.msra.mxu1 %v17091_v59  ;;  %v17111_v59 = vld [vmem:[#allocation10 + $0x174] ss:$8 sps:$4 sm:$0xff]  }
 0x6ca   :  { %10271 = vmatprep.subr.bf16.mxu1 %v17096_v28  ;;  %v21617_v28 = vld [vmem:[#allocation30_spill] sm:$0xff] }
 0x6cc   :  { %9156 = vmatmul.mubr.bf16.gmra.mrb[4].mxu1 %v21614_v34  ;;  %v17117_v34 = vld [vmem:[#allocation10 + $0x194] ss:$8 sps:$4 sm:$0xff]  }
 0x6cd   :  { %9165 = vmatprep.mubr.bf16.mxu1 %v21615_v18  ;;  %10272 = vmatpush1.bf16.msra.mxu1 %v17094_v2  ;;  %v17109_v2 = vld [vmem:[#allocation10 + $0x170] ss:$8 sps:$4 sm:$0xff]  }
 0x6ce   :  { %10273 = vmatprep.subr.bf16.mxu1 %v17099_v32  ;;  %v17112_v32 = vld [vmem:[#allocation10 + $0x180] ss:$8 sps:$4 sm:$0xff]   ;;  %v21618_v18 = vld [vmem:[#allocation28_spill] sm:$0xff] }
 0x6d1   :  { %10274 = vmatpush1.bf16.msra.mxu1 %v17097_v3  ;;  %v21619_v3 = vld [vmem:[#allocation48_spill] sm:$0xff] }
 0x6d2   :  { %10275 = vmatprep.subr.bf16.mxu1 %v17102_v25  ;;  %v17115_v25 = vld [vmem:[#allocation10 + $0x190] ss:$8 sps:$4 sm:$0xff]  }
 0x6d4   :  { %9166 = vmatmul.mubr.bf16.gmra.mrb[8].mxu1 %v21616_v4  ;;  %v21621_v4 = vld [vmem:[#allocation53_spill] sm:$0xff] }
 0x6d5   :  { %9175 = vmatprep.mubr.bf16.mxu1 %v8913_v15  ;;  %10276 = vmatpush1.bf16.msra.mxu1 %v17100_v12  ;;  %v17118_v12 = vld [vmem:[#allocation10 + $0x1a0] ss:$8 sps:$4 sm:$0xff]  }
 0x6d6   :  { %10277 = vmatprep.subr.bf16.mxu1 %v17105_v17  ;;  %v17123_v17 = vld [vmem:[#allocation10 + $0x1b4] ss:$8 sps:$4 sm:$0xff]   ;;  %v21620_v15 = vld [vmem:[#allocation47_spill] sm:$0xff] }
 0x6d9   :  { %10278 = vmatpush1.bf16.msra.mxu1 %v17103_v11  ;;  %v17121_v11 = vld [vmem:[#allocation10 + $0x1b0] ss:$8 sps:$4 sm:$0xff]  }
 0x6da   :  { %10279 = vmatprep.subr.bf16.mxu1 %v17108_v42  ;;  %v17126_v42 = vld [vmem:[#allocation10 + $0x1c4] ss:$8 sps:$4 sm:$0xff]  }
 0x6dc   :  { %9176 = vmatmul.mubr.bf16.gmra.mrb[12].mxu1 %v8912_v56  ;;  %v17129_v56 = vld [vmem:[#allocation10 + $0x1d4] ss:$8 sps:$4 sm:$0xff]  }
 0x6dd   :  { %9185 = vmatprep.mubr.bf16.mxu1 %v21617_v28  ;;  %10280 = vmatpush1.bf16.msra.mxu1 %v17106_v10  ;;  %v17124_v10 = vld [vmem:[#allocation10 + $0x1c0] ss:$8 sps:$4 sm:$0xff]  }
 0x6de   :  { %10281 = vmatprep.subr.bf16.mxu1 %v17111_v59  ;;  %v8915_v59 = vpack.c.bf16 %v19877_v41, %v19786_v46  ;;  %v21622_v28 = vld [vmem:[#allocation54_spill] sm:$0xff] }
 0x6df   :  { %v17138_v46 = vld [vmem:[#allocation10 + $0x404] ss:$8 sps:$4 sm:$0xff]  }
 0x6e1   :  { %10282 = vmatpush1.bf16.msra.mxu1 %v17109_v2  ;;  %v17127_v2 = vld [vmem:[#allocation10 + $0x1d0] ss:$8 sps:$4 sm:$0xff]  }
 0x6e2   :  { %10283 = vmatprep.subr.bf16.mxu1 %v17114_v43  ;;  %v17132_v43 = vld [vmem:[#allocation10 + $0x1e4] ss:$8 sps:$4 sm:$0xff]  }
 0x6e4   :  { %9186 = vmatmul.mubr.bf16.gmra.mrb[16].mxu1 %v21618_v18  ;;  %v17135_v18 = vld [vmem:[#allocation10 + $0x1f4] ss:$8 sps:$4 sm:$0xff]  }
 0x6e5   :  { %9195 = vmatprep.mubr.bf16.mxu1 %v21619_v3  ;;  %10284 = vmatpush1.bf16.msra.mxu1 %v17112_v32  ;;  %v17130_v32 = vld [vmem:[#allocation10 + $0x1e0] ss:$8 sps:$4 sm:$0xff]  }
 0x6e6   :  { %10285 = vmatprep.subr.bf16.mxu1 %v17117_v34  ;;  %v8914_v34 = vpack.c.bf16 %v19877_v41, %v19818_v53  ;;  %v21623_v3 = vld [vmem:[#allocation61_spill] sm:$0xff]  ;;  %v8917_v53 = vpack.c.bf16 %v19877_v41, %v19836_v51  ;;  %v8919_v51 = vpack.c.bf16 %v19877_v41, %v19861_v63 }
 0x6e9   :  { %10286 = vmatpush1.bf16.msra.mxu1 %v17115_v25  ;;  %v17133_v25 = vld [vmem:[#allocation10 + $0x1f0] ss:$8 sps:$4 sm:$0xff]  }
 0x6ea   :  { %10287 = vmatprep.subr.bf16.mxu1 %v17120_v52  ;;  %v21624_v52 = vld [vmem:[#allocation60_spill] sm:$0xff] }
 0x6ec   :  { %9196 = vmatmul.mubr.bf16.gmra.mrb[20].mxu1 %v21620_v15  ;;  %v21627_v15 = vld [vmem:[#allocation80_spill] sm:$0xff] }
 0x6ed   :  { %9205 = vmatprep.mubr.bf16.mxu1 %v21621_v4  ;;  %10288 = vmatpush1.bf16.msra.mxu1 %v17118_v12  ;;  %v21625_v12 = vld [vmem:[#allocation72_spill] sm:$0xff]  ;;  %v21628_v4 = vld [vmem:[#allocation81_spill] sm:$0xff] }
 0x6ee   :  { %10289 = vmatprep.subr.bf16.mxu1 %v17123_v17  ;;  %v21626_v17 = vld [vmem:[#allocation70_spill] sm:$0xff] }
 0x6f1   :  { %10290 = vmatpush1.bf16.msra.mxu1 %v17121_v11  ;;  %v8916_v11 = vpack.c.bf16 %v19877_v41, %v19843_v57 }
 0x6f2   :  { %10291 = vmatprep.subr.bf16.mxu1 %v17126_v42  ;;  %v21629_v42 = vld [vmem:[#allocation93_spill] sm:$0xff] }
 0x6f4   :  { %9206 = vmatmul.mubr.bf16.gmra.mrb[24].mxu1 %v21622_v28  ;;  %v21633_v28 = vld [vmem:[#allocation113_spill] sm:$0xff] }
 0x6f5   :  { %9215 = vmatprep.mubr.bf16.mxu1 %v8915_v59  ;;  %10292 = vmatpush1.bf16.msra.mxu1 %v17124_v10  ;;  %v21630_v10 = vld [vmem:[#allocation92_spill] sm:$0xff]  ;;  %v21632_v59 = vld [vmem:[#allocation102_spill] sm:$0xff] }
 0x6f6   :  { %10293 = vmatprep.subr.bf16.mxu1 %v17129_v56  ;;  %v21631_v56 = vld [vmem:[#allocation103_spill] sm:$0xff] }
 0x6f9   :  { %10294 = vmatpush1.bf16.msra.mxu1 %v17127_v2  ;;  %v9499_v2 = vld [vmem:[#allocation2 + $0x8] sm:$0xfe] }
 0x6fa   :  { %10295 = vmatprep.subr.bf16.mxu1 %v17132_v43  ;;  %v9501_v43 = vld [vmem:[#allocation2 + $0x18] sm:$0x1] }
 0x6fb   :  { %v9790_v57 = vrot.slane %v9501_v43, 1  ;;  %v9529_v43 = vld [vmem:[#allocation2 + $0xf8] sm:$0x1] }
 0x6fc   :  { %9216 = vmatmul.mubr.bf16.gmra.mrb[28].mxu1 %v8914_v34  ;;  %v9789_v34 = vrot.slane %v9499_v2, 1  ;;  %v9527_v2 = vld [vmem:[#allocation2 + $0xe8] sm:$0xfe] }
 0x6fd   :  { %9225 = vmatprep.mubr.bf16.mxu1 %v21623_v3  ;;  %10296 = vmatpush1.bf16.msra.mxu1 %v17130_v32  ;;  %v21634_v32 = vld [vmem:[#allocation115_spill] sm:$0xff]  ;;  %v9498_v3 = vld [vmem:[#allocation2] sm:$0xfe] }
 0x6fe   :  { %10297 = vmatprep.subr.bf16.mxu1 %v17135_v18  ;;  %v9791_v18 = vsel %vm2675_vm0, %v9789_v34, %v9790_v57  ;;  %v17147_v57 = vld [vmem:[#allocation10 + $0x434] ss:$8 sps:$4 sm:$0xff]  }
 0x701   :  { %10298 = vmatpush1.bf16.msra.mxu1 %v17133_v25  ;;  %v9500_v25 = vld [vmem:[#allocation2 + $0x10] sm:$0x1] }
 0x702   :  { %10925 = vmatprep.subr.bf16.mxu1 %v17138_v46  ;;  %v8918_v46 = vpack.c.bf16 %v19877_v41, %v19868_v39  ;;  %v17139_v39 = vld [vmem:[#allocation10 + $0x410] ss:$8 sps:$4 sm:$0xff]   ;;  %v17144_v41 = vld [vmem:[#allocation10 + $0x424] ss:$8 sps:$4 sm:$0xff]  }
 0x704   :  { %9226 = vmatmul.mubr.bf16.gmra.mrb[32].mxu1 %v21624_v52  ;;  %v21635_v52 = vld [vmem:[#allocation29_spill] sm:$0xff] }
 0x705   :  { %9235 = vmatprep.mubr.bf16.mxu1 %v21625_v12  ;;  %v10043_v12 = vpack.c.bf16 %v21635_v52, %v9791_v18  ;;  %v21643_v18 = vld [vmem:[#allocation39_spill] sm:$0xff] }
 0x70c   :  { %9236 = vmatmul.mubr.bf16.gmra.mrb[36].mxu1 %v21626_v17  ;;  %v9786_v17 = vrot.slane %v9498_v3, 1  ;;  %v21644_v3 = vld [vmem:[#allocation43_spill] sm:$0xff] }
 0x70d   :  { %9245 = vmatprep.mubr.bf16.mxu1 %v21627_v15  ;;  %v9787_v15 = vrot.slane %v9500_v25, 1  ;;  %v19929_v25 = vpack.c.bf16 %v21644_v3, %v21643_v18 }
 0x70f   :  { %v9788_v63 = vsel %vm2675_vm0, %v9786_v17, %v9787_v15  ;;  %21645 = vst [vmem:[#allocation74_spill] sm:$0xff] %v19929_v25  ;;  %v17145_v17 = vld [vmem:[#allocation10 + $0x430] ss:$8 sps:$4 sm:$0xff]   ;;  %v17150_v15 = vld [vmem:[#allocation10 + $0x444] ss:$8 sps:$4 sm:$0xff]  }
 0x714   :  { %9246 = vmatmul.mubr.bf16.gmra.mrb[40].mxu1 %v21628_v4  ;;  %v21636_v4 = vld [vmem:[#allocation32_spill] sm:$0xff] }
 0x715   :  { %9255 = vmatprep.mubr.bf16.mxu1 %v8917_v53  ;;  %v17136_v53 = vld [vmem:[#allocation10 + $0x400] ss:$8 sps:$4 sm:$0xff]  }
 0x71c   :  { %9256 = vmatmul.mubr.bf16.gmra.mrb[44].mxu1 %v8916_v11  ;;  %v10042_v11 = vpack.c.bf16 %v21636_v4, %v9788_v63 }
 0x71d   :  { %9265 = vmatprep.mubr.bf16.mxu1 %v21629_v42  ;;  %v17141_v42 = vld [vmem:[#allocation10 + $0x414] ss:$8 sps:$4 sm:$0xff]  }
 0x724   :  { %9266 = vmatmul.mubr.bf16.gmra.mrb[48].mxu1 %v21630_v10  ;;  %v21637_v10 = vld [vmem:[#allocation31_spill] sm:$0xff] }
 0x725   :  { %9275 = vmatprep.mubr.bf16.mxu1 %v21631_v56  ;;  %v21638_v56 = vld [vmem:[#allocation33_spill] sm:$0xff] }
 0x72c   :  { %9276 = vmatmul.mubr.bf16.gmra.mrb[52].mxu1 %v21632_v59  ;;  %v19920_v59 = vpack.c.bf16 %v21638_v56, %v21637_v10 }
 0x72d   :  { %9285 = vmatprep.mubr.bf16.mxu1 %v21633_v28  ;;  %v17142_v28 = vld [vmem:[#allocation10 + $0x420] ss:$8 sps:$4 sm:$0xff]  }
 0x72e   :  { %21639 = vst [vmem:[#allocation62_spill] sm:$0xff] %v19920_v59 }
 0x734   :  { %9286 = vmatmul.mubr.bf16.gmra.mrb[56].mxu1 %v21634_v32  ;;  %v21641_v32 = vld [vmem:[#allocation36_spill] sm:$0xff] }
 0x735   :  { %9295 = vmatprep.mubr.bf16.mxu1 %v8919_v51  ;;  %v21640_v51 = vld [vmem:[#allocation34_spill] sm:$0xff] }
 0x736   :  { %v19925_v34 = vpack.c.bf16 %v21641_v32, %v21640_v51 }
 0x738   :  { %21642 = vst [vmem:[#allocation58_spill] sm:$0xff] %v19925_v34 }
 0x73c   :  { %9296 = vmatmul.mubr.bf16.gmra.mrb[60].mxu1 %v8918_v46  ;;  %v9831_v46 = vrot.slane %v9527_v2, 1  ;;  %v17153_v2 = vld [vmem:[#allocation10 + $0x454] ss:$8 sps:$4 sm:$0xff]  }
 0x73d   :  { %10299 = vmatprep.mubr.bf16.mxu1 %v10043_v12  ;;  %v9832_v12 = vrot.slane %v9529_v43, 1  ;;  %v21649_v43 = vld [vmem:[#allocation19_spill] sm:$0xff] }
 0x73f   :  { %v19934_v63 = vsel %vm2675_vm0, %v9831_v46, %v9832_v12 }
 0x744   :  { %10300 = vmatmul.mubr.bf16.vlgmr.msra.gmra.mrb[0].mxu1 %v10042_v11  ;;  %v9528_v11 = vld [vmem:[#allocation2 + $0xf0] sm:$0x1] }
 0x745   :  { %10309 = vmatprep.mubr.bf16.mxu1 %v19920_v59  ;;  %10926 = vmatpush1.bf16.msra.mxu1 %v17136_v53  ;;  %v9526_v53 = vld [vmem:[#allocation2 + $0xe0] sm:$0xfe]  ;;  %v9829_v60 = vrot.slane %v9528_v11, 1  ;;  %v21651_v11 = vld [vmem:[#allocation20_spill] sm:$0xff] }
 0x746   :  { %10927 = vmatprep.subr.bf16.mxu1 %v17141_v42  ;;  %v9539_v42 = vld [vmem:[#allocation2 + $0x148] sm:$0xfe] }
 0x747   :  { %v9837_v46 = vrot.slane %v9539_v42, 1  ;;  %v17159_v42 = vld [vmem:[#allocation10 + $0x474] ss:$8 sps:$4 sm:$0xff]  }
 0x749   :  { %10928 = vmatpush1.bf16.msra.mxu1 %v17139_v39  ;;  %v9541_v39 = vld [vmem:[#allocation2 + $0x158] sm:$0x1] }
 0x74a   :  { %10929 = vmatprep.subr.bf16.mxu1 %v17144_v41  ;;  %v17148_v41 = vld [vmem:[#allocation10 + $0x440] ss:$8 sps:$4 sm:$0xff]   ;;  %v9838_v12 = vrot.slane %v9541_v39, 1 }
 0x74b   :  { %v21653_v39 = vld [vmem:[#allocation23_spill] sm:$0xff] }
 0x74c   :  { %10310 = vmatmul.mubr.bf16.gmra.mrb[4].mxu1 %v19925_v34  ;;  %v21703_v34 = vld [vmem:[#allocation108_spill] sm:$0xff] }
 0x74d   :  { %10319 = vmatprep.mubr.bf16.mxu1 %v19929_v25  ;;  %10930 = vmatpush1.bf16.msra.mxu1 %v17142_v28  ;;  %v19942_v28 = vpack.c.bf16 %v19934_v63, %v21649_v43 }
 0x74e   :  { %10931 = vmatprep.subr.bf16.mxu1 %v17147_v57  ;;  %v9828_v57 = vrot.slane %v9526_v53, 1  ;;  %v17154_v53 = vld [vmem:[#allocation10 + $0x460] ss:$8 sps:$4 sm:$0xff]  }
 0x74f   :  { %21650 = vst [vmem:[#allocation79_spill] sm:$0xff] %v19942_v28 }
 0x750   :  { %v19947_v61 = vsel %vm2675_vm0, %v9828_v57, %v9829_v60  ;;  %v17157_v60 = vld [vmem:[#allocation10 + $0x470] ss:$8 sps:$4 sm:$0xff]   ;;  %v17162_v57 = vld [vmem:[#allocation10 + $0x484] ss:$8 sps:$4 sm:$0xff]  }
 0x751   :  { %10932 = vmatpush1.bf16.msra.mxu1 %v17145_v17  ;;  %v17151_v17 = vld [vmem:[#allocation10 + $0x450] ss:$8 sps:$4 sm:$0xff]   ;;  %v19952_v16 = vpack.c.bf16 %v19947_v61, %v21651_v11 }
 0x752   :  { %10933 = vmatprep.subr.bf16.mxu1 %v17150_v15  ;;  %v9839_v15 = vsel %vm2675_vm0, %v9837_v46, %v9838_v12  ;;  %v17160_v12 = vld [vmem:[#allocation10 + $0x480] ss:$8 sps:$4 sm:$0xff]  }
 0x753   :  { %21652 = vst [vmem:[#allocation73_spill] sm:$0xff] %v19952_v16 }
 0x754   :  { %10320 = vmatmul.mubr.bf16.gmra.mrb[8].mxu1 %v19938_v26  ;;  %v21701_v26 = vld [vmem:[#allocation107_spill] sm:$0xff] }
 0x755   :  { %10329 = vmatprep.mubr.bf16.mxu1 %v19942_v28  ;;  %10934 = vmatpush1.bf16.msra.mxu1 %v17148_v41  ;;  %v10051_v41 = vpack.c.bf16 %v21653_v39, %v9839_v15  ;;  %v19960_v15 = vpack.c.bf16 %v21656_v22, %v21655_v1  ;;  %v21700_v28 = vld [vmem:[#allocation100_spill] sm:$0xff] }
 0x756   :  { %10935 = vmatprep.subr.bf16.mxu1 %v17153_v2  ;;  %v9835_v2 = vrot.slane %v9540_v36, 1  ;;  %v17163_v36 = vld [vmem:[#allocation10 + $0x490] ss:$8 sps:$4 sm:$0xff]   ;;  %v20058_v25 = vpack.c.bf16 %v21701_v26, %v21700_v28 }
 0x757   :  { %21657 = vst [vmem:[#allocation67_spill] sm:$0xff] %v19960_v15 }
 0x758   :  { %v9836_v46 = vsel %vm2675_vm0, %v9834_v37, %v9835_v2  ;;  %v17166_v37 = vld [vmem:[#allocation10 + $0x4a0] ss:$8 sps:$4 sm:$0xff]   ;;  %v21659_v2 = vld [vmem:[#allocation44_spill] sm:$0xff]  ;;  %21702 = vst [vmem:[#allocation41_spill] sm:$0xff] %v20058_v25 }
 0x759   :  { %10936 = vmatpush1.bf16.msra.mxu1 %v17151_v17  ;;  %v21654_v17 = vld [vmem:[#allocation24_spill] sm:$0xff] }
 0x75a   :  { %10937 = vmatprep.subr.bf16.mxu1 %v17156_v47  ;;  %v10050_v31 = vpack.c.bf16 %v21654_v17, %v9836_v46  ;;  %v17165_v47 = vld [vmem:[#allocation10 + $0x494] ss:$8 sps:$4 sm:$0xff]  }
 0x75b   :  { %v21661_v46 = vld [vmem:[#allocation45_spill] sm:$0xff] }
 0x75c   :  { %10330 = vmatmul.mubr.bf16.gmra.mrb[12].mxu1 %v19952_v16  ;;  %v19969_v8 = vpack.c.bf16 %v21662_v24, %v21661_v46  ;;  %v21694_v16 = vld [vmem:[#allocation90_spill] sm:$0xff] }
 0x75d   :  { %10339 = vmatprep.mubr.bf16.mxu1 %v10051_v41  ;;  %10938 = vmatpush1.bf16.msra.mxu1 %v17154_v53  ;;  %v9567_v53 = vld [vmem:[#allocation2 + $0x228] sm:$0xfe] }
 0x75e   :  { %10939 = vmatprep.subr.bf16.mxu1 %v17159_v42  ;;  %v9569_v42 = vld [vmem:[#allocation2 + $0x238] sm:$0x1]  ;;  %v21658_v41 = vld [vmem:[#allocation27_spill] sm:$0xff]  ;;  %21663 = vst [vmem:[#allocation83_spill] sm:$0xff] %v19969_v8 }
 0x761   :  { %10940 = vmatpush1.bf16.msra.mxu1 %v17157_v60  ;;  %v19965_v60 = vpack.c.bf16 %v21659_v2, %v21658_v41 }
 0x762   :  { %10941 = vmatprep.subr.bf16.mxu1 %v17162_v57  ;;  %v17171_v57 = vld [vmem:[#allocation10 + $0x4b4] ss:$8 sps:$4 sm:$0xff]  }
 0x763   :  { %21660 = vst [vmem:[#allocation85_spill] sm:$0xff] %v19965_v60 }
 0x764   :  { %10340 = vmatmul.mubr.bf16.gmra.mrb[16].mxu1 %v10050_v31  ;;  %v9879_v31 = vrot.slane %v9567_v53, 1  ;;  %v17177_v53 = vld [vmem:[#allocation10 + $0x4d4] ss:$8 sps:$4 sm:$0xff]  }
 0x765   :  { %10349 = vmatprep.mubr.bf16.mxu1 %v19960_v15  ;;  %10942 = vmatpush1.bf16.msra.mxu1 %v17160_v12  ;;  %v9880_v12 = vrot.slane %v9569_v42, 1  ;;  %v21667_v42 = vld [vmem:[#allocation51_spill] sm:$0xff] }
 0x766   :  { %10943 = vmatprep.subr.bf16.mxu1 %v17165_v47  ;;  %v17169_v47 = vld [vmem:[#allocation10 + $0x4b0] ss:$8 sps:$4 sm:$0xff]  }
 0x767   :  { %v19974_v58 = vsel %vm2675_vm0, %v9879_v31, %v9880_v12  ;;  %v9885_v31 = vrot.slane %v9579_v19, 1  ;;  %v9886_v12 = vrot.slane %v9581_v50, 1  ;;  %v17183_v50 = vld [vmem:[#allocation10 + $0x4f4] ss:$8 sps:$4 sm:$0xff]   ;;  %v21671_v19 = vld [vmem:[#allocation55_spill] sm:$0xff] }
 0x769   :  { %10944 = vmatpush1.bf16.msra.mxu1 %v17163_v36  ;;  %v17174_v36 = vld [vmem:[#allocation10 + $0x4c4] ss:$8 sps:$4 sm:$0xff]  }
 0x76a   :  { %10945 = vmatprep.subr.bf16.mxu1 %v17168_v62  ;;  %v9568_v62 = vld [vmem:[#allocation2 + $0x230] sm:$0x1] }
 0x76b   :  { %v9877_v40 = vrot.slane %v9568_v62, 1  ;;  %v21669_v62 = vld [vmem:[#allocation52_spill] sm:$0xff] }
 0x76c   :  { %10350 = vmatmul.mubr.bf16.gmra.mrb[20].mxu1 %v19965_v60  ;;  %v21689_v60 = vld [vmem:[#allocation86_spill] sm:$0xff] }
 0x76d   :  { %10359 = vmatprep.mubr.bf16.mxu1 %v19969_v8  ;;  %10946 = vmatpush1.bf16.msra.mxu1 %v17166_v37  ;;  %v19982_v37 = vpack.c.bf16 %v19974_v58, %v21667_v42 }
 0x76e   :  { %10947 = vmatprep.subr.bf16.mxu1 %v17171_v57  ;;  %v9876_v57 = vrot.slane %v9566_v6, 1  ;;  %v17178_v6 = vld [vmem:[#allocation10 + $0x4e0] ss:$8 sps:$4 sm:$0xff]  }
 0x76f   :  { %21668 = vst [vmem:[#allocation82_spill] sm:$0xff] %v19982_v37 }
 0x770   :  { %v19987_v38 = vsel %vm2675_vm0, %v9876_v57, %v9877_v40  ;;  %v17181_v40 = vld [vmem:[#allocation10 + $0x4f0] ss:$8 sps:$4 sm:$0xff]   ;;  %v17186_v57 = vld [vmem:[#allocation10 + $0x704] ss:$8 sps:$4 sm:$0xff]  }
 0x771   :  { %10948 = vmatpush1.bf16.msra.mxu1 %v17169_v47  ;;  %v17175_v47 = vld [vmem:[#allocation10 + $0x4d0] ss:$8 sps:$4 sm:$0xff]   ;;  %v19992_v27 = vpack.c.bf16 %v19987_v38, %v21669_v62 }
 0x772   :  { %10949 = vmatprep.subr.bf16.mxu1 %v17174_v36  ;;  %v9887_v36 = vsel %vm2675_vm0, %v9885_v31, %v9886_v12  ;;  %v21672_v12 = vld [vmem:[#allocation56_spill] sm:$0xff] }
 0x773   :  { %21670 = vst [vmem:[#allocation95_spill] sm:$0xff] %v19992_v27 }
 0x774   :  { %10360 = vmatmul.mubr.bf16.gmra.mrb[24].mxu1 %v19978_v20  ;;  %v21687_v20 = vld [vmem:[#allocation78_spill] sm:$0xff] }
 0x775   :  { %10369 = vmatprep.mubr.bf16.mxu1 %v19982_v37  ;;  %10950 = vmatpush1.bf16.msra.mxu1 %v17172_v23  ;;  %v10059_v23 = vpack.c.bf16 %v21671_v19, %v9887_v36  ;;  %v21676_v36 = vld [vmem:[#allocation59_spill] sm:$0xff] }
 0x776   :  { %10951 = vmatprep.subr.bf16.mxu1 %v17177_v53  ;;  %v9883_v53 = vrot.slane %v9580_v35, 1  ;;  %v9609_v35 = vld [vmem:[#allocation2 + $0x378] sm:$0x1]  ;;  %v9620_v37 = vld [vmem:[#allocation2 + $0x3d0] sm:$0x1] }
 0x777   :  { %v9931_v15 = vrot.slane %v9620_v37, 1  ;;  %v21697_v37 = vld [vmem:[#allocation98_spill] sm:$0xff] }
 0x778   :  { %v9884_v31 = vsel %vm2675_vm0, %v9882_v13, %v9883_v53  ;;  %v9927_v53 = vrot.slane %v9607_v5, 1 }
 0x779   :  { %10952 = vmatpush1.bf16.msra.mxu1 %v17175_v47  ;;  %v10058_v47 = vpack.c.bf16 %v21672_v12, %v9884_v31  ;;  %v9606_v31 = vld [vmem:[#allocation2 + $0x360] sm:$0xfe] }
 0x77a   :  { %10953 = vmatprep.subr.bf16.mxu1 %v17180_v30  ;;  %v21674_v30 = vld [vmem:[#allocation64_spill] sm:$0xff] }
 0x77b   :  { %v20000_v49 = vpack.c.bf16 %v21674_v30, %v21673_v55 }
 0x77c   :  { %10370 = vmatmul.mubr.bf16.gmra.mrb[28].mxu1 %v19992_v27  ;;  %v9618_v27 = vld [vmem:[#allocation2 + $0x3c0] sm:$0xfe] }
 0x77d   :  { %10379 = vmatprep.mubr.bf16.mxu1 %v10059_v23  ;;  %10954 = vmatpush1.bf16.msra.mxu1 %v17178_v6  ;;  %21675 = vst [vmem:[#allocation91_spill] sm:$0xff] %v20000_v49  ;;  %v21677_v6 = vld [vmem:[#allocation65_spill] sm:$0xff] }
 0x77e   :  { %10955 = vmatprep.subr.bf16.mxu1 %v17183_v50  ;;  %v20005_v23 = vpack.c.bf16 %v21677_v6, %v21676_v36  ;;  %v21679_v50 = vld [vmem:[#allocation66_spill] sm:$0xff] }
 0x77f   :  { %v20009_v13 = vpack.c.bf16 %v21680_v44, %v21679_v50 }
 0x780   :  { %21678 = vst [vmem:[#allocation94_spill] sm:$0xff] %v20005_v23 }
 0x781   :  { %10956 = vmatpush1.bf16.msra.mxu1 %v17181_v40  ;;  %21681 = vst [vmem:[#allocation89_spill] sm:$0xff] %v20009_v13  ;;  %v9928_v40 = vrot.slane %v9609_v35, 1  ;;  %v9933_v35 = vrot.slane %v9619_v14, 1  ;;  %v21690_v14 = vld [vmem:[#allocation87_spill] sm:$0xff] }
 0x782   :  { %11559 = vmatprep.subr.bf16.mxu1 %v17186_v57 }
 0x783   :  { %v20014_v57 = vsel %vm2675_vm0, %v9927_v53, %v9928_v40 }
 0x784   :  { %10380 = vmatmul.mubr.bf16.gmra.mrb[32].mxu1 %v10058_v47  ;;  %v9608_v47 = vld [vmem:[#allocation2 + $0x370] sm:$0x1] }
 0x785   :  { %10389 = vmatprep.mubr.bf16.mxu1 %v20000_v49  ;;  %v20022_v49 = vpack.c.bf16 %v20014_v57, %v21685_v29  ;;  %v9925_v5 = vrot.slane %v9608_v47, 1  ;;  %v9930_v47 = vrot.slane %v9618_v27, 1 }
 0x787   :  { %21686 = vst [vmem:[#allocation101_spill] sm:$0xff] %v20022_v49 }
 0x78c   :  { %10390 = vmatmul.mubr.bf16.gmra.mrb[36].mxu1 %v20005_v23  ;;  %v9924_v23 = vrot.slane %v9606_v31, 1 }
 0x78d   :  { %10399 = vmatprep.mubr.bf16.mxu1 %v20009_v13  ;;  %v9934_v13 = vrot.slane %v9621_v0, 1  ;;  %v9932_v0 = vsel %vm2675_vm0, %v9930_v47, %v9931_v15 }
 0x78e   :  { %v20027_v53 = vsel %vm2675_vm0, %v9924_v23, %v9925_v5  ;;  %v10066_v23 = vpack.c.bf16 %v21690_v14, %v9932_v0  ;;  %v21691_v5 = vld [vmem:[#allocation88_spill] sm:$0xff] }
 0x78f   :  { %v9935_v40 = vsel %vm2675_vm0, %v9933_v35, %v9934_v13  ;;  %v20032_v8 = vpack.c.bf16 %v20027_v53, %v21687_v20  ;;  %v9647_v35 = vld [vmem:[#allocation2 + $0x4a8] sm:$0xfe] }
 0x790   :  { %v10067_v31 = vpack.c.bf16 %v21689_v60, %v9935_v40  ;;  %v21695_v40 = vld [vmem:[#allocation97_spill] sm:$0xff]  ;;  %v9975_v15 = vrot.slane %v9647_v35, 1 }
 0x791   :  { %21688 = vst [vmem:[#allocation112_spill] sm:$0xff] %v20032_v8  ;;  %v20045_v27 = vpack.c.bf16 %v21695_v40, %v21694_v16  ;;  %v21705_v35 = vld [vmem:[#allocation109_spill] sm:$0xff] }
 0x793   :  { %21696 = vst [vmem:[#allocation99_spill] sm:$0xff] %v20045_v27 }
 0x794   :  { %10400 = vmatmul.mubr.bf16.gmra.mrb[40].mxu1 %v20018_v33  ;;  %v9649_v33 = vld [vmem:[#allocation2 + $0x4b8] sm:$0x1] }
 0x795   :  { %10409 = vmatprep.mubr.bf16.mxu1 %v20022_v49  ;;  %v21692_v49 = vld [vmem:[#allocation96_spill] sm:$0xff]  ;;  %v9976_v47 = vrot.slane %v9649_v33, 1 }
 0x796   :  { %v20040_v13 = vpack.c.bf16 %v21692_v49, %v21691_v5 }
 0x797   :  { %v20054_v0 = vsel %vm2675_vm0, %v9975_v15, %v9976_v47  ;;  %v21707_v47 = vpack.c.bf16 %v21637_v10, %v21635_v52  ;;  %v17195_v52 = vld [vmem:[#allocation10 + $0x734] ss:$8 sps:$4 sm:$0xff]   ;;  %v21710_v10 = vpack.c.bf16 %v21646_v9, %v21641_v32 }
 0x798   :  { %21693 = vst [vmem:[#allocation104_spill] sm:$0xff] %v20040_v13  ;;  %v20062_v59 = vpack.c.bf16 %v20054_v0, %v21703_v34  ;;  %v17201_v9 = vld [vmem:[#allocation10 + $0x754] ss:$8 sps:$4 sm:$0xff]  }
 0x79a   :  { %21704 = vst [vmem:[#allocation37_spill] sm:$0xff] %v20062_v59 }
 0x79c   :  { %10410 = vmatmul.mubr.bf16.gmra.mrb[44].mxu1 %v20032_v8  ;;  %v21698_v8 = vld [vmem:[#allocation106_spill] sm:$0xff] }
 0x79d   :  { %10419 = vmatprep.mubr.bf16.mxu1 %v10067_v31  ;;  %v20049_v31 = vpack.c.bf16 %v21698_v8, %v21697_v37 }
 0x79f   :  { %21699 = vst [vmem:[#allocation110_spill] sm:$0xff] %v20049_v31 }
 0x7a4   :  { %10420 = vmatmul.mubr.bf16.gmra.mrb[48].mxu1 %v10066_v23  ;;  %v9646_v23 = vld [vmem:[#allocation2 + $0x4a0] sm:$0xfe] }
 0x7a5   :  { %10429 = vmatprep.mubr.bf16.mxu1 %v20040_v13  ;;  %v9648_v13 = vld [vmem:[#allocation2 + $0x4b0] sm:$0x1]  ;;  %v9972_v8 = vrot.slane %v9646_v23, 1  ;;  %v17189_v23 = vld [vmem:[#allocation10 + $0x714] ss:$8 sps:$4 sm:$0xff]  }
 0x7a6   :  { %v9973_v40 = vrot.slane %v9648_v13, 1  ;;  %v21708_v13 = vpack.c.bf16 %v21640_v51, %v21636_v4 }
 0x7a8   :  { %v20067_v33 = vsel %vm2675_vm0, %v9972_v8, %v9973_v40  ;;  %v21709_v8 = vpack.c.bf16 %v21643_v18, %v21638_v56  ;;  %v17187_v40 = vld [vmem:[#allocation10 + $0x710] ss:$8 sps:$4 sm:$0xff]   ;;  %v21711_v56 = vpack.c.bf16 %v21649_v43, %v21644_v3  ;;  %v21712_v3 = vpack.c.bf16 %v21651_v11, %v21647_v48 }
 0x7a9   :  { %v20071_v15 = vpack.c.bf16 %v20067_v33, %v21705_v35  ;;  %v17193_v18 = vld [vmem:[#allocation10 + $0x730] ss:$8 sps:$4 sm:$0xff]   ;;  %v21713_v48 = vpack.c.bf16 %v21655_v1, %v21653_v39  ;;  %v17216_v1 = vld [vmem:[#allocation10 + $0x7a4] ss:$8 sps:$4 sm:$0xff]  }
 0x7aa   :  { %v17199_v43 = vld [vmem:[#allocation10 + $0x750] ss:$8 sps:$4 sm:$0xff]   ;;  %v9571_v39 = vld [vmem:[#allocation2 + $0x248] sm:$0xfe] }
 0x7ab   :  { %21706 = vst [vmem:[#allocation42_spill] sm:$0xff] %v20071_v15  ;;  %v17205_v11 = vld [vmem:[#allocation10 + $0x770] ss:$8 sps:$4 sm:$0xff]  }
 0x7ac   :  { %10430 = vmatmul.mubr.bf16.gmra.mrb[52].mxu1 %v20045_v27  ;;  %v9533_v27 = vld [vmem:[#allocation2 + $0x118] sm:$0x1] }
 0x7ad   :  { %10439 = vmatprep.mubr.bf16.mxu1 %v20049_v31  ;;  %v17184_v31 = vld [vmem:[#allocation10 + $0x700] ss:$8 sps:$4 sm:$0xff]   ;;  %v10672_v51 = vrot.slane %v9533_v27, 1 }
 0x7b4   :  { %10440 = vmatmul.mubr.bf16.gmra.mrb[56].mxu1 %v20058_v25  ;;  %v9531_v25 = vld [vmem:[#allocation2 + $0x108] sm:$0xfe] }
 0x7b5   :  { %10449 = vmatprep.mubr.bf16.mxu1 %v20062_v59  ;;  %v17192_v59 = vld [vmem:[#allocation10 + $0x724] ss:$8 sps:$4 sm:$0xff]   ;;  %v10671_v4 = vrot.slane %v9531_v25, 1 }
 0x7bc   :  { %10450 = vmatmul.mubr.bf16.gmra.mrb[60].mxu1 %v20071_v15  ;;  %v17190_v15 = vld [vmem:[#allocation10 + $0x720] ss:$8 sps:$4 sm:$0xff]  }
 0x7bd   :  { %10957 = vmatprep.mubr.bf16.mxu1 %v21707_v47  ;;  %v20090_v47 = vsel %vm2675_vm0, %v10671_v4, %v10672_v51  ;;  %v17208_v4 = vld [vmem:[#allocation10 + $0x780] ss:$8 sps:$4 sm:$0xff]   ;;  %v17213_v51 = vld [vmem:[#allocation10 + $0x794] ss:$8 sps:$4 sm:$0xff]  }
 0x7be   :  { %v10707_v32 = vpack.c.bf16 %v20090_v47, %v19934_v63  ;;  %v17207_v63 = vld [vmem:[#allocation10 + $0x774] ss:$8 sps:$4 sm:$0xff]  }
 0x7c4   :  { %10958 = vmatmul.mubr.bf16.vlgmr.msra.gmra.mrb[0].mxu1 %v21708_v13  ;;  %v17196_v13 = vld [vmem:[#allocation10 + $0x740] ss:$8 sps:$4 sm:$0xff]  }
 0x7c5   :  { %10967 = vmatprep.mubr.bf16.mxu1 %v21709_v8  ;;  %11560 = vmatpush1.bf16.msra.mxu1 %v17184_v31  ;;  %v17198_v31 = vld [vmem:[#allocation10 + $0x744] ss:$8 sps:$4 sm:$0xff]  }
 0x7c6   :  { %11561 = vmatprep.subr.bf16.mxu1 %v17189_v23  ;;  %v9530_v23 = vld [vmem:[#allocation2 + $0x100] sm:$0xfe] }
 0x7c7   :  { %v10668_v25 = vrot.slane %v9530_v23, 1  ;;  %v17214_v23 = vld [vmem:[#allocation10 + $0x7a0] ss:$8 sps:$4 sm:$0xff]  }
 0x7c9   :  { %11562 = vmatpush1.bf16.msra.mxu1 %v17187_v40  ;;  %v17202_v40 = vld [vmem:[#allocation10 + $0x760] ss:$8 sps:$4 sm:$0xff]  }
 0x7ca   :  { %11563 = vmatprep.subr.bf16.mxu1 %v17192_v59  ;;  %v9532_v59 = vld [vmem:[#allocation2 + $0x110] sm:$0x1] }
 0x7cb   :  { %v10669_v27 = vrot.slane %v9532_v59, 1  ;;  %v17219_v59 = vld [vmem:[#allocation10 + $0x7b4] ss:$8 sps:$4 sm:$0xff]  }
 0x7cc   :  { %10968 = vmatmul.mubr.bf16.gmra.mrb[4].mxu1 %v21710_v10  ;;  %v17210_v10 = vld [vmem:[#allocation10 + $0x784] ss:$8 sps:$4 sm:$0xff]  }
 0x7cd   :  { %10977 = vmatprep.mubr.bf16.mxu1 %v21711_v56  ;;  %11564 = vmatpush1.bf16.msra.mxu1 %v17190_v15  ;;  %v17204_v15 = vld [vmem:[#allocation10 + $0x764] ss:$8 sps:$4 sm:$0xff]   ;;  %v20098_v8 = vsel %vm2675_vm0, %v10668_v25, %v10669_v27  ;;  %v21714_v56 = vpack.c.bf16 %v21658_v41, %v21654_v17  ;;  %v10677_v17 = vrot.slane %v9571_v39, 1  ;;  %v9653_v39 = vld [vmem:[#allocation2 + $0x4d8] sm:$0x1] }
 0x7ce   :  { %11565 = vmatprep.subr.bf16.mxu1 %v17195_v52  ;;  %v10706_v52 = vpack.c.bf16 %v20098_v8, %v19947_v61  ;;  %v21715_v61 = vpack.c.bf16 %v21661_v46, %v21656_v22  ;;  %v21717_v22 = vpack.c.bf16 %v21667_v42, %v21662_v24  ;;  %v17217_v46 = vld [vmem:[#allocation10 + $0x7b0] ss:$8 sps:$4 sm:$0xff]   ;;  %v9570_v25 = vld [vmem:[#allocation2 + $0x240] sm:$0xfe]  ;;  %v9572_v27 = vld [vmem:[#allocation2 + $0x250] sm:$0x1]  ;;  %v21718_v24 = vpack.c.bf16 %v21669_v62, %v21665_v7 }
 0x7cf   :  { %v17223_v42 = vld [vmem:[#allocation10 + $0x7d0] ss:$8 sps:$4 sm:$0xff]   ;;  %v21719_v7 = vpack.c.bf16 %v21673_v55, %v21671_v19  ;;  %v21722_v55 = vpack.c.bf16 %v21682_v45, %v21677_v6  ;;  %v21724_v45 = vpack.c.bf16 %v21687_v20, %v21683_v21  ;;  %v21727_v21 = vpack.c.bf16 %v21697_v37, %v21692_v49  ;;  %v9651_v20 = vld [vmem:[#allocation2 + $0x4c8] sm:$0xfe] }
 0x7d0   :  { %v17229_v62 = vld [vmem:[#allocation10 + $0x7f0] ss:$8 sps:$4 sm:$0xff]  }
 0x7d1   :  { %11566 = vmatpush1.bf16.msra.mxu1 %v17193_v18  ;;  %v17211_v18 = vld [vmem:[#allocation10 + $0x790] ss:$8 sps:$4 sm:$0xff]  }
 0x7d2   :  { %11567 = vmatprep.subr.bf16.mxu1 %v17198_v31  ;;  %v9573_v31 = vld [vmem:[#allocation2 + $0x258] sm:$0x1] }
 0x7d3   :  { %v10678_v41 = vrot.slane %v9573_v31, 1  ;;  %v21728_v31 = vld [vmem:[#allocation97_spill] sm:$0xff] }
 0x7d4   :  { %10978 = vmatmul.mubr.bf16.gmra.mrb[8].mxu1 %v21712_v3  ;;  %v17220_v3 = vld [vmem:[#allocation10 + $0x7c0] ss:$8 sps:$4 sm:$0xff]  }
 0x7d5   :  { %10987 = vmatprep.mubr.bf16.mxu1 %v10707_v32  ;;  %11568 = vmatpush1.bf16.msra.mxu1 %v17196_v13  ;;  %v21716_v13 = vpack.c.bf16 %v21664_v54, %v21659_v2  ;;  %v20118_v32 = vsel %vm2675_vm0, %v10677_v17, %v10678_v41  ;;  %v17225_v54 = vld [vmem:[#allocation10 + $0x7d4] ss:$8 sps:$4 sm:$0xff]  }
 0x7d6   :  { %11569 = vmatprep.subr.bf16.mxu1 %v17201_v9  ;;  %v17222_v9 = vld [vmem:[#allocation10 + $0x7c4] ss:$8 sps:$4 sm:$0xff]   ;;  %v10715_v2 = vpack.c.bf16 %v20118_v32, %v19974_v58  ;;  %v17231_v58 = vld [vmem:[#allocation10 + $0x7f4] ss:$8 sps:$4 sm:$0xff]  }
 0x7d9   :  { %11570 = vmatpush1.bf16.msra.mxu1 %v17199_v43  ;;  %v10674_v43 = vrot.slane %v9570_v25, 1  ;;  %v21734_v25 = vld [vmem:[#allocation58_spill] sm:$0xff] }
 0x7da   :  { %11571 = vmatprep.subr.bf16.mxu1 %v17204_v15  ;;  %v10675_v15 = vrot.slane %v9572_v27, 1  ;;  %v17235_v27 = vld [vmem:[#allocation10 + $0x210] ss:$8 sps:$4 sm:$0xff]  }
 0x7dc   :  { %10988 = vmatmul.mubr.bf16.gmra.mrb[12].mxu1 %v10706_v52  ;;  %v20126_v52 = vsel %vm2675_vm0, %v10674_v43, %v10675_v15 }
 0x7dd   :  { %10997 = vmatprep.mubr.bf16.mxu1 %v21713_v48  ;;  %11572 = vmatpush1.bf16.msra.mxu1 %v17202_v40  ;;  %v17228_v40 = vld [vmem:[#allocation10 + $0x7e4] ss:$8 sps:$4 sm:$0xff]   ;;  %v10714_v48 = vpack.c.bf16 %v20126_v52, %v19987_v38  ;;  %v21721_v38 = vpack.c.bf16 %v21679_v50, %v21674_v30 }
 0x7de   :  { %11573 = vmatprep.subr.bf16.mxu1 %v17207_v63  ;;  %v17226_v63 = vld [vmem:[#allocation10 + $0x7e0] ss:$8 sps:$4 sm:$0xff]  }
 0x7e1   :  { %11574 = vmatpush1.bf16.msra.mxu1 %v17205_v11  ;;  %v17234_v11 = vld [vmem:[#allocation10 + $0x204] ss:$8 sps:$4 sm:$0xff]  }
 0x7e2   :  { %11575 = vmatprep.subr.bf16.mxu1 %v17210_v10  ;;  %v21720_v10 = vpack.c.bf16 %v21676_v36, %v21672_v12  ;;  %v9610_v12 = vld [vmem:[#allocation2 + $0x380] sm:$0xfe]  ;;  %v9612_v36 = vld [vmem:[#allocation2 + $0x390] sm:$0x1] }
 0x7e3   :  { %v10680_v50 = vrot.slane %v9610_v12, 1  ;;  %v17255_v12 = vld [vmem:[#allocation10 + $0x274] ss:$8 sps:$4 sm:$0xff]  }
 0x7e4   :  { %10998 = vmatmul.mubr.bf16.gmra.mrb[16].mxu1 %v21714_v56 }
 0x7e5   :  { %11007 = vmatprep.mubr.bf16.mxu1 %v21715_v61  ;;  %11576 = vmatpush1.bf16.msra.mxu1 %v17208_v4  ;;  %v9611_v4 = vld [vmem:[#allocation2 + $0x388] sm:$0xfe]  ;;  %v21723_v61 = vpack.c.bf16 %v21685_v29, %v21680_v44  ;;  %v21725_v44 = vpack.c.bf16 %v21691_v5, %v21689_v60 }
 0x7e6   :  { %11577 = vmatprep.subr.bf16.mxu1 %v17213_v51  ;;  %v9613_v51 = vld [vmem:[#allocation2 + $0x398] sm:$0x1]  ;;  %v10683_v19 = vrot.slane %v9611_v4, 1  ;;  %v21738_v4 = vld [vmem:[#allocation73_spill] sm:$0xff] }
 0x7e7   :  { %v10684_v56 = vrot.slane %v9613_v51, 1  ;;  %v17247_v51 = vld [vmem:[#allocation10 + $0x250] ss:$8 sps:$4 sm:$0xff]  }
 0x7e9   :  { %11578 = vmatpush1.bf16.msra.mxu1 %v17211_v18  ;;  %v20146_v18 = vsel %vm2675_vm0, %v10683_v19, %v10684_v56  ;;  %v17250_v56 = vld [vmem:[#allocation10 + $0x260] ss:$8 sps:$4 sm:$0xff]  }
 0x7ea   :  { %11579 = vmatprep.subr.bf16.mxu1 %v17216_v1  ;;  %v10723_v30 = vpack.c.bf16 %v20146_v18, %v20014_v57  ;;  %v10681_v1 = vrot.slane %v9612_v36, 1  ;;  %v21726_v57 = vpack.c.bf16 %v21694_v16, %v21690_v14  ;;  %v9650_v16 = vld [vmem:[#allocation2 + $0x4c0] sm:$0xfe]  ;;  %v9652_v14 = vld [vmem:[#allocation2 + $0x4d0] sm:$0x1] }
 0x7eb   :  { %v10686_v37 = vrot.slane %v9650_v16, 1  ;;  %v10687_v17 = vrot.slane %v9652_v14, 1  ;;  %v21739_v36 = vld [vmem:[#allocation67_spill] sm:$0xff]  ;;  %v9574_v14 = vld [vmem:[#allocation2 + $0x260] sm:$0xfe] }
 0x7ec   :  { %11008 = vmatmul.mubr.bf16.gmra.mrb[20].mxu1 %v21716_v13  ;;  %v20154_v6 = vsel %vm2675_vm0, %v10680_v50, %v10681_v1  ;;  %v21730_v13 = vld [vmem:[#allocation106_spill] sm:$0xff]  ;;  %v17261_v1 = vld [vmem:[#allocation10 + $0x294] ss:$8 sps:$4 sm:$0xff]  }
 0x7ed   :  { %11017 = vmatprep.mubr.bf16.mxu1 %v21717_v22  ;;  %11580 = vmatpush1.bf16.msra.mxu1 %v17214_v23  ;;  %v10722_v29 = vpack.c.bf16 %v20154_v6, %v20027_v53  ;;  %v21729_v23 = vpack.c.bf16 %v21700_v28, %v21728_v31  ;;  %v10689_v53 = vrot.slane %v9651_v20, 1  ;;  %v21731_v60 = vpack.c.bf16 %v21703_v34, %v21730_v13  ;;  %v21733_v22 = vld [vmem:[#allocation62_spill] sm:$0xff]  ;;  %v21742_v31 = vld [vmem:[#allocation84_spill] sm:$0xff] }
 0x7ee   :  { %11581 = vmatprep.subr.bf16.mxu1 %v17219_v59  ;;  %v10690_v59 = vrot.slane %v9653_v39, 1  ;;  %v21732_v28 = vpack.c.bf16 %v21705_v35, %v21701_v26  ;;  %v20182_v41 = vsel %vm2675_vm0, %v10686_v37, %v10687_v17  ;;  %v17240_v26 = vld [vmem:[#allocation10 + $0x224] ss:$8 sps:$4 sm:$0xff]   ;;  %v17238_v35 = vld [vmem:[#allocation10 + $0x220] ss:$8 sps:$4 sm:$0xff]  }
 0x7ef   :  { %v10730_v34 = vpack.c.bf16 %v20182_v41, %v20067_v33  ;;  %v21736_v33 = vld [vmem:[#allocation69_spill] sm:$0xff] }
 0x7f0   :  { %v20174_v5 = vsel %vm2675_vm0, %v10689_v53, %v10690_v59  ;;  %v17256_v50 = vld [vmem:[#allocation10 + $0x280] ss:$8 sps:$4 sm:$0xff]   ;;  %v17267_v39 = vld [vmem:[#allocation10 + $0x2b4] ss:$8 sps:$4 sm:$0xff]   ;;  %v17265_v13 = vld [vmem:[#allocation10 + $0x2b0] ss:$8 sps:$4 sm:$0xff]  }
 0x7f1   :  { %11582 = vmatpush1.bf16.msra.mxu1 %v17217_v46  ;;  %v10731_v49 = vpack.c.bf16 %v20174_v5, %v20054_v0  ;;  %v17232_v46 = vld [vmem:[#allocation10 + $0x200] ss:$8 sps:$4 sm:$0xff]   ;;  %v17273_v17 = vld [vmem:[#allocation10 + $0x2d4] ss:$8 sps:$4 sm:$0xff]  }
 0x7f2   :  { %11583 = vmatprep.subr.bf16.mxu1 %v17222_v9  ;;  %v17237_v9 = vld [vmem:[#allocation10 + $0x214] ss:$8 sps:$4 sm:$0xff]   ;;  %v21735_v0 = vld [vmem:[#allocation74_spill] sm:$0xff] }
 0x7f3   :  { %v17262_v20 = vld [vmem:[#allocation10 + $0x2a0] ss:$8 sps:$4 sm:$0xff]  }
 0x7f4   :  { %11018 = vmatmul.mubr.bf16.gmra.mrb[24].mxu1 %v21718_v24  ;;  %v21737_v24 = vld [vmem:[#allocation79_spill] sm:$0xff]  ;;  %v21743_v59 = vld [vmem:[#allocation82_spill] sm:$0xff] }
 0x7f5   :  { %11027 = vmatprep.mubr.bf16.mxu1 %v10715_v2  ;;  %11584 = vmatpush1.bf16.msra.mxu1 %v17220_v3  ;;  %v9535_v3 = vld [vmem:[#allocation2 + $0x128] sm:$0xfe]  ;;  %v17243_v2 = vld [vmem:[#allocation10 + $0x234] ss:$8 sps:$4 sm:$0xff]  }
 0x7f6   :  { %11585 = vmatprep.subr.bf16.mxu1 %v17225_v54  ;;  %v9537_v54 = vld [vmem:[#allocation2 + $0x138] sm:$0x1]  ;;  %v11329_v43 = vrot.slane %v9535_v3, 1  ;;  %v17268_v37 = vld [vmem:[#allocation10 + $0x2c0] ss:$8 sps:$4 sm:$0xff]  }
 0x7f7   :  { %v11330_v15 = vrot.slane %v9537_v54, 1  ;;  %v21745_v3 = vld [vmem:[#allocation91_spill] sm:$0xff] }
 0x7f8   :  { %v17282_v54 = vld [vmem:[#allocation10 + $0x504] ss:$8 sps:$4 sm:$0xff]  }
 0x7f9   :  { %11586 = vmatpush1.bf16.msra.mxu1 %v17223_v42  ;;  %v17241_v42 = vld [vmem:[#allocation10 + $0x230] ss:$8 sps:$4 sm:$0xff]  }
 0x7fa   :  { %11587 = vmatprep.subr.bf16.mxu1 %v17228_v40  ;;  %v17246_v40 = vld [vmem:[#allocation10 + $0x244] ss:$8 sps:$4 sm:$0xff]  }
 0x7fc   :  { %11028 = vmatmul.mubr.bf16.gmra.mrb[28].mxu1 %v10714_v48  ;;  %v9534_v48 = vld [vmem:[#allocation2 + $0x120] sm:$0xfe] }
 0x7fd   :  { %11037 = vmatprep.mubr.bf16.mxu1 %v21719_v7  ;;  %11588 = vmatpush1.bf16.msra.mxu1 %v17226_v63  ;;  %v11331_v63 = vsel %vm2675_vm0, %v11329_v43, %v11330_v15  ;;  %v17244_v7 = vld [vmem:[#allocation10 + $0x240] ss:$8 sps:$4 sm:$0xff]   ;;  %v9617_v15 = vld [vmem:[#allocation2 + $0x3b8] sm:$0x1] }
 0x7fe   :  { %11589 = vmatprep.subr.bf16.mxu1 %v17231_v58  ;;  %v9536_v58 = vld [vmem:[#allocation2 + $0x130] sm:$0x1]  ;;  %v9615_v43 = vld [vmem:[#allocation2 + $0x3a8] sm:$0xfe] }
 0x801   :  { %11590 = vmatpush1.bf16.msra.mxu1 %v17229_v62  ;;  %v17249_v62 = vld [vmem:[#allocation10 + $0x254] ss:$8 sps:$4 sm:$0xff]  }
 0x802   :  { %12713 = vmatprep.subr.bf16.mxu1 %v17234_v11  ;;  %v11359_v11 = vpack.c.bf16 %v11331_v63, %v20090_v47  ;;  %v17253_v47 = vld [vmem:[#allocation10 + $0x270] ss:$8 sps:$4 sm:$0xff]  }
 0x804   :  { %11038 = vmatmul.mubr.bf16.gmra.mrb[32].mxu1 %v21720_v10  ;;  %v11326_v10 = vrot.slane %v9534_v48, 1  ;;  %v9614_v48 = vld [vmem:[#allocation2 + $0x3a0] sm:$0xfe] }
 0x805   :  { %11047 = vmatprep.mubr.bf16.mxu1 %v21721_v38  ;;  %v11327_v38 = vrot.slane %v9536_v58, 1  ;;  %v9616_v58 = vld [vmem:[#allocation2 + $0x3b0] sm:$0x1] }
 0x807   :  { %v11328_v19 = vsel %vm2675_vm0, %v11326_v10, %v11327_v38  ;;  %v21750_v10 = vld [vmem:[#allocation112_spill] sm:$0xff] }
 0x80c   :  { %11048 = vmatmul.mubr.bf16.gmra.mrb[36].mxu1 %v21722_v55  ;;  %v17252_v55 = vld [vmem:[#allocation10 + $0x264] ss:$8 sps:$4 sm:$0xff]  }
 0x80d   :  { %11057 = vmatprep.mubr.bf16.mxu1 %v21723_v61  ;;  %v11358_v61 = vpack.c.bf16 %v11328_v19, %v20098_v8  ;;  %v17264_v8 = vld [vmem:[#allocation10 + $0x2a4] ss:$8 sps:$4 sm:$0xff]  }
 0x80e   :  { %v21753_v19 = vld [vmem:[#allocation110_spill] sm:$0xff] }
 0x814   :  { %11058 = vmatmul.mubr.bf16.gmra.mrb[40].mxu1 %v21724_v45  ;;  %v21740_v45 = vld [vmem:[#allocation85_spill] sm:$0xff] }
 0x815   :  { %11067 = vmatprep.mubr.bf16.mxu1 %v10723_v30  ;;  %v17258_v30 = vld [vmem:[#allocation10 + $0x284] ss:$8 sps:$4 sm:$0xff]  }
 0x81c   :  { %11068 = vmatmul.mubr.bf16.gmra.mrb[44].mxu1 %v10722_v29  ;;  %v21741_v29 = vld [vmem:[#allocation83_spill] sm:$0xff] }
 0x81d   :  { %11077 = vmatprep.mubr.bf16.mxu1 %v21725_v44  ;;  %v17259_v44 = vld [vmem:[#allocation10 + $0x290] ss:$8 sps:$4 sm:$0xff]  }
 0x824   :  { %11078 = vmatmul.mubr.bf16.gmra.mrb[48].mxu1 %v21726_v57  ;;  %v9575_v57 = vld [vmem:[#allocation2 + $0x268] sm:$0xfe] }
 0x825   :  { %11087 = vmatprep.mubr.bf16.mxu1 %v21727_v21  ;;  %v9577_v21 = vld [vmem:[#allocation2 + $0x278] sm:$0x1] }
 0x826   :  { %v11336_v53 = vrot.slane %v9577_v21, 1 }
 0x82c   :  { %11088 = vmatmul.mubr.bf16.gmra.mrb[52].mxu1 %v21729_v23  ;;  %v11335_v23 = vrot.slane %v9575_v57, 1 }
 0x82d   :  { %11097 = vmatprep.mubr.bf16.mxu1 %v21731_v60  ;;  %v17270_v60 = vld [vmem:[#allocation10 + $0x2c4] ss:$8 sps:$4 sm:$0xff]  }
 0x82e   :  { %v11337_v16 = vsel %vm2675_vm0, %v11335_v23, %v11336_v53 }
 0x834   :  { %11098 = vmatmul.mubr.bf16.gmra.mrb[56].mxu1 %v21732_v28  ;;  %v11361_v28 = vpack.c.bf16 %v11337_v16, %v20118_v32  ;;  %v17277_v32 = vld [vmem:[#allocation10 + $0x2f0] ss:$8 sps:$4 sm:$0xff]   ;;  %v11944_v16 = vld [vmem:[#allocation2] sm:$0xfc] }
 0x835   :  { %11107 = vmatprep.mubr.bf16.mxu1 %v10731_v49  ;;  %v9576_v49 = vld [vmem:[#allocation2 + $0x270] sm:$0x1] }
 0x83c   :  { %11108 = vmatmul.mubr.bf16.gmra.mrb[60].mxu1 %v10730_v34  ;;  %v11332_v34 = vrot.slane %v9574_v14, 1  ;;  %v11946_v14 = vld [vmem:[#allocation2 + $0x10] sm:$0x3] }
 0x83d   :  { %11591 = vmatprep.mubr.bf16.mxu1 %v21733_v22  ;;  %v11333_v22 = vrot.slane %v9576_v49, 1 }
 0x844   :  { %11592 = vmatmul.mubr.bf16.vlgmr.msra.gmra.mrb[0].mxu1 %v21734_v25  ;;  %v17276_v25 = vld [vmem:[#allocation10 + $0x2e4] ss:$8 sps:$4 sm:$0xff]  }
 0x845   :  { %11601 = vmatprep.mubr.bf16.mxu1 %v21735_v0  ;;  %12714 = vmatpush1.bf16.msra.mxu1 %v17232_v46  ;;  %v21744_v46 = vld [vmem:[#allocation95_spill] sm:$0xff]  ;;  %v11334_v0 = vsel %vm2675_vm0, %v11332_v34, %v11333_v22  ;;  %v11955_v34 = vld [vmem:[#allocation2 + $0x58] sm:$0x3] }
 0x846   :  { %12715 = vmatprep.subr.bf16.mxu1 %v17237_v9  ;;  %v17271_v9 = vld [vmem:[#allocation10 + $0x2d0] ss:$8 sps:$4 sm:$0xff]  }
 0x849   :  { %12716 = vmatpush1.bf16.msra.mxu1 %v17235_v27  ;;  %v17274_v27 = vld [vmem:[#allocation10 + $0x2e0] ss:$8 sps:$4 sm:$0xff]  }
 0x84a   :  { %12717 = vmatprep.subr.bf16.mxu1 %v17240_v26  ;;  %v11360_v26 = vpack.c.bf16 %v11334_v0, %v20126_v52  ;;  %v11341_v52 = vrot.slane %v9615_v43, 1  ;;  %v21757_v0 = vld [vmem:[#allocation63_spill] sm:$0xff]  ;;  %v11975_v43 = vld [vmem:[#allocation2 + $0xf8] sm:$0x3] }
 0x84c   :  { %11602 = vmatmul.mubr.bf16.gmra.mrb[4].mxu1 %v21736_v33  ;;  %v21747_v33 = vld [vmem:[#allocation89_spill] sm:$0xff] }
 0x84d   :  { %11611 = vmatprep.mubr.bf16.mxu1 %v21737_v24  ;;  %12718 = vmatpush1.bf16.msra.mxu1 %v17238_v35  ;;  %v17279_v35 = vld [vmem:[#allocation10 + $0x2f4] ss:$8 sps:$4 sm:$0xff]  }
 0x84e   :  { %12719 = vmatprep.subr.bf16.mxu1 %v17243_v2  ;;  %v21746_v2 = vld [vmem:[#allocation94_spill] sm:$0xff]  ;;  %v21748_v24 = vld [vmem:[#allocation105_spill] sm:$0xff] }
 0x851   :  { %12720 = vmatpush1.bf16.msra.mxu1 %v17241_v42  ;;  %v11342_v42 = vrot.slane %v9617_v15, 1  ;;  %v21760_v15 = vld [vmem:[#allocation71_spill] sm:$0xff] }
 0x852   :  { %12721 = vmatprep.subr.bf16.mxu1 %v17246_v40  ;;  %v21749_v40 = vld [vmem:[#allocation101_spill] sm:$0xff] }
 0x853   :  { %v11343_v63 = vsel %vm2675_vm0, %v11341_v52, %v11342_v42  ;;  %v17291_v42 = vld [vmem:[#allocation10 + $0x534] ss:$8 sps:$4 sm:$0xff]  }
 0x854   :  { %11612 = vmatmul.mubr.bf16.gmra.mrb[8].mxu1 %v21738_v4 }
 0x855   :  { %11621 = vmatprep.mubr.bf16.mxu1 %v11359_v11  ;;  %12722 = vmatpush1.bf16.msra.mxu1 %v17244_v7  ;;  %v11363_v7 = vpack.c.bf16 %v11343_v63, %v20146_v18  ;;  %v11339_v11 = vrot.slane %v9616_v58, 1  ;;  %v21764_v63 = vld [vmem:[#allocation118_spill] sm:$0xff] }
 0x856   :  { %12723 = vmatprep.subr.bf16.mxu1 %v17249_v62  ;;  %v11338_v62 = vrot.slane %v9614_v48, 1 }
 0x858   :  { %v11340_v38 = vsel %vm2675_vm0, %v11338_v62, %v11339_v11  ;;  %v17289_v62 = vld [vmem:[#allocation10 + $0x530] ss:$8 sps:$4 sm:$0xff]   ;;  %v17294_v11 = vld [vmem:[#allocation10 + $0x544] ss:$8 sps:$4 sm:$0xff]  }
 0x859   :  { %12724 = vmatpush1.bf16.msra.mxu1 %v17247_v51  ;;  %v11362_v4 = vpack.c.bf16 %v11340_v38, %v20154_v6  ;;  %v21751_v51 = vld [vmem:[#allocation104_spill] sm:$0xff]  ;;  %v11945_v6 = vld [vmem:[#allocation2 + $0x8] sm:$0xfc]  ;;  %v11972_v38 = vld [vmem:[#allocation2 + $0xe0] sm:$0xfc] }
 0x85a   :  { %12725 = vmatprep.subr.bf16.mxu1 %v17252_v55  ;;  %v21752_v55 = vld [vmem:[#allocation99_spill] sm:$0xff] }
 0x85c   :  { %11622 = vmatmul.mubr.bf16.gmra.mrb[12].mxu1 %v11358_v61  ;;  %v9657_v61 = vld [vmem:[#allocation2 + $0x4f8] sm:$0x1] }
 0x85d   :  { %11631 = vmatprep.mubr.bf16.mxu1 %v21739_v36  ;;  %12726 = vmatpush1.bf16.msra.mxu1 %v17250_v56  ;;  %v9655_v56 = vld [vmem:[#allocation2 + $0x4e8] sm:$0xfe]  ;;  %v11348_v36 = vrot.slane %v9657_v61, 1 }
 0x85e   :  { %12727 = vmatprep.subr.bf16.mxu1 %v17255_v12  ;;  %v21754_v12 = vld [vmem:[#allocation41_spill] sm:$0xff]  ;;  %v11347_v18 = vrot.slane %v9655_v56, 1  ;;  %v21766_v56 = vld [vmem:[#allocation116_spill] sm:$0xff]  ;;  %v21767_v61 = vld [vmem:[#allocation119_spill] sm:$0xff] }
 0x861   :  { %12728 = vmatpush1.bf16.msra.mxu1 %v17253_v47  ;;  %v21755_v47 = vld [vmem:[#allocation37_spill] sm:$0xff] }
 0x862   :  { %12729 = vmatprep.subr.bf16.mxu1 %v17258_v30  ;;  %v11349_v30 = vsel %vm2675_vm0, %v11347_v18, %v11348_v36  ;;  %v17297_v18 = vld [vmem:[#allocation10 + $0x554] ss:$8 sps:$4 sm:$0xff]  }
 0x863   :  { %v21769_v36 = vld [vmem:[#allocation120_spill] sm:$0xff] }
 0x864   :  { %11632 = vmatmul.mubr.bf16.gmra.mrb[16].mxu1 %v21740_v45  ;;  %v11947_v45 = vld [vmem:[#allocation2 + $0x18] sm:$0x3] }
 0x865   :  { %11641 = vmatprep.mubr.bf16.mxu1 %v21741_v29  ;;  %12730 = vmatpush1.bf16.msra.mxu1 %v17256_v50  ;;  %v9654_v50 = vld [vmem:[#allocation2 + $0x4e0] sm:$0xfe]  ;;  %v11949_v29 = vld [vmem:[#allocation2 + $0x28] sm:$0xfc] }
 0x866   :  { %12731 = vmatprep.subr.bf16.mxu1 %v17261_v1  ;;  %v9656_v1 = vld [vmem:[#allocation2 + $0x4f0] sm:$0x1]  ;;  %v11344_v57 = vrot.slane %v9654_v50, 1  ;;  %v12241_v23 = vrot.slane %v11949_v29, 2 }
 0x867   :  { %v11345_v21 = vrot.slane %v9656_v1, 1  ;;  %v17300_v29 = vld [vmem:[#allocation10 + $0x564] ss:$8 sps:$4 sm:$0xff]  }
 0x869   :  { %12732 = vmatpush1.bf16.msra.mxu1 %v17259_v44  ;;  %v11951_v44 = vld [vmem:[#allocation2 + $0x38] sm:$0x3] }
 0x86a   :  { %12733 = vmatprep.subr.bf16.mxu1 %v17264_v8  ;;  %v11365_v8 = vpack.c.bf16 %v11349_v30, %v20174_v5  ;;  %v12242_v53 = vrot.slane %v11951_v44, 2  ;;  %v12274_v30 = vrot.slane %v11972_v38, 2 }
 0x86c   :  { %11642 = vmatmul.mubr.bf16.gmra.mrb[20].mxu1 %v21742_v31  ;;  %v12236_v31 = vrot.slane %v11947_v45, 2  ;;  %v17295_v45 = vld [vmem:[#allocation10 + $0x550] ss:$8 sps:$4 sm:$0xff]  }
 0x86d   :  { %11651 = vmatprep.mubr.bf16.mxu1 %v21743_v59  ;;  %12734 = vmatpush1.bf16.msra.mxu1 %v17262_v20  ;;  %v21756_v20 = vld [vmem:[#allocation42_spill] sm:$0xff]  ;;  %v11346_v59 = vsel %vm2675_vm0, %v11344_v57, %v11345_v21  ;;  %v11986_v21 = vld [vmem:[#allocation2 + $0x150] sm:$0x3] }
 0x86e   :  { %12735 = vmatprep.subr.bf16.mxu1 %v17267_v39  ;;  %v12235_v39 = vrot.slane %v11945_v6, 2  ;;  %v11364_v5 = vpack.c.bf16 %v11346_v59, %v20182_v41  ;;  %v21758_v41 = vld [vmem:[#allocation114_spill] sm:$0xff] }
 0x86f   :  { %v11984_v57 = vld [vmem:[#allocation2 + $0x140] sm:$0xfc] }
 0x871   :  { %12736 = vmatpush1.bf16.msra.mxu1 %v17265_v13  ;;  %v12237_v13 = vsel %vm5122_vm1, %v12235_v39, %v12236_v31  ;;  %v21771_v39 = vld [vmem:[#allocation121_spill] sm:$0xff] }
 0x872   :  { %12737 = vmatprep.subr.bf16.mxu1 %v17270_v60  ;;  %v20227_v60 = vsel %vm5122_vm1, %v12241_v23, %v12242_v53  ;;  %v17303_v23 = vld [vmem:[#allocation10 + $0x574] ss:$8 sps:$4 sm:$0xff]   ;;  %v21773_v53 = vld [vmem:[#allocation122_spill] sm:$0xff] }
 0x873   :  { %v12489_v49 = vpack.c.bf16 %v20227_v60, %v12237_v13  ;;  %v12280_v13 = vrot.slane %v11984_v57, 2  ;;  %v21787_v57 = vld [vmem:[#allocation128_spill] sm:$0xff] }
 0x874   :  { %11652 = vmatmul.mubr.bf16.gmra.mrb[24].mxu1 %v21744_v46  ;;  %v12248_v46 = vrot.slane %v11955_v34, 2  ;;  %v17309_v34 = vld [vmem:[#allocation10 + $0x594] ss:$8 sps:$4 sm:$0xff]  }
 0x875   :  { %11661 = vmatprep.mubr.bf16.mxu1 %v11361_v28  ;;  %12738 = vmatpush1.bf16.msra.mxu1 %v17268_v37  ;;  %v12232_v37 = vrot.slane %v11944_v16, 2  ;;  %v11953_v28 = vld [vmem:[#allocation2 + $0x48] sm:$0xfc]  ;;  %v12281_v16 = vrot.slane %v11986_v21, 2 }
 0x876   :  { %12739 = vmatprep.subr.bf16.mxu1 %v17273_v17  ;;  %v12233_v17 = vrot.slane %v11946_v14, 2  ;;  %v12247_v22 = vrot.slane %v11953_v28, 2  ;;  %v17301_v14 = vld [vmem:[#allocation10 + $0x570] ss:$8 sps:$4 sm:$0xff]  }
 0x879   :  { %12740 = vmatpush1.bf16.msra.mxu1 %v17271_v9  ;;  %v12234_v9 = vsel %vm5122_vm1, %v12232_v37, %v12233_v17  ;;  %v17304_v37 = vld [vmem:[#allocation10 + $0x580] ss:$8 sps:$4 sm:$0xff]  }
 0x87a   :  { %12741 = vmatprep.subr.bf16.mxu1 %v17276_v25  ;;  %v17280_v25 = vld [vmem:[#allocation10 + $0x500] ss:$8 sps:$4 sm:$0xff]  }
 0x87b   :  { %v21774_v17 = vld [vmem:[#allocation125_spill] sm:$0xff] }
 0x87c   :  { %11662 = vmatmul.mubr.bf16.gmra.mrb[28].mxu1 %v11360_v26  ;;  %v20234_v26 = vsel %vm5122_vm1, %v12247_v22, %v12248_v46  ;;  %v21775_v22 = vld [vmem:[#allocation123_spill] sm:$0xff]  ;;  %v21776_v46 = vld [vmem:[#allocation129_spill] sm:$0xff] }
 0x87d   :  { %11671 = vmatprep.mubr.bf16.mxu1 %v21745_v3  ;;  %12742 = vmatpush1.bf16.msra.mxu1 %v17274_v27  ;;  %v12488_v27 = vpack.c.bf16 %v21757_v0, %v12234_v9  ;;  %v20238_v3 = vpack.c.bf16 %v21758_v41, %v20234_v26  ;;  %v20278_v9 = vpack.c.bf16 %v21776_v46, %v21775_v22 }
 0x87e   :  { %12743 = vmatprep.subr.bf16.mxu1 %v17279_v35  ;;  %v17285_v35 = vld [vmem:[#allocation10 + $0x514] ss:$8 sps:$4 sm:$0xff]  }
 0x87f   :  { %21759 = vst [vmem:[#allocation40_spill] sm:$0xff] %v20238_v3  ;;  %21777 = vst [vmem:[#allocation47_spill] sm:$0xff] %v20278_v9 }
 0x881   :  { %12744 = vmatpush1.bf16.msra.mxu1 %v17277_v32  ;;  %v17283_v32 = vld [vmem:[#allocation10 + $0x510] ss:$8 sps:$4 sm:$0xff]  }
 0x882   :  { %13371 = vmatprep.subr.bf16.mxu1 %v17282_v54  ;;  %v17288_v54 = vld [vmem:[#allocation10 + $0x524] ss:$8 sps:$4 sm:$0xff]  }
 0x884   :  { %11672 = vmatmul.mubr.bf16.gmra.mrb[32].mxu1 %v21746_v2  ;;  %v17286_v2 = vld [vmem:[#allocation10 + $0x520] ss:$8 sps:$4 sm:$0xff]  }
 0x885   :  { %11681 = vmatprep.mubr.bf16.mxu1 %v21747_v33  ;;  %v11973_v33 = vld [vmem:[#allocation2 + $0xe8] sm:$0xfc] }
 0x886   :  { %v12277_v58 = vrot.slane %v11973_v33, 2  ;;  %v21779_v33 = vld [vmem:[#allocation130_spill] sm:$0xff] }
 0x88c   :  { %11682 = vmatmul.mubr.bf16.gmra.mrb[36].mxu1 %v21748_v24  ;;  %v21761_v24 = vld [vmem:[#allocation117_spill] sm:$0xff] }
 0x88d   :  { %11691 = vmatprep.mubr.bf16.mxu1 %v21749_v40  ;;  %v20243_v52 = vpack.c.bf16 %v21761_v24, %v21760_v15  ;;  %v21763_v40 = vld [vmem:[#allocation111_spill] sm:$0xff] }
 0x88e   :  { %v20247_v48 = vpack.c.bf16 %v21764_v63, %v21763_v40 }
 0x88f   :  { %21762 = vst [vmem:[#allocation21_spill] sm:$0xff] %v20243_v52 }
 0x890   :  { %21765 = vst [vmem:[#allocation22_spill] sm:$0xff] %v20247_v48 }
 0x894   :  { %11692 = vmatmul.mubr.bf16.gmra.mrb[40].mxu1 %v21750_v10 }
 0x895   :  { %11701 = vmatprep.mubr.bf16.mxu1 %v11363_v7  ;;  %v12278_v7 = vrot.slane %v11975_v43, 2 }
 0x897   :  { %v20252_v10 = vsel %vm5122_vm1, %v12277_v58, %v12278_v7  ;;  %v21781_v58 = vld [vmem:[#allocation126_spill] sm:$0xff]  ;;  %v21782_v7 = vld [vmem:[#allocation131_spill] sm:$0xff] }
 0x89c   :  { %11702 = vmatmul.mubr.bf16.gmra.mrb[44].mxu1 %v11362_v4  ;;  %v11974_v4 = vld [vmem:[#allocation2 + $0xf0] sm:$0x3] }
 0x89d   :  { %11711 = vmatprep.mubr.bf16.mxu1 %v21751_v51  ;;  %v11985_v51 = vld [vmem:[#allocation2 + $0x148] sm:$0xfc]  ;;  %v12275_v50 = vrot.slane %v11974_v4, 2  ;;  %v17313_v4 = vld [vmem:[#allocation10 + $0x5b0] ss:$8 sps:$4 sm:$0xff]  }
 0x89e   :  { %v12283_v1 = vrot.slane %v11985_v51, 2  ;;  %v17318_v51 = vld [vmem:[#allocation10 + $0x5c4] ss:$8 sps:$4 sm:$0xff]  }
 0x89f   :  { %v20265_v44 = vsel %vm5122_vm1, %v12274_v30, %v12275_v50  ;;  %v12025_v30 = vld [vmem:[#allocation2 + $0x288] sm:$0xfc]  ;;  %v12027_v50 = vld [vmem:[#allocation2 + $0x298] sm:$0x3] }
 0x8a0   :  { %v20270_v31 = vpack.c.bf16 %v20265_v44, %v21771_v39 }
 0x8a2   :  { %21772 = vst [vmem:[#allocation48_spill] sm:$0xff] %v20270_v31 }
 0x8a4   :  { %11712 = vmatmul.mubr.bf16.gmra.mrb[48].mxu1 %v21752_v55  ;;  %v11987_v55 = vld [vmem:[#allocation2 + $0x158] sm:$0x3] }
 0x8a5   :  { %11721 = vmatprep.mubr.bf16.mxu1 %v21753_v19  ;;  %v17292_v19 = vld [vmem:[#allocation10 + $0x540] ss:$8 sps:$4 sm:$0xff]   ;;  %v12284_v6 = vrot.slane %v11987_v55, 2 }
 0x8ac   :  { %11722 = vmatmul.mubr.bf16.gmra.mrb[52].mxu1 %v21754_v12  ;;  %v20256_v12 = vpack.c.bf16 %v21767_v61, %v21766_v56 }
 0x8ad   :  { %11731 = vmatprep.mubr.bf16.mxu1 %v21755_v47  ;;  %v20260_v47 = vpack.c.bf16 %v20252_v10, %v21769_v36 }
 0x8ae   :  { %21768 = vst [vmem:[#allocation30_spill] sm:$0xff] %v20256_v12 }
 0x8af   :  { %21770 = vst [vmem:[#allocation28_spill] sm:$0xff] %v20260_v47 }
 0x8b4   :  { %11732 = vmatmul.mubr.bf16.gmra.mrb[56].mxu1 %v21756_v20  ;;  %v17298_v20 = vld [vmem:[#allocation10 + $0x560] ss:$8 sps:$4 sm:$0xff]  }
 0x8b5   :  { %11741 = vmatprep.mubr.bf16.mxu1 %v11365_v8  ;;  %v12285_v8 = vsel %vm5122_vm1, %v12283_v1, %v12284_v6  ;;  %v17316_v1 = vld [vmem:[#allocation10 + $0x5c0] ss:$8 sps:$4 sm:$0xff]  }
 0x8b6   :  { %v12497_v59 = vpack.c.bf16 %v21773_v53, %v12285_v8  ;;  %v21784_v6 = vld [vmem:[#allocation127_spill] sm:$0xff]  ;;  %v17321_v8 = vld [vmem:[#allocation10 + $0x5d4] ss:$8 sps:$4 sm:$0xff]  }
 0x8bc   :  { %11742 = vmatmul.mubr.bf16.gmra.mrb[60].mxu1 %v11364_v5  ;;  %v17306_v5 = vld [vmem:[#allocation10 + $0x584] ss:$8 sps:$4 sm:$0xff]  }
 0x8bd   :  { %12745 = vmatprep.mubr.bf16.mxu1 %v12489_v49  ;;  %v12282_v49 = vsel %vm5122_vm1, %v12280_v13, %v12281_v16  ;;  %v12332_v13 = vrot.slane %v12027_v50, 2  ;;  %v17319_v16 = vld [vmem:[#allocation10 + $0x5d0] ss:$8 sps:$4 sm:$0xff]   ;;  %v21794_v50 = vld [vmem:[#allocation138_spill] sm:$0xff] }
 0x8be   :  { %v12496_v28 = vpack.c.bf16 %v21774_v17, %v12282_v49 }
 0x8c4   :  { %12746 = vmatmul.mubr.bf16.vlgmr.msra.gmra.mrb[0].mxu1 %v12488_v27  ;;  %v17312_v27 = vld [vmem:[#allocation10 + $0x5a4] ss:$8 sps:$4 sm:$0xff]  }
 0x8c5   :  { %12755 = vmatprep.mubr.bf16.mxu1 %v20238_v3  ;;  %13372 = vmatpush1.bf16.msra.mxu1 %v17280_v25  ;;  %v17307_v25 = vld [vmem:[#allocation10 + $0x590] ss:$8 sps:$4 sm:$0xff]  }
 0x8c6   :  { %13373 = vmatprep.subr.bf16.mxu1 %v17285_v35  ;;  %v12013_v35 = vld [vmem:[#allocation2 + $0x228] sm:$0xfc] }
 0x8c9   :  { %13374 = vmatpush1.bf16.msra.mxu1 %v17283_v32  ;;  %v12015_v32 = vld [vmem:[#allocation2 + $0x238] sm:$0x3] }
 0x8ca   :  { %13375 = vmatprep.subr.bf16.mxu1 %v17288_v54  ;;  %v17310_v54 = vld [vmem:[#allocation10 + $0x5a0] ss:$8 sps:$4 sm:$0xff]   ;;  %v12326_v38 = vrot.slane %v12015_v32, 2 }
 0x8cb   :  { %v21791_v32 = vld [vmem:[#allocation134_spill] sm:$0xff] }
 0x8cc   :  { %12756 = vmatmul.mubr.bf16.gmra.mrb[4].mxu1 %v20243_v52  ;;  %v21822_v52 = vld [vmem:[#allocation155_spill] sm:$0xff] }
 0x8cd   :  { %12765 = vmatprep.mubr.bf16.mxu1 %v20247_v48  ;;  %13376 = vmatpush1.bf16.msra.mxu1 %v17286_v2  ;;  %v21778_v2 = vld [vmem:[#allocation124_spill] sm:$0xff] }
 0x8ce   :  { %13377 = vmatprep.subr.bf16.mxu1 %v17291_v42  ;;  %v20283_v43 = vpack.c.bf16 %v21779_v33, %v21778_v2  ;;  %v17315_v42 = vld [vmem:[#allocation10 + $0x5b4] ss:$8 sps:$4 sm:$0xff]  }
 0x8d0   :  { %21780 = vst [vmem:[#allocation53_spill] sm:$0xff] %v20283_v43 }
 0x8d1   :  { %13378 = vmatpush1.bf16.msra.mxu1 %v17289_v62  ;;  %v20287_v62 = vpack.c.bf16 %v21782_v7, %v21781_v58 }
 0x8d2   :  { %13379 = vmatprep.subr.bf16.mxu1 %v17294_v11  ;;  %v12325_v11 = vrot.slane %v12013_v35, 2  ;;  %v17327_v35 = vld [vmem:[#allocation10 + $0x5f4] ss:$8 sps:$4 sm:$0xff]  }
 0x8d3   :  { %21783 = vst [vmem:[#allocation54_spill] sm:$0xff] %v20287_v62 }
 0x8d4   :  { %12766 = vmatmul.mubr.bf16.gmra.mrb[8].mxu1 %v20256_v12  ;;  %v20292_v55 = vsel %vm5122_vm1, %v12325_v11, %v12326_v38  ;;  %v17325_v38 = vld [vmem:[#allocation10 + $0x5f0] ss:$8 sps:$4 sm:$0xff]  }
 0x8d5   :  { %12775 = vmatprep.mubr.bf16.mxu1 %v20260_v47  ;;  %13380 = vmatpush1.bf16.msra.mxu1 %v17292_v19  ;;  %v12012_v19 = vld [vmem:[#allocation2 + $0x220] sm:$0xfc]  ;;  %v20300_v21 = vpack.c.bf16 %v20292_v55, %v21787_v57  ;;  %v21820_v12 = vld [vmem:[#allocation156_spill] sm:$0xff] }
 0x8d6   :  { %13381 = vmatprep.subr.bf16.mxu1 %v17297_v18  ;;  %v12014_v18 = vld [vmem:[#allocation2 + $0x230] sm:$0x3]  ;;  %v21819_v47 = vld [vmem:[#allocation153_spill] sm:$0xff] }
 0x8d7   :  { %21788 = vst [vmem:[#allocation60_spill] sm:$0xff] %v20300_v21  ;;  %v20376_v48 = vpack.c.bf16 %v21820_v12, %v21819_v47 }
 0x8d9   :  { %13382 = vmatpush1.bf16.msra.mxu1 %v17295_v45  ;;  %v21785_v45 = vld [vmem:[#allocation133_spill] sm:$0xff]  ;;  %21821 = vst [vmem:[#allocation115_spill] sm:$0xff] %v20376_v48 }
 0x8da   :  { %13383 = vmatprep.subr.bf16.mxu1 %v17300_v29  ;;  %v20296_v29 = vpack.c.bf16 %v21785_v45, %v21784_v6 }
 0x8dc   :  { %12776 = vmatmul.mubr.bf16.gmra.mrb[12].mxu1 %v20270_v31  ;;  %21786 = vst [vmem:[#allocation61_spill] sm:$0xff] %v20296_v29  ;;  %v21814_v31 = vld [vmem:[#allocation149_spill] sm:$0xff] }
 0x8dd   :  { %12785 = vmatprep.mubr.bf16.mxu1 %v12497_v59  ;;  %13384 = vmatpush1.bf16.msra.mxu1 %v17298_v20  ;;  %v12322_v20 = vrot.slane %v12012_v19, 2  ;;  %v12331_v59 = vrot.slane %v12025_v30, 2  ;;  %v21792_v19 = vld [vmem:[#allocation136_spill] sm:$0xff]  ;;  %v21793_v30 = vld [vmem:[#allocation135_spill] sm:$0xff] }
 0x8de   :  { %13385 = vmatprep.subr.bf16.mxu1 %v17303_v23  ;;  %v12323_v23 = vrot.slane %v12014_v18, 2 }
 0x8df   :  { %v12333_v49 = vsel %vm5122_vm1, %v12331_v59, %v12332_v13  ;;  %v21797_v59 = vld [vmem:[#allocation141_spill] sm:$0xff] }
 0x8e1   :  { %13386 = vmatpush1.bf16.msra.mxu1 %v17301_v14  ;;  %v17324_v14 = vld [vmem:[#allocation10 + $0x5e4] ss:$8 sps:$4 sm:$0xff]  }
 0x8e2   :  { %13387 = vmatprep.subr.bf16.mxu1 %v17306_v5  ;;  %v20305_v5 = vsel %vm5122_vm1, %v12322_v20, %v12323_v23  ;;  %v12055_v20 = vld [vmem:[#allocation2 + $0x378] sm:$0x3]  ;;  %v21796_v23 = vld [vmem:[#allocation137_spill] sm:$0xff] }
 0x8e3   :  { %v20323_v13 = vpack.c.bf16 %v21797_v59, %v21796_v23 }
 0x8e4   :  { %12786 = vmatmul.mubr.bf16.gmra.mrb[16].mxu1 %v12496_v28  ;;  %v12026_v28 = vld [vmem:[#allocation2 + $0x290] sm:$0x3] }
 0x8e5   :  { %12795 = vmatprep.mubr.bf16.mxu1 %v20278_v9  ;;  %13388 = vmatpush1.bf16.msra.mxu1 %v17304_v37  ;;  %v12024_v37 = vld [vmem:[#allocation2 + $0x280] sm:$0xfc]  ;;  %v12329_v11 = vrot.slane %v12026_v28, 2  ;;  %21798 = vst [vmem:[#allocation80_spill] sm:$0xff] %v20323_v13  ;;  %v12374_v28 = vrot.slane %v12055_v20, 2 }
 0x8e6   :  { %13389 = vmatprep.subr.bf16.mxu1 %v17309_v34  ;;  %v17322_v34 = vld [vmem:[#allocation10 + $0x5e0] ss:$8 sps:$4 sm:$0xff]  }
 0x8e9   :  { %13390 = vmatpush1.bf16.msra.mxu1 %v17307_v25  ;;  %v21789_v25 = vld [vmem:[#allocation132_spill] sm:$0xff] }
 0x8ea   :  { %13391 = vmatprep.subr.bf16.mxu1 %v17312_v27  ;;  %v20310_v27 = vpack.c.bf16 %v20305_v5, %v21789_v25 }
 0x8ec   :  { %12796 = vmatmul.mubr.bf16.gmra.mrb[20].mxu1 %v20283_v43  ;;  %21790 = vst [vmem:[#allocation72_spill] sm:$0xff] %v20310_v27  ;;  %v21809_v43 = vld [vmem:[#allocation146_spill] sm:$0xff] }
 0x8ed   :  { %12805 = vmatprep.mubr.bf16.mxu1 %v20287_v62  ;;  %13392 = vmatpush1.bf16.msra.mxu1 %v17310_v54  ;;  %v12505_v54 = vpack.c.bf16 %v21791_v32, %v12333_v49 }
 0x8ee   :  { %13393 = vmatprep.subr.bf16.mxu1 %v17315_v42  ;;  %v12328_v42 = vrot.slane %v12024_v37, 2 }
 0x8f1   :  { %13394 = vmatpush1.bf16.msra.mxu1 %v17313_v4  ;;  %v17330_v4 = vld [vmem:[#allocation10 + $0x804] ss:$8 sps:$4 sm:$0xff]  }
 0x8f2   :  { %13395 = vmatprep.subr.bf16.mxu1 %v17318_v51  ;;  %v12330_v51 = vsel %vm5122_vm1, %v12328_v42, %v12329_v11  ;;  %v12065_v42 = vld [vmem:[#allocation2 + $0x3c8] sm:$0xfc]  ;;  %v12067_v11 = vld [vmem:[#allocation2 + $0x3d8] sm:$0x3] }
 0x8f3   :  { %v12504_v18 = vpack.c.bf16 %v21792_v19, %v12330_v51  ;;  %v12379_v20 = vrot.slane %v12065_v42, 2 }
 0x8f4   :  { %12806 = vmatmul.mubr.bf16.gmra.mrb[24].mxu1 %v20296_v29  ;;  %v21807_v29 = vld [vmem:[#allocation145_spill] sm:$0xff] }
 0x8f5   :  { %12815 = vmatprep.mubr.bf16.mxu1 %v20300_v21  ;;  %13396 = vmatpush1.bf16.msra.mxu1 %v17316_v1  ;;  %v20318_v1 = vpack.c.bf16 %v21794_v50, %v21793_v30  ;;  %v12066_v21 = vld [vmem:[#allocation2 + $0x3d0] sm:$0x3] }
 0x8f6   :  { %13397 = vmatprep.subr.bf16.mxu1 %v17321_v8  ;;  %v12053_v8 = vld [vmem:[#allocation2 + $0x368] sm:$0xfc]  ;;  %v12377_v9 = vrot.slane %v12066_v21, 2 }
 0x8f7   :  { %21795 = vst [vmem:[#allocation70_spill] sm:$0xff] %v20318_v1  ;;  %v12373_v37 = vrot.slane %v12053_v8, 2  ;;  %v21816_v21 = vld [vmem:[#allocation150_spill] sm:$0xff] }
 0x8f9   :  { %13398 = vmatpush1.bf16.msra.mxu1 %v17319_v16  ;;  %v21799_v16 = vld [vmem:[#allocation139_spill] sm:$0xff] }
 0x8fa   :  { %13399 = vmatprep.subr.bf16.mxu1 %v17324_v14  ;;  %v21800_v14 = vld [vmem:[#allocation142_spill] sm:$0xff] }
 0x8fb   :  { %v20327_v49 = vpack.c.bf16 %v21800_v14, %v21799_v16 }
 0x8fc   :  { %12816 = vmatmul.mubr.bf16.gmra.mrb[28].mxu1 %v20310_v27  ;;  %v12064_v27 = vld [vmem:[#allocation2 + $0x3c0] sm:$0xfc] }
 0x8fd   :  { %12825 = vmatprep.mubr.bf16.mxu1 %v12505_v54  ;;  %13400 = vmatpush1.bf16.msra.mxu1 %v17322_v34  ;;  %21801 = vst [vmem:[#allocation81_spill] sm:$0xff] %v20327_v49  ;;  %v20332_v34 = vsel %vm5122_vm1, %v12373_v37, %v12374_v28  ;;  %v12054_v54 = vld [vmem:[#allocation2 + $0x370] sm:$0x3] }
 0x8fe   :  { %13401 = vmatprep.subr.bf16.mxu1 %v17327_v35  ;;  %v12052_v35 = vld [vmem:[#allocation2 + $0x360] sm:$0xfc]  ;;  %v12371_v8 = vrot.slane %v12054_v54, 2  ;;  %v12376_v54 = vrot.slane %v12064_v27, 2 }
 0x900   :  { %v12378_v42 = vsel %vm5122_vm1, %v12376_v54, %v12377_v9 }
 0x901   :  { %13402 = vmatpush1.bf16.msra.mxu1 %v17325_v38  ;;  %v21802_v38 = vld [vmem:[#allocation140_spill] sm:$0xff] }
 0x902   :  { %14005 = vmatprep.subr.bf16.mxu1 %v17330_v4  ;;  %v21803_v4 = vld [vmem:[#allocation144_spill] sm:$0xff] }
 0x903   :  { %v20336_v51 = vpack.c.bf16 %v21803_v4, %v21802_v38 }
 0x904   :  { %12826 = vmatmul.mubr.bf16.gmra.mrb[32].mxu1 %v12504_v18  ;;  %v21805_v18 = vld [vmem:[#allocation143_spill] sm:$0xff] }
 0x905   :  { %12835 = vmatprep.mubr.bf16.mxu1 %v20318_v1  ;;  %21804 = vst [vmem:[#allocation93_spill] sm:$0xff] %v20336_v51  ;;  %v20340_v1 = vpack.c.bf16 %v20332_v34, %v21805_v18 }
 0x907   :  { %21806 = vst [vmem:[#allocation92_spill] sm:$0xff] %v20340_v1 }
 0x90c   :  { %12836 = vmatmul.mubr.bf16.gmra.mrb[36].mxu1 %v20323_v13  ;;  %v12370_v13 = vrot.slane %v12052_v35, 2 }
 0x90d   :  { %12845 = vmatprep.mubr.bf16.mxu1 %v20327_v49  ;;  %v12380_v49 = vrot.slane %v12067_v11, 2  ;;  %v21810_v11 = vld [vmem:[#allocation148_spill] sm:$0xff] }
 0x90e   :  { %v20345_v37 = vsel %vm5122_vm1, %v12370_v13, %v12371_v8  ;;  %v12512_v13 = vpack.c.bf16 %v21810_v11, %v12378_v42  ;;  %v21811_v8 = vld [vmem:[#allocation147_spill] sm:$0xff] }
 0x90f   :  { %v12381_v28 = vsel %vm5122_vm1, %v12379_v20, %v12380_v49  ;;  %v20350_v62 = vpack.c.bf16 %v20345_v37, %v21807_v29  ;;  %v12093_v20 = vld [vmem:[#allocation2 + $0x4a8] sm:$0xfc] }
 0x910   :  { %v12513_v35 = vpack.c.bf16 %v21809_v43, %v12381_v28  ;;  %v21815_v28 = vld [vmem:[#allocation152_spill] sm:$0xff]  ;;  %v12421_v9 = vrot.slane %v12093_v20, 2  ;;  %v21824_v20 = vld [vmem:[#allocation157_spill] sm:$0xff] }
 0x911   :  { %21808 = vst [vmem:[#allocation103_spill] sm:$0xff] %v20350_v62  ;;  %v20363_v27 = vpack.c.bf16 %v21815_v28, %v21814_v31 }
 0x914   :  { %12846 = vmatmul.mubr.bf16.gmra.mrb[40].mxu1 %v20336_v51  ;;  %v12095_v51 = vld [vmem:[#allocation2 + $0x4b8] sm:$0x3] }
 0x915   :  { %12855 = vmatprep.mubr.bf16.mxu1 %v20340_v1  ;;  %v21812_v1 = vld [vmem:[#allocation151_spill] sm:$0xff]  ;;  %v12422_v54 = vrot.slane %v12095_v51, 2 }
 0x916   :  { %v20358_v49 = vpack.c.bf16 %v21812_v1, %v21811_v8 }
 0x917   :  { %v20372_v42 = vsel %vm5122_vm1, %v12421_v9, %v12422_v54  ;;  %v13147_v54 = vpack.c.bf16 %v20234_v26, %v20227_v60  ;;  %v11977_v60 = vld [vmem:[#allocation2 + $0x108] sm:$0xfc]  ;;  %v11979_v26 = vld [vmem:[#allocation2 + $0x118] sm:$0x3] }
 0x918   :  { %21813 = vst [vmem:[#allocation102_spill] sm:$0xff] %v20358_v49  ;;  %v20380_v3 = vpack.c.bf16 %v20372_v42, %v21822_v52 }
 0x91a   :  { %21823 = vst [vmem:[#allocation29_spill] sm:$0xff] %v20380_v3 }
 0x91c   :  { %12856 = vmatmul.mubr.bf16.gmra.mrb[44].mxu1 %v20350_v62  ;;  %v21817_v62 = vld [vmem:[#allocation154_spill] sm:$0xff] }
 0x91d   :  { %12865 = vmatprep.mubr.bf16.mxu1 %v12513_v35  ;;  %v20367_v35 = vpack.c.bf16 %v21817_v62, %v21816_v21 }
 0x91f   :  { %21818 = vst [vmem:[#allocation113_spill] sm:$0xff] %v20367_v35 }
 0x924   :  { %12866 = vmatmul.mubr.bf16.gmra.mrb[48].mxu1 %v12512_v13  ;;  %v12092_v13 = vld [vmem:[#allocation2 + $0x4a0] sm:$0xfc] }
 0x925   :  { %12875 = vmatprep.mubr.bf16.mxu1 %v20358_v49  ;;  %v12094_v49 = vld [vmem:[#allocation2 + $0x4b0] sm:$0x3]  ;;  %v12418_v62 = vrot.slane %v12092_v13, 2  ;;  %v17333_v13 = vld [vmem:[#allocation10 + $0x814] ss:$8 sps:$4 sm:$0xff]  }
 0x926   :  { %v12419_v28 = vrot.slane %v12094_v49, 2  ;;  %v21826_v49 = vpack.c.bf16 %v21760_v15, %v21757_v0  ;;  %v13117_v0 = vrot.slane %v11977_v60, 2  ;;  %v13118_v15 = vrot.slane %v11979_v26, 2  ;;  %v17346_v26 = vld [vmem:[#allocation10 + $0x860] ss:$8 sps:$4 sm:$0xff]  }
 0x928   :  { %v20385_v51 = vsel %vm5122_vm1, %v12418_v62, %v12419_v28  ;;  %v21827_v62 = vpack.c.bf16 %v21763_v40, %v21758_v41  ;;  %v17331_v28 = vld [vmem:[#allocation10 + $0x810] ss:$8 sps:$4 sm:$0xff]   ;;  %v21829_v41 = vpack.c.bf16 %v21769_v36, %v21764_v63  ;;  %v21830_v63 = vpack.c.bf16 %v21771_v39, %v21767_v61  ;;  %v17348_v36 = vld [vmem:[#allocation10 + $0x864] ss:$8 sps:$4 sm:$0xff]  }
 0x929   :  { %v20389_v9 = vpack.c.bf16 %v20385_v51, %v21824_v20  ;;  %v17337_v40 = vld [vmem:[#allocation10 + $0x830] ss:$8 sps:$4 sm:$0xff]   ;;  %v21831_v61 = vpack.c.bf16 %v21775_v22, %v21773_v53  ;;  %v17360_v53 = vld [vmem:[#allocation10 + $0x8a4] ss:$8 sps:$4 sm:$0xff]  }
 0x92a   :  { %v17349_v39 = vld [vmem:[#allocation10 + $0x870] ss:$8 sps:$4 sm:$0xff]   ;;  %v12017_v22 = vld [vmem:[#allocation2 + $0x248] sm:$0xfc] }
 0x92b   :  { %21825 = vst [vmem:[#allocation32_spill] sm:$0xff] %v20389_v9 }
 0x92c   :  { %12876 = vmatmul.mubr.bf16.gmra.mrb[52].mxu1 %v20363_v27 }
 0x92d   :  { %12885 = vmatprep.mubr.bf16.mxu1 %v20367_v35  ;;  %v17328_v35 = vld [vmem:[#allocation10 + $0x800] ss:$8 sps:$4 sm:$0xff]  }
 0x934   :  { %12886 = vmatmul.mubr.bf16.gmra.mrb[56].mxu1 %v20376_v48  ;;  %v17334_v48 = vld [vmem:[#allocation10 + $0x820] ss:$8 sps:$4 sm:$0xff]  }
 0x935   :  { %12895 = vmatprep.mubr.bf16.mxu1 %v20380_v3  ;;  %v17336_v3 = vld [vmem:[#allocation10 + $0x824] ss:$8 sps:$4 sm:$0xff]  }
 0x93c   :  { %12896 = vmatmul.mubr.bf16.gmra.mrb[60].mxu1 %v20389_v9  ;;  %v21828_v9 = vpack.c.bf16 %v21766_v56, %v21761_v24  ;;  %v17345_v24 = vld [vmem:[#allocation10 + $0x854] ss:$8 sps:$4 sm:$0xff]  }
 0x93d   :  { %13403 = vmatprep.mubr.bf16.mxu1 %v13147_v54  ;;  %v17339_v54 = vld [vmem:[#allocation10 + $0x834] ss:$8 sps:$4 sm:$0xff]  }
 0x944   :  { %13404 = vmatmul.mubr.bf16.vlgmr.msra.gmra.mrb[0].mxu1 %v21826_v49  ;;  %v11976_v49 = vld [vmem:[#allocation2 + $0x100] sm:$0xfc] }
 0x945   :  { %13413 = vmatprep.mubr.bf16.mxu1 %v21827_v62  ;;  %14006 = vmatpush1.bf16.msra.mxu1 %v17328_v35  ;;  %v17342_v35 = vld [vmem:[#allocation10 + $0x844] ss:$8 sps:$4 sm:$0xff]   ;;  %v17340_v62 = vld [vmem:[#allocation10 + $0x840] ss:$8 sps:$4 sm:$0xff]  }
 0x946   :  { %14007 = vmatprep.subr.bf16.mxu1 %v17333_v13  ;;  %v20407_v13 = vsel %vm5122_vm1, %v13117_v0, %v13118_v15  ;;  %v17354_v0 = vld [vmem:[#allocation10 + $0x884] ss:$8 sps:$4 sm:$0xff]   ;;  %v17352_v15 = vld [vmem:[#allocation10 + $0x880] ss:$8 sps:$4 sm:$0xff]  }
 0x947   :  { %v13153_v56 = vpack.c.bf16 %v20407_v13, %v20252_v10  ;;  %v17351_v10 = vld [vmem:[#allocation10 + $0x874] ss:$8 sps:$4 sm:$0xff]  }
 0x949   :  { %14008 = vmatpush1.bf16.msra.mxu1 %v17331_v28 }
 0x94a   :  { %14009 = vmatprep.subr.bf16.mxu1 %v17336_v3  ;;  %v11978_v3 = vld [vmem:[#allocation2 + $0x110] sm:$0x3] }
 0x94b   :  { %v13115_v28 = vrot.slane %v11978_v3, 2  ;;  %v17358_v3 = vld [vmem:[#allocation10 + $0x8a0] ss:$8 sps:$4 sm:$0xff]  }
 0x94c   :  { %13414 = vmatmul.mubr.bf16.gmra.mrb[4].mxu1 %v21828_v9  ;;  %v13114_v9 = vrot.slane %v11976_v49, 2  ;;  %v12019_v49 = vld [vmem:[#allocation2 + $0x258] sm:$0x3] }
 0x94d   :  { %13423 = vmatprep.mubr.bf16.mxu1 %v21829_v41  ;;  %14010 = vmatpush1.bf16.msra.mxu1 %v17334_v48  ;;  %v17343_v48 = vld [vmem:[#allocation10 + $0x850] ss:$8 sps:$4 sm:$0xff]   ;;  %v17357_v41 = vld [vmem:[#allocation10 + $0x894] ss:$8 sps:$4 sm:$0xff]  }
 0x94e   :  { %14011 = vmatprep.subr.bf16.mxu1 %v17339_v54  ;;  %v20415_v60 = vsel %vm5122_vm1, %v13114_v9, %v13115_v28  ;;  %v12016_v28 = vld [vmem:[#allocation2 + $0x240] sm:$0xfc] }
 0x94f   :  { %v13152_v54 = vpack.c.bf16 %v20415_v60, %v20265_v44  ;;  %v21833_v44 = vpack.c.bf16 %v21781_v58, %v21776_v46  ;;  %v21835_v46 = vpack.c.bf16 %v21787_v57, %v21782_v7  ;;  %v17361_v58 = vld [vmem:[#allocation10 + $0x8b0] ss:$8 sps:$4 sm:$0xff]   ;;  %v21836_v7 = vpack.c.bf16 %v21789_v25, %v21785_v45 }
 0x950   :  { %v17367_v57 = vld [vmem:[#allocation10 + $0x8d0] ss:$8 sps:$4 sm:$0xff]   ;;  %v21837_v45 = vpack.c.bf16 %v21793_v30, %v21791_v32 }
 0x951   :  { %14012 = vmatpush1.bf16.msra.mxu1 %v17337_v40  ;;  %v21832_v40 = vpack.c.bf16 %v21778_v2, %v21774_v17  ;;  %v13123_v17 = vrot.slane %v12017_v22, 2  ;;  %v13124_v2 = vrot.slane %v12019_v49, 2  ;;  %v17373_v25 = vld [vmem:[#allocation10 + $0x8f0] ss:$8 sps:$4 sm:$0xff]   ;;  %v12099_v22 = vld [vmem:[#allocation2 + $0x4d8] sm:$0x3] }
 0x952   :  { %14013 = vmatprep.subr.bf16.mxu1 %v17342_v35  ;;  %v17355_v35 = vld [vmem:[#allocation10 + $0x890] ss:$8 sps:$4 sm:$0xff]  }
 0x953   :  { %v20435_v9 = vsel %vm5122_vm1, %v13123_v17, %v13124_v2  ;;  %v21846_v49 = vld [vmem:[#allocation152_spill] sm:$0xff] }
 0x954   :  { %13424 = vmatmul.mubr.bf16.gmra.mrb[8].mxu1 %v21830_v63  ;;  %v12018_v63 = vld [vmem:[#allocation2 + $0x250] sm:$0x3] }
 0x955   :  { %13433 = vmatprep.mubr.bf16.mxu1 %v13153_v56  ;;  %14014 = vmatpush1.bf16.msra.mxu1 %v17340_v62  ;;  %v17363_v62 = vld [vmem:[#allocation10 + $0x8b4] ss:$8 sps:$4 sm:$0xff]   ;;  %v17366_v56 = vld [vmem:[#allocation10 + $0x8c4] ss:$8 sps:$4 sm:$0xff]  }
 0x956   :  { %14015 = vmatprep.subr.bf16.mxu1 %v17345_v24  ;;  %v21834_v24 = vpack.c.bf16 %v21784_v6, %v21779_v33  ;;  %v17369_v33 = vld [vmem:[#allocation10 + $0x8d4] ss:$8 sps:$4 sm:$0xff]   ;;  %v13161_v6 = vpack.c.bf16 %v20435_v9, %v20292_v55 }
 0x957   :  { %v17375_v55 = vld [vmem:[#allocation10 + $0x8f4] ss:$8 sps:$4 sm:$0xff]  }
 0x959   :  { %14016 = vmatpush1.bf16.msra.mxu1 %v17343_v48  ;;  %v17364_v48 = vld [vmem:[#allocation10 + $0x8c0] ss:$8 sps:$4 sm:$0xff]  }
 0x95a   :  { %14017 = vmatprep.subr.bf16.mxu1 %v17348_v36  ;;  %v13120_v36 = vrot.slane %v12016_v28, 2  ;;  %v11983_v28 = vld [vmem:[#allocation2 + $0x138] sm:$0x3] }
 0x95c   :  { %13434 = vmatmul.mubr.bf16.gmra.mrb[12].mxu1 %v13152_v54  ;;  %v17372_v54 = vld [vmem:[#allocation10 + $0x8e4] ss:$8 sps:$4 sm:$0xff]  }
 0x95d   :  { %13443 = vmatprep.mubr.bf16.mxu1 %v21831_v61  ;;  %14018 = vmatpush1.bf16.msra.mxu1 %v17346_v26  ;;  %v13121_v26 = vrot.slane %v12018_v63, 2  ;;  %v17370_v61 = vld [vmem:[#allocation10 + $0x8e0] ss:$8 sps:$4 sm:$0xff]  }
 0x95e   :  { %14019 = vmatprep.subr.bf16.mxu1 %v17351_v10  ;;  %v21854_v63 = vld [vmem:[#allocation30_spill] sm:$0xff] }
 0x95f   :  { %v20443_v10 = vsel %vm5122_vm1, %v13120_v36, %v13121_v26  ;;  %v11982_v36 = vld [vmem:[#allocation2 + $0x130] sm:$0x3] }
 0x961   :  { %14020 = vmatpush1.bf16.msra.mxu1 %v17349_v39  ;;  %v13160_v39 = vpack.c.bf16 %v20443_v10, %v20305_v5  ;;  %v12057_v5 = vld [vmem:[#allocation2 + $0x388] sm:$0xfc] }
 0x962   :  { %14021 = vmatprep.subr.bf16.mxu1 %v17354_v0  ;;  %v21838_v0 = vpack.c.bf16 %v21796_v23, %v21792_v19  ;;  %v13129_v32 = vrot.slane %v12057_v5, 2  ;;  %v12056_v19 = vld [vmem:[#allocation2 + $0x380] sm:$0xfc]  ;;  %v12058_v23 = vld [vmem:[#allocation2 + $0x390] sm:$0x3] }
 0x964   :  { %13444 = vmatmul.mubr.bf16.gmra.mrb[16].mxu1 %v21832_v40  ;;  %v21840_v40 = vpack.c.bf16 %v21802_v38, %v21797_v59  ;;  %v21842_v59 = vpack.c.bf16 %v21807_v29, %v21803_v4  ;;  %v21845_v29 = vpack.c.bf16 %v21816_v21, %v21812_v1  ;;  %v12097_v4 = vld [vmem:[#allocation2 + $0x4c8] sm:$0xfc] }
 0x965   :  { %13453 = vmatprep.mubr.bf16.mxu1 %v21833_v44  ;;  %14022 = vmatpush1.bf16.msra.mxu1 %v17352_v15  ;;  %v21839_v15 = vpack.c.bf16 %v21799_v16, %v21794_v50  ;;  %v21841_v44 = vpack.c.bf16 %v21805_v18, %v21800_v14  ;;  %v13126_v16 = vrot.slane %v12056_v19, 2  ;;  %v21843_v18 = vpack.c.bf16 %v21811_v8, %v21809_v43 }
 0x966   :  { %14023 = vmatprep.subr.bf16.mxu1 %v17357_v41  ;;  %v12059_v41 = vld [vmem:[#allocation2 + $0x398] sm:$0x3] }
 0x967   :  { %v13130_v30 = vrot.slane %v12059_v41, 2  ;;  %v21861_v41 = vld [vmem:[#allocation60_spill] sm:$0xff] }
 0x969   :  { %14024 = vmatpush1.bf16.msra.mxu1 %v17355_v35  ;;  %v20463_v35 = vsel %vm5122_vm1, %v13129_v32, %v13130_v30  ;;  %v12020_v32 = vld [vmem:[#allocation2 + $0x260] sm:$0xfc]  ;;  %v12022_v30 = vld [vmem:[#allocation2 + $0x270] sm:$0x3] }
 0x96a   :  { %14025 = vmatprep.subr.bf16.mxu1 %v17360_v53  ;;  %v13169_v50 = vpack.c.bf16 %v20463_v35, %v20332_v34  ;;  %v13127_v53 = vrot.slane %v12058_v23, 2  ;;  %v21844_v34 = vpack.c.bf16 %v21814_v31, %v21810_v11  ;;  %v12096_v31 = vld [vmem:[#allocation2 + $0x4c0] sm:$0xfc]  ;;  %v12098_v11 = vld [vmem:[#allocation2 + $0x4d0] sm:$0x3]  ;;  %v13779_v19 = vrot.slane %v12022_v30, 2 }
 0x96b   :  { %v13132_v21 = vrot.slane %v12096_v31, 2  ;;  %v13133_v17 = vrot.slane %v12098_v11, 2  ;;  %v21862_v23 = vld [vmem:[#allocation72_spill] sm:$0xff] }
 0x96c   :  { %13454 = vmatmul.mubr.bf16.gmra.mrb[20].mxu1 %v21834_v24  ;;  %v20471_v38 = vsel %vm5122_vm1, %v13126_v16, %v13127_v53  ;;  %v21848_v24 = vld [vmem:[#allocation154_spill] sm:$0xff] }
 0x96d   :  { %13463 = vmatprep.mubr.bf16.mxu1 %v21835_v46  ;;  %14026 = vmatpush1.bf16.msra.mxu1 %v17358_v3  ;;  %v13168_v14 = vpack.c.bf16 %v20471_v38, %v20345_v37  ;;  %v21847_v3 = vpack.c.bf16 %v21819_v47, %v21846_v49  ;;  %v13135_v37 = vrot.slane %v12097_v4, 2  ;;  %v21849_v43 = vpack.c.bf16 %v21822_v52, %v21848_v24  ;;  %v21851_v46 = vld [vmem:[#allocation40_spill] sm:$0xff]  ;;  %v21863_v53 = vld [vmem:[#allocation70_spill] sm:$0xff] }
 0x96e   :  { %14027 = vmatprep.subr.bf16.mxu1 %v17363_v62  ;;  %v13136_v62 = vrot.slane %v12099_v22, 2  ;;  %v21850_v47 = vpack.c.bf16 %v21824_v20, %v21820_v12  ;;  %v20499_v2 = vsel %vm5122_vm1, %v13132_v21, %v13133_v17  ;;  %v13776_v20 = vrot.slane %v11983_v28, 2  ;;  %v21867_v22 = vld [vmem:[#allocation92_spill] sm:$0xff]  ;;  %v21870_v21 = vld [vmem:[#allocation113_spill] sm:$0xff]  ;;  %v12101_v17 = vld [vmem:[#allocation2 + $0x4e8] sm:$0xfc] }
 0x96f   :  { %v13176_v52 = vpack.c.bf16 %v20499_v2, %v20385_v51  ;;  %v12102_v28 = vld [vmem:[#allocation2 + $0x4f0] sm:$0x3] }
 0x970   :  { %v20491_v8 = vsel %vm5122_vm1, %v13135_v37, %v13136_v62  ;;  %v12062_v37 = vld [vmem:[#allocation2 + $0x3b0] sm:$0x3] }
 0x971   :  { %14028 = vmatpush1.bf16.msra.mxu1 %v17361_v58  ;;  %v13177_v1 = vpack.c.bf16 %v20491_v8, %v20372_v42  ;;  %v21852_v58 = vld [vmem:[#allocation21_spill] sm:$0xff]  ;;  %v11981_v42 = vld [vmem:[#allocation2 + $0x128] sm:$0xfc]  ;;  %v13785_v24 = vrot.slane %v12062_v37, 2 }
 0x972   :  { %14029 = vmatprep.subr.bf16.mxu1 %v17366_v56  ;;  %v21853_v56 = vld [vmem:[#allocation22_spill] sm:$0xff]  ;;  %v13775_v12 = vrot.slane %v11981_v42, 2 }
 0x973   :  { %v12100_v42 = vld [vmem:[#allocation2 + $0x4e0] sm:$0xfc] }
 0x974   :  { %13464 = vmatmul.mubr.bf16.gmra.mrb[24].mxu1 %v21836_v7  ;;  %v13773_v7 = vrot.slane %v11982_v36, 2 }
 0x975   :  { %13473 = vmatprep.mubr.bf16.mxu1 %v13161_v6  ;;  %14030 = vmatpush1.bf16.msra.mxu1 %v17364_v48  ;;  %v21855_v48 = vld [vmem:[#allocation28_spill] sm:$0xff]  ;;  %v11980_v6 = vld [vmem:[#allocation2 + $0x120] sm:$0xfc] }
 0x976   :  { %14031 = vmatprep.subr.bf16.mxu1 %v17369_v33  ;;  %v13777_v33 = vsel %vm5122_vm1, %v13775_v12, %v13776_v20  ;;  %v13772_v26 = vrot.slane %v11980_v6, 2  ;;  %v13791_v12 = vrot.slane %v12102_v28, 2  ;;  %v21873_v20 = vld [vmem:[#allocation32_spill] sm:$0xff]  ;;  %v21874_v6 = vld [vmem:[#allocation26_spill] sm:$0xff] }
 0x977   :  { %v13805_v51 = vpack.c.bf16 %v13777_v33, %v20407_v13  ;;  %v14454_v33 = vld [vmem:[#allocation12] sm:$0x3]  ;;  %v21875_v36 = vsub.s32 0, %v21874_v6 }
 0x979   :  { %14032 = vmatpush1.bf16.msra.mxu1 %v17367_v57  ;;  %v21856_v57 = vld [vmem:[#allocation48_spill] sm:$0xff] }
 0x97a   :  { %14033 = vmatprep.subr.bf16.mxu1 %v17372_v54  ;;  %v13774_v54 = vsel %vm5122_vm1, %v13772_v26, %v13773_v7  ;;  %v21876_v26 = vsub.s32 1, %v21874_v6 }
 0x97c   :  { %13474 = vmatmul.mubr.bf16.gmra.mrb[28].mxu1 %v13160_v39  ;;  %v21857_v39 = vld [vmem:[#allocation47_spill] sm:$0xff]  ;;  %v20549_v7 = vrot.slane %v14454_v33, %v21876_v26 }
 0x97d   :  { %13483 = vmatprep.mubr.bf16.mxu1 %v21837_v45  ;;  %14034 = vmatpush1.bf16.msra.mxu1 %v17370_v61  ;;  %v13804_v61 = vpack.c.bf16 %v13774_v54, %v20415_v60  ;;  %v21859_v45 = vld [vmem:[#allocation54_spill] sm:$0xff] }
 0x97e   :  { %14035 = vmatprep.subr.bf16.mxu1 %v17375_v55  ;;  %v21858_v55 = vld [vmem:[#allocation53_spill] sm:$0xff] }
 0x981   :  { %14036 = vmatpush1.bf16.msra.mxu1 %v17373_v25  ;;  %v12021_v25 = vld [vmem:[#allocation2 + $0x268] sm:$0xfc] }
 0x982   :  { %v13781_v13 = vrot.slane %v12021_v25, 2 }
 0x984   :  { %13484 = vmatmul.mubr.bf16.gmra.mrb[32].mxu1 %v21838_v0  ;;  %v12023_v0 = vld [vmem:[#allocation2 + $0x278] sm:$0x3] }
 0x985   :  { %13493 = vmatprep.mubr.bf16.mxu1 %v21839_v15  ;;  %v21860_v15 = vld [vmem:[#allocation61_spill] sm:$0xff]  ;;  %v13782_v5 = vrot.slane %v12023_v0, 2 }
 0x98c   :  { %13494 = vmatmul.mubr.bf16.gmra.mrb[36].mxu1 %v21840_v40  ;;  %v13783_v40 = vsel %vm5122_vm1, %v13781_v13, %v13782_v5 }
 0x98d   :  { %13503 = vmatprep.mubr.bf16.mxu1 %v21841_v44  ;;  %v13807_v60 = vpack.c.bf16 %v13783_v40, %v20435_v9  ;;  %v13778_v44 = vrot.slane %v12020_v32, 2 }
 0x994   :  { %13504 = vmatmul.mubr.bf16.gmra.mrb[40].mxu1 %v21842_v59  ;;  %v21864_v59 = vld [vmem:[#allocation80_spill] sm:$0xff] }
 0x995   :  { %13513 = vmatprep.mubr.bf16.mxu1 %v13169_v50  ;;  %v13780_v50 = vsel %vm5122_vm1, %v13778_v44, %v13779_v19 }
 0x996   :  { %v13806_v16 = vpack.c.bf16 %v13780_v50, %v20443_v10 }
 0x99c   :  { %13514 = vmatmul.mubr.bf16.gmra.mrb[44].mxu1 %v13168_v14  ;;  %v21865_v14 = vld [vmem:[#allocation81_spill] sm:$0xff] }
 0x99d   :  { %13523 = vmatprep.mubr.bf16.mxu1 %v21843_v18  ;;  %v12061_v18 = vld [vmem:[#allocation2 + $0x3a8] sm:$0xfc] }
 0x99e   :  { %v13787_v9 = vrot.slane %v12061_v18, 2 }
 0x9a4   :  { %13524 = vmatmul.mubr.bf16.gmra.mrb[48].mxu1 %v21844_v34  ;;  %v12063_v34 = vld [vmem:[#allocation2 + $0x3b8] sm:$0x3] }
 0x9a5   :  { %13533 = vmatprep.mubr.bf16.mxu1 %v21845_v29  ;;  %v21866_v29 = vld [vmem:[#allocation93_spill] sm:$0xff]  ;;  %v13788_v4 = vrot.slane %v12063_v34, 2 }
 0x9a7   :  { %v13789_v49 = vsel %vm5122_vm1, %v13787_v9, %v13788_v4 }
 0x9a8   :  { %v13809_v10 = vpack.c.bf16 %v13789_v49, %v20463_v35  ;;  %v13793_v35 = vrot.slane %v12101_v17, 2 }
 0x9ac   :  { %13534 = vmatmul.mubr.bf16.gmra.mrb[52].mxu1 %v21847_v3  ;;  %v12060_v3 = vld [vmem:[#allocation2 + $0x3a0] sm:$0xfc] }
 0x9ad   :  { %13543 = vmatprep.mubr.bf16.mxu1 %v21849_v43  ;;  %v13784_v62 = vrot.slane %v12060_v3, 2  ;;  %v21868_v43 = vld [vmem:[#allocation103_spill] sm:$0xff] }
 0x9af   :  { %v13786_v31 = vsel %vm5122_vm1, %v13784_v62, %v13785_v24 }
 0x9b0   :  { %v13808_v11 = vpack.c.bf16 %v13786_v31, %v20471_v38 }
 0x9b4   :  { %13544 = vmatmul.mubr.bf16.gmra.mrb[56].mxu1 %v21850_v47  ;;  %v12103_v47 = vld [vmem:[#allocation2 + $0x4f8] sm:$0x3] }
 0x9b5   :  { %13553 = vmatprep.mubr.bf16.mxu1 %v13177_v1  ;;  %v21869_v1 = vld [vmem:[#allocation102_spill] sm:$0xff] }
 0x9bc   :  { %13554 = vmatmul.mubr.bf16.gmra.mrb[60].mxu1 %v13176_v52  ;;  %v21871_v52 = vld [vmem:[#allocation115_spill] sm:$0xff] }
 0x9bd   :  { %14037 = vmatprep.mubr.bf16.mxu1 %v21851_v46  ;;  %v13794_v46 = vrot.slane %v12103_v47, 2 }
 0x9c4   :  { %14038 = vmatmul.mubr.bf16.vlgmr.msra.gmra.mrb[0].mxu1 %v21852_v58  ;;  %v21872_v58 = vld [vmem:[#allocation29_spill] sm:$0xff] }
 0x9c5   :  { %14047 = vmatprep.mubr.bf16.mxu1 %v21853_v56  ;;  %v13795_v56 = vsel %vm5122_vm1, %v13793_v35, %v13794_v46 }
 0x9c6   :  { %v13811_v38 = vpack.c.bf16 %v13795_v56, %v20491_v8 }
 0x9cc   :  { %14048 = vmatmul.mubr.bf16.gmra.mrb[4].mxu1 %v21854_v63  ;;  %v13790_v63 = vrot.slane %v12100_v42, 2 }
 0x9cd   :  { %14057 = vmatprep.mubr.bf16.mxu1 %v21855_v48 }
 0x9d4   :  { %14058 = vmatmul.mubr.bf16.gmra.mrb[8].mxu1 %v21856_v57 }
 0x9d5   :  { %14067 = vmatprep.mubr.bf16.mxu1 %v13805_v51  ;;  %v20545_v51 = vrot.slane %v14454_v33, %v21875_v36 }
 0x9dc   :  { %14068 = vmatmul.mubr.bf16.gmra.mrb[12].mxu1 %v13804_v61 }
 0x9dd   :  { %14077 = vmatprep.mubr.bf16.mxu1 %v21857_v39 }
 0x9e4   :  { %14078 = vmatmul.mubr.bf16.gmra.mrb[16].mxu1 %v21858_v55 }
 0x9e5   :  { %14087 = vmatprep.mubr.bf16.mxu1 %v21859_v45 }
 0x9ec   :  { %14088 = vmatmul.mubr.bf16.gmra.mrb[20].mxu1 %v21860_v15 }
 0x9ed   :  { %14097 = vmatprep.mubr.bf16.mxu1 %v21861_v41 }
 0x9f4   :  { %14098 = vmatmul.mubr.bf16.gmra.mrb[24].mxu1 %v21862_v23 }
 0x9f5   :  { %14107 = vmatprep.mubr.bf16.mxu1 %v13807_v60 }
 0x9fc   :  { %14108 = vmatmul.mubr.bf16.gmra.mrb[28].mxu1 %v13806_v16 }
 0x9fd   :  { %14117 = vmatprep.mubr.bf16.mxu1 %v21863_v53 }
 0xa04   :  { %14118 = vmatmul.mubr.bf16.gmra.mrb[32].mxu1 %v21864_v59 }
 0xa05   :  { %14127 = vmatprep.mubr.bf16.mxu1 %v21865_v14 }
 0xa0c   :  { %14128 = vmatmul.mubr.bf16.gmra.mrb[36].mxu1 %v21866_v29 }
 0xa0d   :  { %14137 = vmatprep.mubr.bf16.mxu1 %v21867_v22 }
 0xa14   :  { %14138 = vmatmul.mubr.bf16.gmra.mrb[40].mxu1 %v21868_v43 }
 0xa15   :  { %14147 = vmatprep.mubr.bf16.mxu1 %v13809_v10 }
 0xa1c   :  { %14148 = vmatmul.mubr.bf16.gmra.mrb[44].mxu1 %v13808_v11 }
 0xa1d   :  { %14157 = vmatprep.mubr.bf16.mxu1 %v21869_v1 }
 0xa24   :  { %14158 = vmatmul.mubr.bf16.gmra.mrb[48].mxu1 %v20363_v27  ;;  %v13792_v27 = vsel %vm5122_vm1, %v13790_v63, %v13791_v12 }
 0xa25   :  { %14167 = vmatprep.mubr.bf16.mxu1 %v21870_v21  ;;  %v13810_v48 = vpack.c.bf16 %v13792_v27, %v20499_v2 }
 0xa2c   :  { %14168 = vmatmul.mubr.bf16.gmra.mrb[52].mxu1 %v21871_v52 }
 0xa2d   :  { %14177 = vmatprep.mubr.bf16.mxu1 %v21872_v58 }
 0xa34   :  { %14178 = vmatmul.mubr.bf16.gmra.mrb[56].mxu1 %v21873_v20 }
 0xa35   :  { %14187 = vmatprep.mubr.bf16.mxu1 %v13811_v38 }
 0xa3c   :  { %14188 = vmatmul.mubr.bf16.gmra.mrb[60].mxu1 %v13810_v48 }
 0xa97   :  { %v14039_v8 = vpop.f32.mrb[0].mxu1 }
 0xa98   :  { %v20552_v57 = vadd.f32 %v20545_v51, %v14039_v8  ;;  %v14041_v54 = vpop.f32.mrb[1].mxu1 }
 0xa99   :  { %v20555_v61 = vadd.f32 %v20549_v7, %v14041_v54  ;;  %v14043_v39 = vpop.f32.mrb[2].mxu1 }
 0xa9a   :  { %v20558_v2 = vadd.f32 %v20545_v51, %v14043_v39  ;;  %v14045_v55 = vpop.f32.mrb[3].mxu1  ;;  %v14530_v45 = vmul.f32 %v20552_v57, %v20552_v57 }
 0xa9b   :  { %v20563_v25 = vadd.f32 %v20549_v7, %v14045_v55  ;;  %v14531_v0 = vmul.f32 %v20555_v61, %v20555_v61 }
 0xa9c   :  { %v14532_v15 = vmul.f32 %v20558_v2, %v20558_v2 }
 0xa9d   :  { %v14533_v13 = vmul.f32 %v20563_v25, %v20563_v25  ;;  %v14594_v5 = vadd.f32 %v14531_v0, %v14530_v45 }
 0xa9f   :  { %14595 = vadd.xlane.f32.xlu0 %v14594_v5  ;;  %v14049_v41 = vpop.f32.mrb[4].mxu1  ;;  %v14597_v44 = vadd.f32 %v14533_v13, %v14532_v15 }
 0xaa0   :  { %v20572_v40 = vadd.f32 %v20545_v51, %v14049_v41  ;;  %v14051_v32 = vpop.f32.mrb[5].mxu1 }
 0xaa1   :  { %v20575_v30 = vadd.f32 %v20549_v7, %v14051_v32  ;;  %v14053_v60 = vpop.f32.mrb[6].mxu1 }
 0xaa2   :  { %v20578_v19 = vadd.f32 %v20545_v51, %v14053_v60  ;;  %v14055_v23 = vpop.f32.mrb[7].mxu1  ;;  %v14534_v50 = vmul.f32 %v20572_v40, %v20572_v40 }
 0xaa3   :  { %v20583_v16 = vadd.f32 %v20549_v7, %v14055_v23  ;;  %14598 = vadd.xlane.f32.xlu0 %v14597_v44  ;;  %v14535_v53 = vmul.f32 %v20575_v30, %v20575_v30 }
 0xaa4   :  { %v14536_v59 = vmul.f32 %v20578_v19, %v20578_v19 }
 0xaa5   :  { %v14537_v14 = vmul.f32 %v20583_v16, %v20583_v16  ;;  %v14600_v18 = vadd.f32 %v14535_v53, %v14534_v50 }
 0xaa7   :  { %14601 = vadd.xlane.f32.xlu1 %v14600_v18  ;;  %v14059_v34 = vpop.f32.mrb[8].mxu1  ;;  %v14603_v49 = vadd.f32 %v14537_v14, %v14536_v59 }
 0xaa8   :  { %v20592_v29 = vadd.f32 %v20545_v51, %v14059_v34  ;;  %v14061_v9 = vpop.f32.mrb[9].mxu1 }
 0xaa9   :  { %v20595_v4 = vadd.f32 %v20549_v7, %v14061_v9  ;;  %v14063_v22 = vpop.f32.mrb[10].mxu1 }
 0xaaa   :  { %v14538_v3 = vmul.f32 %v20592_v29, %v20592_v29  ;;  %v20600_v37 = vadd.f32 %v20545_v51, %v14063_v22  ;;  %v14065_v10 = vpop.f32.mrb[11].mxu1 }
 0xaab   :  { %v14539_v62 = vmul.f32 %v20595_v4, %v20595_v4  ;;  %v20605_v24 = vadd.f32 %v20549_v7, %v14065_v10  ;;  %14604 = vadd.xlane.f32.xlu1 %v14603_v49 }
 0xaac   :  { %v14540_v43 = vmul.f32 %v20600_v37, %v20600_v37 }
 0xaad   :  { %v14541_v31 = vmul.f32 %v20605_v24, %v20605_v24  ;;  %v14606_v11 = vadd.f32 %v14539_v62, %v14538_v3 }
 0xaaf   :  { %14607 = vadd.xlane.f32.xlu0 %v14606_v11  ;;  %v14069_v1 = vpop.f32.mrb[12].mxu1  ;;  %v14609_v21 = vadd.f32 %v14541_v31, %v14540_v43 }
 0xab0   :  { %v20612_v17 = vadd.f32 %v20545_v51, %v14069_v1  ;;  %v14071_v47 = vpop.f32.mrb[13].mxu1 }
 0xab1   :  { %v20615_v52 = vadd.f32 %v20549_v7, %v14071_v47  ;;  %14610 = vadd.xlane.f32.xlu1 %v14609_v21  ;;  %v14073_v35 = vpop.f32.mrb[14].mxu1 }
 0xab2   :  { %v14542_v46 = vmul.f32 %v20612_v17, %v20612_v17  ;;  %v20620_v58 = vadd.f32 %v20545_v51, %v14073_v35  ;;  %v14075_v56 = vpop.f32.mrb[15].mxu1 }
 0xab3   :  { %v14543_v42 = vmul.f32 %v20615_v52, %v20615_v52  ;;  %v20625_v28 = vadd.f32 %v20549_v7, %v14075_v56 }
 0xab4   :  { %v14544_v38 = vmul.f32 %v20620_v58, %v20620_v58 }
 0xab5   :  { %v14545_v63 = vmul.f32 %v20625_v28, %v20625_v28  ;;  %v14612_v12 = vadd.f32 %v14543_v42, %v14542_v46 }
 0xab7   :  { %14613 = vadd.xlane.f32.xlu0 %v14612_v12  ;;  %v14079_v20 = vpop.f32.mrb[16].mxu1  ;;  %v14615_v27 = vadd.f32 %v14545_v63, %v14544_v38 }
 0xab8   :  { %v20632_v48 = vadd.f32 %v20545_v51, %v14079_v20  ;;  %v14081_v33 = vpop.f32.mrb[17].mxu1 }
 0xab9   :  { %v20635_v6 = vadd.f32 %v20549_v7, %v14081_v33  ;;  %14616 = vadd.xlane.f32.xlu1 %v14615_v27  ;;  %v14083_v36 = vpop.f32.mrb[18].mxu1 }
 0xaba   :  { %v14546_v26 = vmul.f32 %v20632_v48, %v20632_v48  ;;  %v20640_v8 = vadd.f32 %v20545_v51, %v14083_v36  ;;  %v14085_v54 = vpop.f32.mrb[19].mxu1 }
 0xabb   :  { %v14547_v39 = vmul.f32 %v20635_v6, %v20635_v6  ;;  %v20645_v55 = vadd.f32 %v20549_v7, %v14085_v54 }
 0xabc   :  { %v14548_v45 = vmul.f32 %v20640_v8, %v20640_v8 }
 0xabd   :  { %v14549_v0 = vmul.f32 %v20645_v55, %v20645_v55  ;;  %v14618_v15 = vadd.f32 %v14547_v39, %v14546_v26 }
 0xabf   :  { %14619 = vadd.xlane.f32.xlu0 %v14618_v15  ;;  %v14089_v13 = vpop.f32.mrb[20].mxu1  ;;  %v14621_v5 = vadd.f32 %v14549_v0, %v14548_v45 }
 0xac0   :  { %v20652_v41 = vadd.f32 %v20545_v51, %v14089_v13  ;;  %v14091_v32 = vpop.f32.mrb[21].mxu1 }
 0xac1   :  { %v20655_v60 = vadd.f32 %v20549_v7, %v14091_v32  ;;  %14622 = vadd.xlane.f32.xlu1 %v14621_v5  ;;  %v14093_v44 = vpop.f32.mrb[22].mxu1 }
 0xac2   :  { %v14550_v23 = vmul.f32 %v20652_v41, %v20652_v41  ;;  %v20660_v50 = vadd.f32 %v20545_v51, %v14093_v44  ;;  %v14095_v53 = vpop.f32.mrb[23].mxu1 }
 0xac3   :  { %v14551_v59 = vmul.f32 %v20655_v60, %v20655_v60  ;;  %v20665_v14 = vadd.f32 %v20549_v7, %v14095_v53 }
 0xac4   :  { %v14552_v18 = vmul.f32 %v20660_v50, %v20660_v50 }
 0xac5   :  { %v14553_v34 = vmul.f32 %v20665_v14, %v20665_v14  ;;  %v14624_v9 = vadd.f32 %v14551_v59, %v14550_v23 }
 0xac7   :  { %14625 = vadd.xlane.f32.xlu0 %v14624_v9  ;;  %v14099_v22 = vpop.f32.mrb[24].mxu1  ;;  %v14627_v49 = vadd.f32 %v14553_v34, %v14552_v18 }
 0xac8   :  { %v20672_v3 = vadd.f32 %v20545_v51, %v14099_v22  ;;  %v14101_v10 = vpop.f32.mrb[25].mxu1 }
 0xac9   :  { %v20675_v62 = vadd.f32 %v20549_v7, %v14101_v10  ;;  %14628 = vadd.xlane.f32.xlu1 %v14627_v49  ;;  %v14103_v43 = vpop.f32.mrb[26].mxu1 }
 0xaca   :  { %v14554_v31 = vmul.f32 %v20672_v3, %v20672_v3  ;;  %v20680_v11 = vadd.f32 %v20545_v51, %v14103_v43  ;;  %v14105_v1 = vpop.f32.mrb[27].mxu1 }
 0xacb   :  { %v14555_v21 = vmul.f32 %v20675_v62, %v20675_v62  ;;  %v20685_v47 = vadd.f32 %v20549_v7, %v14105_v1 }
 0xacc   :  { %v14556_v35 = vmul.f32 %v20680_v11, %v20680_v11 }
 0xacd   :  { %v14557_v46 = vmul.f32 %v20685_v47, %v20685_v47  ;;  %v14630_v56 = vadd.f32 %v14555_v21, %v14554_v31 }
 0xacf   :  { %14631 = vadd.xlane.f32.xlu0 %v14630_v56  ;;  %v14109_v42 = vpop.f32.mrb[28].mxu1  ;;  %v14633_v38 = vadd.f32 %v14557_v46, %v14556_v35 }
 0xad0   :  { %v20692_v63 = vadd.f32 %v20545_v51, %v14109_v42  ;;  %v14111_v12 = vpop.f32.mrb[29].mxu1 }
 0xad1   :  { %v20695_v20 = vadd.f32 %v20549_v7, %v14111_v12  ;;  %14634 = vadd.xlane.f32.xlu1 %v14633_v38  ;;  %v14113_v27 = vpop.f32.mrb[30].mxu1 }
 0xad2   :  { %v14558_v33 = vmul.f32 %v20692_v63, %v20692_v63  ;;  %v20700_v36 = vadd.f32 %v20545_v51, %v14113_v27  ;;  %v14115_v26 = vpop.f32.mrb[31].mxu1 }
 0xad3   :  { %v14559_v54 = vmul.f32 %v20695_v20, %v20695_v20  ;;  %v20705_v39 = vadd.f32 %v20549_v7, %v14115_v26 }
 0xad4   :  { %v14560_v45 = vmul.f32 %v20700_v36, %v20700_v36 }
 0xad5   :  { %v14561_v0 = vmul.f32 %v20705_v39, %v20705_v39  ;;  %v14636_v15 = vadd.f32 %v14559_v54, %v14558_v33 }
 0xad7   :  { %14637 = vadd.xlane.f32.xlu0 %v14636_v15  ;;  %v14119_v13 = vpop.f32.mrb[32].mxu1  ;;  %v14639_v5 = vadd.f32 %v14561_v0, %v14560_v45 }
 0xad8   :  { %v20712_v32 = vadd.f32 %v20545_v51, %v14119_v13  ;;  %v14121_v44 = vpop.f32.mrb[33].mxu1 }
 0xad9   :  { %v20715_v23 = vadd.f32 %v20549_v7, %v14121_v44  ;;  %14640 = vadd.xlane.f32.xlu1 %v14639_v5  ;;  %v14123_v53 = vpop.f32.mrb[34].mxu1 }
 0xada   :  { %v14562_v59 = vmul.f32 %v20712_v32, %v20712_v32  ;;  %v20720_v18 = vadd.f32 %v20545_v51, %v14123_v53  ;;  %v14125_v34 = vpop.f32.mrb[35].mxu1 }
 0xadb   :  { %v14563_v9 = vmul.f32 %v20715_v23, %v20715_v23  ;;  %v20725_v22 = vadd.f32 %v20549_v7, %v14125_v34 }
 0xadc   :  { %v14564_v49 = vmul.f32 %v20720_v18, %v20720_v18 }
 0xadd   :  { %v14565_v10 = vmul.f32 %v20725_v22, %v20725_v22  ;;  %v14642_v43 = vadd.f32 %v14563_v9, %v14562_v59 }
 0xadf   :  { %14643 = vadd.xlane.f32.xlu0 %v14642_v43  ;;  %v14129_v31 = vpop.f32.mrb[36].mxu1  ;;  %v14645_v1 = vadd.f32 %v14565_v10, %v14564_v49 }
 0xae0   :  { %v20732_v21 = vadd.f32 %v20545_v51, %v14129_v31  ;;  %v14131_v35 = vpop.f32.mrb[37].mxu1 }
 0xae1   :  { %v20735_v46 = vadd.f32 %v20549_v7, %v14131_v35  ;;  %14646 = vadd.xlane.f32.xlu1 %v14645_v1  ;;  %v14133_v56 = vpop.f32.mrb[38].mxu1 }
 0xae2   :  { %v14566_v42 = vmul.f32 %v20732_v21, %v20732_v21  ;;  %v20740_v38 = vadd.f32 %v20545_v51, %v14133_v56  ;;  %v14135_v12 = vpop.f32.mrb[39].mxu1 }
 0xae3   :  { %v14567_v27 = vmul.f32 %v20735_v46, %v20735_v46  ;;  %v20745_v33 = vadd.f32 %v20549_v7, %v14135_v12 }
 0xae4   :  { %v14568_v26 = vmul.f32 %v20740_v38, %v20740_v38 }
 0xae5   :  { %v14569_v54 = vmul.f32 %v20745_v33, %v20745_v33  ;;  %v14648_v45 = vadd.f32 %v14567_v27, %v14566_v42 }
 0xae7   :  { %14649 = vadd.xlane.f32.xlu0 %v14648_v45  ;;  %v14139_v0 = vpop.f32.mrb[40].mxu1  ;;  %v14651_v15 = vadd.f32 %v14569_v54, %v14568_v26 }
 0xae8   :  { %v20752_v13 = vadd.f32 %v20545_v51, %v14139_v0  ;;  %v14141_v5 = vpop.f32.mrb[41].mxu1 }
 0xae9   :  { %v20755_v44 = vadd.f32 %v20549_v7, %v14141_v5  ;;  %14652 = vadd.xlane.f32.xlu1 %v14651_v15  ;;  %v14143_v53 = vpop.f32.mrb[42].mxu1 }
 0xaea   :  { %v14570_v59 = vmul.f32 %v20752_v13, %v20752_v13  ;;  %v20760_v34 = vadd.f32 %v20545_v51, %v14143_v53  ;;  %v14145_v9 = vpop.f32.mrb[43].mxu1 }
 0xaeb   :  { %v14571_v49 = vmul.f32 %v20755_v44, %v20755_v44  ;;  %v20765_v10 = vadd.f32 %v20549_v7, %v14145_v9 }
 0xaec   :  { %v14572_v43 = vmul.f32 %v20760_v34, %v20760_v34 }
 0xaed   :  { %v14573_v31 = vmul.f32 %v20765_v10, %v20765_v10  ;;  %v14654_v1 = vadd.f32 %v14571_v49, %v14570_v59 }
 0xaef   :  { %14655 = vadd.xlane.f32.xlu0 %v14654_v1  ;;  %v14149_v35 = vpop.f32.mrb[44].mxu1  ;;  %v14657_v56 = vadd.f32 %v14573_v31, %v14572_v43 }
 0xaf0   :  { %v20772_v42 = vadd.f32 %v20545_v51, %v14149_v35  ;;  %v14151_v12 = vpop.f32.mrb[45].mxu1 }
 0xaf1   :  { %v20775_v27 = vadd.f32 %v20549_v7, %v14151_v12  ;;  %14658 = vadd.xlane.f32.xlu1 %v14657_v56  ;;  %v14153_v26 = vpop.f32.mrb[46].mxu1 }
 0xaf2   :  { %v14574_v54 = vmul.f32 %v20772_v42, %v20772_v42  ;;  %v20780_v45 = vadd.f32 %v20545_v51, %v14153_v26  ;;  %v14155_v0 = vpop.f32.mrb[47].mxu1 }
 0xaf3   :  { %v14575_v15 = vmul.f32 %v20775_v27, %v20775_v27  ;;  %v20785_v5 = vadd.f32 %v20549_v7, %v14155_v0 }
 0xaf4   :  { %v14576_v53 = vmul.f32 %v20780_v45, %v20780_v45 }
 0xaf5   :  { %21877 = vst [vmem:[#allocation31_spill] sm:$0xff] %v20785_v5  ;;  %v14577_v59 = vmul.f32 %v20785_v5, %v20785_v5  ;;  %v14660_v9 = vadd.f32 %v14575_v15, %v14574_v54 }
 0xaf7   :  { %14661 = vadd.xlane.f32.xlu0 %v14660_v9  ;;  %v14159_v49 = vpop.f32.mrb[48].mxu1  ;;  %v14663_v43 = vadd.f32 %v14577_v59, %v14576_v53 }
 0xaf8   :  { %v20792_v31 = vadd.f32 %v20545_v51, %v14159_v49  ;;  %v14161_v1 = vpop.f32.mrb[49].mxu1 }
 0xaf9   :  { %v20795_v35 = vadd.f32 %v20549_v7, %v14161_v1  ;;  %14664 = vadd.xlane.f32.xlu1 %v14663_v43  ;;  %v14163_v56 = vpop.f32.mrb[50].mxu1 }
 0xafa   :  { %21878 = vst [vmem:[#allocation33_spill] sm:$0xff] %v20792_v31  ;;  %v14578_v12 = vmul.f32 %v20792_v31, %v20792_v31  ;;  %v20800_v26 = vadd.f32 %v20545_v51, %v14163_v56  ;;  %v14165_v0 = vpop.f32.mrb[51].mxu1 }
 0xafb   :  { %21879 = vst [vmem:[#allocation34_spill] sm:$0xff] %v20795_v35  ;;  %v14579_v54 = vmul.f32 %v20795_v35, %v20795_v35  ;;  %v20805_v15 = vadd.f32 %v20549_v7, %v14165_v0 }
 0xafc   :  { %21880 = vst [vmem:[#allocation36_spill] sm:$0xff] %v20800_v26  ;;  %v14580_v53 = vmul.f32 %v20800_v26, %v20800_v26 }
 0xafd   :  { %21881 = vst [vmem:[#allocation39_spill] sm:$0xff] %v20805_v15  ;;  %v14581_v59 = vmul.f32 %v20805_v15, %v20805_v15  ;;  %v14666_v9 = vadd.f32 %v14579_v54, %v14578_v12 }
 0xaff   :  { %14667 = vadd.xlane.f32.xlu0 %v14666_v9  ;;  %v14169_v49 = vpop.f32.mrb[52].mxu1  ;;  %v14669_v43 = vadd.f32 %v14581_v59, %v14580_v53 }
 0xb00   :  { %v20812_v1 = vadd.f32 %v20545_v51, %v14169_v49  ;;  %v14171_v56 = vpop.f32.mrb[53].mxu1 }
 0xb01   :  { %v20815_v31 = vadd.f32 %v20549_v7, %v14171_v56  ;;  %14670 = vadd.xlane.f32.xlu1 %v14669_v43  ;;  %v14173_v0 = vpop.f32.mrb[54].mxu1 }
 0xb02   :  { %21882 = vst [vmem:[#allocation43_spill] sm:$0xff] %v20812_v1  ;;  %v14582_v35 = vmul.f32 %v20812_v1, %v20812_v1  ;;  %v20820_v26 = vadd.f32 %v20545_v51, %v14173_v0  ;;  %v14175_v15 = vpop.f32.mrb[55].mxu1 }
 0xb03   :  { %21883 = vst [vmem:[#allocation38_spill] sm:$0xff] %v20815_v31  ;;  %v14583_v12 = vmul.f32 %v20815_v31, %v20815_v31  ;;  %v20825_v54 = vadd.f32 %v20549_v7, %v14175_v15 }
 0xb04   :  { %21884 = vst [vmem:[#allocation18_spill] sm:$0xff] %v20820_v26  ;;  %v14584_v53 = vmul.f32 %v20820_v26, %v20820_v26 }
 0xb05   :  { %21885 = vst [vmem:[#allocation19_spill] sm:$0xff] %v20825_v54  ;;  %v14585_v59 = vmul.f32 %v20825_v54, %v20825_v54  ;;  %v14672_v9 = vadd.f32 %v14583_v12, %v14582_v35 }
 0xb07   :  { %14673 = vadd.xlane.f32.xlu0 %v14672_v9  ;;  %v14179_v49 = vpop.f32.mrb[56].mxu1  ;;  %v14675_v43 = vadd.f32 %v14585_v59, %v14584_v53 }
 0xb08   :  { %v20832_v56 = vadd.f32 %v20545_v51, %v14179_v49  ;;  %v14181_v0 = vpop.f32.mrb[57].mxu1 }
 0xb09   :  { %v20835_v1 = vadd.f32 %v20549_v7, %v14181_v0  ;;  %14676 = vadd.xlane.f32.xlu1 %v14675_v43  ;;  %v14183_v15 = vpop.f32.mrb[58].mxu1 }
 0xb0a   :  { %21886 = vst [vmem:[#allocation20_spill] sm:$0xff] %v20832_v56  ;;  %v14586_v31 = vmul.f32 %v20832_v56, %v20832_v56  ;;  %v20840_v26 = vadd.f32 %v20545_v51, %v14183_v15  ;;  %v14185_v54 = vpop.f32.mrb[59].mxu1 }
 0xb0b   :  { %21887 = vst [vmem:[#allocation23_spill] sm:$0xff] %v20835_v1  ;;  %v14587_v35 = vmul.f32 %v20835_v1, %v20835_v1  ;;  %v20845_v12 = vadd.f32 %v20549_v7, %v14185_v54 }
 0xb0c   :  { %21888 = vst [vmem:[#allocation24_spill] sm:$0xff] %v20840_v26  ;;  %v14588_v53 = vmul.f32 %v20840_v26, %v20840_v26 }
 0xb0d   :  { %21889 = vst [vmem:[#allocation25_spill] sm:$0xff] %v20845_v12  ;;  %v14589_v59 = vmul.f32 %v20845_v12, %v20845_v12  ;;  %v14678_v9 = vadd.f32 %v14587_v35, %v14586_v31 }
 0xb0f   :  { %14679 = vadd.xlane.f32.xlu0 %v14678_v9  ;;  %v14189_v49 = vpop.f32.mrb[60].mxu1  ;;  %v14681_v43 = vadd.f32 %v14589_v59, %v14588_v53 }
 0xb10   :  { %v20852_v0 = vadd.f32 %v20545_v51, %v14189_v49  ;;  %v14191_v15 = vpop.f32.mrb[61].mxu1 }
 0xb11   :  { %v20855_v56 = vadd.f32 %v20549_v7, %v14191_v15  ;;  %14682 = vadd.xlane.f32.xlu1 %v14681_v43  ;;  %v14193_v54 = vpop.f32.mrb[62].mxu1 }
 0xb12   :  { %21890 = vst [vmem:[#allocation35_spill] sm:$0xff] %v20852_v0  ;;  %v14590_v1 = vmul.f32 %v20852_v0, %v20852_v0  ;;  %v20860_v26 = vadd.f32 %v20545_v51, %v14193_v54  ;;  %v14195_v12 = vpop.f32.mrb[63].mxu1 }
 0xb13   :  { %21891 = vst [vmem:[#allocation27_spill] sm:$0xff] %v20855_v56  ;;  %v14591_v31 = vmul.f32 %v20855_v56, %v20855_v56  ;;  %v20865_v35 = vadd.f32 %v20549_v7, %v14195_v12 }
 0xb14   :  { %21892 = vst [vmem:[#allocation44_spill] sm:$0xff] %v20860_v26  ;;  %v14592_v53 = vmul.f32 %v20860_v26, %v20860_v26 }
 0xb15   :  { %21893 = vst [vmem:[#allocation45_spill] sm:$0xff] %v20865_v35  ;;  %v14593_v59 = vmul.f32 %v20865_v35, %v20865_v35  ;;  %v14684_v9 = vadd.f32 %v14591_v31, %v14590_v1 }
 0xb17   :  { %14685 = vadd.xlane.f32.xlu0 %v14684_v9  ;;  %v14687_v49 = vadd.f32 %v14593_v59, %v14592_v53 }
 0xb19   :  { %14688 = vadd.xlane.f32.xlu1 %v14687_v49 }
 0xb2c   :  { %v14596_v43 = vpop.xlane.xlu0 %14595 }
 0xb2d   :  { %v14690_v51 = vmax.f32 %v14596_v43, 1e-12 }
 0xb2f   :  { %17376 = vrsqrt.f32 %v14690_v51 }
 0xb30   :  { %v14599_v15 = vpop.xlane.xlu0 %14598 }
 0xb31   :  { %v14691_v54 = vmax.f32 %v14599_v15, 1e-12 }
 0xb33   :  { %17378 = vrsqrt.f32 %v14691_v54 }
 0xb34   :  { %v14602_v56 = vpop.xlane.xlu1 %14601 }
 0xb35   :  { %v14692_v0 = vmax.f32 %v14602_v56, 1e-12 }
 0xb37   :  { %17380 = vrsqrt.f32 %v14692_v0 }
 0xb38   :  { %v14605_v7 = vpop.xlane.xlu1 %14604 }
 0xb39   :  { %v17377_v12 = vpop.eup %17376  ;;  %v14693_v5 = vmax.f32 %v14605_v7, 1e-12 }
 0xb3a   :  { %v14754_v26 = vmul.f32 %v17377_v12, %v20552_v57  ;;  %v14755_v35 = vmul.f32 %v17377_v12, %v20555_v61 }
 0xb3b   :  { %17382 = vrsqrt.f32 %v14693_v5 }
 0xb3c   :  { %14818 = vst [vmem:[#allocation13] sm:$0xff] %v14754_v26  ;;  %14819 = vst [vmem:[#allocation13 + $0x8] sm:$0xff] %v14755_v35  ;;  %v14608_v1 = vpop.xlane.xlu0 %14607 }
 0xb3d   :  { %v17379_v31 = vpop.eup %17378  ;;  %v14694_v53 = vmax.f32 %v14608_v1, 1e-12 }
 0xb3e   :  { %v14756_v59 = vmul.f32 %v17379_v31, %v20558_v2  ;;  %v14757_v9 = vmul.f32 %v17379_v31, %v20563_v25  ;;  %v14611_v49 = vpop.xlane.xlu1 %14610 }
 0xb3f   :  { %17384 = vrsqrt.f32 %v14694_v53  ;;  %v14695_v56 = vmax.f32 %v14611_v49, 1e-12 }
 0xb40   :  { %14820 = vst [vmem:[#allocation13 + $0x10] sm:$0xff] %v14756_v59  ;;  %14821 = vst [vmem:[#allocation13 + $0x18] sm:$0xff] %v14757_v9 }
 0xb41   :  { %v17381_v0 = vpop.eup %17380  ;;  %17386 = vrsqrt.f32 %v14695_v56 }
 0xb42   :  { %v14758_v57 = vmul.f32 %v17381_v0, %v20572_v40  ;;  %v14759_v61 = vmul.f32 %v17381_v0, %v20575_v30 }
 0xb44   :  { %14822 = vst [vmem:[#allocation13 + $0x20] sm:$0xff] %v14758_v57  ;;  %14823 = vst [vmem:[#allocation13 + $0x28] sm:$0xff] %v14759_v61  ;;  %v14614_v5 = vpop.xlane.xlu0 %14613 }
 0xb45   :  { %v17383_v26 = vpop.eup %17382  ;;  %v14696_v35 = vmax.f32 %v14614_v5, 1e-12 }
 0xb46   :  { %v14760_v2 = vmul.f32 %v17383_v26, %v20578_v19  ;;  %v14761_v25 = vmul.f32 %v17383_v26, %v20583_v16  ;;  %v14617_v43 = vpop.xlane.xlu1 %14616 }
 0xb47   :  { %17388 = vrsqrt.f32 %v14696_v35  ;;  %v14697_v51 = vmax.f32 %v14617_v43, 1e-12 }
 0xb48   :  { %14824 = vst [vmem:[#allocation13 + $0x30] sm:$0xff] %v14760_v2  ;;  %14825 = vst [vmem:[#allocation13 + $0x38] sm:$0xff] %v14761_v25 }
 0xb49   :  { %v17385_v15 = vpop.eup %17384  ;;  %17390 = vrsqrt.f32 %v14697_v51 }
 0xb4a   :  { %v14762_v40 = vmul.f32 %v17385_v15, %v20592_v29  ;;  %v14763_v30 = vmul.f32 %v17385_v15, %v20595_v4 }
 0xb4b   :  { %v17387_v54 = vpop.eup %17386 }
 0xb4c   :  { %14826 = vst [vmem:[#allocation13 + $0x40] sm:$0xff] %v14762_v40  ;;  %14827 = vst [vmem:[#allocation13 + $0x48] sm:$0xff] %v14763_v30  ;;  %v14764_v7 = vmul.f32 %v17387_v54, %v20600_v37  ;;  %v14765_v19 = vmul.f32 %v17387_v54, %v20605_v24  ;;  %v14620_v12 = vpop.xlane.xlu0 %14619 }
 0xb4d   :  { %v14698_v16 = vmax.f32 %v14620_v12, 1e-12 }
 0xb4e   :  { %14828 = vst [vmem:[#allocation13 + $0x50] sm:$0xff] %v14764_v7  ;;  %14829 = vst [vmem:[#allocation13 + $0x58] sm:$0xff] %v14765_v19  ;;  %v14623_v1 = vpop.xlane.xlu1 %14622 }
 0xb4f   :  { %17392 = vrsqrt.f32 %v14698_v16  ;;  %v14699_v31 = vmax.f32 %v14623_v1, 1e-12 }
 0xb51   :  { %v17389_v53 = vpop.eup %17388  ;;  %17394 = vrsqrt.f32 %v14699_v31 }
 0xb52   :  { %v14766_v29 = vmul.f32 %v17389_v53, %v20612_v17  ;;  %v14767_v4 = vmul.f32 %v17389_v53, %v20615_v52 }
 0xb53   :  { %v17391_v59 = vpop.eup %17390 }
 0xb54   :  { %14830 = vst [vmem:[#allocation13 + $0x60] sm:$0xff] %v14766_v29  ;;  %14831 = vst [vmem:[#allocation13 + $0x68] sm:$0xff] %v14767_v4  ;;  %v14768_v37 = vmul.f32 %v17391_v59, %v20620_v58  ;;  %v14769_v24 = vmul.f32 %v17391_v59, %v20625_v28  ;;  %v14626_v9 = vpop.xlane.xlu0 %14625 }
 0xb55   :  { %v14700_v49 = vmax.f32 %v14626_v9, 1e-12 }
 0xb56   :  { %14832 = vst [vmem:[#allocation13 + $0x70] sm:$0xff] %v14768_v37  ;;  %14833 = vst [vmem:[#allocation13 + $0x78] sm:$0xff] %v14769_v24  ;;  %v14629_v56 = vpop.xlane.xlu1 %14628 }
 0xb57   :  { %17396 = vrsqrt.f32 %v14700_v49  ;;  %v14701_v0 = vmax.f32 %v14629_v56, 1e-12 }
 0xb59   :  { %v17393_v57 = vpop.eup %17392  ;;  %17398 = vrsqrt.f32 %v14701_v0 }
 0xb5a   :  { %v14770_v17 = vmul.f32 %v17393_v57, %v20632_v48  ;;  %v14771_v52 = vmul.f32 %v17393_v57, %v20635_v6 }
 0xb5b   :  { %v17395_v61 = vpop.eup %17394 }
 0xb5c   :  { %14834 = vst [vmem:[#allocation13 + $0x80] sm:$0xff] %v14770_v17  ;;  %14835 = vst [vmem:[#allocation13 + $0x88] sm:$0xff] %v14771_v52  ;;  %v14772_v58 = vmul.f32 %v17395_v61, %v20640_v8  ;;  %v14773_v28 = vmul.f32 %v17395_v61, %v20645_v55  ;;  %v14632_v5 = vpop.xlane.xlu0 %14631 }
 0xb5d   :  { %v14702_v26 = vmax.f32 %v14632_v5, 1e-12 }
 0xb5e   :  { %14836 = vst [vmem:[#allocation13 + $0x90] sm:$0xff] %v14772_v58  ;;  %14837 = vst [vmem:[#allocation13 + $0x98] sm:$0xff] %v14773_v28  ;;  %v14635_v35 = vpop.xlane.xlu1 %14634 }
 0xb5f   :  { %17400 = vrsqrt.f32 %v14702_v26  ;;  %v14703_v2 = vmax.f32 %v14635_v35, 1e-12 }
 0xb61   :  { %v17397_v25 = vpop.eup %17396  ;;  %17402 = vrsqrt.f32 %v14703_v2 }
 0xb62   :  { %v14774_v48 = vmul.f32 %v17397_v25, %v20652_v41  ;;  %v14775_v6 = vmul.f32 %v17397_v25, %v20655_v60 }
 0xb63   :  { %v17399_v43 = vpop.eup %17398 }
 0xb64   :  { %14838 = vst [vmem:[#allocation13 + $0xa0] sm:$0xff] %v14774_v48  ;;  %14839 = vst [vmem:[#allocation13 + $0xa8] sm:$0xff] %v14775_v6  ;;  %v14776_v8 = vmul.f32 %v17399_v43, %v20660_v50  ;;  %v14777_v55 = vmul.f32 %v17399_v43, %v20665_v14  ;;  %v14638_v51 = vpop.xlane.xlu0 %14637 }
 0xb65   :  { %v14704_v15 = vmax.f32 %v14638_v51, 1e-12 }
 0xb66   :  { %14840 = vst [vmem:[#allocation13 + $0xb0] sm:$0xff] %v14776_v8  ;;  %14841 = vst [vmem:[#allocation13 + $0xb8] sm:$0xff] %v14777_v55  ;;  %v14641_v40 = vpop.xlane.xlu1 %14640  ;;  %v21894_v55 = vld [vmem:[#allocation31_spill] sm:$0xff] }
 0xb67   :  { %17404 = vrsqrt.f32 %v14704_v15  ;;  %v14705_v30 = vmax.f32 %v14641_v40, 1e-12 }
 0xb69   :  { %v17401_v54 = vpop.eup %17400  ;;  %17406 = vrsqrt.f32 %v14705_v30 }
 0xb6a   :  { %v14778_v41 = vmul.f32 %v17401_v54, %v20672_v3  ;;  %v14779_v60 = vmul.f32 %v17401_v54, %v20675_v62 }
 0xb6b   :  { %v17403_v7 = vpop.eup %17402 }
 0xb6c   :  { %14842 = vst [vmem:[#allocation13 + $0xc0] sm:$0xff] %v14778_v41  ;;  %14843 = vst [vmem:[#allocation13 + $0xc8] sm:$0xff] %v14779_v60  ;;  %v14780_v50 = vmul.f32 %v17403_v7, %v20680_v11  ;;  %v14781_v14 = vmul.f32 %v17403_v7, %v20685_v47  ;;  %v14644_v19 = vpop.xlane.xlu0 %14643  ;;  %v21895_v41 = vld [vmem:[#allocation33_spill] sm:$0xff]  ;;  %v21896_v60 = vld [vmem:[#allocation34_spill] sm:$0xff] }
 0xb6d   :  { %v14706_v12 = vmax.f32 %v14644_v19, 1e-12 }
 0xb6e   :  { %14844 = vst [vmem:[#allocation13 + $0xd0] sm:$0xff] %v14780_v50  ;;  %14845 = vst [vmem:[#allocation13 + $0xd8] sm:$0xff] %v14781_v14  ;;  %v14647_v16 = vpop.xlane.xlu1 %14646  ;;  %v21897_v50 = vld [vmem:[#allocation36_spill] sm:$0xff]  ;;  %v21898_v14 = vld [vmem:[#allocation39_spill] sm:$0xff] }
 0xb6f   :  { %17408 = vrsqrt.f32 %v14706_v12  ;;  %v14707_v1 = vmax.f32 %v14647_v16, 1e-12 }
 0xb71   :  { %v17405_v31 = vpop.eup %17404  ;;  %17410 = vrsqrt.f32 %v14707_v1 }
 0xb72   :  { %v14782_v3 = vmul.f32 %v17405_v31, %v20692_v63  ;;  %v14783_v62 = vmul.f32 %v17405_v31, %v20695_v20 }
 0xb73   :  { %v17407_v53 = vpop.eup %17406 }
 0xb74   :  { %14846 = vst [vmem:[#allocation13 + $0xe0] sm:$0xff] %v14782_v3  ;;  %14847 = vst [vmem:[#allocation13 + $0xe8] sm:$0xff] %v14783_v62  ;;  %v14784_v11 = vmul.f32 %v17407_v53, %v20700_v36  ;;  %v14785_v47 = vmul.f32 %v17407_v53, %v20705_v39  ;;  %v14650_v29 = vpop.xlane.xlu0 %14649  ;;  %v21899_v62 = vld [vmem:[#allocation43_spill] sm:$0xff] }
 0xb75   :  { %v14708_v4 = vmax.f32 %v14650_v29, 1e-12 }
 0xb76   :  { %14848 = vst [vmem:[#allocation13 + $0xf0] sm:$0xff] %v14784_v11  ;;  %14849 = vst [vmem:[#allocation13 + $0xf8] sm:$0xff] %v14785_v47  ;;  %v14653_v59 = vpop.xlane.xlu1 %14652  ;;  %v21900_v11 = vld [vmem:[#allocation38_spill] sm:$0xff] }
 0xb77   :  { %17412 = vrsqrt.f32 %v14708_v4  ;;  %v14709_v37 = vmax.f32 %v14653_v59, 1e-12  ;;  %v21901_v4 = vld [vmem:[#allocation18_spill] sm:$0xff] }
 0xb79   :  { %v17409_v24 = vpop.eup %17408  ;;  %17414 = vrsqrt.f32 %v14709_v37  ;;  %v21902_v37 = vld [vmem:[#allocation19_spill] sm:$0xff] }
 0xb7a   :  { %v14786_v63 = vmul.f32 %v17409_v24, %v20712_v32  ;;  %v14787_v20 = vmul.f32 %v17409_v24, %v20715_v23 }
 0xb7b   :  { %v17411_v9 = vpop.eup %17410 }
 0xb7c   :  { %14850 = vst [vmem:[#allocation13 + $0x100] sm:$0xff] %v14786_v63  ;;  %14851 = vst [vmem:[#allocation13 + $0x108] sm:$0xff] %v14787_v20  ;;  %v14788_v36 = vmul.f32 %v17411_v9, %v20720_v18  ;;  %v14789_v39 = vmul.f32 %v17411_v9, %v20725_v22  ;;  %v14656_v49 = vpop.xlane.xlu0 %14655 }
 0xb7d   :  { %v14710_v56 = vmax.f32 %v14656_v49, 1e-12  ;;  %v21903_v49 = vld [vmem:[#allocation20_spill] sm:$0xff] }
 0xb7e   :  { %14852 = vst [vmem:[#allocation13 + $0x110] sm:$0xff] %v14788_v36  ;;  %14853 = vst [vmem:[#allocation13 + $0x118] sm:$0xff] %v14789_v39  ;;  %v14659_v0 = vpop.xlane.xlu1 %14658 }
 0xb7f   :  { %17416 = vrsqrt.f32 %v14710_v56  ;;  %v14711_v57 = vmax.f32 %v14659_v0, 1e-12  ;;  %v21904_v0 = vld [vmem:[#allocation23_spill] sm:$0xff] }
 0xb81   :  { %v17413_v17 = vpop.eup %17412  ;;  %17418 = vrsqrt.f32 %v14711_v57 }
 0xb82   :  { %v14790_v32 = vmul.f32 %v17413_v17, %v20732_v21  ;;  %v14791_v23 = vmul.f32 %v17413_v17, %v20735_v46 }
 0xb83   :  { %v17415_v52 = vpop.eup %17414 }
 0xb84   :  { %14854 = vst [vmem:[#allocation13 + $0x120] sm:$0xff] %v14790_v32  ;;  %14855 = vst [vmem:[#allocation13 + $0x128] sm:$0xff] %v14791_v23  ;;  %v14792_v18 = vmul.f32 %v17415_v52, %v20740_v38  ;;  %v14793_v22 = vmul.f32 %v17415_v52, %v20745_v33  ;;  %v14662_v61 = vpop.xlane.xlu0 %14661  ;;  %v21905_v32 = vld [vmem:[#allocation24_spill] sm:$0xff]  ;;  %v21906_v52 = vld [vmem:[#allocation25_spill] sm:$0xff] }
 0xb85   :  { %v14712_v58 = vmax.f32 %v14662_v61, 1e-12  ;;  %v21907_v61 = vld [vmem:[#allocation35_spill] sm:$0xff] }
 0xb86   :  { %14856 = vst [vmem:[#allocation13 + $0x130] sm:$0xff] %v14792_v18  ;;  %14857 = vst [vmem:[#allocation13 + $0x138] sm:$0xff] %v14793_v22  ;;  %v14665_v28 = vpop.xlane.xlu1 %14664 }
 0xb87   :  { %17420 = vrsqrt.f32 %v14712_v58  ;;  %v14713_v5 = vmax.f32 %v14665_v28, 1e-12  ;;  %v21908_v28 = vld [vmem:[#allocation27_spill] sm:$0xff] }
 0xb89   :  { %v17417_v26 = vpop.eup %17416  ;;  %17422 = vrsqrt.f32 %v14713_v5 }
 0xb8a   :  { %v14794_v21 = vmul.f32 %v17417_v26, %v20752_v13  ;;  %v14795_v46 = vmul.f32 %v17417_v26, %v20755_v44 }
 0xb8b   :  { %v17419_v35 = vpop.eup %17418 }
 0xb8c   :  { %14858 = vst [vmem:[#allocation13 + $0x140] sm:$0xff] %v14794_v21  ;;  %14859 = vst [vmem:[#allocation13 + $0x148] sm:$0xff] %v14795_v46  ;;  %v14796_v38 = vmul.f32 %v17419_v35, %v20760_v34  ;;  %v14797_v33 = vmul.f32 %v17419_v35, %v20765_v10  ;;  %v14668_v2 = vpop.xlane.xlu0 %14667  ;;  %v21909_v21 = vld [vmem:[#allocation44_spill] sm:$0xff]  ;;  %v21910_v35 = vld [vmem:[#allocation45_spill] sm:$0xff] }
 0xb8d   :  { %v14714_v25 = vmax.f32 %v14668_v2, 1e-12 }
 0xb8e   :  { %14860 = vst [vmem:[#allocation13 + $0x150] sm:$0xff] %v14796_v38  ;;  %14861 = vst [vmem:[#allocation13 + $0x158] sm:$0xff] %v14797_v33  ;;  %v14671_v48 = vpop.xlane.xlu1 %14670 }
 0xb8f   :  { %17424 = vrsqrt.f32 %v14714_v25  ;;  %v14715_v6 = vmax.f32 %v14671_v48, 1e-12 }
 0xb91   :  { %v17421_v43 = vpop.eup %17420  ;;  %17426 = vrsqrt.f32 %v14715_v6 }
 0xb92   :  { %v14798_v13 = vmul.f32 %v17421_v43, %v20772_v42  ;;  %v14799_v44 = vmul.f32 %v17421_v43, %v20775_v27 }
 0xb93   :  { %v17423_v8 = vpop.eup %17422 }
 0xb94   :  { %14862 = vst [vmem:[#allocation13 + $0x160] sm:$0xff] %v14798_v13  ;;  %14863 = vst [vmem:[#allocation13 + $0x168] sm:$0xff] %v14799_v44  ;;  %v14800_v34 = vmul.f32 %v17423_v8, %v20780_v45  ;;  %v14801_v10 = vmul.f32 %v17423_v8, %v21894_v55  ;;  %v14674_v51 = vpop.xlane.xlu0 %14673 }
 0xb95   :  { %v14716_v15 = vmax.f32 %v14674_v51, 1e-12 }
 0xb96   :  { %14864 = vst [vmem:[#allocation13 + $0x170] sm:$0xff] %v14800_v34  ;;  %14865 = vst [vmem:[#allocation13 + $0x178] sm:$0xff] %v14801_v10  ;;  %v14677_v40 = vpop.xlane.xlu1 %14676 }
 0xb97   :  { %17428 = vrsqrt.f32 %v14716_v15  ;;  %v14717_v30 = vmax.f32 %v14677_v40, 1e-12 }
 0xb99   :  { %v17425_v54 = vpop.eup %17424  ;;  %17430 = vrsqrt.f32 %v14717_v30 }
 0xb9a   :  { %v14802_v42 = vmul.f32 %v17425_v54, %v21895_v41  ;;  %v14803_v27 = vmul.f32 %v17425_v54, %v21896_v60 }
 0xb9b   :  { %v17427_v7 = vpop.eup %17426 }
 0xb9c   :  { %14866 = vst [vmem:[#allocation13 + $0x180] sm:$0xff] %v14802_v42  ;;  %14867 = vst [vmem:[#allocation13 + $0x188] sm:$0xff] %v14803_v27  ;;  %v14804_v45 = vmul.f32 %v17427_v7, %v21897_v50  ;;  %v14805_v19 = vmul.f32 %v17427_v7, %v21898_v14  ;;  %v14680_v12 = vpop.xlane.xlu0 %14679 }
 0xb9d   :  { %v14718_v16 = vmax.f32 %v14680_v12, 1e-12 }
 0xb9e   :  { %14868 = vst [vmem:[#allocation13 + $0x190] sm:$0xff] %v14804_v45  ;;  %14869 = vst [vmem:[#allocation13 + $0x198] sm:$0xff] %v14805_v19  ;;  %v14683_v1 = vpop.xlane.xlu1 %14682 }
 0xb9f   :  { %17432 = vrsqrt.f32 %v14718_v16  ;;  %v14719_v31 = vmax.f32 %v14683_v1, 1e-12 }
 0xba1   :  { %v17429_v3 = vpop.eup %17428  ;;  %17434 = vrsqrt.f32 %v14719_v31 }
 0xba2   :  { %v14806_v53 = vmul.f32 %v17429_v3, %v21899_v62  ;;  %v14807_v47 = vmul.f32 %v17429_v3, %v21900_v11 }
 0xba3   :  { %v17431_v29 = vpop.eup %17430 }
 0xba4   :  { %14870 = vst [vmem:[#allocation13 + $0x1a0] sm:$0xff] %v14806_v53  ;;  %14871 = vst [vmem:[#allocation13 + $0x1a8] sm:$0xff] %v14807_v47  ;;  %v14808_v59 = vmul.f32 %v17431_v29, %v21901_v4  ;;  %v14809_v24 = vmul.f32 %v17431_v29, %v21902_v37  ;;  %v14686_v63 = vpop.xlane.xlu0 %14685 }
 0xba5   :  { %v14720_v20 = vmax.f32 %v14686_v63, 1e-12 }
 0xba6   :  { %14872 = vst [vmem:[#allocation13 + $0x1b0] sm:$0xff] %v14808_v59  ;;  %14873 = vst [vmem:[#allocation13 + $0x1b8] sm:$0xff] %v14809_v24  ;;  %v14689_v9 = vpop.xlane.xlu1 %14688 }
 0xba7   :  { %17436 = vrsqrt.f32 %v14720_v20  ;;  %v14721_v36 = vmax.f32 %v14689_v9, 1e-12 }
 0xba9   :  { %v17433_v39 = vpop.eup %17432  ;;  %17438 = vrsqrt.f32 %v14721_v36 }
 0xbaa   :  { %v14810_v56 = vmul.f32 %v17433_v39, %v21903_v49  ;;  %v14811_v57 = vmul.f32 %v17433_v39, %v21904_v0 }
 0xbab   :  { %v17435_v17 = vpop.eup %17434 }
 0xbac   :  { %14874 = vst [vmem:[#allocation13 + $0x1c0] sm:$0xff] %v14810_v56  ;;  %14875 = vst [vmem:[#allocation13 + $0x1c8] sm:$0xff] %v14811_v57  ;;  %v14812_v23 = vmul.f32 %v17435_v17, %v21905_v32  ;;  %v14813_v18 = vmul.f32 %v17435_v17, %v21906_v52 }
 0xbae   :  { %14876 = vst [vmem:[#allocation13 + $0x1d0] sm:$0xff] %v14812_v23  ;;  %14877 = vst [vmem:[#allocation13 + $0x1d8] sm:$0xff] %v14813_v18 }
 0xbb1   :  { %v17437_v22 = vpop.eup %17436 }
 0xbb2   :  { %v14814_v58 = vmul.f32 %v17437_v22, %v21907_v61  ;;  %v14815_v5 = vmul.f32 %v17437_v22, %v21908_v28 }
 0xbb3   :  { %v17439_v26 = vpop.eup %17438 }
 0xbb4   :  { %14878 = vst [vmem:[#allocation13 + $0x1e0] sm:$0xff] %v14814_v58  ;;  %14879 = vst [vmem:[#allocation13 + $0x1e8] sm:$0xff] %v14815_v5  ;;  %v14816_v46 = vmul.f32 %v17439_v26, %v21909_v21  ;;  %v14817_v38 = vmul.f32 %v17439_v26, %v21910_v35 }
 0xbb6   :  { %14880 = vst [vmem:[#allocation13 + $0x1f0] sm:$0xff] %v14816_v46  ;;  %14881 = vst [vmem:[#allocation13 + $0x1f8] sm:$0xff] %v14817_v38 }
 0xbb7   :  { %17605 = shalt.err (!%p17602_p2)
}
 0xbb8   :  { %s17606_s7 = scalar_lea.hbm %s20955_s5, 8192 }
 0xbb9   :  { %p17607_p3 = scmp.ne.s32.totalorder %s20955_s5, %s17606_s7  ;;  %p17610_p4 = scmp.lt.u32.totalorder %s17606_s7, %s20955_s5 }
 0xbbb   :  { %p17612_p5 = pnand %p17610_p4, %p17607_p3 }
 0xbbd   :  { %17615 = shalt.err (!%p17612_p5)
}
 0xbbe   :  { %14893 = dma.vmem_to_hbm [thread:$0]  %s14888_s27, 8192, %s20955_s5, [#allocation6], %s17629_s3, %s17629_s3, %s17630_s28  }
 0xbbf   :  { %17622 = dma.done.wait [#allocation6], 8192  }
 0xbc0   :  { %17623 = vsyncadd [#allocation6], 4294959104 }
 0xbc1   :  { %14897 = vsyncpa [#allocation5], 1 }
 0xbc2   :  { %14898 = vsyncpa [#allocation8], 1 }
 0xbc3   :  { %14899 = vsyncpa [#allocation11], 1 }
 0xbc4   :  { %14900 = vsyncpa [#allocation6], 1 }

</bundles_post_ra>
